<compile_context>
chip_gen: v7x
topology: tpu7x:2x2x1
jax: 0.10.0
libtpu: 0.0.40
codegen_flags: <defaults>
</compile_context>

<pallas_src>
import functools

import jax
import jax.numpy as jnp
from jax.experimental import pallas as pl
from jax.experimental.pallas import tpu as pltpu

NEG_SLOPE = 0.3                 # LeakyReLU(negative_slope=0.3)
PAD = 128                       # flat-spatial lane tail padding (must be >= 2)
VMEM_LIMIT = 48 * 1024 * 1024   # safe scoped-VMEM cap on v5e / v6e / v7x


# --------------------------------------------------------------------------- conv kernels

def _conv3x3_acc(x_ref, w_ref, b_ref, *, W, negative_slope):
    """Shared 3x3 valid conv on flattened channels-major layout.

    x_ref: (1, Cin, HWp)  channels on sublanes, flat spatial (width-interp W) on lanes
    w_ref: (Cout, 9*Cin)  tap-major (kh, kw), channel-minor; bf16
    b_ref: (Cout, 1)      f32
    Returns (Cout, HWp - 2*W - 2) f32 after bias + LeakyReLU.  Output columns whose
    spatial column index exceeds the valid width are junk but always finite.
    """
    x32 = x_ref[0].astype(jnp.float32)                 # (Cin, HWp)
    cin, hwp = x32.shape
    wout = hwp - 2 * W - 2
    taps = []
    for kh in range(3):
        for kw in range(3):
            s = kh * W + kw
            taps.append(x32[:, s:s + wout])            # static lane-offset slice
    patches = jnp.concatenate(taps, axis=0).astype(jnp.bfloat16)   # (9*Cin, wout)
    acc = jnp.dot(w_ref[...].astype(jnp.bfloat16), patches,
                  preferred_element_type=jnp.float32)  # (Cout, wout) single MXU matmul
    acc = acc + b_ref[...]
    return jnp.where(acc >= 0.0, acc, negative_slope * acc)


def _conv3x3_kernel(x_ref, w_ref, b_ref, o_ref, *, W, negative_slope):
    acc = _conv3x3_acc(x_ref, w_ref, b_ref, W=W, negative_slope=negative_slope)
    o_ref[0] = acc.astype(o_ref.dtype)


def _rowcol(shape, W):
    """Float row/col index grids for a flat spatial axis of width-interp W."""
    flat = jax.lax.broadcasted_iota(jnp.int32, shape, 1).astype(jnp.float32)
    row = jnp.floor((flat + 0.5) * (1.0 / W))          # exact for these magnitudes
    col = flat - row * W
    return flat, row, col


def _conv3x3_ssm_kernel(x_ref, w_ref, b_ref, ex_ref, ey_ref, *,
                        W, Ho, Ws, negative_slope, inv_temp):
    """Last pos-encoder conv fused with SpatialSoftmax keypoint expectation."""
    acc = _conv3x3_acc(x_ref, w_ref, b_ref, W=W, negative_slope=negative_slope)
    k, wacc = acc.shape
    n = float(Ho * W)
    flat, row, col = _rowcol((k, wacc), W)
    valid = (col < Ws) & (flat < n)                    # mask junk columns / tail
    logit = jnp.where(valid, acc * inv_temp, -1e30)
    m = jnp.max(logit, axis=1, keepdims=True)
    e = jnp.exp(logit - m)
    att = e / jnp.sum(e, axis=1, keepdims=True)        # softmax over spatial (lanes)
    px = col * (2.0 / (Ws - 1)) - 1.0                  # normalized [-1, 1] grid
    py = row * (2.0 / (Ho - 1)) - 1.0
    ex_ref[0] = jnp.sum(att * px, axis=1, keepdims=True)   # (K, 1)
    ey_ref[0] = jnp.sum(att * py, axis=1, keepdims=True)


def _issm_kernel(f_ref, kx_ref, ky_ref, o_ref, *, W, Hs, Ws, inv_heat):
    """InverseSpatialSoftmax heatmap(keys) * feature, lane-dense (K, HW) layout."""
    f = f_ref[0].astype(jnp.float32)                   # (K, Wf)
    k, wf = f.shape
    _, row, col = _rowcol((k, wf), W)
    px = col * (2.0 / (Ws - 1)) - 1.0
    py = row * (2.0 / (Hs - 1)) - 1.0
    d2 = (px - kx_ref[0]) ** 2 + (py - ky_ref[0]) ** 2
    o_ref[0] = (jnp.exp(-d2 * inv_heat) * f).astype(o_ref.dtype)


# --------------------------------------------------------------------------- fused RNN kernel

def _hrnn_kernel(ep_ref, xv_ref, kh_ref, kc_ref, vh_ref, vc_ref, uh_ref, uc_ref,
                 wkx_ref, wku_ref, wkh_ref, bk_ref,
                 wvx_ref, wvu_ref, wvh_ref, bv_ref,
                 wuk_ref, wuv_ref, wuh_ref, bu_ref,
                 wp_ref, bp_ref, wj_ref, bj_ref,
                 kho_ref, kco_ref, vho_ref, vco_ref, uho_ref, uco_ref,
                 dp_ref, yv_ref, *, S, U, negative_slope):
    dot = lambda a, b: jnp.dot(a, b, preferred_element_type=jnp.float32)

    def lstm_step(gates, c, hd):                       # PyTorch gate order i, f, g, o
        i = jax.nn.sigmoid(gates[:, 0 * hd:1 * hd])
        f = jax.nn.sigmoid(gates[:, 1 * hd:2 * hd])
        g = jnp.tanh(gates[:, 2 * hd:3 * hd])
        o = jax.nn.sigmoid(gates[:, 3 * hd:4 * hd])
        c2 = f * c + i * g
        return o * jnp.tanh(c2), c2

    uh = uh_ref[...]
    # sensory LSTM (keypoints): input = [enc_pts, prev union hidden]
    gk = (dot(ep_ref[...], wkx_ref[...]) + dot(uh, wku_ref[...])
          + dot(kh_ref[...], wkh_ref[...]) + bk_ref[...])
    kh2, kc2 = lstm_step(gk, kc_ref[...], S)
    # sensory LSTM (vector): input = [xv, prev union hidden]
    gv = (dot(xv_ref[...], wvx_ref[...]) + dot(uh, wvu_ref[...])
          + dot(vh_ref[...], wvh_ref[...]) + bv_ref[...])
    vh2, vc2 = lstm_step(gv, vc_ref[...], S)
    # union LSTM: input = [new key hidden, new vector hidden]
    gu = (dot(kh2, wuk_ref[...]) + dot(vh2, wuv_ref[...])
          + dot(uh, wuh_ref[...]) + bu_ref[...])
    uh2, uc2 = lstm_step(gu, uc_ref[...], U)

    kho_ref[...] = kh2
    kco_ref[...] = kc2
    vho_ref[...] = vh2
    vco_ref[...] = vc2
    uho_ref[...] = uh2
    uco_ref[...] = uc2
    # decoders (point: no activation, joint: LeakyReLU)
    dp_ref[...] = dot(kh2, wp_ref[...]) + bp_ref[...]
    yv = dot(vh2, wj_ref[...]) + bj_ref[...]
    yv_ref[...] = jnp.where(yv >= 0.0, yv, negative_slope * yv)


# --------------------------------------------------------------------------- wrappers

def _fs(shape):
    return pl.BlockSpec(shape, lambda *_: (0,) * len(shape))


def _cparams():
    return pltpu.CompilerParams(dimension_semantics=("parallel",),
                                vmem_limit_bytes=VMEM_LIMIT)


def conv3x3(x, w, b, *, W, cin_block=0, out_dtype=jnp.bfloat16,
            negative_slope=NEG_SLOPE):
    """3x3/stride-1/valid conv + LeakyReLU on flat channels-major input.

    x: (B, Ctot, HWp), w: (Cout, 9*Cin), b: (Cout, 1).  The Cin input channels are
    channel-block `cin_block` of x (zero-copy split of a fused layer output).
    Returns (B, Cout, HWp - 2*W - 2).
    """
    bsz, ctot, hwp_in = x.shape
    cout, k9 = w.shape
    cin = k9 // 9
    assert ctot % cin == 0 and hwp_in > 2 * W + 2
    hwp_out = hwp_in - 2 * W - 2

    def x_map(i):
        return (i, cin_block, 0)

    kern = functools.partial(_conv3x3_kernel, W=W, negative_slope=negative_slope)
    return pl.pallas_call(
        kern,
        out_shape=jax.ShapeDtypeStruct((bsz, cout, hwp_out), out_dtype),
        grid=(bsz,),
        in_specs=[
            pl.BlockSpec((1, cin, hwp_in), x_map),
            pl.BlockSpec((cout, k9), lambda i: (0, 0)),
            pl.BlockSpec((cout, 1), lambda i: (0, 0)),
        ],
        out_specs=pl.BlockSpec((1, cout, hwp_out), lambda i: (i, 0, 0)),
        compiler_params=_cparams(),
    )(x, w, b)


def conv3x3_ssm(x, w, b, *, W, Ho, Ws, temperature, negative_slope=NEG_SLOPE):
    """Last pos-encoder conv fused with SpatialSoftmax -> (ex, ey) each (B, K, 1)."""
    bsz, ctot, hwp_in = x.shape
    k, k9 = w.shape
    kern = functools.partial(_conv3x3_ssm_kernel, W=W, Ho=Ho, Ws=Ws,
                             negative_slope=negative_slope,
                             inv_temp=1.0 / temperature)
    return pl.pallas_call(
        kern,
        out_shape=(jax.ShapeDtypeStruct((bsz, k, 1), jnp.float32),
                   jax.ShapeDtypeStruct((bsz, k, 1), jnp.float32)),
        grid=(bsz,),
        in_specs=[
            pl.BlockSpec((1, ctot, hwp_in), lambda i: (i, 0, 0)),
            pl.BlockSpec((k, k9), lambda i: (0, 0)),
            pl.BlockSpec((k, 1), lambda i: (0, 0)),
        ],
        out_specs=(pl.BlockSpec((1, k, 1), lambda i: (i, 0, 0)),
                   pl.BlockSpec((1, k, 1), lambda i: (i, 0, 0))),
        compiler_params=_cparams(),
    )(x, w, b)


def issm_mul(feat, kx, ky, *, W, Hs, Ws, heatmap_size):
    """heatmap(dec keypoints) * feat.  feat: (B, K, Wf) flat (width-interp W)."""
    bsz, k, wf = feat.shape
    kern = functools.partial(_issm_kernel, W=W, Hs=Hs, Ws=Ws,
                             inv_heat=1.0 / heatmap_size)
    return pl.pallas_call(
        kern,
        out_shape=jax.ShapeDtypeStruct((bsz, k, wf), jnp.float32),
        grid=(bsz,),
        in_specs=[
            pl.BlockSpec((1, k, wf), lambda i: (i, 0, 0)),
            pl.BlockSpec((1, k, 1), lambda i: (i, 0, 0)),
            pl.BlockSpec((1, k, 1), lambda i: (i, 0, 0)),
        ],
        out_specs=pl.BlockSpec((1, k, wf), lambda i: (i, 0, 0)),
        compiler_params=_cparams(),
    )(feat, kx, ky)


def hrnn_step(p, enc_pts, xv, kh, kc, vh, vc, uh, uc, *, srnn_hid, urnn_hid):
    """Fused HierarchicalRNNCell + decoder_point + decoder_joint (one launch)."""
    bsz = enc_pts.shape[0]
    s, u = srnn_hid, urnn_hid
    key_dim = p["wp"].shape[1]
    vec_dim = p["wj"].shape[1]
    args = (enc_pts, xv, kh, kc, vh, vc, uh, uc,
            p["wkx"], p["wku"], p["wkh"], p["bk"],
            p["wvx"], p["wvu"], p["wvh"], p["bv"],
            p["wuk"], p["wuv"], p["wuh"], p["bu"],
            p["wp"], p["bp"], p["wj"], p["bj"])
    out_shapes = tuple(jax.ShapeDtypeStruct(sh, jnp.float32) for sh in
                       [(bsz, s), (bsz, s), (bsz, s), (bsz, s),
                        (bsz, u), (bsz, u), (bsz, key_dim), (bsz, vec_dim)])
    kern = functools.partial(_hrnn_kernel, S=s, U=u, negative_slope=NEG_SLOPE)
    return pl.pallas_call(
        kern,
        out_shape=out_shapes,
        grid=(1,),
        in_specs=[_fs(a.shape) for a in args],
        out_specs=tuple(_fs(o.shape) for o in out_shapes),
    )(*args)


# --------------------------------------------------------------------------- params & forward

def init_params(key, *, k_dim=5, vec_dim=10, srnn_hid=32, urnn_hid=16):
    keys = iter(jax.random.split(key, 64))
    p = {}

    def xavier(shape, fan_in, fan_out):
        sc = (6.0 / (fan_in + fan_out)) ** 0.5
        return jax.random.uniform(next(keys), shape, jnp.float32, -sc, sc)

    def conv_w(cin, cout):
        # stored as (Cout, 9*Cin), tap-major / channel-minor, bf16
        return xavier((cout, 9 * cin), 9 * cin, 9 * cout).astype(jnp.bfloat16)

    def conv_b(cout):
        return jnp.zeros((cout, 1), jnp.float32)

    # fused img/pos encoder layer-0 (Cin padded 3 -> 8; padded input channels are zero)
    p["enc0_w"], p["enc0_b"] = conv_w(8, 32), conv_b(32)
    p["img1_w"], p["img1_b"] = conv_w(16, 32), conv_b(32)
    p["pos1_w"], p["pos1_b"] = conv_w(16, 32), conv_b(32)
    p["img2_w"], p["img2_b"] = conv_w(32, k_dim), conv_b(k_dim)
    p["pos2_w"], p["pos2_b"] = conv_w(32, k_dim), conv_b(k_dim)
    # decoder (ConvTranspose2d emulated as pad(2)+conv); Cin padded k_dim -> 8
    p["dec0_w"], p["dec0_b"] = conv_w(8, 32), conv_b(32)
    p["dec1_w"], p["dec1_b"] = conv_w(32, 16), conv_b(16)
    p["dec2_w"], p["dec2_b"] = conv_w(16, 3), conv_b(3)

    key_dim, s, u = 2 * k_dim, srnn_hid, urnn_hid
    # TODO(synk): orthogonal_ init for weight_hh replaced by xavier uniform.
    p["wkx"] = xavier((key_dim, 4 * s), key_dim + u, 4 * s)
    p["wku"] = xavier((u, 4 * s), key_dim + u, 4 * s)
    p["wkh"] = xavier((s, 4 * s), s, 4 * s)
    p["bk"] = jnp.zeros((1, 4 * s), jnp.float32)
    p["wvx"] = xavier((vec_dim, 4 * s), vec_dim + u, 4 * s)
    p["wvu"] = xavier((u, 4 * s), vec_dim + u, 4 * s)
    p["wvh"] = xavier((s, 4 * s), s, 4 * s)
    p["bv"] = jnp.zeros((1, 4 * s), jnp.float32)
    p["wuk"] = xavier((s, 4 * u), 2 * s, 4 * u)
    p["wuv"] = xavier((s, 4 * u), 2 * s, 4 * u)
    p["wuh"] = xavier((u, 4 * u), u, 4 * u)
    p["bu"] = jnp.zeros((1, 4 * u), jnp.float32)
    p["wp"] = xavier((s, key_dim), s, key_dim)
    p["bp"] = jnp.zeros((1, key_dim), jnp.float32)
    p["wj"] = xavier((s, vec_dim), s, vec_dim)
    p["bj"] = jnp.zeros((1, vec_dim), jnp.float32)
    return p


def hsarnn_forward(params, xi, xv, states=None, *,
                   k_dim=5, vec_dim=10, srnn_hid=32, urnn_hid=16,
                   temperature=1e-4, heatmap_size=0.1):
    """xi: (B, 3, H, W) NCHW, xv: (B, vec_dim). Returns (yi, yv, enc_pts, dec_pts, states)."""
    bsz, _, H, W = xi.shape
    Hs, Ws = H - 6, W - 6

    # flat channels-major input, channels padded 3 -> 8, lane tail pad
    x0 = xi.reshape(bsz, 3, H * W).astype(jnp.bfloat16)
    x0 = jnp.pad(x0, ((0, 0), (0, 5), (0, PAD)))

    # --- fused img/pos encoder layer 0, then the two branches -----------------
    y0 = conv3x3(x0, params["enc0_w"], params["enc0_b"], W=W)                 # (B, 32, .)
    y1i = conv3x3(y0, params["img1_w"], params["img1_b"], W=W, cin_block=0)   # img half
    y1p = conv3x3(y0, params["pos1_w"], params["pos1_b"], W=W, cin_block=1)   # pos half
    xi_feat = conv3x3(y1i, params["img2_w"], params["img2_b"], W=W,
                      out_dtype=jnp.float32)                                  # (B, K, .)
    ex, ey = conv3x3_ssm(y1p, params["pos2_w"], params["pos2_b"], W=W,
                         Ho=Hs, Ws=Ws, temperature=temperature)               # (B, K, 1) x2
    enc_pts = jnp.concatenate([ex, ey], axis=-1).reshape(bsz, 2 * k_dim)      # (x,y) per key

    # --- fused hierarchical RNN cell + point/joint decoders -------------------
    if states is None:
        z = lambda d: jnp.zeros((bsz, d), jnp.float32)
        states = ((z(srnn_hid), z(srnn_hid)), (z(srnn_hid), z(srnn_hid)),
                  (z(urnn_hid), z(urnn_hid)))
    (kh, kc), (vh, vc), (uh, uc) = states
    kh2, kc2, vh2, vc2, uh2, uc2, dec_pts, yv = hrnn_step(
        params, enc_pts, xv.astype(jnp.float32), kh, kc, vh, vc, uh, uc,
        srnn_hid=srnn_hid, urnn_hid=urnn_hid)
    new_states = ((kh2, kc2), (vh2, vc2), (uh2, uc2))

    # --- InverseSpatialSoftmax heatmap * image features ------------------------
    dpr = dec_pts.reshape(bsz, k_dim, 2)
    kx, ky = dpr[:, :, 0:1], dpr[:, :, 1:2]
    feat_mod = issm_mul(xi_feat, kx, ky, W=W, Hs=Hs, Ws=Ws,
                        heatmap_size=heatmap_size)                            # (B, K, .)

    # --- image decoder: 3 x (zero-pad(2) + 3x3 conv + LeakyReLU) --------------
    h = feat_mod
    Hv, Wv, Wi = Hs, Ws, W
    dec = [(params["dec0_w"], params["dec0_b"]),
           (params["dec1_w"], params["dec1_b"]),
           (params["dec2_w"], params["dec2_b"])]
    for li, (w, b) in enumerate(dec):
        c = h.shape[1]
        hm = h[:, :, :Hv * Wi].reshape(bsz, c, Hv, Wi)[:, :, :, :Wv]
        cpad = 8 - c if li == 0 else 0
        hm = jnp.pad(hm, ((0, 0), (0, cpad), (2, 2), (2, 2)))
        Hp, Wp = Hv + 4, Wv + 4
        hf = jnp.pad(hm.reshape(bsz, c + cpad, Hp * Wp),
                     ((0, 0), (0, 0), (0, PAD))).astype(jnp.bfloat16)
        out_dtype = jnp.float32 if li == 2 else jnp.bfloat16
        h = conv3x3(hf, w, b, W=Wp, out_dtype=out_dtype)
        Hv, Wv, Wi = Hp - 2, Wp - 2, Wp

    yi = h[:, :, :Hv * Wi].reshape(bsz, 3, Hv, Wi)[:, :, :, :Wv]              # (B, 3, H, W)
    return yi, yv, enc_pts, dec_pts, new_states


# --------------------------------------------------------------------------- demo

if __name__ == "__main__":
    key = jax.random.PRNGKey(0)
    kp, kxi, kxv = jax.random.split(key, 3)

    B, K_DIM, VEC_DIM, S_HID, U_HID = 2, 5, 10, 32, 16
    IMG = 16  # small img_size (module default is 128)

    params = init_params(kp, k_dim=K_DIM, vec_dim=VEC_DIM,
                         srnn_hid=S_HID, urnn_hid=U_HID)
    xi = jax.random.uniform(kxi, (B, 3, IMG, IMG), jnp.float32)
    xv = jax.random.uniform(kxv, (B, VEC_DIM), jnp.float32)

    fwd = jax.jit(functools.partial(hsarnn_forward, k_dim=K_DIM, vec_dim=VEC_DIM,
                                    srnn_hid=S_HID, urnn_hid=U_HID))
    yi, yv, enc_pts, dec_pts, states = jax.block_until_ready(fwd(params, xi, xv))

    assert yi.shape == (B, 3, IMG, IMG)
    assert yv.shape == (B, VEC_DIM)
    assert enc_pts.shape == (B, 2 * K_DIM)
    assert dec_pts.shape == (B, 2 * K_DIM)
    assert states[0][0].shape == (B, S_HID) and states[2][0].shape == (B, U_HID)
    assert all(bool(jnp.all(jnp.isfinite(a))) for a in (yi, yv, enc_pts, dec_pts))

    print("KERNEL_OK")
</pallas_src>

<mosaic_0001>
module attributes {stable_mosaic.version = 11 : i64} {
  func.func @_conv3x3_kernel(%arg0: i32, %arg1: memref<1x8x384xbf16, #tpu.memory_space<vmem>>, %arg2: memref<32x72xbf16, #tpu.memory_space<vmem>>, %arg3: memref<32x1xf32, #tpu.memory_space<vmem>>, %arg4: memref<1x32x350xbf16, #tpu.memory_space<vmem>>) attributes {dimension_semantics = [#tpu.dimension_semantics<parallel>], iteration_bounds = array<i64: 2>, scalar_prefetch = 0 : i64, scratch_operands = 0 : i64, tpu.core_type = #tpu.core_type<tc>, window_params = [{transform_indices = @transform_0, window_bounds = array<i64: 1, 8, 384>}, {pipeline_mode = #tpu.pipeline_mode<synchronous>, transform_indices = @transform_1, window_bounds = array<i64: 32, 72>}, {pipeline_mode = #tpu.pipeline_mode<synchronous>, transform_indices = @transform_2, window_bounds = array<i64: 32, 1>}, {transform_indices = @transform_3, window_bounds = array<i64: 1, 32, 350>}]} {
    %c0 = arith.constant 0 : index
    %c0_0 = arith.constant 0 : index
    %c0_1 = arith.constant 0 : index
    %0 = vector.load %arg1[%c0, %c0_0, %c0_1] : memref<1x8x384xbf16, #tpu.memory_space<vmem>>, vector<1x8x384xbf16>
    %1 = vector.shape_cast %0 : vector<1x8x384xbf16> to vector<8x384xbf16>
    %2 = arith.extf %1 : vector<8x384xbf16> to vector<8x384xf32>
    %3 = vector.extract_strided_slice %2 {offsets = [0, 0], sizes = [8, 350], strides = [1, 1]} : vector<8x384xf32> to vector<8x350xf32>
    %4 = vector.extract_strided_slice %2 {offsets = [0, 1], sizes = [8, 350], strides = [1, 1]} : vector<8x384xf32> to vector<8x350xf32>
    %5 = vector.extract_strided_slice %2 {offsets = [0, 2], sizes = [8, 350], strides = [1, 1]} : vector<8x384xf32> to vector<8x350xf32>
    %6 = vector.extract_strided_slice %2 {offsets = [0, 16], sizes = [8, 350], strides = [1, 1]} : vector<8x384xf32> to vector<8x350xf32>
    %7 = vector.extract_strided_slice %2 {offsets = [0, 17], sizes = [8, 350], strides = [1, 1]} : vector<8x384xf32> to vector<8x350xf32>
    %8 = vector.extract_strided_slice %2 {offsets = [0, 18], sizes = [8, 350], strides = [1, 1]} : vector<8x384xf32> to vector<8x350xf32>
    %9 = vector.extract_strided_slice %2 {offsets = [0, 32], sizes = [8, 350], strides = [1, 1]} : vector<8x384xf32> to vector<8x350xf32>
    %10 = vector.extract_strided_slice %2 {offsets = [0, 33], sizes = [8, 350], strides = [1, 1]} : vector<8x384xf32> to vector<8x350xf32>
    %11 = vector.extract_strided_slice %2 {offsets = [0, 34], sizes = [8, 350], strides = [1, 1]} : vector<8x384xf32> to vector<8x350xf32>
    %12 = tpu.concatenate %3, %4, %5, %6, %7, %8, %9, %10, %11 in 0 : vector<8x350xf32>, vector<8x350xf32>, vector<8x350xf32>, vector<8x350xf32>, vector<8x350xf32>, vector<8x350xf32>, vector<8x350xf32>, vector<8x350xf32>, vector<8x350xf32> -> vector<72x350xf32>
    %13 = arith.truncf %12 : vector<72x350xf32> to vector<72x350xbf16>
    %c0_2 = arith.constant 0 : index
    %c0_3 = arith.constant 0 : index
    %14 = vector.load %arg2[%c0_2, %c0_3] : memref<32x72xbf16, #tpu.memory_space<vmem>>, vector<32x72xbf16>
    %cst = arith.constant dense<0.000000e+00> : vector<32x350xf32>
    %15 = tpu.matmul %14, %13, %cst {dimension_numbers = #tpu.dot_dimension_numbers<[1], [0], [0], [1], [0, 0, 1, 1], [], []>} : vector<32x72xbf16>, vector<72x350xbf16>, vector<32x350xf32> -> vector<32x350xf32>
    %c0_4 = arith.constant 0 : index
    %c0_5 = arith.constant 0 : index
    %16 = vector.load %arg3[%c0_4, %c0_5] : memref<32x1xf32, #tpu.memory_space<vmem>>, vector<32x1xf32>
    %17 = vector.broadcast %16 : vector<32x1xf32> to vector<32x350xf32>
    %18 = arith.addf %15, %17 : vector<32x350xf32>
    %cst_6 = arith.constant 0.000000e+00 : f32
    %19 = vector.broadcast %cst_6 : f32 to vector<32x350xf32>
    %20 = arith.cmpf oge, %18, %19 : vector<32x350xf32>
    %cst_7 = arith.constant 3.000000e-01 : f32
    %21 = vector.broadcast %cst_7 : f32 to vector<32x350xf32>
    %22 = arith.mulf %21, %18 : vector<32x350xf32>
    %23 = arith.select %20, %18, %22 : vector<32x350xi1>, vector<32x350xf32>
    %24 = arith.truncf %23 : vector<32x350xf32> to vector<32x350xbf16>
    %c0_8 = arith.constant 0 : index
    %c0_9 = arith.constant 0 : index
    %c0_10 = arith.constant 0 : index
    %25 = vector.load %arg4[%c0_8, %c0_9, %c0_10] : memref<1x32x350xbf16, #tpu.memory_space<vmem>>, vector<1x32x350xbf16>
    %26 = vector.shape_cast %25 : vector<1x32x350xbf16> to vector<32x350xbf16>
    %27 = vector.shape_cast %24 : vector<32x350xbf16> to vector<1x32x350xbf16>
    tpu.vector_store %arg4[%c0_8, %c0_9, %c0_10], %27 {strides = array<i32>} : memref<1x32x350xbf16, #tpu.memory_space<vmem>>, vector<1x32x350xbf16>,
    return
  }
  func.func @transform_0(%arg0: i32) -> (i32, i32, i32) {
    %c0_i32 = arith.constant 0 : i32
    %c0_i32_0 = arith.constant 0 : i32
    %c0_i32_1 = arith.constant 0 : i32
    return %arg0, %c0_i32, %c0_i32_0 : i32, i32, i32
  }
  func.func @transform_1(%arg0: i32) -> (i32, i32) {
    %c0_i32 = arith.constant 0 : i32
    %c0_i32_0 = arith.constant 0 : i32
    %c0_i32_1 = arith.constant 0 : i32
    return %c0_i32, %c0_i32_0 : i32, i32
  }
  func.func @transform_2(%arg0: i32) -> (i32, i32) {
    %c0_i32 = arith.constant 0 : i32
    %c0_i32_0 = arith.constant 0 : i32
    %c0_i32_1 = arith.constant 0 : i32
    return %c0_i32, %c0_i32_0 : i32, i32
  }
  func.func @transform_3(%arg0: i32) -> (i32, i32, i32) {
    %c0_i32 = arith.constant 0 : i32
    %c0_i32_0 = arith.constant 0 : i32
    %c0_i32_1 = arith.constant 0 : i32
    return %arg0, %c0_i32, %c0_i32_0 : i32, i32, i32
  }
}

module attributes {stable_mosaic.version = 11 : i64} {
  func.func @_conv3x3_kernel(%arg0: i32, %arg1: memref<1x16x350xbf16, #tpu.memory_space<vmem>>, %arg2: memref<32x144xbf16, #tpu.memory_space<vmem>>, %arg3: memref<32x1xf32, #tpu.memory_space<vmem>>, %arg4: memref<1x32x316xbf16, #tpu.memory_space<vmem>>) attributes {dimension_semantics = [#tpu.dimension_semantics<parallel>], iteration_bounds = array<i64: 2>, scalar_prefetch = 0 : i64, scratch_operands = 0 : i64, tpu.core_type = #tpu.core_type<tc>, window_params = [{transform_indices = @transform_0, window_bounds = array<i64: 1, 16, 350>}, {pipeline_mode = #tpu.pipeline_mode<synchronous>, transform_indices = @transform_1, window_bounds = array<i64: 32, 144>}, {pipeline_mode = #tpu.pipeline_mode<synchronous>, transform_indices = @transform_2, window_bounds = array<i64: 32, 1>}, {transform_indices = @transform_3, window_bounds = array<i64: 1, 32, 316>}]} {
    %c0 = arith.constant 0 : index
    %c0_0 = arith.constant 0 : index
    %c0_1 = arith.constant 0 : index
    %0 = vector.load %arg1[%c0, %c0_0, %c0_1] : memref<1x16x350xbf16, #tpu.memory_space<vmem>>, vector<1x16x350xbf16>
    %1 = vector.shape_cast %0 : vector<1x16x350xbf16> to vector<16x350xbf16>
    %2 = arith.extf %1 : vector<16x350xbf16> to vector<16x350xf32>
    %3 = vector.extract_strided_slice %2 {offsets = [0, 0], sizes = [16, 316], strides = [1, 1]} : vector<16x350xf32> to vector<16x316xf32>
    %4 = vector.extract_strided_slice %2 {offsets = [0, 1], sizes = [16, 316], strides = [1, 1]} : vector<16x350xf32> to vector<16x316xf32>
    %5 = vector.extract_strided_slice %2 {offsets = [0, 2], sizes = [16, 316], strides = [1, 1]} : vector<16x350xf32> to vector<16x316xf32>
    %6 = vector.extract_strided_slice %2 {offsets = [0, 16], sizes = [16, 316], strides = [1, 1]} : vector<16x350xf32> to vector<16x316xf32>
    %7 = vector.extract_strided_slice %2 {offsets = [0, 17], sizes = [16, 316], strides = [1, 1]} : vector<16x350xf32> to vector<16x316xf32>
    %8 = vector.extract_strided_slice %2 {offsets = [0, 18], sizes = [16, 316], strides = [1, 1]} : vector<16x350xf32> to vector<16x316xf32>
    %9 = vector.extract_strided_slice %2 {offsets = [0, 32], sizes = [16, 316], strides = [1, 1]} : vector<16x350xf32> to vector<16x316xf32>
    %10 = vector.extract_strided_slice %2 {offsets = [0, 33], sizes = [16, 316], strides = [1, 1]} : vector<16x350xf32> to vector<16x316xf32>
    %11 = vector.extract_strided_slice %2 {offsets = [0, 34], sizes = [16, 316], strides = [1, 1]} : vector<16x350xf32> to vector<16x316xf32>
    %12 = tpu.concatenate %3, %4, %5, %6, %7, %8, %9, %10, %11 in 0 : vector<16x316xf32>, vector<16x316xf32>, vector<16x316xf32>, vector<16x316xf32>, vector<16x316xf32>, vector<16x316xf32>, vector<16x316xf32>, vector<16x316xf32>, vector<16x316xf32> -> vector<144x316xf32>
    %13 = arith.truncf %12 : vector<144x316xf32> to vector<144x316xbf16>
    %c0_2 = arith.constant 0 : index
    %c0_3 = arith.constant 0 : index
    %14 = vector.load %arg2[%c0_2, %c0_3] : memref<32x144xbf16, #tpu.memory_space<vmem>>, vector<32x144xbf16>
    %cst = arith.constant dense<0.000000e+00> : vector<32x316xf32>
    %15 = tpu.matmul %14, %13, %cst {dimension_numbers = #tpu.dot_dimension_numbers<[1], [0], [0], [1], [0, 0, 1, 1], [], []>} : vector<32x144xbf16>, vector<144x316xbf16>, vector<32x316xf32> -> vector<32x316xf32>
    %c0_4 = arith.constant 0 : index
    %c0_5 = arith.constant 0 : index
    %16 = vector.load %arg3[%c0_4, %c0_5] : memref<32x1xf32, #tpu.memory_space<vmem>>, vector<32x1xf32>
    %17 = vector.broadcast %16 : vector<32x1xf32> to vector<32x316xf32>
    %18 = arith.addf %15, %17 : vector<32x316xf32>
    %cst_6 = arith.constant 0.000000e+00 : f32
    %19 = vector.broadcast %cst_6 : f32 to vector<32x316xf32>
    %20 = arith.cmpf oge, %18, %19 : vector<32x316xf32>
    %cst_7 = arith.constant 3.000000e-01 : f32
    %21 = vector.broadcast %cst_7 : f32 to vector<32x316xf32>
    %22 = arith.mulf %21, %18 : vector<32x316xf32>
    %23 = arith.select %20, %18, %22 : vector<32x316xi1>, vector<32x316xf32>
    %24 = arith.truncf %23 : vector<32x316xf32> to vector<32x316xbf16>
    %c0_8 = arith.constant 0 : index
    %c0_9 = arith.constant 0 : index
    %c0_10 = arith.constant 0 : index
    %25 = vector.load %arg4[%c0_8, %c0_9, %c0_10] : memref<1x32x316xbf16, #tpu.memory_space<vmem>>, vector<1x32x316xbf16>
    %26 = vector.shape_cast %25 : vector<1x32x316xbf16> to vector<32x316xbf16>
    %27 = vector.shape_cast %24 : vector<32x316xbf16> to vector<1x32x316xbf16>
    tpu.vector_store %arg4[%c0_8, %c0_9, %c0_10], %27 {strides = array<i32>} : memref<1x32x316xbf16, #tpu.memory_space<vmem>>, vector<1x32x316xbf16>,
    return
  }
  func.func @transform_0(%arg0: i32) -> (i32, i32, i32) {
    %c1_i32 = arith.constant 1 : i32
    %c0_i32 = arith.constant 0 : i32
    %c0_i32_0 = arith.constant 0 : i32
    return %arg0, %c1_i32, %c0_i32 : i32, i32, i32
  }
  func.func @transform_1(%arg0: i32) -> (i32, i32) {
    %c0_i32 = arith.constant 0 : i32
    %c0_i32_0 = arith.constant 0 : i32
    %c0_i32_1 = arith.constant 0 : i32
    return %c0_i32, %c0_i32_0 : i32, i32
  }
  func.func @transform_2(%arg0: i32) -> (i32, i32) {
    %c0_i32 = arith.constant 0 : i32
    %c0_i32_0 = arith.constant 0 : i32
    %c0_i32_1 = arith.constant 0 : i32
    return %c0_i32, %c0_i32_0 : i32, i32
  }
  func.func @transform_3(%arg0: i32) -> (i32, i32, i32) {
    %c0_i32 = arith.constant 0 : i32
    %c0_i32_0 = arith.constant 0 : i32
    %c0_i32_1 = arith.constant 0 : i32
    return %arg0, %c0_i32, %c0_i32_0 : i32, i32, i32
  }
}

module attributes {stable_mosaic.version = 11 : i64} {
  func.func @_conv3x3_ssm_kernel(%arg0: i32, %arg1: memref<1x32x316xbf16, #tpu.memory_space<vmem>>, %arg2: memref<5x288xbf16, #tpu.memory_space<vmem>>, %arg3: memref<5x1xf32, #tpu.memory_space<vmem>>, %arg4: memref<1x5x1xf32, #tpu.memory_space<vmem>>, %arg5: memref<1x5x1xf32, #tpu.memory_space<vmem>>) attributes {dimension_semantics = [#tpu.dimension_semantics<parallel>], iteration_bounds = array<i64: 2>, scalar_prefetch = 0 : i64, scratch_operands = 0 : i64, tpu.core_type = #tpu.core_type<tc>, window_params = [{transform_indices = @transform_0, window_bounds = array<i64: 1, 32, 316>}, {pipeline_mode = #tpu.pipeline_mode<synchronous>, transform_indices = @transform_1, window_bounds = array<i64: 5, 288>}, {pipeline_mode = #tpu.pipeline_mode<synchronous>, transform_indices = @transform_2, window_bounds = array<i64: 5, 1>}, {transform_indices = @transform_3, window_bounds = array<i64: 1, 5, 1>}, {transform_indices = @transform_4, window_bounds = array<i64: 1, 5, 1>}]} {
    %c0 = arith.constant 0 : index
    %c0_0 = arith.constant 0 : index
    %c0_1 = arith.constant 0 : index
    %0 = vector.load %arg1[%c0, %c0_0, %c0_1] : memref<1x32x316xbf16, #tpu.memory_space<vmem>>, vector<1x32x316xbf16>
    %1 = vector.shape_cast %0 : vector<1x32x316xbf16> to vector<32x316xbf16>
    %2 = arith.extf %1 : vector<32x316xbf16> to vector<32x316xf32>
    %3 = vector.extract_strided_slice %2 {offsets = [0, 0], sizes = [32, 282], strides = [1, 1]} : vector<32x316xf32> to vector<32x282xf32>
    %4 = vector.extract_strided_slice %2 {offsets = [0, 1], sizes = [32, 282], strides = [1, 1]} : vector<32x316xf32> to vector<32x282xf32>
    %5 = vector.extract_strided_slice %2 {offsets = [0, 2], sizes = [32, 282], strides = [1, 1]} : vector<32x316xf32> to vector<32x282xf32>
    %6 = vector.extract_strided_slice %2 {offsets = [0, 16], sizes = [32, 282], strides = [1, 1]} : vector<32x316xf32> to vector<32x282xf32>
    %7 = vector.extract_strided_slice %2 {offsets = [0, 17], sizes = [32, 282], strides = [1, 1]} : vector<32x316xf32> to vector<32x282xf32>
    %8 = vector.extract_strided_slice %2 {offsets = [0, 18], sizes = [32, 282], strides = [1, 1]} : vector<32x316xf32> to vector<32x282xf32>
    %9 = vector.extract_strided_slice %2 {offsets = [0, 32], sizes = [32, 282], strides = [1, 1]} : vector<32x316xf32> to vector<32x282xf32>
    %10 = vector.extract_strided_slice %2 {offsets = [0, 33], sizes = [32, 282], strides = [1, 1]} : vector<32x316xf32> to vector<32x282xf32>
    %11 = vector.extract_strided_slice %2 {offsets = [0, 34], sizes = [32, 282], strides = [1, 1]} : vector<32x316xf32> to vector<32x282xf32>
    %12 = tpu.concatenate %3, %4, %5, %6, %7, %8, %9, %10, %11 in 0 : vector<32x282xf32>, vector<32x282xf32>, vector<32x282xf32>, vector<32x282xf32>, vector<32x282xf32>, vector<32x282xf32>, vector<32x282xf32>, vector<32x282xf32>, vector<32x282xf32> -> vector<288x282xf32>
    %13 = arith.truncf %12 : vector<288x282xf32> to vector<288x282xbf16>
    %c0_2 = arith.constant 0 : index
    %c0_3 = arith.constant 0 : index
    %14 = vector.load %arg2[%c0_2, %c0_3] : memref<5x288xbf16, #tpu.memory_space<vmem>>, vector<5x288xbf16>
    %cst = arith.constant dense<0.000000e+00> : vector<5x282xf32>
    %15 = tpu.matmul %14, %13, %cst {dimension_numbers = #tpu.dot_dimension_numbers<[1], [0], [0], [1], [0, 0, 1, 1], [], []>} : vector<5x288xbf16>, vector<288x282xbf16>, vector<5x282xf32> -> vector<5x282xf32>
    %c0_4 = arith.constant 0 : index
    %c0_5 = arith.constant 0 : index
    %16 = vector.load %arg3[%c0_4, %c0_5] : memref<5x1xf32, #tpu.memory_space<vmem>>, vector<5x1xf32>
    %17 = vector.broadcast %16 : vector<5x1xf32> to vector<5x282xf32>
    %18 = arith.addf %15, %17 : vector<5x282xf32>
    %cst_6 = arith.constant 0.000000e+00 : f32
    %19 = vector.broadcast %cst_6 : f32 to vector<5x282xf32>
    %20 = arith.cmpf oge, %18, %19 : vector<5x282xf32>
    %cst_7 = arith.constant 3.000000e-01 : f32
    %21 = vector.broadcast %cst_7 : f32 to vector<5x282xf32>
    %22 = arith.mulf %21, %18 : vector<5x282xf32>
    %23 = arith.select %20, %18, %22 : vector<5x282xi1>, vector<5x282xf32>
    %24 = tpu.iota {dimensions = array<i32: 1>} : vector<5x282xi32>
    %25 = arith.sitofp %24 : vector<5x282xi32> to vector<5x282xf32>
    %cst_8 = arith.constant 5.000000e-01 : f32
    %26 = vector.broadcast %cst_8 : f32 to vector<5x282xf32>
    %27 = arith.addf %25, %26 : vector<5x282xf32>
    %cst_9 = arith.constant 6.250000e-02 : f32
    %28 = vector.broadcast %cst_9 : f32 to vector<5x282xf32>
    %29 = arith.mulf %27, %28 : vector<5x282xf32>
    %30 = math.floor %29 : vector<5x282xf32>
    %cst_10 = arith.constant 1.600000e+01 : f32
    %31 = vector.broadcast %cst_10 : f32 to vector<5x282xf32>
    %32 = arith.mulf %30, %31 : vector<5x282xf32>
    %33 = arith.subf %25, %32 : vector<5x282xf32>
    %cst_11 = arith.constant 1.000000e+01 : f32
    %34 = vector.broadcast %cst_11 : f32 to vector<5x282xf32>
    %35 = arith.cmpf olt, %33, %34 : vector<5x282xf32>
    %cst_12 = arith.constant 1.600000e+02 : f32
    %36 = vector.broadcast %cst_12 : f32 to vector<5x282xf32>
    %37 = arith.cmpf olt, %25, %36 : vector<5x282xf32>
    %38 = arith.andi %35, %37 : vector<5x282xi1>
    %cst_13 = arith.constant 1.000000e+04 : f32
    %39 = vector.broadcast %cst_13 : f32 to vector<5x282xf32>
    %40 = arith.mulf %23, %39 : vector<5x282xf32>
    %cst_14 = arith.constant -1.000000e+30 : f32
    %41 = vector.broadcast %cst_14 : f32 to vector<5x282xf32>
    %42 = arith.select %38, %40, %41 : vector<5x282xi1>, vector<5x282xf32>
    %cst_15 = arith.constant dense<0xFF800000> : vector<5xf32>
    %43 = vector.multi_reduction <maximumf>, %42, %cst_15 [1] : vector<5x282xf32> to vector<5xf32>
    %44 = vector.shape_cast %43 : vector<5xf32> to vector<5x1xf32>
    %45 = vector.broadcast %44 : vector<5x1xf32> to vector<5x282xf32>
    %46 = arith.subf %42, %45 : vector<5x282xf32>
    %47 = math.exp %46 : vector<5x282xf32>
    %cst_16 = arith.constant dense<0.000000e+00> : vector<5xf32>
    %48 = vector.multi_reduction <add>, %47, %cst_16 [1] : vector<5x282xf32> to vector<5xf32>
    %49 = vector.shape_cast %48 : vector<5xf32> to vector<5x1xf32>
    %50 = vector.broadcast %49 : vector<5x1xf32> to vector<5x282xf32>
    %51 = arith.divf %47, %50 : vector<5x282xf32>
    %cst_17 = arith.constant 0.222222224 : f32
    %52 = vector.broadcast %cst_17 : f32 to vector<5x282xf32>
    %53 = arith.mulf %33, %52 : vector<5x282xf32>
    %cst_18 = arith.constant 1.000000e+00 : f32
    %54 = vector.broadcast %cst_18 : f32 to vector<5x282xf32>
    %55 = arith.subf %53, %54 : vector<5x282xf32>
    %cst_19 = arith.constant 0.222222224 : f32
    %56 = vector.broadcast %cst_19 : f32 to vector<5x282xf32>
    %57 = arith.mulf %30, %56 : vector<5x282xf32>
    %cst_20 = arith.constant 1.000000e+00 : f32
    %58 = vector.broadcast %cst_20 : f32 to vector<5x282xf32>
    %59 = arith.subf %57, %58 : vector<5x282xf32>
    %60 = arith.mulf %51, %55 : vector<5x282xf32>
    %cst_21 = arith.constant dense<0.000000e+00> : vector<5xf32>
    %61 = vector.multi_reduction <add>, %60, %cst_21 [1] : vector<5x282xf32> to vector<5xf32>
    %62 = vector.shape_cast %61 : vector<5xf32> to vector<5x1xf32>
    %c0_22 = arith.constant 0 : index
    %c0_23 = arith.constant 0 : index
    %c0_24 = arith.constant 0 : index
    %63 = vector.load %arg4[%c0_22, %c0_23, %c0_24] : memref<1x5x1xf32, #tpu.memory_space<vmem>>, vector<1x5x1xf32>
    %64 = vector.shape_cast %63 : vector<1x5x1xf32> to vector<5x1xf32>
    %65 = vector.shape_cast %62 : vector<5x1xf32> to vector<1x5x1xf32>
    tpu.vector_store %arg4[%c0_22, %c0_23, %c0_24], %65 {strides = array<i32>} : memref<1x5x1xf32, #tpu.memory_space<vmem>>, vector<1x5x1xf32>,
    %66 = arith.mulf %51, %59 : vector<5x282xf32>
    %cst_25 = arith.constant dense<0.000000e+00> : vector<5xf32>
    %67 = vector.multi_reduction <add>, %66, %cst_25 [1] : vector<5x282xf32> to vector<5xf32>
    %68 = vector.shape_cast %67 : vector<5xf32> to vector<5x1xf32>
    %c0_26 = arith.constant 0 : index
    %c0_27 = arith.constant 0 : index
    %c0_28 = arith.constant 0 : index
    %69 = vector.load %arg5[%c0_26, %c0_27, %c0_28] : memref<1x5x1xf32, #tpu.memory_space<vmem>>, vector<1x5x1xf32>
    %70 = vector.shape_cast %69 : vector<1x5x1xf32> to vector<5x1xf32>
    %71 = vector.shape_cast %68 : vector<5x1xf32> to vector<1x5x1xf32>
    tpu.vector_store %arg5[%c0_26, %c0_27, %c0_28], %71 {strides = array<i32>} : memref<1x5x1xf32, #tpu.memory_space<vmem>>, vector<1x5x1xf32>,
    return
  }
  func.func @transform_0(%arg0: i32) -> (i32, i32, i32) {
    %c0_i32 = arith.constant 0 : i32
    %c0_i32_0 = arith.constant 0 : i32
    %c0_i32_1 = arith.constant 0 : i32
    return %arg0, %c0_i32, %c0_i32_0 : i32, i32, i32
  }
  func.func @transform_1(%arg0: i32) -> (i32, i32) {
    %c0_i32 = arith.constant 0 : i32
    %c0_i32_0 = arith.constant 0 : i32
    %c0_i32_1 = arith.constant 0 : i32
    return %c0_i32, %c0_i32_0 : i32, i32
  }
  func.func @transform_2(%arg0: i32) -> (i32, i32) {
    %c0_i32 = arith.constant 0 : i32
    %c0_i32_0 = arith.constant 0 : i32
    %c0_i32_1 = arith.constant 0 : i32
    return %c0_i32, %c0_i32_0 : i32, i32
  }
  func.func @transform_3(%arg0: i32) -> (i32, i32, i32) {
    %c0_i32 = arith.constant 0 : i32
    %c0_i32_0 = arith.constant 0 : i32
    %c0_i32_1 = arith.constant 0 : i32
    return %arg0, %c0_i32, %c0_i32_0 : i32, i32, i32
  }
  func.func @transform_4(%arg0: i32) -> (i32, i32, i32) {
    %c0_i32 = arith.constant 0 : i32
    %c0_i32_0 = arith.constant 0 : i32
    %c0_i32_1 = arith.constant 0 : i32
    return %arg0, %c0_i32, %c0_i32_0 : i32, i32, i32
  }
}

module attributes {stable_mosaic.version = 11 : i64} {
  func.func @_hrnn_kernel(%arg0: i32, %arg1: memref<2x10xf32, #tpu.memory_space<vmem>>, %arg2: memref<2x10xf32, #tpu.memory_space<vmem>>, %arg3: memref<2x32xf32, #tpu.memory_space<vmem>>, %arg4: memref<2x32xf32, #tpu.memory_space<vmem>>, %arg5: memref<2x32xf32, #tpu.memory_space<vmem>>, %arg6: memref<2x32xf32, #tpu.memory_space<vmem>>, %arg7: memref<2x16xf32, #tpu.memory_space<vmem>>, %arg8: memref<2x16xf32, #tpu.memory_space<vmem>>, %arg9: memref<10x128xf32, #tpu.memory_space<vmem>>, %arg10: memref<16x128xf32, #tpu.memory_space<vmem>>, %arg11: memref<32x128xf32, #tpu.memory_space<vmem>>, %arg12: memref<1x128xf32, #tpu.memory_space<vmem>>, %arg13: memref<10x128xf32, #tpu.memory_space<vmem>>, %arg14: memref<16x128xf32, #tpu.memory_space<vmem>>, %arg15: memref<32x128xf32, #tpu.memory_space<vmem>>, %arg16: memref<1x128xf32, #tpu.memory_space<vmem>>, %arg17: memref<32x64xf32, #tpu.memory_space<vmem>>, %arg18: memref<32x64xf32, #tpu.memory_space<vmem>>, %arg19: memref<16x64xf32, #tpu.memory_space<vmem>>, %arg20: memref<1x64xf32, #tpu.memory_space<vmem>>, %arg21: memref<32x10xf32, #tpu.memory_space<vmem>>, %arg22: memref<1x10xf32, #tpu.memory_space<vmem>>, %arg23: memref<32x10xf32, #tpu.memory_space<vmem>>, %arg24: memref<1x10xf32, #tpu.memory_space<vmem>>, %arg25: memref<2x32xf32, #tpu.memory_space<vmem>>, %arg26: memref<2x32xf32, #tpu.memory_space<vmem>>, %arg27: memref<2x32xf32, #tpu.memory_space<vmem>>, %arg28: memref<2x32xf32, #tpu.memory_space<vmem>>, %arg29: memref<2x16xf32, #tpu.memory_space<vmem>>, %arg30: memref<2x16xf32, #tpu.memory_space<vmem>>, %arg31: memref<2x10xf32, #tpu.memory_space<vmem>>, %arg32: memref<2x10xf32, #tpu.memory_space<vmem>>) attributes {dimension_semantics = [#tpu.dimension_semantics<arbitrary>], iteration_bounds = array<i64: 1>, scalar_prefetch = 0 : i64, scratch_operands = 0 : i64, tpu.core_type = #tpu.core_type<tc>, window_params = [{pipeline_mode = #tpu.pipeline_mode<synchronous>, transform_indices = @transform_0, window_bounds = array<i64: 2, 10>}, {pipeline_mode = #tpu.pipeline_mode<synchronous>, transform_indices = @transform_1, window_bounds = array<i64: 2, 10>}, {pipeline_mode = #tpu.pipeline_mode<synchronous>, transform_indices = @transform_2, window_bounds = array<i64: 2, 32>}, {pipeline_mode = #tpu.pipeline_mode<synchronous>, transform_indices = @transform_3, window_bounds = array<i64: 2, 32>}, {pipeline_mode = #tpu.pipeline_mode<synchronous>, transform_indices = @transform_4, window_bounds = array<i64: 2, 32>}, {pipeline_mode = #tpu.pipeline_mode<synchronous>, transform_indices = @transform_5, window_bounds = array<i64: 2, 32>}, {pipeline_mode = #tpu.pipeline_mode<synchronous>, transform_indices = @transform_6, window_bounds = array<i64: 2, 16>}, {pipeline_mode = #tpu.pipeline_mode<synchronous>, transform_indices = @transform_7, window_bounds = array<i64: 2, 16>}, {pipeline_mode = #tpu.pipeline_mode<synchronous>, transform_indices = @transform_8, window_bounds = array<i64: 10, 128>}, {pipeline_mode = #tpu.pipeline_mode<synchronous>, transform_indices = @transform_9, window_bounds = array<i64: 16, 128>}, {pipeline_mode = #tpu.pipeline_mode<synchronous>, transform_indices = @transform_10, window_bounds = array<i64: 32, 128>}, {pipeline_mode = #tpu.pipeline_mode<synchronous>, transform_indices = @transform_11, window_bounds = array<i64: 1, 128>}, {pipeline_mode = #tpu.pipeline_mode<synchronous>, transform_indices = @transform_12, window_bounds = array<i64: 10, 128>}, {pipeline_mode = #tpu.pipeline_mode<synchronous>, transform_indices = @transform_13, window_bounds = array<i64: 16, 128>}, {pipeline_mode = #tpu.pipeline_mode<synchronous>, transform_indices = @transform_14, window_bounds = array<i64: 32, 128>}, {pipeline_mode = #tpu.pipeline_mode<synchronous>, transform_indices = @transform_15, window_bounds = array<i64: 1, 128>}, {pipeline_mode = #tpu.pipeline_mode<synchronous>, transform_indices = @transform_16, window_bounds = array<i64: 32, 64>}, {pipeline_mode = #tpu.pipeline_mode<synchronous>, transform_indices = @transform_17, window_bounds = array<i64: 32, 64>}, {pipeline_mode = #tpu.pipeline_mode<synchronous>, transform_indices = @transform_18, window_bounds = array<i64: 16, 64>}, {pipeline_mode = #tpu.pipeline_mode<synchronous>, transform_indices = @transform_19, window_bounds = array<i64: 1, 64>}, {pipeline_mode = #tpu.pipeline_mode<synchronous>, transform_indices = @transform_20, window_bounds = array<i64: 32, 10>}, {pipeline_mode = #tpu.pipeline_mode<synchronous>, transform_indices = @transform_21, window_bounds = array<i64: 1, 10>}, {pipeline_mode = #tpu.pipeline_mode<synchronous>, transform_indices = @transform_22, window_bounds = array<i64: 32, 10>}, {pipeline_mode = #tpu.pipeline_mode<synchronous>, transform_indices = @transform_23, window_bounds = array<i64: 1, 10>}, {pipeline_mode = #tpu.pipeline_mode<synchronous>, transform_indices = @transform_24, window_bounds = array<i64: 2, 32>}, {pipeline_mode = #tpu.pipeline_mode<synchronous>, transform_indices = @transform_25, window_bounds = array<i64: 2, 32>}, {pipeline_mode = #tpu.pipeline_mode<synchronous>, transform_indices = @transform_26, window_bounds = array<i64: 2, 32>}, {pipeline_mode = #tpu.pipeline_mode<synchronous>, transform_indices = @transform_27, window_bounds = array<i64: 2, 32>}, {pipeline_mode = #tpu.pipeline_mode<synchronous>, transform_indices = @transform_28, window_bounds = array<i64: 2, 16>}, {pipeline_mode = #tpu.pipeline_mode<synchronous>, transform_indices = @transform_29, window_bounds = array<i64: 2, 16>}, {pipeline_mode = #tpu.pipeline_mode<synchronous>, transform_indices = @transform_30, window_bounds = array<i64: 2, 10>}, {pipeline_mode = #tpu.pipeline_mode<synchronous>, transform_indices = @transform_31, window_bounds = array<i64: 2, 10>}]} {
    %c0 = arith.constant 0 : index
    %c0_0 = arith.constant 0 : index
    %0 = vector.load %arg7[%c0, %c0_0] : memref<2x16xf32, #tpu.memory_space<vmem>>, vector<2x16xf32>
    %c0_1 = arith.constant 0 : index
    %c0_2 = arith.constant 0 : index
    %1 = vector.load %arg1[%c0_1, %c0_2] : memref<2x10xf32, #tpu.memory_space<vmem>>, vector<2x10xf32>
    %c0_3 = arith.constant 0 : index
    %c0_4 = arith.constant 0 : index
    %2 = vector.load %arg9[%c0_3, %c0_4] : memref<10x128xf32, #tpu.memory_space<vmem>>, vector<10x128xf32>
    %cst = arith.constant dense<0.000000e+00> : vector<2x128xf32>
    %3 = tpu.matmul %1, %2, %cst {dimension_numbers = #tpu.dot_dimension_numbers<[1], [0], [0], [1], [0, 0, 1, 1], [], []>} : vector<2x10xf32>, vector<10x128xf32>, vector<2x128xf32> -> vector<2x128xf32>
    %c0_5 = arith.constant 0 : index
    %c0_6 = arith.constant 0 : index
    %4 = vector.load %arg10[%c0_5, %c0_6] : memref<16x128xf32, #tpu.memory_space<vmem>>, vector<16x128xf32>
    %cst_7 = arith.constant dense<0.000000e+00> : vector<2x128xf32>
    %5 = tpu.matmul %0, %4, %cst_7 {dimension_numbers = #tpu.dot_dimension_numbers<[1], [0], [0], [1], [0, 0, 1, 1], [], []>} : vector<2x16xf32>, vector<16x128xf32>, vector<2x128xf32> -> vector<2x128xf32>
    %6 = arith.addf %3, %5 : vector<2x128xf32>
    %c0_8 = arith.constant 0 : index
    %c0_9 = arith.constant 0 : index
    %7 = vector.load %arg3[%c0_8, %c0_9] : memref<2x32xf32, #tpu.memory_space<vmem>>, vector<2x32xf32>
    %c0_10 = arith.constant 0 : index
    %c0_11 = arith.constant 0 : index
    %8 = vector.load %arg11[%c0_10, %c0_11] : memref<32x128xf32, #tpu.memory_space<vmem>>, vector<32x128xf32>
    %cst_12 = arith.constant dense<0.000000e+00> : vector<2x128xf32>
    %9 = tpu.matmul %7, %8, %cst_12 {dimension_numbers = #tpu.dot_dimension_numbers<[1], [0], [0], [1], [0, 0, 1, 1], [], []>} : vector<2x32xf32>, vector<32x128xf32>, vector<2x128xf32> -> vector<2x128xf32>
    %10 = arith.addf %6, %9 : vector<2x128xf32>
    %c0_13 = arith.constant 0 : index
    %c0_14 = arith.constant 0 : index
    %11 = vector.load %arg12[%c0_13, %c0_14] : memref<1x128xf32, #tpu.memory_space<vmem>>, vector<1x128xf32>
    %12 = vector.broadcast %11 : vector<1x128xf32> to vector<2x128xf32>
    %13 = arith.addf %10, %12 : vector<2x128xf32>
    %c0_15 = arith.constant 0 : index
    %c0_16 = arith.constant 0 : index
    %14 = vector.load %arg4[%c0_15, %c0_16] : memref<2x32xf32, #tpu.memory_space<vmem>>, vector<2x32xf32>
    %15 = vector.extract_strided_slice %13 {offsets = [0, 0], sizes = [2, 32], strides = [1, 1]} : vector<2x128xf32> to vector<2x32xf32>
    %16 = arith.negf %15 : vector<2x32xf32>
    %17 = math.exp %16 : vector<2x32xf32>
    %cst_17 = arith.constant 1.000000e+00 : f32
    %18 = vector.broadcast %cst_17 : f32 to vector<2x32xf32>
    %19 = arith.addf %18, %17 : vector<2x32xf32>
    %20 = arith.divf %18, %19 : vector<2x32xf32>
    %21 = vector.extract_strided_slice %13 {offsets = [0, 32], sizes = [2, 32], strides = [1, 1]} : vector<2x128xf32> to vector<2x32xf32>
    %22 = arith.negf %21 : vector<2x32xf32>
    %23 = math.exp %22 : vector<2x32xf32>
    %cst_18 = arith.constant 1.000000e+00 : f32
    %24 = vector.broadcast %cst_18 : f32 to vector<2x32xf32>
    %25 = arith.addf %24, %23 : vector<2x32xf32>
    %26 = arith.divf %24, %25 : vector<2x32xf32>
    %27 = vector.extract_strided_slice %13 {offsets = [0, 64], sizes = [2, 32], strides = [1, 1]} : vector<2x128xf32> to vector<2x32xf32>
    %28 = math.tanh %27 : vector<2x32xf32>
    %29 = vector.extract_strided_slice %13 {offsets = [0, 96], sizes = [2, 32], strides = [1, 1]} : vector<2x128xf32> to vector<2x32xf32>
    %30 = arith.negf %29 : vector<2x32xf32>
    %31 = math.exp %30 : vector<2x32xf32>
    %cst_19 = arith.constant 1.000000e+00 : f32
    %32 = vector.broadcast %cst_19 : f32 to vector<2x32xf32>
    %33 = arith.addf %32, %31 : vector<2x32xf32>
    %34 = arith.divf %32, %33 : vector<2x32xf32>
    %35 = arith.mulf %26, %14 : vector<2x32xf32>
    %36 = arith.mulf %20, %28 : vector<2x32xf32>
    %37 = arith.addf %35, %36 : vector<2x32xf32>
    %38 = math.tanh %37 : vector<2x32xf32>
    %39 = arith.mulf %34, %38 : vector<2x32xf32>
    %c0_20 = arith.constant 0 : index
    %c0_21 = arith.constant 0 : index
    %40 = vector.load %arg2[%c0_20, %c0_21] : memref<2x10xf32, #tpu.memory_space<vmem>>, vector<2x10xf32>
    %c0_22 = arith.constant 0 : index
    %c0_23 = arith.constant 0 : index
    %41 = vector.load %arg13[%c0_22, %c0_23] : memref<10x128xf32, #tpu.memory_space<vmem>>, vector<10x128xf32>
    %cst_24 = arith.constant dense<0.000000e+00> : vector<2x128xf32>
    %42 = tpu.matmul %40, %41, %cst_24 {dimension_numbers = #tpu.dot_dimension_numbers<[1], [0], [0], [1], [0, 0, 1, 1], [], []>} : vector<2x10xf32>, vector<10x128xf32>, vector<2x128xf32> -> vector<2x128xf32>
    %c0_25 = arith.constant 0 : index
    %c0_26 = arith.constant 0 : index
    %43 = vector.load %arg14[%c0_25, %c0_26] : memref<16x128xf32, #tpu.memory_space<vmem>>, vector<16x128xf32>
    %cst_27 = arith.constant dense<0.000000e+00> : vector<2x128xf32>
    %44 = tpu.matmul %0, %43, %cst_27 {dimension_numbers = #tpu.dot_dimension_numbers<[1], [0], [0], [1], [0, 0, 1, 1], [], []>} : vector<2x16xf32>, vector<16x128xf32>, vector<2x128xf32> -> vector<2x128xf32>
    %45 = arith.addf %42, %44 : vector<2x128xf32>
    %c0_28 = arith.constant 0 : index
    %c0_29 = arith.constant 0 : index
    %46 = vector.load %arg5[%c0_28, %c0_29] : memref<2x32xf32, #tpu.memory_space<vmem>>, vector<2x32xf32>
    %c0_30 = arith.constant 0 : index
    %c0_31 = arith.constant 0 : index
    %47 = vector.load %arg15[%c0_30, %c0_31] : memref<32x128xf32, #tpu.memory_space<vmem>>, vector<32x128xf32>
    %cst_32 = arith.constant dense<0.000000e+00> : vector<2x128xf32>
    %48 = tpu.matmul %46, %47, %cst_32 {dimension_numbers = #tpu.dot_dimension_numbers<[1], [0], [0], [1], [0, 0, 1, 1], [], []>} : vector<2x32xf32>, vector<32x128xf32>, vector<2x128xf32> -> vector<2x128xf32>
    %49 = arith.addf %45, %48 : vector<2x128xf32>
    %c0_33 = arith.constant 0 : index
    %c0_34 = arith.constant 0 : index
    %50 = vector.load %arg16[%c0_33, %c0_34] : memref<1x128xf32, #tpu.memory_space<vmem>>, vector<1x128xf32>
    %51 = vector.broadcast %50 : vector<1x128xf32> to vector<2x128xf32>
    %52 = arith.addf %49, %51 : vector<2x128xf32>
    %c0_35 = arith.constant 0 : index
    %c0_36 = arith.constant 0 : index
    %53 = vector.load %arg6[%c0_35, %c0_36] : memref<2x32xf32, #tpu.memory_space<vmem>>, vector<2x32xf32>
    %54 = vector.extract_strided_slice %52 {offsets = [0, 0], sizes = [2, 32], strides = [1, 1]} : vector<2x128xf32> to vector<2x32xf32>
    %55 = arith.negf %54 : vector<2x32xf32>
    %56 = math.exp %55 : vector<2x32xf32>
    %cst_37 = arith.constant 1.000000e+00 : f32
    %57 = vector.broadcast %cst_37 : f32 to vector<2x32xf32>
    %58 = arith.addf %57, %56 : vector<2x32xf32>
    %59 = arith.divf %57, %58 : vector<2x32xf32>
    %60 = vector.extract_strided_slice %52 {offsets = [0, 32], sizes = [2, 32], strides = [1, 1]} : vector<2x128xf32> to vector<2x32xf32>
    %61 = arith.negf %60 : vector<2x32xf32>
    %62 = math.exp %61 : vector<2x32xf32>
    %cst_38 = arith.constant 1.000000e+00 : f32
    %63 = vector.broadcast %cst_38 : f32 to vector<2x32xf32>
    %64 = arith.addf %63, %62 : vector<2x32xf32>
    %65 = arith.divf %63, %64 : vector<2x32xf32>
    %66 = vector.extract_strided_slice %52 {offsets = [0, 64], sizes = [2, 32], strides = [1, 1]} : vector<2x128xf32> to vector<2x32xf32>
    %67 = math.tanh %66 : vector<2x32xf32>
    %68 = vector.extract_strided_slice %52 {offsets = [0, 96], sizes = [2, 32], strides = [1, 1]} : vector<2x128xf32> to vector<2x32xf32>
    %69 = arith.negf %68 : vector<2x32xf32>
    %70 = math.exp %69 : vector<2x32xf32>
    %cst_39 = arith.constant 1.000000e+00 : f32
    %71 = vector.broadcast %cst_39 : f32 to vector<2x32xf32>
    %72 = arith.addf %71, %70 : vector<2x32xf32>
    %73 = arith.divf %71, %72 : vector<2x32xf32>
    %74 = arith.mulf %65, %53 : vector<2x32xf32>
    %75 = arith.mulf %59, %67 : vector<2x32xf32>
    %76 = arith.addf %74, %75 : vector<2x32xf32>
    %77 = math.tanh %76 : vector<2x32xf32>
    %78 = arith.mulf %73, %77 : vector<2x32xf32>
    %c0_40 = arith.constant 0 : index
    %c0_41 = arith.constant 0 : index
    %79 = vector.load %arg17[%c0_40, %c0_41] : memref<32x64xf32, #tpu.memory_space<vmem>>, vector<32x64xf32>
    %cst_42 = arith.constant dense<0.000000e+00> : vector<2x64xf32>
    %80 = tpu.matmul %39, %79, %cst_42 {dimension_numbers = #tpu.dot_dimension_numbers<[1], [0], [0], [1], [0, 0, 1, 1], [], []>} : vector<2x32xf32>, vector<32x64xf32>, vector<2x64xf32> -> vector<2x64xf32>
    %c0_43 = arith.constant 0 : index
    %c0_44 = arith.constant 0 : index
    %81 = vector.load %arg18[%c0_43, %c0_44] : memref<32x64xf32, #tpu.memory_space<vmem>>, vector<32x64xf32>
    %cst_45 = arith.constant dense<0.000000e+00> : vector<2x64xf32>
    %82 = tpu.matmul %78, %81, %cst_45 {dimension_numbers = #tpu.dot_dimension_numbers<[1], [0], [0], [1], [0, 0, 1, 1], [], []>} : vector<2x32xf32>, vector<32x64xf32>, vector<2x64xf32> -> vector<2x64xf32>
    %83 = arith.addf %80, %82 : vector<2x64xf32>
    %c0_46 = arith.constant 0 : index
    %c0_47 = arith.constant 0 : index
    %84 = vector.load %arg19[%c0_46, %c0_47] : memref<16x64xf32, #tpu.memory_space<vmem>>, vector<16x64xf32>
    %cst_48 = arith.constant dense<0.000000e+00> : vector<2x64xf32>
    %85 = tpu.matmul %0, %84, %cst_48 {dimension_numbers = #tpu.dot_dimension_numbers<[1], [0], [0], [1], [0, 0, 1, 1], [], []>} : vector<2x16xf32>, vector<16x64xf32>, vector<2x64xf32> -> vector<2x64xf32>
    %86 = arith.addf %83, %85 : vector<2x64xf32>
    %c0_49 = arith.constant 0 : index
    %c0_50 = arith.constant 0 : index
    %87 = vector.load %arg20[%c0_49, %c0_50] : memref<1x64xf32, #tpu.memory_space<vmem>>, vector<1x64xf32>
    %88 = vector.broadcast %87 : vector<1x64xf32> to vector<2x64xf32>
    %89 = arith.addf %86, %88 : vector<2x64xf32>
    %c0_51 = arith.constant 0 : index
    %c0_52 = arith.constant 0 : index
    %90 = vector.load %arg8[%c0_51, %c0_52] : memref<2x16xf32, #tpu.memory_space<vmem>>, vector<2x16xf32>
    %91 = vector.extract_strided_slice %89 {offsets = [0, 0], sizes = [2, 16], strides = [1, 1]} : vector<2x64xf32> to vector<2x16xf32>
    %92 = arith.negf %91 : vector<2x16xf32>
    %93 = math.exp %92 : vector<2x16xf32>
    %cst_53 = arith.constant 1.000000e+00 : f32
    %94 = vector.broadcast %cst_53 : f32 to vector<2x16xf32>
    %95 = arith.addf %94, %93 : vector<2x16xf32>
    %96 = arith.divf %94, %95 : vector<2x16xf32>
    %97 = vector.extract_strided_slice %89 {offsets = [0, 16], sizes = [2, 16], strides = [1, 1]} : vector<2x64xf32> to vector<2x16xf32>
    %98 = arith.negf %97 : vector<2x16xf32>
    %99 = math.exp %98 : vector<2x16xf32>
    %cst_54 = arith.constant 1.000000e+00 : f32
    %100 = vector.broadcast %cst_54 : f32 to vector<2x16xf32>
    %101 = arith.addf %100, %99 : vector<2x16xf32>
    %102 = arith.divf %100, %101 : vector<2x16xf32>
    %103 = vector.extract_strided_slice %89 {offsets = [0, 32], sizes = [2, 16], strides = [1, 1]} : vector<2x64xf32> to vector<2x16xf32>
    %104 = math.tanh %103 : vector<2x16xf32>
    %105 = vector.extract_strided_slice %89 {offsets = [0, 48], sizes = [2, 16], strides = [1, 1]} : vector<2x64xf32> to vector<2x16xf32>
    %106 = arith.negf %105 : vector<2x16xf32>
    %107 = math.exp %106 : vector<2x16xf32>
    %cst_55 = arith.constant 1.000000e+00 : f32
    %108 = vector.broadcast %cst_55 : f32 to vector<2x16xf32>
    %109 = arith.addf %108, %107 : vector<2x16xf32>
    %110 = arith.divf %108, %109 : vector<2x16xf32>
    %111 = arith.mulf %102, %90 : vector<2x16xf32>
    %112 = arith.mulf %96, %104 : vector<2x16xf32>
    %113 = arith.addf %111, %112 : vector<2x16xf32>
    %114 = math.tanh %113 : vector<2x16xf32>
    %115 = arith.mulf %110, %114 : vector<2x16xf32>
    %c0_56 = arith.constant 0 : index
    %c0_57 = arith.constant 0 : index
    %116 = vector.load %arg25[%c0_56, %c0_57] : memref<2x32xf32, #tpu.memory_space<vmem>>, vector<2x32xf32>
    tpu.vector_store %arg25[%c0_56, %c0_57], %39 {strides = array<i32>} : memref<2x32xf32, #tpu.memory_space<vmem>>, vector<2x32xf32>,
    %c0_58 = arith.constant 0 : index
    %c0_59 = arith.constant 0 : index
    %117 = vector.load %arg26[%c0_58, %c0_59] : memref<2x32xf32, #tpu.memory_space<vmem>>, vector<2x32xf32>
    tpu.vector_store %arg26[%c0_58, %c0_59], %37 {strides = array<i32>} : memref<2x32xf32, #tpu.memory_space<vmem>>, vector<2x32xf32>,
    %c0_60 = arith.constant 0 : index
    %c0_61 = arith.constant 0 : index
    %118 = vector.load %arg27[%c0_60, %c0_61] : memref<2x32xf32, #tpu.memory_space<vmem>>, vector<2x32xf32>
    tpu.vector_store %arg27[%c0_60, %c0_61], %78 {strides = array<i32>} : memref<2x32xf32, #tpu.memory_space<vmem>>, vector<2x32xf32>,
    %c0_62 = arith.constant 0 : index
    %c0_63 = arith.constant 0 : index
    %119 = vector.load %arg28[%c0_62, %c0_63] : memref<2x32xf32, #tpu.memory_space<vmem>>, vector<2x32xf32>
    tpu.vector_store %arg28[%c0_62, %c0_63], %76 {strides = array<i32>} : memref<2x32xf32, #tpu.memory_space<vmem>>, vector<2x32xf32>,
    %c0_64 = arith.constant 0 : index
    %c0_65 = arith.constant 0 : index
    %120 = vector.load %arg29[%c0_64, %c0_65] : memref<2x16xf32, #tpu.memory_space<vmem>>, vector<2x16xf32>
    tpu.vector_store %arg29[%c0_64, %c0_65], %115 {strides = array<i32>} : memref<2x16xf32, #tpu.memory_space<vmem>>, vector<2x16xf32>,
    %c0_66 = arith.constant 0 : index
    %c0_67 = arith.constant 0 : index
    %121 = vector.load %arg30[%c0_66, %c0_67] : memref<2x16xf32, #tpu.memory_space<vmem>>, vector<2x16xf32>
    tpu.vector_store %arg30[%c0_66, %c0_67], %113 {strides = array<i32>} : memref<2x16xf32, #tpu.memory_space<vmem>>, vector<2x16xf32>,
    %c0_68 = arith.constant 0 : index
    %c0_69 = arith.constant 0 : index
    %122 = vector.load %arg21[%c0_68, %c0_69] : memref<32x10xf32, #tpu.memory_space<vmem>>, vector<32x10xf32>
    %cst_70 = arith.constant dense<0.000000e+00> : vector<2x10xf32>
    %123 = tpu.matmul %39, %122, %cst_70 {dimension_numbers = #tpu.dot_dimension_numbers<[1], [0], [0], [1], [0, 0, 1, 1], [], []>} : vector<2x32xf32>, vector<32x10xf32>, vector<2x10xf32> -> vector<2x10xf32>
    %c0_71 = arith.constant 0 : index
    %c0_72 = arith.constant 0 : index
    %124 = vector.load %arg22[%c0_71, %c0_72] : memref<1x10xf32, #tpu.memory_space<vmem>>, vector<1x10xf32>
    %125 = vector.broadcast %124 : vector<1x10xf32> to vector<2x10xf32>
    %126 = arith.addf %123, %125 : vector<2x10xf32>
    %c0_73 = arith.constant 0 : index
    %c0_74 = arith.constant 0 : index
    %127 = vector.load %arg31[%c0_73, %c0_74] : memref<2x10xf32, #tpu.memory_space<vmem>>, vector<2x10xf32>
    tpu.vector_store %arg31[%c0_73, %c0_74], %126 {strides = array<i32>} : memref<2x10xf32, #tpu.memory_space<vmem>>, vector<2x10xf32>,
    %c0_75 = arith.constant 0 : index
    %c0_76 = arith.constant 0 : index
    %128 = vector.load %arg23[%c0_75, %c0_76] : memref<32x10xf32, #tpu.memory_space<vmem>>, vector<32x10xf32>
    %cst_77 = arith.constant dense<0.000000e+00> : vector<2x10xf32>
    %129 = tpu.matmul %78, %128, %cst_77 {dimension_numbers = #tpu.dot_dimension_numbers<[1], [0], [0], [1], [0, 0, 1, 1], [], []>} : vector<2x32xf32>, vector<32x10xf32>, vector<2x10xf32> -> vector<2x10xf32>
    %c0_78 = arith.constant 0 : index
    %c0_79 = arith.constant 0 : index
    %130 = vector.load %arg24[%c0_78, %c0_79] : memref<1x10xf32, #tpu.memory_space<vmem>>, vector<1x10xf32>
    %131 = vector.broadcast %130 : vector<1x10xf32> to vector<2x10xf32>
    %132 = arith.addf %129, %131 : vector<2x10xf32>
    %cst_80 = arith.constant 0.000000e+00 : f32
    %133 = vector.broadcast %cst_80 : f32 to vector<2x10xf32>
    %134 = arith.cmpf oge, %132, %133 : vector<2x10xf32>
    %cst_81 = arith.constant 3.000000e-01 : f32
    %135 = vector.broadcast %cst_81 : f32 to vector<2x10xf32>
    %136 = arith.mulf %135, %132 : vector<2x10xf32>
    %137 = arith.select %134, %132, %136 : vector<2x10xi1>, vector<2x10xf32>
    %c0_82 = arith.constant 0 : index
    %c0_83 = arith.constant 0 : index
    %138 = vector.load %arg32[%c0_82, %c0_83] : memref<2x10xf32, #tpu.memory_space<vmem>>, vector<2x10xf32>
    tpu.vector_store %arg32[%c0_82, %c0_83], %137 {strides = array<i32>} : memref<2x10xf32, #tpu.memory_space<vmem>>, vector<2x10xf32>,
    return
  }
  func.func @transform_0(%arg0: i32) -> (i32, i32) {
    %c0_i32 = arith.constant 0 : i32
    %c0_i32_0 = arith.constant 0 : i32
    %c0_i32_1 = arith.constant 0 : i32
    return %c0_i32, %c0_i32_0 : i32, i32
  }
  func.func @transform_1(%arg0: i32) -> (i32, i32) {
    %c0_i32 = arith.constant 0 : i32
    %c0_i32_0 = arith.constant 0 : i32
    %c0_i32_1 = arith.constant 0 : i32
    return %c0_i32, %c0_i32_0 : i32, i32
  }
  func.func @transform_2(%arg0: i32) -> (i32, i32) {
    %c0_i32 = arith.constant 0 : i32
    %c0_i32_0 = arith.constant 0 : i32
    %c0_i32_1 = arith.constant 0 : i32
    return %c0_i32, %c0_i32_0 : i32, i32
  }
  func.func @transform_3(%arg0: i32) -> (i32, i32) {
    %c0_i32 = arith.constant 0 : i32
    %c0_i32_0 = arith.constant 0 : i32
    %c0_i32_1 = arith.constant 0 : i32
    return %c0_i32, %c0_i32_0 : i32, i32
  }
  func.func @transform_4(%arg0: i32) -> (i32, i32) {
    %c0_i32 = arith.constant 0 : i32
    %c0_i32_0 = arith.constant 0 : i32
    %c0_i32_1 = arith.constant 0 : i32
    return %c0_i32, %c0_i32_0 : i32, i32
  }
  func.func @transform_5(%arg0: i32) -> (i32, i32) {
    %c0_i32 = arith.constant 0 : i32
    %c0_i32_0 = arith.constant 0 : i32
    %c0_i32_1 = arith.constant 0 : i32
    return %c0_i32, %c0_i32_0 : i32, i32
  }
  func.func @transform_6(%arg0: i32) -> (i32, i32) {
    %c0_i32 = arith.constant 0 : i32
    %c0_i32_0 = arith.constant 0 : i32
    %c0_i32_1 = arith.constant 0 : i32
    return %c0_i32, %c0_i32_0 : i32, i32
  }
  func.func @transform_7(%arg0: i32) -> (i32, i32) {
    %c0_i32 = arith.constant 0 : i32
    %c0_i32_0 = arith.constant 0 : i32
    %c0_i32_1 = arith.constant 0 : i32
    return %c0_i32, %c0_i32_0 : i32, i32
  }
  func.func @transform_8(%arg0: i32) -> (i32, i32) {
    %c0_i32 = arith.constant 0 : i32
    %c0_i32_0 = arith.constant 0 : i32
    %c0_i32_1 = arith.constant 0 : i32
    return %c0_i32, %c0_i32_0 : i32, i32
  }
  func.func @transform_9(%arg0: i32) -> (i32, i32) {
    %c0_i32 = arith.constant 0 : i32
    %c0_i32_0 = arith.constant 0 : i32
    %c0_i32_1 = arith.constant 0 : i32
    return %c0_i32, %c0_i32_0 : i32, i32
  }
  func.func @transform_10(%arg0: i32) -> (i32, i32) {
    %c0_i32 = arith.constant 0 : i32
    %c0_i32_0 = arith.constant 0 : i32
    %c0_i32_1 = arith.constant 0 : i32
    return %c0_i32, %c0_i32_0 : i32, i32
  }
  func.func @transform_11(%arg0: i32) -> (i32, i32) {
    %c0_i32 = arith.constant 0 : i32
    %c0_i32_0 = arith.constant 0 : i32
    %c0_i32_1 = arith.constant 0 : i32
    return %c0_i32, %c0_i32_0 : i32, i32
  }
  func.func @transform_12(%arg0: i32) -> (i32, i32) {
    %c0_i32 = arith.constant 0 : i32
    %c0_i32_0 = arith.constant 0 : i32
    %c0_i32_1 = arith.constant 0 : i32
    return %c0_i32, %c0_i32_0 : i32, i32
  }
  func.func @transform_13(%arg0: i32) -> (i32, i32) {
    %c0_i32 = arith.constant 0 : i32
    %c0_i32_0 = arith.constant 0 : i32
    %c0_i32_1 = arith.constant 0 : i32
    return %c0_i32, %c0_i32_0 : i32, i32
  }
  func.func @transform_14(%arg0: i32) -> (i32, i32) {
    %c0_i32 = arith.constant 0 : i32
    %c0_i32_0 = arith.constant 0 : i32
    %c0_i32_1 = arith.constant 0 : i32
    return %c0_i32, %c0_i32_0 : i32, i32
  }
  func.func @transform_15(%arg0: i32) -> (i32, i32) {
    %c0_i32 = arith.constant 0 : i32
    %c0_i32_0 = arith.constant 0 : i32
    %c0_i32_1 = arith.constant 0 : i32
    return %c0_i32, %c0_i32_0 : i32, i32
  }
  func.func @transform_16(%arg0: i32) -> (i32, i32) {
    %c0_i32 = arith.constant 0 : i32
    %c0_i32_0 = arith.constant 0 : i32
    %c0_i32_1 = arith.constant 0 : i32
    return %c0_i32, %c0_i32_0 : i32, i32
  }
  func.func @transform_17(%arg0: i32) -> (i32, i32) {
    %c0_i32 = arith.constant 0 : i32
    %c0_i32_0 = arith.constant 0 : i32
    %c0_i32_1 = arith.constant 0 : i32
    return %c0_i32, %c0_i32_0 : i32, i32
  }
  func.func @transform_18(%arg0: i32) -> (i32, i32) {
    %c0_i32 = arith.constant 0 : i32
    %c0_i32_0 = arith.constant 0 : i32
    %c0_i32_1 = arith.constant 0 : i32
    return %c0_i32, %c0_i32_0 : i32, i32
  }
  func.func @transform_19(%arg0: i32) -> (i32, i32) {
    %c0_i32 = arith.constant 0 : i32
    %c0_i32_0 = arith.constant 0 : i32
    %c0_i32_1 = arith.constant 0 : i32
    return %c0_i32, %c0_i32_0 : i32, i32
  }
  func.func @transform_20(%arg0: i32) -> (i32, i32) {
    %c0_i32 = arith.constant 0 : i32
    %c0_i32_0 = arith.constant 0 : i32
    %c0_i32_1 = arith.constant 0 : i32
    return %c0_i32, %c0_i32_0 : i32, i32
  }
  func.func @transform_21(%arg0: i32) -> (i32, i32) {
    %c0_i32 = arith.constant 0 : i32
    %c0_i32_0 = arith.constant 0 : i32
    %c0_i32_1 = arith.constant 0 : i32
    return %c0_i32, %c0_i32_0 : i32, i32
  }
  func.func @transform_22(%arg0: i32) -> (i32, i32) {
    %c0_i32 = arith.constant 0 : i32
    %c0_i32_0 = arith.constant 0 : i32
    %c0_i32_1 = arith.constant 0 : i32
    return %c0_i32, %c0_i32_0 : i32, i32
  }
  func.func @transform_23(%arg0: i32) -> (i32, i32) {
    %c0_i32 = arith.constant 0 : i32
    %c0_i32_0 = arith.constant 0 : i32
    %c0_i32_1 = arith.constant 0 : i32
    return %c0_i32, %c0_i32_0 : i32, i32
  }
  func.func @transform_24(%arg0: i32) -> (i32, i32) {
    %c0_i32 = arith.constant 0 : i32
    %c0_i32_0 = arith.constant 0 : i32
    %c0_i32_1 = arith.constant 0 : i32
    return %c0_i32, %c0_i32_0 : i32, i32
  }
  func.func @transform_25(%arg0: i32) -> (i32, i32) {
    %c0_i32 = arith.constant 0 : i32
    %c0_i32_0 = arith.constant 0 : i32
    %c0_i32_1 = arith.constant 0 : i32
    return %c0_i32, %c0_i32_0 : i32, i32
  }
  func.func @transform_26(%arg0: i32) -> (i32, i32) {
    %c0_i32 = arith.constant 0 : i32
    %c0_i32_0 = arith.constant 0 : i32
    %c0_i32_1 = arith.constant 0 : i32
    return %c0_i32, %c0_i32_0 : i32, i32
  }
  func.func @transform_27(%arg0: i32) -> (i32, i32) {
    %c0_i32 = arith.constant 0 : i32
    %c0_i32_0 = arith.constant 0 : i32
    %c0_i32_1 = arith.constant 0 : i32
    return %c0_i32, %c0_i32_0 : i32, i32
  }
  func.func @transform_28(%arg0: i32) -> (i32, i32) {
    %c0_i32 = arith.constant 0 : i32
    %c0_i32_0 = arith.constant 0 : i32
    %c0_i32_1 = arith.constant 0 : i32
    return %c0_i32, %c0_i32_0 : i32, i32
  }
  func.func @transform_29(%arg0: i32) -> (i32, i32) {
    %c0_i32 = arith.constant 0 : i32
    %c0_i32_0 = arith.constant 0 : i32
    %c0_i32_1 = arith.constant 0 : i32
    return %c0_i32, %c0_i32_0 : i32, i32
  }
  func.func @transform_30(%arg0: i32) -> (i32, i32) {
    %c0_i32 = arith.constant 0 : i32
    %c0_i32_0 = arith.constant 0 : i32
    %c0_i32_1 = arith.constant 0 : i32
    return %c0_i32, %c0_i32_0 : i32, i32
  }
  func.func @transform_31(%arg0: i32) -> (i32, i32) {
    %c0_i32 = arith.constant 0 : i32
    %c0_i32_0 = arith.constant 0 : i32
    %c0_i32_1 = arith.constant 0 : i32
    return %c0_i32, %c0_i32_0 : i32, i32
  }
}

module attributes {stable_mosaic.version = 11 : i64} {
  func.func @_conv3x3_kernel(%arg0: i32, %arg1: memref<1x32x316xbf16, #tpu.memory_space<vmem>>, %arg2: memref<5x288xbf16, #tpu.memory_space<vmem>>, %arg3: memref<5x1xf32, #tpu.memory_space<vmem>>, %arg4: memref<1x5x282xf32, #tpu.memory_space<vmem>>) attributes {dimension_semantics = [#tpu.dimension_semantics<parallel>], iteration_bounds = array<i64: 2>, scalar_prefetch = 0 : i64, scratch_operands = 0 : i64, tpu.core_type = #tpu.core_type<tc>, window_params = [{transform_indices = @transform_0, window_bounds = array<i64: 1, 32, 316>}, {pipeline_mode = #tpu.pipeline_mode<synchronous>, transform_indices = @transform_1, window_bounds = array<i64: 5, 288>}, {pipeline_mode = #tpu.pipeline_mode<synchronous>, transform_indices = @transform_2, window_bounds = array<i64: 5, 1>}, {transform_indices = @transform_3, window_bounds = array<i64: 1, 5, 282>}]} {
    %c0 = arith.constant 0 : index
    %c0_0 = arith.constant 0 : index
    %c0_1 = arith.constant 0 : index
    %0 = vector.load %arg1[%c0, %c0_0, %c0_1] : memref<1x32x316xbf16, #tpu.memory_space<vmem>>, vector<1x32x316xbf16>
    %1 = vector.shape_cast %0 : vector<1x32x316xbf16> to vector<32x316xbf16>
    %2 = arith.extf %1 : vector<32x316xbf16> to vector<32x316xf32>
    %3 = vector.extract_strided_slice %2 {offsets = [0, 0], sizes = [32, 282], strides = [1, 1]} : vector<32x316xf32> to vector<32x282xf32>
    %4 = vector.extract_strided_slice %2 {offsets = [0, 1], sizes = [32, 282], strides = [1, 1]} : vector<32x316xf32> to vector<32x282xf32>
    %5 = vector.extract_strided_slice %2 {offsets = [0, 2], sizes = [32, 282], strides = [1, 1]} : vector<32x316xf32> to vector<32x282xf32>
    %6 = vector.extract_strided_slice %2 {offsets = [0, 16], sizes = [32, 282], strides = [1, 1]} : vector<32x316xf32> to vector<32x282xf32>
    %7 = vector.extract_strided_slice %2 {offsets = [0, 17], sizes = [32, 282], strides = [1, 1]} : vector<32x316xf32> to vector<32x282xf32>
    %8 = vector.extract_strided_slice %2 {offsets = [0, 18], sizes = [32, 282], strides = [1, 1]} : vector<32x316xf32> to vector<32x282xf32>
    %9 = vector.extract_strided_slice %2 {offsets = [0, 32], sizes = [32, 282], strides = [1, 1]} : vector<32x316xf32> to vector<32x282xf32>
    %10 = vector.extract_strided_slice %2 {offsets = [0, 33], sizes = [32, 282], strides = [1, 1]} : vector<32x316xf32> to vector<32x282xf32>
    %11 = vector.extract_strided_slice %2 {offsets = [0, 34], sizes = [32, 282], strides = [1, 1]} : vector<32x316xf32> to vector<32x282xf32>
    %12 = tpu.concatenate %3, %4, %5, %6, %7, %8, %9, %10, %11 in 0 : vector<32x282xf32>, vector<32x282xf32>, vector<32x282xf32>, vector<32x282xf32>, vector<32x282xf32>, vector<32x282xf32>, vector<32x282xf32>, vector<32x282xf32>, vector<32x282xf32> -> vector<288x282xf32>
    %13 = arith.truncf %12 : vector<288x282xf32> to vector<288x282xbf16>
    %c0_2 = arith.constant 0 : index
    %c0_3 = arith.constant 0 : index
    %14 = vector.load %arg2[%c0_2, %c0_3] : memref<5x288xbf16, #tpu.memory_space<vmem>>, vector<5x288xbf16>
    %cst = arith.constant dense<0.000000e+00> : vector<5x282xf32>
    %15 = tpu.matmul %14, %13, %cst {dimension_numbers = #tpu.dot_dimension_numbers<[1], [0], [0], [1], [0, 0, 1, 1], [], []>} : vector<5x288xbf16>, vector<288x282xbf16>, vector<5x282xf32> -> vector<5x282xf32>
    %c0_4 = arith.constant 0 : index
    %c0_5 = arith.constant 0 : index
    %16 = vector.load %arg3[%c0_4, %c0_5] : memref<5x1xf32, #tpu.memory_space<vmem>>, vector<5x1xf32>
    %17 = vector.broadcast %16 : vector<5x1xf32> to vector<5x282xf32>
    %18 = arith.addf %15, %17 : vector<5x282xf32>
    %cst_6 = arith.constant 0.000000e+00 : f32
    %19 = vector.broadcast %cst_6 : f32 to vector<5x282xf32>
    %20 = arith.cmpf oge, %18, %19 : vector<5x282xf32>
    %cst_7 = arith.constant 3.000000e-01 : f32
    %21 = vector.broadcast %cst_7 : f32 to vector<5x282xf32>
    %22 = arith.mulf %21, %18 : vector<5x282xf32>
    %23 = arith.select %20, %18, %22 : vector<5x282xi1>, vector<5x282xf32>
    %c0_8 = arith.constant 0 : index
    %c0_9 = arith.constant 0 : index
    %c0_10 = arith.constant 0 : index
    %24 = vector.load %arg4[%c0_8, %c0_9, %c0_10] : memref<1x5x282xf32, #tpu.memory_space<vmem>>, vector<1x5x282xf32>
    %25 = vector.shape_cast %24 : vector<1x5x282xf32> to vector<5x282xf32>
    %26 = vector.shape_cast %23 : vector<5x282xf32> to vector<1x5x282xf32>
    tpu.vector_store %arg4[%c0_8, %c0_9, %c0_10], %26 {strides = array<i32>} : memref<1x5x282xf32, #tpu.memory_space<vmem>>, vector<1x5x282xf32>,
    return
  }
  func.func @transform_0(%arg0: i32) -> (i32, i32, i32) {
    %c0_i32 = arith.constant 0 : i32
    %c0_i32_0 = arith.constant 0 : i32
    %c0_i32_1 = arith.constant 0 : i32
    return %arg0, %c0_i32, %c0_i32_0 : i32, i32, i32
  }
  func.func @transform_1(%arg0: i32) -> (i32, i32) {
    %c0_i32 = arith.constant 0 : i32
    %c0_i32_0 = arith.constant 0 : i32
    %c0_i32_1 = arith.constant 0 : i32
    return %c0_i32, %c0_i32_0 : i32, i32
  }
  func.func @transform_2(%arg0: i32) -> (i32, i32) {
    %c0_i32 = arith.constant 0 : i32
    %c0_i32_0 = arith.constant 0 : i32
    %c0_i32_1 = arith.constant 0 : i32
    return %c0_i32, %c0_i32_0 : i32, i32
  }
  func.func @transform_3(%arg0: i32) -> (i32, i32, i32) {
    %c0_i32 = arith.constant 0 : i32
    %c0_i32_0 = arith.constant 0 : i32
    %c0_i32_1 = arith.constant 0 : i32
    return %arg0, %c0_i32, %c0_i32_0 : i32, i32, i32
  }
}

module attributes {stable_mosaic.version = 11 : i64} {
  func.func @_issm_kernel(%arg0: i32, %arg1: memref<1x5x282xf32, #tpu.memory_space<vmem>>, %arg2: memref<1x5x1xf32, #tpu.memory_space<vmem>>, %arg3: memref<1x5x1xf32, #tpu.memory_space<vmem>>, %arg4: memref<1x5x282xf32, #tpu.memory_space<vmem>>) attributes {dimension_semantics = [#tpu.dimension_semantics<parallel>], iteration_bounds = array<i64: 2>, scalar_prefetch = 0 : i64, scratch_operands = 0 : i64, tpu.core_type = #tpu.core_type<tc>, window_params = [{transform_indices = @transform_0, window_bounds = array<i64: 1, 5, 282>}, {transform_indices = @transform_1, window_bounds = array<i64: 1, 5, 1>}, {transform_indices = @transform_2, window_bounds = array<i64: 1, 5, 1>}, {transform_indices = @transform_3, window_bounds = array<i64: 1, 5, 282>}]} {
    %c0 = arith.constant 0 : index
    %c0_0 = arith.constant 0 : index
    %c0_1 = arith.constant 0 : index
    %0 = vector.load %arg1[%c0, %c0_0, %c0_1] : memref<1x5x282xf32, #tpu.memory_space<vmem>>, vector<1x5x282xf32>
    %1 = vector.shape_cast %0 : vector<1x5x282xf32> to vector<5x282xf32>
    %2 = tpu.iota {dimensions = array<i32: 1>} : vector<5x282xi32>
    %3 = arith.sitofp %2 : vector<5x282xi32> to vector<5x282xf32>
    %cst = arith.constant 5.000000e-01 : f32
    %4 = vector.broadcast %cst : f32 to vector<5x282xf32>
    %5 = arith.addf %3, %4 : vector<5x282xf32>
    %cst_2 = arith.constant 6.250000e-02 : f32
    %6 = vector.broadcast %cst_2 : f32 to vector<5x282xf32>
    %7 = arith.mulf %5, %6 : vector<5x282xf32>
    %8 = math.floor %7 : vector<5x282xf32>
    %cst_3 = arith.constant 1.600000e+01 : f32
    %9 = vector.broadcast %cst_3 : f32 to vector<5x282xf32>
    %10 = arith.mulf %8, %9 : vector<5x282xf32>
    %11 = arith.subf %3, %10 : vector<5x282xf32>
    %cst_4 = arith.constant 0.222222224 : f32
    %12 = vector.broadcast %cst_4 : f32 to vector<5x282xf32>
    %13 = arith.mulf %11, %12 : vector<5x282xf32>
    %cst_5 = arith.constant 1.000000e+00 : f32
    %14 = vector.broadcast %cst_5 : f32 to vector<5x282xf32>
    %15 = arith.subf %13, %14 : vector<5x282xf32>
    %cst_6 = arith.constant 0.222222224 : f32
    %16 = vector.broadcast %cst_6 : f32 to vector<5x282xf32>
    %17 = arith.mulf %8, %16 : vector<5x282xf32>
    %cst_7 = arith.constant 1.000000e+00 : f32
    %18 = vector.broadcast %cst_7 : f32 to vector<5x282xf32>
    %19 = arith.subf %17, %18 : vector<5x282xf32>
    %c0_8 = arith.constant 0 : index
    %c0_9 = arith.constant 0 : index
    %c0_10 = arith.constant 0 : index
    %20 = vector.load %arg2[%c0_8, %c0_9, %c0_10] : memref<1x5x1xf32, #tpu.memory_space<vmem>>, vector<1x5x1xf32>
    %21 = vector.shape_cast %20 : vector<1x5x1xf32> to vector<5x1xf32>
    %22 = vector.broadcast %21 : vector<5x1xf32> to vector<5x282xf32>
    %23 = arith.subf %15, %22 : vector<5x282xf32>
    %24 = arith.mulf %23, %23 : vector<5x282xf32>
    %c0_11 = arith.constant 0 : index
    %c0_12 = arith.constant 0 : index
    %c0_13 = arith.constant 0 : index
    %25 = vector.load %arg3[%c0_11, %c0_12, %c0_13] : memref<1x5x1xf32, #tpu.memory_space<vmem>>, vector<1x5x1xf32>
    %26 = vector.shape_cast %25 : vector<1x5x1xf32> to vector<5x1xf32>
    %27 = vector.broadcast %26 : vector<5x1xf32> to vector<5x282xf32>
    %28 = arith.subf %19, %27 : vector<5x282xf32>
    %29 = arith.mulf %28, %28 : vector<5x282xf32>
    %30 = arith.addf %24, %29 : vector<5x282xf32>
    %cst_14 = arith.constant 0.000000e+00 : f32
    %31 = vector.broadcast %cst_14 : f32 to vector<5x282xf32>
    %32 = arith.subf %31, %30 : vector<5x282xf32>
    %cst_15 = arith.constant 1.000000e+01 : f32
    %33 = vector.broadcast %cst_15 : f32 to vector<5x282xf32>
    %34 = arith.mulf %32, %33 : vector<5x282xf32>
    %35 = math.exp %34 : vector<5x282xf32>
    %36 = arith.mulf %35, %1 : vector<5x282xf32>
    %c0_16 = arith.constant 0 : index
    %c0_17 = arith.constant 0 : index
    %c0_18 = arith.constant 0 : index
    %37 = vector.load %arg4[%c0_16, %c0_17, %c0_18] : memref<1x5x282xf32, #tpu.memory_space<vmem>>, vector<1x5x282xf32>
    %38 = vector.shape_cast %37 : vector<1x5x282xf32> to vector<5x282xf32>
    %39 = vector.shape_cast %36 : vector<5x282xf32> to vector<1x5x282xf32>
    tpu.vector_store %arg4[%c0_16, %c0_17, %c0_18], %39 {strides = array<i32>} : memref<1x5x282xf32, #tpu.memory_space<vmem>>, vector<1x5x282xf32>,
    return
  }
  func.func @transform_0(%arg0: i32) -> (i32, i32, i32) {
    %c0_i32 = arith.constant 0 : i32
    %c0_i32_0 = arith.constant 0 : i32
    %c0_i32_1 = arith.constant 0 : i32
    return %arg0, %c0_i32, %c0_i32_0 : i32, i32, i32
  }
  func.func @transform_1(%arg0: i32) -> (i32, i32, i32) {
    %c0_i32 = arith.constant 0 : i32
    %c0_i32_0 = arith.constant 0 : i32
    %c0_i32_1 = arith.constant 0 : i32
    return %arg0, %c0_i32, %c0_i32_0 : i32, i32, i32
  }
  func.func @transform_2(%arg0: i32) -> (i32, i32, i32) {
    %c0_i32 = arith.constant 0 : i32
    %c0_i32_0 = arith.constant 0 : i32
    %c0_i32_1 = arith.constant 0 : i32
    return %arg0, %c0_i32, %c0_i32_0 : i32, i32, i32
  }
  func.func @transform_3(%arg0: i32) -> (i32, i32, i32) {
    %c0_i32 = arith.constant 0 : i32
    %c0_i32_0 = arith.constant 0 : i32
    %c0_i32_1 = arith.constant 0 : i32
    return %arg0, %c0_i32, %c0_i32_0 : i32, i32, i32
  }
}

module attributes {stable_mosaic.version = 11 : i64} {
  func.func @_conv3x3_kernel(%arg0: i32, %arg1: memref<1x16x350xbf16, #tpu.memory_space<vmem>>, %arg2: memref<32x144xbf16, #tpu.memory_space<vmem>>, %arg3: memref<32x1xf32, #tpu.memory_space<vmem>>, %arg4: memref<1x32x316xbf16, #tpu.memory_space<vmem>>) attributes {dimension_semantics = [#tpu.dimension_semantics<parallel>], iteration_bounds = array<i64: 2>, scalar_prefetch = 0 : i64, scratch_operands = 0 : i64, tpu.core_type = #tpu.core_type<tc>, window_params = [{transform_indices = @transform_0, window_bounds = array<i64: 1, 16, 350>}, {pipeline_mode = #tpu.pipeline_mode<synchronous>, transform_indices = @transform_1, window_bounds = array<i64: 32, 144>}, {pipeline_mode = #tpu.pipeline_mode<synchronous>, transform_indices = @transform_2, window_bounds = array<i64: 32, 1>}, {transform_indices = @transform_3, window_bounds = array<i64: 1, 32, 316>}]} {
    %c0 = arith.constant 0 : index
    %c0_0 = arith.constant 0 : index
    %c0_1 = arith.constant 0 : index
    %0 = vector.load %arg1[%c0, %c0_0, %c0_1] : memref<1x16x350xbf16, #tpu.memory_space<vmem>>, vector<1x16x350xbf16>
    %1 = vector.shape_cast %0 : vector<1x16x350xbf16> to vector<16x350xbf16>
    %2 = arith.extf %1 : vector<16x350xbf16> to vector<16x350xf32>
    %3 = vector.extract_strided_slice %2 {offsets = [0, 0], sizes = [16, 316], strides = [1, 1]} : vector<16x350xf32> to vector<16x316xf32>
    %4 = vector.extract_strided_slice %2 {offsets = [0, 1], sizes = [16, 316], strides = [1, 1]} : vector<16x350xf32> to vector<16x316xf32>
    %5 = vector.extract_strided_slice %2 {offsets = [0, 2], sizes = [16, 316], strides = [1, 1]} : vector<16x350xf32> to vector<16x316xf32>
    %6 = vector.extract_strided_slice %2 {offsets = [0, 16], sizes = [16, 316], strides = [1, 1]} : vector<16x350xf32> to vector<16x316xf32>
    %7 = vector.extract_strided_slice %2 {offsets = [0, 17], sizes = [16, 316], strides = [1, 1]} : vector<16x350xf32> to vector<16x316xf32>
    %8 = vector.extract_strided_slice %2 {offsets = [0, 18], sizes = [16, 316], strides = [1, 1]} : vector<16x350xf32> to vector<16x316xf32>
    %9 = vector.extract_strided_slice %2 {offsets = [0, 32], sizes = [16, 316], strides = [1, 1]} : vector<16x350xf32> to vector<16x316xf32>
    %10 = vector.extract_strided_slice %2 {offsets = [0, 33], sizes = [16, 316], strides = [1, 1]} : vector<16x350xf32> to vector<16x316xf32>
    %11 = vector.extract_strided_slice %2 {offsets = [0, 34], sizes = [16, 316], strides = [1, 1]} : vector<16x350xf32> to vector<16x316xf32>
    %12 = tpu.concatenate %3, %4, %5, %6, %7, %8, %9, %10, %11 in 0 : vector<16x316xf32>, vector<16x316xf32>, vector<16x316xf32>, vector<16x316xf32>, vector<16x316xf32>, vector<16x316xf32>, vector<16x316xf32>, vector<16x316xf32>, vector<16x316xf32> -> vector<144x316xf32>
    %13 = arith.truncf %12 : vector<144x316xf32> to vector<144x316xbf16>
    %c0_2 = arith.constant 0 : index
    %c0_3 = arith.constant 0 : index
    %14 = vector.load %arg2[%c0_2, %c0_3] : memref<32x144xbf16, #tpu.memory_space<vmem>>, vector<32x144xbf16>
    %cst = arith.constant dense<0.000000e+00> : vector<32x316xf32>
    %15 = tpu.matmul %14, %13, %cst {dimension_numbers = #tpu.dot_dimension_numbers<[1], [0], [0], [1], [0, 0, 1, 1], [], []>} : vector<32x144xbf16>, vector<144x316xbf16>, vector<32x316xf32> -> vector<32x316xf32>
    %c0_4 = arith.constant 0 : index
    %c0_5 = arith.constant 0 : index
    %16 = vector.load %arg3[%c0_4, %c0_5] : memref<32x1xf32, #tpu.memory_space<vmem>>, vector<32x1xf32>
    %17 = vector.broadcast %16 : vector<32x1xf32> to vector<32x316xf32>
    %18 = arith.addf %15, %17 : vector<32x316xf32>
    %cst_6 = arith.constant 0.000000e+00 : f32
    %19 = vector.broadcast %cst_6 : f32 to vector<32x316xf32>
    %20 = arith.cmpf oge, %18, %19 : vector<32x316xf32>
    %cst_7 = arith.constant 3.000000e-01 : f32
    %21 = vector.broadcast %cst_7 : f32 to vector<32x316xf32>
    %22 = arith.mulf %21, %18 : vector<32x316xf32>
    %23 = arith.select %20, %18, %22 : vector<32x316xi1>, vector<32x316xf32>
    %24 = arith.truncf %23 : vector<32x316xf32> to vector<32x316xbf16>
    %c0_8 = arith.constant 0 : index
    %c0_9 = arith.constant 0 : index
    %c0_10 = arith.constant 0 : index
    %25 = vector.load %arg4[%c0_8, %c0_9, %c0_10] : memref<1x32x316xbf16, #tpu.memory_space<vmem>>, vector<1x32x316xbf16>
    %26 = vector.shape_cast %25 : vector<1x32x316xbf16> to vector<32x316xbf16>
    %27 = vector.shape_cast %24 : vector<32x316xbf16> to vector<1x32x316xbf16>
    tpu.vector_store %arg4[%c0_8, %c0_9, %c0_10], %27 {strides = array<i32>} : memref<1x32x316xbf16, #tpu.memory_space<vmem>>, vector<1x32x316xbf16>,
    return
  }
  func.func @transform_0(%arg0: i32) -> (i32, i32, i32) {
    %c0_i32 = arith.constant 0 : i32
    %c0_i32_0 = arith.constant 0 : i32
    %c0_i32_1 = arith.constant 0 : i32
    return %arg0, %c0_i32, %c0_i32_0 : i32, i32, i32
  }
  func.func @transform_1(%arg0: i32) -> (i32, i32) {
    %c0_i32 = arith.constant 0 : i32
    %c0_i32_0 = arith.constant 0 : i32
    %c0_i32_1 = arith.constant 0 : i32
    return %c0_i32, %c0_i32_0 : i32, i32
  }
  func.func @transform_2(%arg0: i32) -> (i32, i32) {
    %c0_i32 = arith.constant 0 : i32
    %c0_i32_0 = arith.constant 0 : i32
    %c0_i32_1 = arith.constant 0 : i32
    return %c0_i32, %c0_i32_0 : i32, i32
  }
  func.func @transform_3(%arg0: i32) -> (i32, i32, i32) {
    %c0_i32 = arith.constant 0 : i32
    %c0_i32_0 = arith.constant 0 : i32
    %c0_i32_1 = arith.constant 0 : i32
    return %arg0, %c0_i32, %c0_i32_0 : i32, i32, i32
  }
}

module attributes {stable_mosaic.version = 11 : i64} {
  func.func @_conv3x3_kernel(%arg0: i32, %arg1: memref<1x8x324xbf16, #tpu.memory_space<vmem>>, %arg2: memref<32x72xbf16, #tpu.memory_space<vmem>>, %arg3: memref<32x1xf32, #tpu.memory_space<vmem>>, %arg4: memref<1x32x294xbf16, #tpu.memory_space<vmem>>) attributes {dimension_semantics = [#tpu.dimension_semantics<parallel>], iteration_bounds = array<i64: 2>, scalar_prefetch = 0 : i64, scratch_operands = 0 : i64, tpu.core_type = #tpu.core_type<tc>, window_params = [{transform_indices = @transform_0, window_bounds = array<i64: 1, 8, 324>}, {pipeline_mode = #tpu.pipeline_mode<synchronous>, transform_indices = @transform_1, window_bounds = array<i64: 32, 72>}, {pipeline_mode = #tpu.pipeline_mode<synchronous>, transform_indices = @transform_2, window_bounds = array<i64: 32, 1>}, {transform_indices = @transform_3, window_bounds = array<i64: 1, 32, 294>}]} {
    %c0 = arith.constant 0 : index
    %c0_0 = arith.constant 0 : index
    %c0_1 = arith.constant 0 : index
    %0 = vector.load %arg1[%c0, %c0_0, %c0_1] : memref<1x8x324xbf16, #tpu.memory_space<vmem>>, vector<1x8x324xbf16>
    %1 = vector.shape_cast %0 : vector<1x8x324xbf16> to vector<8x324xbf16>
    %2 = arith.extf %1 : vector<8x324xbf16> to vector<8x324xf32>
    %3 = vector.extract_strided_slice %2 {offsets = [0, 0], sizes = [8, 294], strides = [1, 1]} : vector<8x324xf32> to vector<8x294xf32>
    %4 = vector.extract_strided_slice %2 {offsets = [0, 1], sizes = [8, 294], strides = [1, 1]} : vector<8x324xf32> to vector<8x294xf32>
    %5 = vector.extract_strided_slice %2 {offsets = [0, 2], sizes = [8, 294], strides = [1, 1]} : vector<8x324xf32> to vector<8x294xf32>
    %6 = vector.extract_strided_slice %2 {offsets = [0, 14], sizes = [8, 294], strides = [1, 1]} : vector<8x324xf32> to vector<8x294xf32>
    %7 = vector.extract_strided_slice %2 {offsets = [0, 15], sizes = [8, 294], strides = [1, 1]} : vector<8x324xf32> to vector<8x294xf32>
    %8 = vector.extract_strided_slice %2 {offsets = [0, 16], sizes = [8, 294], strides = [1, 1]} : vector<8x324xf32> to vector<8x294xf32>
    %9 = vector.extract_strided_slice %2 {offsets = [0, 28], sizes = [8, 294], strides = [1, 1]} : vector<8x324xf32> to vector<8x294xf32>
    %10 = vector.extract_strided_slice %2 {offsets = [0, 29], sizes = [8, 294], strides = [1, 1]} : vector<8x324xf32> to vector<8x294xf32>
    %11 = vector.extract_strided_slice %2 {offsets = [0, 30], sizes = [8, 294], strides = [1, 1]} : vector<8x324xf32> to vector<8x294xf32>
    %12 = tpu.concatenate %3, %4, %5, %6, %7, %8, %9, %10, %11 in 0 : vector<8x294xf32>, vector<8x294xf32>, vector<8x294xf32>, vector<8x294xf32>, vector<8x294xf32>, vector<8x294xf32>, vector<8x294xf32>, vector<8x294xf32>, vector<8x294xf32> -> vector<72x294xf32>
    %13 = arith.truncf %12 : vector<72x294xf32> to vector<72x294xbf16>
    %c0_2 = arith.constant 0 : index
    %c0_3 = arith.constant 0 : index
    %14 = vector.load %arg2[%c0_2, %c0_3] : memref<32x72xbf16, #tpu.memory_space<vmem>>, vector<32x72xbf16>
    %cst = arith.constant dense<0.000000e+00> : vector<32x294xf32>
    %15 = tpu.matmul %14, %13, %cst {dimension_numbers = #tpu.dot_dimension_numbers<[1], [0], [0], [1], [0, 0, 1, 1], [], []>} : vector<32x72xbf16>, vector<72x294xbf16>, vector<32x294xf32> -> vector<32x294xf32>
    %c0_4 = arith.constant 0 : index
    %c0_5 = arith.constant 0 : index
    %16 = vector.load %arg3[%c0_4, %c0_5] : memref<32x1xf32, #tpu.memory_space<vmem>>, vector<32x1xf32>
    %17 = vector.broadcast %16 : vector<32x1xf32> to vector<32x294xf32>
    %18 = arith.addf %15, %17 : vector<32x294xf32>
    %cst_6 = arith.constant 0.000000e+00 : f32
    %19 = vector.broadcast %cst_6 : f32 to vector<32x294xf32>
    %20 = arith.cmpf oge, %18, %19 : vector<32x294xf32>
    %cst_7 = arith.constant 3.000000e-01 : f32
    %21 = vector.broadcast %cst_7 : f32 to vector<32x294xf32>
    %22 = arith.mulf %21, %18 : vector<32x294xf32>
    %23 = arith.select %20, %18, %22 : vector<32x294xi1>, vector<32x294xf32>
    %24 = arith.truncf %23 : vector<32x294xf32> to vector<32x294xbf16>
    %c0_8 = arith.constant 0 : index
    %c0_9 = arith.constant 0 : index
    %c0_10 = arith.constant 0 : index
    %25 = vector.load %arg4[%c0_8, %c0_9, %c0_10] : memref<1x32x294xbf16, #tpu.memory_space<vmem>>, vector<1x32x294xbf16>
    %26 = vector.shape_cast %25 : vector<1x32x294xbf16> to vector<32x294xbf16>
    %27 = vector.shape_cast %24 : vector<32x294xbf16> to vector<1x32x294xbf16>
    tpu.vector_store %arg4[%c0_8, %c0_9, %c0_10], %27 {strides = array<i32>} : memref<1x32x294xbf16, #tpu.memory_space<vmem>>, vector<1x32x294xbf16>,
    return
  }
  func.func @transform_0(%arg0: i32) -> (i32, i32, i32) {
    %c0_i32 = arith.constant 0 : i32
    %c0_i32_0 = arith.constant 0 : i32
    %c0_i32_1 = arith.constant 0 : i32
    return %arg0, %c0_i32, %c0_i32_0 : i32, i32, i32
  }
  func.func @transform_1(%arg0: i32) -> (i32, i32) {
    %c0_i32 = arith.constant 0 : i32
    %c0_i32_0 = arith.constant 0 : i32
    %c0_i32_1 = arith.constant 0 : i32
    return %c0_i32, %c0_i32_0 : i32, i32
  }
  func.func @transform_2(%arg0: i32) -> (i32, i32) {
    %c0_i32 = arith.constant 0 : i32
    %c0_i32_0 = arith.constant 0 : i32
    %c0_i32_1 = arith.constant 0 : i32
    return %c0_i32, %c0_i32_0 : i32, i32
  }
  func.func @transform_3(%arg0: i32) -> (i32, i32, i32) {
    %c0_i32 = arith.constant 0 : i32
    %c0_i32_0 = arith.constant 0 : i32
    %c0_i32_1 = arith.constant 0 : i32
    return %arg0, %c0_i32, %c0_i32_0 : i32, i32, i32
  }
}

module attributes {stable_mosaic.version = 11 : i64} {
  func.func @_conv3x3_kernel(%arg0: i32, %arg1: memref<1x32x384xbf16, #tpu.memory_space<vmem>>, %arg2: memref<16x288xbf16, #tpu.memory_space<vmem>>, %arg3: memref<16x1xf32, #tpu.memory_space<vmem>>, %arg4: memref<1x16x350xbf16, #tpu.memory_space<vmem>>) attributes {dimension_semantics = [#tpu.dimension_semantics<parallel>], iteration_bounds = array<i64: 2>, scalar_prefetch = 0 : i64, scratch_operands = 0 : i64, tpu.core_type = #tpu.core_type<tc>, window_params = [{transform_indices = @transform_0, window_bounds = array<i64: 1, 32, 384>}, {pipeline_mode = #tpu.pipeline_mode<synchronous>, transform_indices = @transform_1, window_bounds = array<i64: 16, 288>}, {pipeline_mode = #tpu.pipeline_mode<synchronous>, transform_indices = @transform_2, window_bounds = array<i64: 16, 1>}, {transform_indices = @transform_3, window_bounds = array<i64: 1, 16, 350>}]} {
    %c0 = arith.constant 0 : index
    %c0_0 = arith.constant 0 : index
    %c0_1 = arith.constant 0 : index
    %0 = vector.load %arg1[%c0, %c0_0, %c0_1] : memref<1x32x384xbf16, #tpu.memory_space<vmem>>, vector<1x32x384xbf16>
    %1 = vector.shape_cast %0 : vector<1x32x384xbf16> to vector<32x384xbf16>
    %2 = arith.extf %1 : vector<32x384xbf16> to vector<32x384xf32>
    %3 = vector.extract_strided_slice %2 {offsets = [0, 0], sizes = [32, 350], strides = [1, 1]} : vector<32x384xf32> to vector<32x350xf32>
    %4 = vector.extract_strided_slice %2 {offsets = [0, 1], sizes = [32, 350], strides = [1, 1]} : vector<32x384xf32> to vector<32x350xf32>
    %5 = vector.extract_strided_slice %2 {offsets = [0, 2], sizes = [32, 350], strides = [1, 1]} : vector<32x384xf32> to vector<32x350xf32>
    %6 = vector.extract_strided_slice %2 {offsets = [0, 16], sizes = [32, 350], strides = [1, 1]} : vector<32x384xf32> to vector<32x350xf32>
    %7 = vector.extract_strided_slice %2 {offsets = [0, 17], sizes = [32, 350], strides = [1, 1]} : vector<32x384xf32> to vector<32x350xf32>
    %8 = vector.extract_strided_slice %2 {offsets = [0, 18], sizes = [32, 350], strides = [1, 1]} : vector<32x384xf32> to vector<32x350xf32>
    %9 = vector.extract_strided_slice %2 {offsets = [0, 32], sizes = [32, 350], strides = [1, 1]} : vector<32x384xf32> to vector<32x350xf32>
    %10 = vector.extract_strided_slice %2 {offsets = [0, 33], sizes = [32, 350], strides = [1, 1]} : vector<32x384xf32> to vector<32x350xf32>
    %11 = vector.extract_strided_slice %2 {offsets = [0, 34], sizes = [32, 350], strides = [1, 1]} : vector<32x384xf32> to vector<32x350xf32>
    %12 = tpu.concatenate %3, %4, %5, %6, %7, %8, %9, %10, %11 in 0 : vector<32x350xf32>, vector<32x350xf32>, vector<32x350xf32>, vector<32x350xf32>, vector<32x350xf32>, vector<32x350xf32>, vector<32x350xf32>, vector<32x350xf32>, vector<32x350xf32> -> vector<288x350xf32>
    %13 = arith.truncf %12 : vector<288x350xf32> to vector<288x350xbf16>
    %c0_2 = arith.constant 0 : index
    %c0_3 = arith.constant 0 : index
    %14 = vector.load %arg2[%c0_2, %c0_3] : memref<16x288xbf16, #tpu.memory_space<vmem>>, vector<16x288xbf16>
    %cst = arith.constant dense<0.000000e+00> : vector<16x350xf32>
    %15 = tpu.matmul %14, %13, %cst {dimension_numbers = #tpu.dot_dimension_numbers<[1], [0], [0], [1], [0, 0, 1, 1], [], []>} : vector<16x288xbf16>, vector<288x350xbf16>, vector<16x350xf32> -> vector<16x350xf32>
    %c0_4 = arith.constant 0 : index
    %c0_5 = arith.constant 0 : index
    %16 = vector.load %arg3[%c0_4, %c0_5] : memref<16x1xf32, #tpu.memory_space<vmem>>, vector<16x1xf32>
    %17 = vector.broadcast %16 : vector<16x1xf32> to vector<16x350xf32>
    %18 = arith.addf %15, %17 : vector<16x350xf32>
    %cst_6 = arith.constant 0.000000e+00 : f32
    %19 = vector.broadcast %cst_6 : f32 to vector<16x350xf32>
    %20 = arith.cmpf oge, %18, %19 : vector<16x350xf32>
    %cst_7 = arith.constant 3.000000e-01 : f32
    %21 = vector.broadcast %cst_7 : f32 to vector<16x350xf32>
    %22 = arith.mulf %21, %18 : vector<16x350xf32>
    %23 = arith.select %20, %18, %22 : vector<16x350xi1>, vector<16x350xf32>
    %24 = arith.truncf %23 : vector<16x350xf32> to vector<16x350xbf16>
    %c0_8 = arith.constant 0 : index
    %c0_9 = arith.constant 0 : index
    %c0_10 = arith.constant 0 : index
    %25 = vector.load %arg4[%c0_8, %c0_9, %c0_10] : memref<1x16x350xbf16, #tpu.memory_space<vmem>>, vector<1x16x350xbf16>
    %26 = vector.shape_cast %25 : vector<1x16x350xbf16> to vector<16x350xbf16>
    %27 = vector.shape_cast %24 : vector<16x350xbf16> to vector<1x16x350xbf16>
    tpu.vector_store %arg4[%c0_8, %c0_9, %c0_10], %27 {strides = array<i32>} : memref<1x16x350xbf16, #tpu.memory_space<vmem>>, vector<1x16x350xbf16>,
    return
  }
  func.func @transform_0(%arg0: i32) -> (i32, i32, i32) {
    %c0_i32 = arith.constant 0 : i32
    %c0_i32_0 = arith.constant 0 : i32
    %c0_i32_1 = arith.constant 0 : i32
    return %arg0, %c0_i32, %c0_i32_0 : i32, i32, i32
  }
  func.func @transform_1(%arg0: i32) -> (i32, i32) {
    %c0_i32 = arith.constant 0 : i32
    %c0_i32_0 = arith.constant 0 : i32
    %c0_i32_1 = arith.constant 0 : i32
    return %c0_i32, %c0_i32_0 : i32, i32
  }
  func.func @transform_2(%arg0: i32) -> (i32, i32) {
    %c0_i32 = arith.constant 0 : i32
    %c0_i32_0 = arith.constant 0 : i32
    %c0_i32_1 = arith.constant 0 : i32
    return %c0_i32, %c0_i32_0 : i32, i32
  }
  func.func @transform_3(%arg0: i32) -> (i32, i32, i32) {
    %c0_i32 = arith.constant 0 : i32
    %c0_i32_0 = arith.constant 0 : i32
    %c0_i32_1 = arith.constant 0 : i32
    return %arg0, %c0_i32, %c0_i32_0 : i32, i32, i32
  }
}

module attributes {stable_mosaic.version = 11 : i64} {
  func.func @_conv3x3_kernel(%arg0: i32, %arg1: memref<1x16x452xbf16, #tpu.memory_space<vmem>>, %arg2: memref<3x144xbf16, #tpu.memory_space<vmem>>, %arg3: memref<3x1xf32, #tpu.memory_space<vmem>>, %arg4: memref<1x3x414xf32, #tpu.memory_space<vmem>>) attributes {dimension_semantics = [#tpu.dimension_semantics<parallel>], iteration_bounds = array<i64: 2>, scalar_prefetch = 0 : i64, scratch_operands = 0 : i64, tpu.core_type = #tpu.core_type<tc>, window_params = [{transform_indices = @transform_0, window_bounds = array<i64: 1, 16, 452>}, {pipeline_mode = #tpu.pipeline_mode<synchronous>, transform_indices = @transform_1, window_bounds = array<i64: 3, 144>}, {pipeline_mode = #tpu.pipeline_mode<synchronous>, transform_indices = @transform_2, window_bounds = array<i64: 3, 1>}, {transform_indices = @transform_3, window_bounds = array<i64: 1, 3, 414>}]} {
    %c0 = arith.constant 0 : index
    %c0_0 = arith.constant 0 : index
    %c0_1 = arith.constant 0 : index
    %0 = vector.load %arg1[%c0, %c0_0, %c0_1] : memref<1x16x452xbf16, #tpu.memory_space<vmem>>, vector<1x16x452xbf16>
    %1 = vector.shape_cast %0 : vector<1x16x452xbf16> to vector<16x452xbf16>
    %2 = arith.extf %1 : vector<16x452xbf16> to vector<16x452xf32>
    %3 = vector.extract_strided_slice %2 {offsets = [0, 0], sizes = [16, 414], strides = [1, 1]} : vector<16x452xf32> to vector<16x414xf32>
    %4 = vector.extract_strided_slice %2 {offsets = [0, 1], sizes = [16, 414], strides = [1, 1]} : vector<16x452xf32> to vector<16x414xf32>
    %5 = vector.extract_strided_slice %2 {offsets = [0, 2], sizes = [16, 414], strides = [1, 1]} : vector<16x452xf32> to vector<16x414xf32>
    %6 = vector.extract_strided_slice %2 {offsets = [0, 18], sizes = [16, 414], strides = [1, 1]} : vector<16x452xf32> to vector<16x414xf32>
    %7 = vector.extract_strided_slice %2 {offsets = [0, 19], sizes = [16, 414], strides = [1, 1]} : vector<16x452xf32> to vector<16x414xf32>
    %8 = vector.extract_strided_slice %2 {offsets = [0, 20], sizes = [16, 414], strides = [1, 1]} : vector<16x452xf32> to vector<16x414xf32>
    %9 = vector.extract_strided_slice %2 {offsets = [0, 36], sizes = [16, 414], strides = [1, 1]} : vector<16x452xf32> to vector<16x414xf32>
    %10 = vector.extract_strided_slice %2 {offsets = [0, 37], sizes = [16, 414], strides = [1, 1]} : vector<16x452xf32> to vector<16x414xf32>
    %11 = vector.extract_strided_slice %2 {offsets = [0, 38], sizes = [16, 414], strides = [1, 1]} : vector<16x452xf32> to vector<16x414xf32>
    %12 = tpu.concatenate %3, %4, %5, %6, %7, %8, %9, %10, %11 in 0 : vector<16x414xf32>, vector<16x414xf32>, vector<16x414xf32>, vector<16x414xf32>, vector<16x414xf32>, vector<16x414xf32>, vector<16x414xf32>, vector<16x414xf32>, vector<16x414xf32> -> vector<144x414xf32>
    %13 = arith.truncf %12 : vector<144x414xf32> to vector<144x414xbf16>
    %c0_2 = arith.constant 0 : index
    %c0_3 = arith.constant 0 : index
    %14 = vector.load %arg2[%c0_2, %c0_3] : memref<3x144xbf16, #tpu.memory_space<vmem>>, vector<3x144xbf16>
    %cst = arith.constant dense<0.000000e+00> : vector<3x414xf32>
    %15 = tpu.matmul %14, %13, %cst {dimension_numbers = #tpu.dot_dimension_numbers<[1], [0], [0], [1], [0, 0, 1, 1], [], []>} : vector<3x144xbf16>, vector<144x414xbf16>, vector<3x414xf32> -> vector<3x414xf32>
    %c0_4 = arith.constant 0 : index
    %c0_5 = arith.constant 0 : index
    %16 = vector.load %arg3[%c0_4, %c0_5] : memref<3x1xf32, #tpu.memory_space<vmem>>, vector<3x1xf32>
    %17 = vector.broadcast %16 : vector<3x1xf32> to vector<3x414xf32>
    %18 = arith.addf %15, %17 : vector<3x414xf32>
    %cst_6 = arith.constant 0.000000e+00 : f32
    %19 = vector.broadcast %cst_6 : f32 to vector<3x414xf32>
    %20 = arith.cmpf oge, %18, %19 : vector<3x414xf32>
    %cst_7 = arith.constant 3.000000e-01 : f32
    %21 = vector.broadcast %cst_7 : f32 to vector<3x414xf32>
    %22 = arith.mulf %21, %18 : vector<3x414xf32>
    %23 = arith.select %20, %18, %22 : vector<3x414xi1>, vector<3x414xf32>
    %c0_8 = arith.constant 0 : index
    %c0_9 = arith.constant 0 : index
    %c0_10 = arith.constant 0 : index
    %24 = vector.load %arg4[%c0_8, %c0_9, %c0_10] : memref<1x3x414xf32, #tpu.memory_space<vmem>>, vector<1x3x414xf32>
    %25 = vector.shape_cast %24 : vector<1x3x414xf32> to vector<3x414xf32>
    %26 = vector.shape_cast %23 : vector<3x414xf32> to vector<1x3x414xf32>
    tpu.vector_store %arg4[%c0_8, %c0_9, %c0_10], %26 {strides = array<i32>} : memref<1x3x414xf32, #tpu.memory_space<vmem>>, vector<1x3x414xf32>,
    return
  }
  func.func @transform_0(%arg0: i32) -> (i32, i32, i32) {
    %c0_i32 = arith.constant 0 : i32
    %c0_i32_0 = arith.constant 0 : i32
    %c0_i32_1 = arith.constant 0 : i32
    return %arg0, %c0_i32, %c0_i32_0 : i32, i32, i32
  }
  func.func @transform_1(%arg0: i32) -> (i32, i32) {
    %c0_i32 = arith.constant 0 : i32
    %c0_i32_0 = arith.constant 0 : i32
    %c0_i32_1 = arith.constant 0 : i32
    return %c0_i32, %c0_i32_0 : i32, i32
  }
  func.func @transform_2(%arg0: i32) -> (i32, i32) {
    %c0_i32 = arith.constant 0 : i32
    %c0_i32_0 = arith.constant 0 : i32
    %c0_i32_1 = arith.constant 0 : i32
    return %c0_i32, %c0_i32_0 : i32, i32
  }
  func.func @transform_3(%arg0: i32) -> (i32, i32, i32) {
    %c0_i32 = arith.constant 0 : i32
    %c0_i32_0 = arith.constant 0 : i32
    %c0_i32_1 = arith.constant 0 : i32
    return %arg0, %c0_i32, %c0_i32_0 : i32, i32, i32
  }
}

</mosaic_0001>

<bundles_post_ra>
// kernel: hsarnn_forward.10
= control target key start
LH: loop header
LB: loop body
LE: loop exit
PB: predicated region body
PF: predicated region fallthrough
CT: control target
= control target key end

     0   :  { %s742_s12 = smov 0   ;;  %s817_s0 = inlined_call_operand.vmem [shape: bf16[2,8,384], index: 0, kind: input, shape index: {}]   ;;  %s818_s1 = inlined_call_operand.vmem [shape: bf16[32,72], index: 1, kind: input, shape index: {}]   ;;  %s819_s2 = inlined_call_operand.vmem [shape: f32[32,1], index: 2, kind: input, shape index: {}]   ;;  %s820_s3 = inlined_call_operand.vmem [shape: bf16[2,32,350], index: 3, kind: output, shape index: {}]  }
   0x1 LB: > { %s588_s13 = sadd.s32 4294967295, %s711_s12   ;;  %p592_p0 = scmp.ge.s32.totalorder %s711_s12, 1  ;;  %s711_s12 = sphi %s742_s12, %s13_s12  }
   0x2   : > { %p137_p1 = scmp.lt.s32.totalorder %s711_s12, 3 }
   0x4   : > { %p138_p2 = pnand %p592_p0, %p137_p1 }
   0x5   : > { %p161_p3 = scmp.lt.s32.totalorder (!%p138_p2), %s588_s13, 1  ;;  %s713_s18 = smov (!%p138_p2), 126   ;;  %v759_v6 = vld [vmem:[%s818_s1] sm:$0xff] (!%p138_p2)   ;;  %vm329_vm0 = vcmask (!%p138_p2), 588800   ;;  %v720_v7 = vmov (!%p138_p2), 0   ;;  %v296_v10 = vld [vmem:[%s819_s2 + $0x8] sm:$0xff] (!%p138_p2) }
   0x6   : > { %141 = sbr.rel (%p138_p2) target bundleno = 405 (0x195), region = 32  ;;  %s714_s19 = smov (!%p138_p2), 127   ;;  %378 = vmatprep.mubr.bf16.mxu0 (!%p138_p2), %v720_v7  ;;  %701 = vset.pattern.permute.xlu0 (!%p138_p2), %v720_v7  ;;  %v295_v9 = vld [vmem:[%s819_s2] sm:$0xff] (!%p138_p2)  ;;  %v297_v11 = vld [vmem:[%s819_s2 + $0x10] sm:$0xff] (!%p138_p2)  ;;  %v298_v12 = vld [vmem:[%s819_s2 + $0x18] sm:$0xff] (!%p138_p2)  ;;  %vm186_vm1 = vcmask (!%p138_p2), 1039360  }
   0x7   : > { %s715_s20 = smov (!%p138_p2), 112   ;;  %s716_s21 = smov (!%p138_p2), 110   ;;  %637 = vmatprep.mubr.msk.bf16.mxu1 (!%p138_p2), %vm329_vm0, %v759_v6  ;;  %702 = vset.pattern.permute.xlu1 (!%p138_p2), %v720_v7  ;;  %vm210_vm2 = vcmask (!%p138_p2), 916480   ;;  %vm198_vm3 = vcmask (!%p138_p2), 1031168   ;;  %vm234_vm4 = vcmask (!%p138_p2), 900096   ;;  %vm222_vm5 = vcmask (!%p138_p2), 908288  }
   0x8   : > { %s717_s22 = smov (!%p138_p2), 111   ;;  %s718_s23 = smov (!%p138_p2), 95   ;;  %vm258_vm6 = vcmask (!%p138_p2), 777216   ;;  %vm246_vm7 = vcmask (!%p138_p2), 785408   ;;  %vm270_vm8 = vcmask (!%p138_p2), 769024   ;;  %vm336_vm9 = vcmask (!%p138_p2), 1043456  }
   0x9   : > { %s719_s24 = smov (!%p138_p2), 96   ;;  %s721_s27 = smov (!%p138_p2), 94   ;;  %vm525_vm10 = vcmask (!%p138_p2), 764928  }
   0xd   : > { %s822_s13 = smov (!%p161_p3, %s588_s13), 1 }
   0xe   : > { %s642_s14 = smul.u32 12, %s822_s13 }
   0xf   : > { %s643_s11 = smul.u32 48, %s822_s13 }
  0x10   : > { %s165_s17 = scalar_lea.vmem %s817_s0, %s642_s14 }
  0x11   : > { %v172_v0 = vld [vmem:[%s165_s17] sm:$0xff]  ;;  %v173_v1 = vld [vmem:[%s165_s17 + $0x8] sm:$0xf]  ;;  %s797_s15 = scalar_lea.vmem %s820_s3, %s643_s11 }
  0x12   : > { %v175_v2 = vunpack.c.h.bf16 %v172_v0  ;;  %v176_v3 = vunpack.c.l.bf16 %v173_v1  ;;  %v174_v5 = vunpack.c.l.bf16 %v172_v0 }
  0x14   : > { %v666_v4 = vpack.i.bf16 %v176_v3, %v175_v2  ;;  %v696_v8 = vpack.i.bf16 %v175_v2, %v174_v5 }
  0x16   : > { %667 = vrot.lane.b32.xlu1 %v666_v4, %s713_s18  ;;  %662 = vrot.lane.b32.xlu0 %v666_v4, %s714_s19 }
  0x1a   : > { %672 = vrot.lane.b32.xlu1 %v666_v4, %s715_s20  ;;  %180 = vrot.lane.b32.xlu0 %v174_v5, %s714_s19 }
  0x1e   : > { %204 = vrot.lane.b32.xlu1 %v174_v5, %s715_s20  ;;  %192 = vrot.lane.b32.xlu0 %v174_v5, %s713_s18 }
  0x22   : > { %682 = vrot.lane.b32.xlu1 %v666_v4, %s716_s21  ;;  %677 = vrot.lane.b32.xlu0 %v666_v4, %s717_s22 }
  0x26   : > { %228 = vrot.lane.b32.xlu1 %v174_v5, %s716_s21  ;;  %216 = vrot.lane.b32.xlu0 %v174_v5, %s717_s22 }
  0x2a   : > { %692 = vrot.lane.b32.xlu1 %v666_v4, %s718_s23  ;;  %687 = vrot.lane.b32.xlu0 %v666_v4, %s719_s24 }
  0x2e   : > { %252 = vrot.lane.b32.xlu1 %v174_v5, %s718_s23  ;;  %240 = vrot.lane.b32.xlu0 %v174_v5, %s719_s24 }
  0x32   : > { %697 = vrot.lane.b32.xlu0 %v696_v8, %s721_s27  ;;  %268 = vrot.lane.b32.xlu1 %v176_v3, %s721_s27 }
  0x36   : > { %301 = vperm.xlu0 %701, %v295_v9   ;;  %306 = vperm.xlu1 %702, %v296_v10  }
  0x3a   : > { %311 = vperm.xlu1 %702, %v297_v11   ;;  %316 = vperm.xlu0 %701, %v298_v12  }
  0x88   : > { %v668_v13 = vpop.permute.xlu1 %667  ;;  %v663_v14 = vpop.permute.xlu0 %662 }
  0x89   : > { %v665_v15 = vunpack.i.h.bf16 %v663_v14  ;;  %v664_v16 = vunpack.i.l.bf16 %v663_v14  ;;  %v670_v17 = vunpack.i.h.bf16 %v668_v13  ;;  %v669_v18 = vunpack.i.l.bf16 %v668_v13  ;;  %v704_v13 = vld [vmem:[%s818_s1 + $0x8] sm:$0xff]  }
  0x8b   : > { %v278_v19 = vpack.c.bf16 %v665_v15, %v176_v3  ;;  %v188_v20 = vsel %vm186_vm1, %v664_v16, %v665_v15  ;;  %v200_v29 = vsel %vm198_vm3, %v669_v18, %v670_v17 }
  0x8c   : > { %v673_v21 = vpop.permute.xlu1 %672  ;;  %v181_v22 = vpop.permute.xlu0 %180  ;;  %v277_v23 = vpack.c.bf16 %v188_v20, %v175_v2 }
  0x8d   : > { %v675_v24 = vunpack.i.h.bf16 %v673_v21  ;;  %v674_v25 = vunpack.i.l.bf16 %v673_v21  ;;  %v187_v26 = vsel %vm186_vm1, %v181_v22, %v664_v16  ;;  %627 = vmatprep.subr.bf16.mxu1 %v278_v19 }
  0x8e   : > { %346 = vmatprep.subr.bf16.mxu0 %v277_v23  ;;  %628 = vmatpush3.bf16.msra.mxu1 %v278_v19  ;;  %v276_v27 = vpack.c.bf16 %v187_v26, %v174_v5 }
  0x8f   : > { %v281_v28 = vpack.c.bf16 %v675_v24, %v670_v17  ;;  %v212_v30 = vsel %vm210_vm2, %v674_v25, %v675_v24 }
  0x90   : > { %v205_v31 = vpop.permute.xlu1 %204  ;;  %347 = vmatpush1.bf16.msra.mxu0 %v276_v27  ;;  %v193_v32 = vpop.permute.xlu0 %192  ;;  %v280_v33 = vpack.c.bf16 %v212_v30, %v200_v29 }
  0x91   : > { %v211_v34 = vsel %vm210_vm2, %v205_v31, %v674_v25  ;;  %v199_v35 = vsel %vm198_vm3, %v193_v32, %v669_v18  ;;  %629 = vmatprep.subr.bf16.mxu1 %v281_v28 }
  0x92   : > { %v279_v36 = vpack.c.bf16 %v211_v34, %v199_v35  ;;  %348 = vmatprep.subr.bf16.mxu0 %v280_v33  ;;  %630 = vmatpush3.bf16.msra.mxu1 %v281_v28 }
  0x94   : > { %v683_v37 = vpop.permute.xlu1 %682  ;;  %349 = vmatpush1.bf16.msra.mxu0 %v279_v36  ;;  %v678_v38 = vpop.permute.xlu0 %677 }
  0x95   : > { %v685_v39 = vunpack.i.h.bf16 %v683_v37  ;;  %v684_v40 = vunpack.i.l.bf16 %v683_v37  ;;  %v680_v41 = vunpack.i.h.bf16 %v678_v38  ;;  %v679_v42 = vunpack.i.l.bf16 %v678_v38 }
  0x97   : > { %v284_v43 = vpack.c.bf16 %v685_v39, %v680_v41  ;;  %v224_v44 = vsel %vm222_vm5, %v679_v42, %v680_v41  ;;  %v236_v45 = vsel %vm234_vm4, %v684_v40, %v685_v39 }
  0x98   : > { %v229_v46 = vpop.permute.xlu1 %228  ;;  %v217_v47 = vpop.permute.xlu0 %216  ;;  %v283_v48 = vpack.c.bf16 %v236_v45, %v224_v44 }
  0x99   : > { %v235_v49 = vsel %vm234_vm4, %v229_v46, %v684_v40  ;;  %v223_v50 = vsel %vm222_vm5, %v217_v47, %v679_v42  ;;  %631 = vmatprep.subr.bf16.mxu1 %v284_v43 }
  0x9a   : > { %v282_v51 = vpack.c.bf16 %v235_v49, %v223_v50  ;;  %350 = vmatprep.subr.bf16.mxu0 %v283_v48  ;;  %632 = vmatpush3.bf16.msra.mxu1 %v284_v43 }
  0x9c   : > { %v693_v52 = vpop.permute.xlu1 %692  ;;  %v688_v53 = vpop.permute.xlu0 %687  ;;  %351 = vmatpush1.bf16.msra.mxu0 %v282_v51 }
  0x9d   : > { %v695_v54 = vunpack.i.h.bf16 %v693_v52  ;;  %v694_v55 = vunpack.i.l.bf16 %v693_v52  ;;  %v690_v56 = vunpack.i.h.bf16 %v688_v53  ;;  %v689_v57 = vunpack.i.l.bf16 %v688_v53 }
  0x9f   : > { %v287_v58 = vpack.c.bf16 %v695_v54, %v690_v56  ;;  %v248_v59 = vsel %vm246_vm7, %v689_v57, %v690_v56  ;;  %v260_v60 = vsel %vm258_vm6, %v694_v55, %v695_v54 }
  0xa0   : > { %v253_v61 = vpop.permute.xlu1 %252  ;;  %v241_v62 = vpop.permute.xlu0 %240  ;;  %v286_v63 = vpack.c.bf16 %v260_v60, %v248_v59 }
  0xa1   : > { %v259_v0 = vsel %vm258_vm6, %v253_v61, %v694_v55  ;;  %v247_v1 = vsel %vm246_vm7, %v241_v62, %v689_v57  ;;  %633 = vmatprep.subr.bf16.mxu1 %v287_v58 }
  0xa2   : > { %v285_v2 = vpack.c.bf16 %v259_v0, %v247_v1  ;;  %352 = vmatprep.subr.bf16.mxu0 %v286_v63  ;;  %634 = vmatpush3.bf16.msra.mxu1 %v287_v58 }
  0xa4   : > { %v698_v3 = vpop.permute.xlu0 %697  ;;  %353 = vmatpush1.bf16.msra.mxu0 %v285_v2  ;;  %v269_v4 = vpop.permute.xlu1 %268 }
  0xa5   : > { %v700_v5 = vunpack.i.h.bf16 %v698_v3  ;;  %v699_v8 = vunpack.i.l.bf16 %v698_v3  ;;  %v290_v9 = vpack.c.bf16 %v269_v4, %v269_v4 }
  0xa7   : > { %v272_v10 = vsel %vm270_vm8, %v700_v5, %v269_v4  ;;  %641 = vmatprep.subr.msk.bf16.mxu1 %vm336_vm9, %v290_v9  ;;  %v344_v11 = vsel %vm336_vm9, %v290_v9, 0  ;;  %v271_v12 = vsel %vm270_vm8, %v699_v8, %v700_v5 }
  0xa8   : > { %v289_v14 = vpack.c.bf16 %v272_v10, %v272_v10  ;;  %636 = vmatpush3.bf16.msra.mxu1 %v344_v11  ;;  %v288_v15 = vpack.c.bf16 %v271_v12, %v271_v12 }
  0xaa   : > { %597 = vmatprep.subr.msk.bf16.mxu0 %vm336_vm9, %v289_v14  ;;  %v338_v16 = vsel %vm336_vm9, %v288_v15, 0 }
  0xab   : > { %355 = vmatpush1.bf16.msra.mxu0 %v338_v16  ;;  %638 = vmatmul.mubr.msk.bf16.vlgmr.msra.gmra.mrb[0].mxu1 %vm329_vm0, %v704_v13 }
  0xae   : > { %598 = vmatmul.mubr.msk.bf16.vlgmr.msra.gmra.mrb[0].mxu0 %vm329_vm0, %v759_v6 }
  0xaf   : > { %388 = vmatprep.mubr.bf16.mxu0 %v720_v7 }
  0xb5   : > { %v307_v17 = vpop.permute.xlu1 %306  ;;  %v302_v18 = vpop.permute.xlu0 %301 }
  0xb6   : > { %599 = vmatmul.mubr.msk.bf16.gmra.mrb[4].mxu0 %vm329_vm0, %v704_v13 }
  0xb9   : > { %v312_v19 = vpop.permute.xlu1 %311  ;;  %v790_v21 = vpop.permute.xlu0 %316 }
 0x17e   : > { %v639_v20 = vpop.f32.mrb[0].mxu1 }
 0x17f   : > { %v433_v22 = vpop.f32.mrb[1].mxu1  ;;  %v442_v23 = vadd.f32 %v639_v20, %v312_v19 }
 0x180   : > { %v434_v24 = vadd.f32 %v433_v22, %v302_v18  ;;  %v640_v25 = vpop.f32.mrb[2].mxu1 }
 0x181   : > { %v380_v26 = vpop.f32.mrb[0].mxu0  ;;  %vm456_vm11 = vcmp.ge.f32.partialorder %v442_v23, 0.0  ;;  %v468_v27 = vmul.f32 0.3, %v442_v23  ;;  %v445_v6 = vadd.f32 %v640_v25, %v790_v21  ;;  %v436_v7 = vpop.f32.mrb[3].mxu1 }
 0x182   : > { %v381_v28 = vadd.f32 %v380_v26, %v302_v18  ;;  %v382_v29 = vpop.f32.mrb[1].mxu0  ;;  %vm450_vm12 = vcmp.ge.f32.partialorder %v434_v24, 0.0  ;;  %v462_v30 = vmul.f32 0.3, %v434_v24  ;;  %v437_v31 = vadd.f32 %v436_v7, %v307_v17 }
 0x183   : > { %v383_v32 = vadd.f32 %v382_v29, %v302_v18  ;;  %v384_v33 = vpop.f32.mrb[2].mxu0  ;;  %v480_v34 = vsel %vm456_vm11, %v442_v23, %v468_v27  ;;  %vm459_vm13 = vcmp.ge.f32.partialorder %v445_v6, 0.0  ;;  %v471_v35 = vmul.f32 0.3, %v445_v6 }
 0x184   : > { %vm448_vm14 = vcmp.ge.f32.partialorder %v381_v28, 0.0  ;;  %v460_v36 = vmul.f32 0.3, %v381_v28  ;;  %v385_v37 = vadd.f32 %v384_v33, %v307_v17  ;;  %v386_v38 = vpop.f32.mrb[3].mxu0  ;;  %v474_v39 = vsel %vm450_vm12, %v434_v24, %v462_v30 }
 0x185   : > { %vm449_vm15 = vcmp.ge.f32.partialorder %v383_v32, 0.0  ;;  %v461_v40 = vmul.f32 0.3, %v383_v32  ;;  %v387_v41 = vadd.f32 %v386_v38, %v307_v17  ;;  %v613_v42 = vpack.c.bf16 %v474_v39, %v474_v39 }
 0x186   : > { %v472_v43 = vsel %vm448_vm14, %v381_v28, %v460_v36  ;;  %vm451_vm0 = vcmp.ge.f32.partialorder %v385_v37, 0.0  ;;  %v463_v44 = vmul.f32 0.3, %v385_v37  ;;  %v617_v45 = vpack.c.bf16 %v480_v34, %v480_v34 }
 0x187   : > { %v473_v46 = vsel %vm449_vm15, %v383_v32, %v461_v40  ;;  %vm452_vm1 = vcmp.ge.f32.partialorder %v387_v41, 0.0  ;;  %v464_v47 = vmul.f32 0.3, %v387_v41  ;;  %526 = vst.msk [vmem:[%s797_s15 + $0x8] sm:$0xf] %vm525_vm10, %v613_v42  ;;  %v483_v48 = vsel %vm459_vm13, %v445_v6, %v471_v35 }
 0x188   : > { %v612_v49 = vpack.c.bf16 %v473_v46, %v472_v43  ;;  %v475_v50 = vsel %vm451_vm0, %v385_v37, %v463_v44  ;;  %530 = vst.msk [vmem:[%s797_s15 + $0x20] sm:$0xf] %vm525_vm10, %v617_v45  ;;  %v619_v51 = vpack.c.bf16 %v483_v48, %v483_v48  ;;  %vm453_vm2 = vcmp.ge.f32.partialorder %v437_v31, 0.0 }
 0x189   : > { %v476_v52 = vsel %vm452_vm1, %v387_v41, %v464_v47  ;;  %v465_v53 = vmul.f32 0.3, %v437_v31  ;;  %v390_v54 = vpop.f32.mrb[4].mxu0 }
 0x18a   : > { %524 = vst [vmem:[%s797_s15] sm:$0xff] %v612_v49  ;;  %v614_v55 = vpack.c.bf16 %v476_v52, %v475_v50  ;;  %532 = vst.msk [vmem:[%s797_s15 + $0x2c] sm:$0xf] %vm525_vm10, %v619_v51  ;;  %v391_v56 = vadd.f32 %v390_v54, %v312_v19  ;;  %v392_v57 = vpop.f32.mrb[5].mxu0 }
 0x18b   : > { %v477_v58 = vsel %vm453_vm2, %v437_v31, %v465_v53  ;;  %v393_v59 = vadd.f32 %v392_v57, %v312_v19  ;;  %v394_v60 = vpop.f32.mrb[6].mxu0 }
 0x18c   : > { %527 = vst [vmem:[%s797_s15 + $0xc] sm:$0xff] %v614_v55  ;;  %v615_v61 = vpack.c.bf16 %v477_v58, %v477_v58  ;;  %vm454_vm3 = vcmp.ge.f32.partialorder %v391_v56, 0.0  ;;  %v466_v62 = vmul.f32 0.3, %v391_v56  ;;  %v395_v63 = vadd.f32 %v394_v60, %v790_v21  ;;  %v396_v0 = vpop.f32.mrb[7].mxu0 }
 0x18d   : > { %vm455_vm4 = vcmp.ge.f32.partialorder %v393_v59, 0.0  ;;  %v467_v1 = vmul.f32 0.3, %v393_v59  ;;  %v397_v2 = vadd.f32 %v396_v0, %v790_v21 }
 0x18e   : > { %528 = vst.msk [vmem:[%s797_s15 + $0x14] sm:$0xf] %vm525_vm10, %v615_v61  ;;  %v478_v3 = vsel %vm454_vm3, %v391_v56, %v466_v62  ;;  %vm457_vm5 = vcmp.ge.f32.partialorder %v395_v63, 0.0  ;;  %v469_v4 = vmul.f32 0.3, %v395_v63 }
 0x18f   : > { %v479_v5 = vsel %vm455_vm4, %v393_v59, %v467_v1  ;;  %vm458_vm6 = vcmp.ge.f32.partialorder %v397_v2, 0.0  ;;  %v470_v8 = vmul.f32 0.3, %v397_v2 }
 0x190   : > { %v616_v9 = vpack.c.bf16 %v479_v5, %v478_v3  ;;  %v481_v10 = vsel %vm457_vm5, %v395_v63, %v469_v4 }
 0x191   : > { %v482_v11 = vsel %vm458_vm6, %v397_v2, %v470_v8 }
 0x192   : > { %529 = vst [vmem:[%s797_s15 + $0x18] sm:$0xff] %v616_v9  ;;  %v618_v12 = vpack.c.bf16 %v482_v11, %v481_v10 }
 0x194   : > { %531 = vst [vmem:[%s797_s15 + $0x24] sm:$0xff] %v618_v12 }
 0x195 PF: > { %s13_s12 = sadd.s32 1, %s711_s12  }
 0x196   : > { %p10_p4 = scmp.ge.s32.totalorder %s13_s12, 4  }
 0x198   :  { %12 = sbr.rel (!%p10_p4) target bundleno = 1 (0x1), region = 62 }

// kernel: hsarnn_forward.12
= control target key start
LH: loop header
LB: loop body
LE: loop exit
PB: predicated region body
PF: predicated region fallthrough
CT: control target
= control target key end

     0   :  { %s929_s12 = smov 0   ;;  %s1022_s0 = inlined_call_operand.vmem [shape: bf16[2,32,350], index: 0, kind: input, shape index: {}]   ;;  %s1023_s1 = inlined_call_operand.vmem [shape: bf16[32,144], index: 1, kind: input, shape index: {}]   ;;  %s1024_s2 = inlined_call_operand.vmem [shape: f32[32,1], index: 2, kind: input, shape index: {}]   ;;  %s1025_s3 = inlined_call_operand.vmem [shape: bf16[2,32,316], index: 3, kind: output, shape index: {}]  }
   0x1 LB: > { %s703_s13 = sadd.s32 4294967295, %s898_s12   ;;  %p707_p0 = scmp.ge.s32.totalorder %s898_s12, 1  ;;  %s898_s12 = sphi %s929_s12, %s13_s12  }
   0x2   : > { %p138_p1 = scmp.lt.s32.totalorder %s898_s12, 3 }
   0x4   : > { %p139_p2 = pnand %p707_p0, %p138_p1 }
   0x5   : > { %p163_p3 = scmp.lt.s32.totalorder (!%p139_p2), %s703_s13, 1  ;;  %v900_v0 = vmov (!%p139_p2), 0   ;;  %s901_s18 = smov (!%p139_p2), 127   ;;  %v888_v17 = vld [vmem:[%s1023_s1 + $0x4] ss:$8 sps:$4 sm:$0xff] (!%p139_p2)   ;;  %vm448_vm0 = vcmask (!%p139_p2), 130048  }
   0x6   : > { %142 = sbr.rel (%p139_p2) target bundleno = 423 (0x1a7), region = 32  ;;  %508 = vmatprep.subr.bf16.mxu1 (!%p139_p2), %v900_v0  ;;  %881 = vset.pattern.permute.xlu0 (!%p139_p2), %v900_v0  ;;  %s902_s19 = smov (!%p139_p2), 126   ;;  %v406_v18 = vld [vmem:[%s1024_s2] sm:$0xff] (!%p139_p2)  ;;  %v407_v19 = vld [vmem:[%s1024_s2 + $0x8] sm:$0xff] (!%p139_p2)  ;;  %v408_v20 = vld [vmem:[%s1024_s2 + $0x10] sm:$0xff] (!%p139_p2)  ;;  %vm203_vm1 = vcmask (!%p139_p2), 1039360  }
   0x7   : > { %882 = vset.pattern.permute.xlu1 (!%p139_p2), %v900_v0  ;;  %s903_s20 = smov (!%p139_p2), 112   ;;  %s904_s21 = smov (!%p139_p2), 111   ;;  %723 = vmatprep.mubr.msk.bf16.mxu1 (!%p139_p2), %vm448_vm0, %v888_v17  ;;  %v409_v21 = vld [vmem:[%s1024_s2 + $0x18] sm:$0xff] (!%p139_p2)  ;;  %vm226_vm2 = vcmask (!%p139_p2), 1031168   ;;  %vm249_vm3 = vcmask (!%p139_p2), 916480   ;;  %vm272_vm4 = vcmask (!%p139_p2), 908288  }
   0x8   : > { %s905_s22 = smov (!%p139_p2), 110   ;;  %s906_s23 = smov (!%p139_p2), 96   ;;  %721 = vmatprep.mubr.msk.bf16.mxu0 (!%p139_p2), %vm448_vm0, %v888_v17  ;;  %vm295_vm5 = vcmask (!%p139_p2), 900096   ;;  %vm318_vm6 = vcmask (!%p139_p2), 785408   ;;  %vm341_vm7 = vcmask (!%p139_p2), 777216   ;;  %vm364_vm8 = vcmask (!%p139_p2), 769024  }
   0x9   : > { %s907_s26 = smov (!%p139_p2), 95   ;;  %s908_s27 = smov (!%p139_p2), 94   ;;  %vm634_vm10 = vcmask (!%p139_p2), 486400  }
   0xd   : > { %s1027_s13 = smov (!%p163_p3, %s703_s13), 1 }
   0xe   : > { %s708_s14 = smul.u32 48, %s1027_s13 }
  0x10   : > { %s675_s17 = scalar_lea.vmem %s1022_s0, %s708_s14 }
  0x11   : > { %v710_v1 = vld [vmem:[%s675_s17 + $0x18] sm:$0xff]  ;;  %v711_v2 = vld [vmem:[%s675_s17 + $0x20] sm:$0xf]  ;;  %v712_v3 = vld [vmem:[%s675_s17 + $0x24] sm:$0xff] }
  0x12   : > { %v180_v4 = vunpack.c.h.bf16 %v710_v1  ;;  %v181_v5 = vunpack.c.l.bf16 %v711_v2  ;;  %v179_v6 = vunpack.c.l.bf16 %v710_v1  ;;  %v182_v7 = vunpack.c.l.bf16 %v712_v3  ;;  %v713_v8 = vld [vmem:[%s675_s17 + $0x2c] sm:$0xf] }
  0x13   : > { %v183_v9 = vunpack.c.h.bf16 %v712_v3  ;;  %v184_v10 = vunpack.c.l.bf16 %v713_v8  ;;  %v716_v11 = vcombine.low %v711_v2, %v713_v8  ;;  %v715_v12 = vcombine.high %v710_v1, %v712_v3 }
  0x14   : > { %v761_v13 = vpack.i.bf16 %v181_v5, %v180_v4  ;;  %v771_v14 = vpack.i.bf16 %v182_v7, %v179_v6  ;;  %v714_v16 = vcombine.low %v710_v1, %v712_v3 }
  0x15   : > { %509 = vmatpush1.bf16.msra.mxu1 %v716_v11  ;;  %v766_v15 = vpack.i.bf16 %v184_v10, %v183_v9  ;;  %455 = vmatprep.subr.bf16.mxu0 %v715_v12 }
  0x16   : > { %762 = vrot.lane.b32.xlu0 %v761_v13, %s901_s18  ;;  %772 = vrot.lane.b32.xlu1 %v771_v14, %s901_s18 }
  0x17   : > { %510 = vmatprep.subr.bf16.mxu1 %v900_v0  ;;  %456 = vmatpush1.bf16.msra.mxu0 %v714_v16 }
  0x1a   : > { %767 = vrot.lane.b32.xlu0 %v766_v15, %s901_s18  ;;  %777 = vrot.lane.b32.xlu1 %v761_v13, %s902_s19 }
  0x1e   : > { %782 = vrot.lane.b32.xlu0 %v766_v15, %s902_s19  ;;  %787 = vrot.lane.b32.xlu1 %v771_v14, %s902_s19 }
  0x22   : > { %792 = vrot.lane.b32.xlu0 %v761_v13, %s903_s20  ;;  %797 = vrot.lane.b32.xlu1 %v766_v15, %s903_s20 }
  0x26   : > { %802 = vrot.lane.b32.xlu0 %v771_v14, %s903_s20  ;;  %807 = vrot.lane.b32.xlu1 %v761_v13, %s904_s21  ;;  %s1005_s20 = scalar_lea.vmem %s1025_s3, %s708_s14 }
  0x2a   : > { %812 = vrot.lane.b32.xlu0 %v766_v15, %s904_s21  ;;  %817 = vrot.lane.b32.xlu1 %v771_v14, %s904_s21 }
  0x2e   : > { %822 = vrot.lane.b32.xlu0 %v761_v13, %s905_s22  ;;  %827 = vrot.lane.b32.xlu1 %v766_v15, %s905_s22 }
  0x32   : > { %832 = vrot.lane.b32.xlu0 %v771_v14, %s905_s22  ;;  %837 = vrot.lane.b32.xlu1 %v761_v13, %s906_s23 }
  0x36   : > { %842 = vrot.lane.b32.xlu0 %v766_v15, %s906_s23  ;;  %847 = vrot.lane.b32.xlu1 %v771_v14, %s906_s23 }
  0x3a   : > { %852 = vrot.lane.b32.xlu0 %v761_v13, %s907_s26  ;;  %857 = vrot.lane.b32.xlu1 %v766_v15, %s907_s26 }
  0x3e   : > { %862 = vrot.lane.b32.xlu0 %v771_v14, %s907_s26  ;;  %867 = vrot.lane.b32.xlu1 %v761_v13, %s908_s27 }
  0x42   : > { %872 = vrot.lane.b32.xlu0 %v766_v15, %s908_s27  ;;  %877 = vrot.lane.b32.xlu1 %v771_v14, %s908_s27 }
  0x46   : > { %412 = vperm.xlu0 %881, %v406_v18   ;;  %417 = vperm.xlu1 %882, %v407_v19  }
  0x4a   : > { %422 = vperm.xlu1 %882, %v408_v20   ;;  %427 = vperm.xlu0 %881, %v409_v21  }
  0x88   : > { %v763_v22 = vpop.permute.xlu0 %762  ;;  %v773_v23 = vpop.permute.xlu1 %772 }
  0x89   : > { %v765_v24 = vunpack.i.h.bf16 %v763_v22  ;;  %v764_v25 = vunpack.i.l.bf16 %v763_v22  ;;  %v774_v26 = vunpack.i.l.bf16 %v773_v23  ;;  %v775_v29 = vunpack.i.h.bf16 %v773_v23 }
  0x8b   : > { %v205_v34 = vsel %vm203_vm1, %v764_v25, %v765_v24  ;;  %v204_v37 = vsel %vm203_vm1, %v774_v26, %v764_v25 }
  0x8c   : > { %v768_v27 = vpop.permute.xlu0 %767  ;;  %v778_v28 = vpop.permute.xlu1 %777 }
  0x8d   : > { %v770_v30 = vunpack.i.h.bf16 %v768_v27  ;;  %v769_v31 = vunpack.i.l.bf16 %v768_v27  ;;  %v780_v32 = vunpack.i.h.bf16 %v778_v28  ;;  %v779_v33 = vunpack.i.l.bf16 %v778_v28 }
  0x8f   : > { %v380_v35 = vpack.c.bf16 %v770_v30, %v765_v24  ;;  %v207_v36 = vsel %vm203_vm1, %v769_v31, %v770_v30  ;;  %v206_v38 = vsel %vm203_vm1, %v775_v29, %v769_v31  ;;  %v228_v47 = vsel %vm226_vm2, %v779_v33, %v780_v32 }
  0x90   : > { %v783_v39 = vpop.permute.xlu0 %782  ;;  %v788_v40 = vpop.permute.xlu1 %787  ;;  %v379_v41 = vpack.c.bf16 %v207_v36, %v205_v34  ;;  %v378_v42 = vpack.c.bf16 %v206_v38, %v204_v37 }
  0x91   : > { %v785_v43 = vunpack.i.h.bf16 %v783_v39  ;;  %v784_v44 = vunpack.i.l.bf16 %v783_v39  ;;  %v790_v45 = vunpack.i.h.bf16 %v788_v40  ;;  %v789_v46 = vunpack.i.l.bf16 %v788_v40  ;;  %511 = vmatpush1.bf16.msra.mxu1 %v380_v35 }
  0x92   : > { %457 = vmatprep.subr.bf16.mxu0 %v379_v41  ;;  %512 = vmatprep.subr.bf16.mxu1 %v900_v0 }
  0x93   : > { %v383_v48 = vpack.c.bf16 %v785_v43, %v780_v32  ;;  %458 = vmatpush1.bf16.msra.mxu0 %v378_v42  ;;  %v230_v49 = vsel %vm226_vm2, %v784_v44, %v785_v43  ;;  %v227_v50 = vsel %vm226_vm2, %v789_v46, %v779_v33  ;;  %v229_v51 = vsel %vm226_vm2, %v790_v45, %v784_v44 }
  0x94   : > { %v793_v52 = vpop.permute.xlu0 %792  ;;  %v798_v53 = vpop.permute.xlu1 %797  ;;  %v382_v54 = vpack.c.bf16 %v230_v49, %v228_v47  ;;  %v381_v55 = vpack.c.bf16 %v229_v51, %v227_v50 }
  0x95   : > { %v795_v56 = vunpack.i.h.bf16 %v793_v52  ;;  %v794_v57 = vunpack.i.l.bf16 %v793_v52  ;;  %v800_v58 = vunpack.i.h.bf16 %v798_v53  ;;  %v799_v59 = vunpack.i.l.bf16 %v798_v53  ;;  %513 = vmatpush1.bf16.msra.mxu1 %v383_v48 }
  0x96   : > { %459 = vmatprep.subr.bf16.mxu0 %v382_v54  ;;  %514 = vmatprep.subr.bf16.mxu1 %v900_v0 }
  0x97   : > { %v386_v60 = vpack.c.bf16 %v800_v58, %v795_v56  ;;  %460 = vmatpush1.bf16.msra.mxu0 %v381_v55  ;;  %v251_v61 = vsel %vm249_vm3, %v794_v57, %v795_v56  ;;  %v253_v62 = vsel %vm249_vm3, %v799_v59, %v800_v58 }
  0x98   : > { %v803_v63 = vpop.permute.xlu0 %802  ;;  %v808_v1 = vpop.permute.xlu1 %807  ;;  %v385_v2 = vpack.c.bf16 %v253_v62, %v251_v61 }
  0x99   : > { %v805_v3 = vunpack.i.h.bf16 %v803_v63  ;;  %v804_v4 = vunpack.i.l.bf16 %v803_v63  ;;  %515 = vmatpush1.bf16.msra.mxu1 %v386_v60  ;;  %v810_v5 = vunpack.i.h.bf16 %v808_v1  ;;  %v809_v6 = vunpack.i.l.bf16 %v808_v1 }
  0x9a   : > { %461 = vmatprep.subr.bf16.mxu0 %v385_v2  ;;  %516 = vmatprep.subr.bf16.mxu1 %v900_v0 }
  0x9b   : > { %v250_v7 = vsel %vm249_vm3, %v804_v4, %v794_v57  ;;  %v252_v8 = vsel %vm249_vm3, %v805_v3, %v799_v59  ;;  %v274_v16 = vsel %vm272_vm4, %v809_v6, %v810_v5 }
  0x9c   : > { %v813_v9 = vpop.permute.xlu0 %812  ;;  %v818_v10 = vpop.permute.xlu1 %817  ;;  %v384_v11 = vpack.c.bf16 %v252_v8, %v250_v7 }
  0x9d   : > { %v815_v12 = vunpack.i.h.bf16 %v813_v9  ;;  %v814_v13 = vunpack.i.l.bf16 %v813_v9  ;;  %v820_v14 = vunpack.i.h.bf16 %v818_v10  ;;  %v819_v15 = vunpack.i.l.bf16 %v818_v10 }
  0x9e   : > { %462 = vmatpush1.bf16.msra.mxu0 %v384_v11 }
  0x9f   : > { %v389_v17 = vpack.c.bf16 %v815_v12, %v810_v5  ;;  %v276_v18 = vsel %vm272_vm4, %v814_v13, %v815_v12  ;;  %v273_v19 = vsel %vm272_vm4, %v819_v15, %v809_v6  ;;  %v275_v20 = vsel %vm272_vm4, %v820_v14, %v814_v13 }
  0xa0   : > { %v823_v21 = vpop.permute.xlu0 %822  ;;  %v828_v22 = vpop.permute.xlu1 %827  ;;  %v388_v23 = vpack.c.bf16 %v276_v18, %v274_v16  ;;  %v387_v24 = vpack.c.bf16 %v275_v20, %v273_v19 }
  0xa1   : > { %v825_v25 = vunpack.i.h.bf16 %v823_v21  ;;  %v824_v26 = vunpack.i.l.bf16 %v823_v21  ;;  %v830_v27 = vunpack.i.h.bf16 %v828_v22  ;;  %v829_v28 = vunpack.i.l.bf16 %v828_v22  ;;  %517 = vmatpush1.bf16.msra.mxu1 %v389_v17 }
  0xa2   : > { %463 = vmatprep.subr.bf16.mxu0 %v388_v23  ;;  %518 = vmatprep.subr.bf16.mxu1 %v900_v0  ;;  %v886_v23 = vld [vmem:[%s1023_s1] ss:$8 sps:$4 sm:$0xff]  }
  0xa3   : > { %v392_v29 = vpack.c.bf16 %v830_v27, %v825_v25  ;;  %464 = vmatpush1.bf16.msra.mxu0 %v387_v24  ;;  %v297_v30 = vsel %vm295_vm5, %v824_v26, %v825_v25  ;;  %v299_v31 = vsel %vm295_vm5, %v829_v28, %v830_v27  ;;  %v889_v24 = vld [vmem:[%s1023_s1 + $0x14] ss:$8 sps:$4 sm:$0xff]   ;;  %v891_v25 = vld [vmem:[%s1023_s1 + $0x10] ss:$8 sps:$4 sm:$0xff]  }
  0xa4   : > { %v833_v32 = vpop.permute.xlu0 %832  ;;  %v838_v33 = vpop.permute.xlu1 %837  ;;  %v391_v34 = vpack.c.bf16 %v299_v31, %v297_v30 }
  0xa5   : > { %v835_v35 = vunpack.i.h.bf16 %v833_v32  ;;  %v834_v36 = vunpack.i.l.bf16 %v833_v32  ;;  %519 = vmatpush1.bf16.msra.mxu1 %v392_v29  ;;  %v840_v37 = vunpack.i.h.bf16 %v838_v33  ;;  %v839_v38 = vunpack.i.l.bf16 %v838_v33 }
  0xa6   : > { %465 = vmatprep.subr.bf16.mxu0 %v391_v34  ;;  %520 = vmatprep.subr.bf16.mxu1 %v900_v0 }
  0xa7   : > { %v296_v39 = vsel %vm295_vm5, %v834_v36, %v824_v26  ;;  %v298_v40 = vsel %vm295_vm5, %v835_v35, %v829_v28  ;;  %v320_v48 = vsel %vm318_vm6, %v839_v38, %v840_v37 }
  0xa8   : > { %v843_v41 = vpop.permute.xlu0 %842  ;;  %v848_v42 = vpop.permute.xlu1 %847  ;;  %v390_v43 = vpack.c.bf16 %v298_v40, %v296_v39 }
  0xa9   : > { %v845_v44 = vunpack.i.h.bf16 %v843_v41  ;;  %v844_v45 = vunpack.i.l.bf16 %v843_v41  ;;  %v850_v46 = vunpack.i.h.bf16 %v848_v42  ;;  %v849_v47 = vunpack.i.l.bf16 %v848_v42 }
  0xaa   : > { %466 = vmatpush1.bf16.msra.mxu0 %v390_v43 }
  0xab   : > { %v395_v49 = vpack.c.bf16 %v845_v44, %v840_v37  ;;  %v322_v50 = vsel %vm318_vm6, %v844_v45, %v845_v44  ;;  %v319_v51 = vsel %vm318_vm6, %v849_v47, %v839_v38  ;;  %v321_v52 = vsel %vm318_vm6, %v850_v46, %v844_v45 }
  0xac   : > { %v853_v53 = vpop.permute.xlu0 %852  ;;  %v858_v54 = vpop.permute.xlu1 %857  ;;  %v394_v55 = vpack.c.bf16 %v322_v50, %v320_v48  ;;  %v393_v56 = vpack.c.bf16 %v321_v52, %v319_v51 }
  0xad   : > { %v855_v57 = vunpack.i.h.bf16 %v853_v53  ;;  %v854_v58 = vunpack.i.l.bf16 %v853_v53  ;;  %v860_v59 = vunpack.i.h.bf16 %v858_v54  ;;  %v859_v60 = vunpack.i.l.bf16 %v858_v54  ;;  %521 = vmatpush1.bf16.msra.mxu1 %v395_v49 }
  0xae   : > { %467 = vmatprep.subr.bf16.mxu0 %v394_v55  ;;  %522 = vmatprep.subr.bf16.mxu1 %v900_v0 }
  0xaf   : > { %v398_v61 = vpack.c.bf16 %v860_v59, %v855_v57  ;;  %468 = vmatpush1.bf16.msra.mxu0 %v393_v56  ;;  %v343_v62 = vsel %vm341_vm7, %v854_v58, %v855_v57  ;;  %v345_v63 = vsel %vm341_vm7, %v859_v60, %v860_v59 }
  0xb0   : > { %v863_v1 = vpop.permute.xlu0 %862  ;;  %v868_v2 = vpop.permute.xlu1 %867  ;;  %v397_v3 = vpack.c.bf16 %v345_v63, %v343_v62 }
  0xb1   : > { %v865_v4 = vunpack.i.h.bf16 %v863_v1  ;;  %v864_v5 = vunpack.i.l.bf16 %v863_v1  ;;  %523 = vmatpush1.bf16.msra.mxu1 %v398_v61  ;;  %v870_v6 = vunpack.i.h.bf16 %v868_v2  ;;  %v869_v7 = vunpack.i.l.bf16 %v868_v2 }
  0xb2   : > { %469 = vmatprep.subr.bf16.mxu0 %v397_v3  ;;  %524 = vmatprep.subr.bf16.mxu1 %v900_v0 }
  0xb3   : > { %v342_v8 = vsel %vm341_vm7, %v864_v5, %v854_v58  ;;  %v344_v9 = vsel %vm341_vm7, %v865_v4, %v859_v60  ;;  %v366_v17 = vsel %vm364_vm8, %v869_v7, %v870_v6 }
  0xb4   : > { %v873_v10 = vpop.permute.xlu0 %872  ;;  %v878_v11 = vpop.permute.xlu1 %877  ;;  %v396_v12 = vpack.c.bf16 %v344_v9, %v342_v8 }
  0xb5   : > { %v875_v13 = vunpack.i.h.bf16 %v873_v10  ;;  %v874_v14 = vunpack.i.l.bf16 %v873_v10  ;;  %v880_v15 = vunpack.i.h.bf16 %v878_v11  ;;  %v879_v16 = vunpack.i.l.bf16 %v878_v11 }
  0xb6   : > { %470 = vmatpush1.bf16.msra.mxu0 %v396_v12 }
  0xb7   : > { %v401_v18 = vpack.c.bf16 %v875_v13, %v870_v6  ;;  %v368_v19 = vsel %vm364_vm8, %v874_v14, %v875_v13  ;;  %v365_v20 = vsel %vm364_vm8, %v879_v16, %v869_v7  ;;  %v367_v21 = vsel %vm364_vm8, %v880_v15, %v874_v14 }
  0xb8   : > { %v400_v22 = vpack.c.bf16 %v368_v19, %v366_v17  ;;  %v399_v0 = vpack.c.bf16 %v367_v21, %v365_v20 }
  0xb9   : > { %525 = vmatpush1.bf16.msra.mxu1 %v401_v18 }
  0xba   : > { %471 = vmatprep.subr.bf16.mxu0 %v400_v22 }
  0xbb   : > { %472 = vmatpush1.bf16.msra.mxu0 %v399_v0 }
  0xbc   : > { %541 = vmatmul.mubr.bf16.vlgmr.msra.gmra.mrb[0].mxu1 %v886_v23 }
  0xbd   : > { %724 = vmatprep.mubr.msk.bf16.mxu1 %vm448_vm0, %v889_v24 }
  0xbe   : > { %488 = vmatmul.mubr.bf16.vlgmr.msra.gmra.mrb[0].mxu0 %v886_v23 }
  0xbf   : > { %722 = vmatprep.mubr.msk.bf16.mxu0 %vm448_vm0, %v889_v24 }
  0xc4   : > { %549 = vmatmul.mubr.bf16.gmra.mrb[4].mxu1 %v891_v25 }
  0xc5   : > { %v413_v26 = vpop.permute.xlu0 %412  ;;  %v418_v28 = vpop.permute.xlu1 %417 }
  0xc6   : > { %498 = vmatmul.mubr.bf16.gmra.mrb[4].mxu0 %v891_v25 }
  0xc9   : > { %v423_v49 = vpop.permute.xlu1 %422  ;;  %v428_v53 = vpop.permute.xlu0 %427 }
 0x18f   : > { %v542_v27 = vpop.f32.mrb[0].mxu1 }
 0x190   : > { %v543_v29 = vadd.f32 %v542_v27, %v413_v26  ;;  %v544_v30 = vpop.f32.mrb[1].mxu1 }
 0x191   : > { %v489_v31 = vpop.f32.mrb[0].mxu0  ;;  %v545_v32 = vpop.f32.mrb[2].mxu1 }
 0x192   : > { %vm559_vm9 = vcmp.ge.f32.partialorder %v543_v29, 0.0  ;;  %v571_v33 = vmul.f32 0.3, %v543_v29  ;;  %v490_v34 = vadd.f32 %v489_v31, %v413_v26  ;;  %v546_v35 = vadd.f32 %v545_v32, %v418_v28  ;;  %v491_v36 = vpop.f32.mrb[1].mxu0  ;;  %v547_v37 = vpop.f32.mrb[3].mxu1 }
 0x193   : > { %v492_v38 = vadd.f32 %v491_v36, %v413_v26  ;;  %v493_v39 = vpop.f32.mrb[2].mxu0 }
 0x194   : > { %v583_v40 = vsel %vm559_vm9, %v543_v29, %v571_v33  ;;  %vm557_vm11 = vcmp.ge.f32.partialorder %v490_v34, 0.0  ;;  %v569_v41 = vmul.f32 0.3, %v490_v34  ;;  %vm562_vm12 = vcmp.ge.f32.partialorder %v546_v35, 0.0  ;;  %v495_v42 = vpop.f32.mrb[3].mxu0 }
 0x195   : > { %v736_v43 = vpack.c.bf16 %v583_v40, %v583_v40  ;;  %v574_v44 = vmul.f32 0.3, %v546_v35  ;;  %vm558_vm13 = vcmp.ge.f32.partialorder %v492_v38, 0.0  ;;  %v570_v45 = vmul.f32 0.3, %v492_v38 }
 0x196   : > { %v581_v46 = vsel %vm557_vm11, %v490_v34, %v569_v41  ;;  %v494_v47 = vadd.f32 %v493_v39, %v418_v28  ;;  %v496_v48 = vadd.f32 %v495_v42, %v418_v28 }
 0x197   : > { %635 = vst.msk [vmem:[%s1005_s20 + $0x8] sm:$0xf] %vm634_vm10, %v736_v43  ;;  %v586_v50 = vsel %vm562_vm12, %v546_v35, %v574_v44  ;;  %v582_v51 = vsel %vm558_vm13, %v492_v38, %v570_v45  ;;  %v550_v52 = vpop.f32.mrb[4].mxu1 }
 0x198   : > { %v738_v54 = vpack.c.bf16 %v586_v50, %v586_v50  ;;  %v735_v55 = vpack.c.bf16 %v582_v51, %v581_v46  ;;  %vm560_vm14 = vcmp.ge.f32.partialorder %v494_v47, 0.0  ;;  %v572_v56 = vmul.f32 0.3, %v494_v47  ;;  %v552_v57 = vpop.f32.mrb[5].mxu1 }
 0x199   : > { %vm561_vm15 = vcmp.ge.f32.partialorder %v496_v48, 0.0  ;;  %v573_v58 = vmul.f32 0.3, %v496_v48  ;;  %v551_v59 = vadd.f32 %v550_v52, %v423_v49  ;;  %v499_v60 = vpop.f32.mrb[4].mxu0  ;;  %v553_v61 = vpop.f32.mrb[6].mxu1 }
 0x19a   : > { %637 = vst.msk [vmem:[%s1005_s20 + $0x14] sm:$0xf] %vm634_vm10, %v738_v54  ;;  %633 = vst [vmem:[%s1005_s20] sm:$0xff] %v735_v55  ;;  %v584_v62 = vsel %vm560_vm14, %v494_v47, %v572_v56  ;;  %v500_v63 = vadd.f32 %v499_v60, %v423_v49  ;;  %v554_v1 = vadd.f32 %v553_v61, %v428_v53  ;;  %v501_v2 = vpop.f32.mrb[5].mxu0  ;;  %v555_v3 = vpop.f32.mrb[7].mxu1 }
 0x19b   : > { %v585_v4 = vsel %vm561_vm15, %v496_v48, %v573_v58  ;;  %vm565_vm0 = vcmp.ge.f32.partialorder %v551_v59, 0.0  ;;  %v577_v5 = vmul.f32 0.3, %v551_v59  ;;  %v502_v6 = vadd.f32 %v501_v2, %v423_v49  ;;  %v503_v7 = vpop.f32.mrb[6].mxu0 }
 0x19c   : > { %v737_v8 = vpack.c.bf16 %v585_v4, %v584_v62  ;;  %vm563_vm1 = vcmp.ge.f32.partialorder %v500_v63, 0.0  ;;  %v575_v9 = vmul.f32 0.3, %v500_v63  ;;  %vm568_vm2 = vcmp.ge.f32.partialorder %v554_v1, 0.0  ;;  %v505_v10 = vpop.f32.mrb[7].mxu0 }
 0x19d   : > { %v589_v11 = vsel %vm565_vm0, %v551_v59, %v577_v5  ;;  %v580_v12 = vmul.f32 0.3, %v554_v1  ;;  %vm564_vm3 = vcmp.ge.f32.partialorder %v502_v6, 0.0  ;;  %v576_v13 = vmul.f32 0.3, %v502_v6 }
 0x19e   : > { %636 = vst [vmem:[%s1005_s20 + $0xc] sm:$0xff] %v737_v8  ;;  %v740_v14 = vpack.c.bf16 %v589_v11, %v589_v11  ;;  %v587_v15 = vsel %vm563_vm1, %v500_v63, %v575_v9  ;;  %v504_v16 = vadd.f32 %v503_v7, %v428_v53  ;;  %v506_v17 = vadd.f32 %v505_v10, %v428_v53 }
 0x19f   : > { %v592_v18 = vsel %vm568_vm2, %v554_v1, %v580_v12  ;;  %v588_v19 = vsel %vm564_vm3, %v502_v6, %v576_v13 }
 0x1a0   : > { %639 = vst.msk [vmem:[%s1005_s20 + $0x20] sm:$0xf] %vm634_vm10, %v740_v14  ;;  %v742_v20 = vpack.c.bf16 %v592_v18, %v592_v18  ;;  %v739_v21 = vpack.c.bf16 %v588_v19, %v587_v15  ;;  %vm566_vm4 = vcmp.ge.f32.partialorder %v504_v16, 0.0  ;;  %v578_v22 = vmul.f32 0.3, %v504_v16 }
 0x1a1   : > { %vm567_vm5 = vcmp.ge.f32.partialorder %v506_v17, 0.0  ;;  %v579_v0 = vmul.f32 0.3, %v506_v17 }
 0x1a2   : > { %641 = vst.msk [vmem:[%s1005_s20 + $0x2c] sm:$0xf] %vm634_vm10, %v742_v20  ;;  %638 = vst [vmem:[%s1005_s20 + $0x18] sm:$0xff] %v739_v21  ;;  %v590_v23 = vsel %vm566_vm4, %v504_v16, %v578_v22 }
 0x1a3   : > { %v591_v24 = vsel %vm567_vm5, %v506_v17, %v579_v0 }
 0x1a4   : > { %v741_v25 = vpack.c.bf16 %v591_v24, %v590_v23 }
 0x1a6   : > { %640 = vst [vmem:[%s1005_s20 + $0x24] sm:$0xff] %v741_v25 }
 0x1a7 PF: > { %s13_s12 = sadd.s32 1, %s898_s12  }
 0x1a8   : > { %p10_p4 = scmp.ge.s32.totalorder %s13_s12, 4  }
 0x1aa   :  { %12 = sbr.rel (!%p10_p4) target bundleno = 1 (0x1), region = 62 }

// kernel: hsarnn_forward.14
= control target key start
LH: loop header
LB: loop body
LE: loop exit
PB: predicated region body
PF: predicated region fallthrough
CT: control target
= control target key end

     0   :  { %s1418_s15 = smov 0   ;;  %s1748_s0 = inlined_call_operand.vmem [shape: bf16[2,32,316], index: 0, kind: input, shape index: {}]   ;;  %s1749_s1 = inlined_call_operand.vmem [shape: bf16[5,288], index: 1, kind: input, shape index: {}]   ;;  %s1750_s2 = inlined_call_operand.vmem [shape: f32[5,1], index: 2, kind: input, shape index: {}]   ;;  %s1751_s3 = inlined_call_operand.vmem [shape: f32[2,5,1], index: 3, kind: output, shape index: {0}]   ;;  %s1752_s4 = inlined_call_operand.vmem [shape: f32[2,5,1], index: 4, kind: output, shape index: {1}]  }
   0x1 LB: > { %s1032_s16 = sadd.s32 4294967295, %s1380_s15   ;;  %p1036_p0 = scmp.ge.s32.totalorder %s1380_s15, 1  ;;  %s1380_s15 = sphi %s1418_s15, %s15_s15  }
   0x2   : > { %p165_p1 = scmp.lt.s32.totalorder %s1380_s15, 3 }
   0x4   : > { %p166_p2 = pnand %p1036_p0, %p165_p1 }
   0x5   : > { %p194_p3 = scmp.lt.s32.totalorder (!%p166_p2), %s1032_s16, 1  ;;  %s1382_s21 = smov (!%p166_p2), 127   ;;  %v1386_v35 = vmov (!%p166_p2), 0   ;;  %v1477_v37 = vld [vmem:[%s1749_s1] sm:$0x77] (!%p166_p2)  ;;  %vm264_vm0 = vcmask (!%p166_p2), 1039360  }
   0x6   : > { %169 = sbr.rel (%p166_p2) target bundleno = 935 (0x3a7), region = 32  ;;  %s1383_s22 = smov (!%p166_p2), 126   ;;  %749 = vmatprep.mubr.bf16.mxu1 (!%p166_p2), %v1386_v35  ;;  %1356 = vset.pattern.permute.xlu0 (!%p166_p2), %v1386_v35  ;;  %v1483_v38 = vcombine.high (!%p166_p2), %v1477_v37, %v1477_v37  ;;  %v656_v39 = vld [vmem:[%s1750_s2] sm:$0x1f] (!%p166_p2)  ;;  %vm309_vm1 = vcmask (!%p166_p2), 1031168   ;;  %vm579_vm2 = vcmask (!%p166_p2), 769024  }
   0x7   : > { %s1384_s23 = smov (!%p166_p2), 94   ;;  %s1385_s24 = smov (!%p166_p2), 112   ;;  %vm354_vm3 = vcmask (!%p166_p2), 916480   ;;  %vm672_vm4 = vcmask (!%p166_p2), 261120   ;;  %vm399_vm5 = vcmask (!%p166_p2), 908288   ;;  %vm444_vm6 = vcmask (!%p166_p2), 900096  }
   0x8   : > { %s1387_s25 = smov (!%p166_p2), 111   ;;  %s1388_s26 = smov (!%p166_p2), 110   ;;  %708 = vmatprep.mubr.bf16.mxu0 (!%p166_p2), %v1483_v38  ;;  %vm489_vm7 = vcmask (!%p166_p2), 785408   ;;  %vm534_vm8 = vcmask (!%p166_p2), 777216   ;;  %vm1392_vm9 = vmmov (!%p166_p2), 0  }
   0x9   : > { %s1389_s27 = smov (!%p166_p2), 96   ;;  %s1390_s30 = smov (!%p166_p2), 95  }
   0xd   : > { %s1754_s16 = smov (!%p194_p3, %s1032_s16), 1 }
   0xe   : > { %s1096_s17 = smul.u32 48, %s1754_s16  ;;  %s1038_s9 = sshll.u32 %s1754_s16, 3 }
   0xf   : > { %s206_s12 = scalar_lea.vmem %s1752_s4, %s1038_s9 }
  0x10   : > { %s198_s20 = scalar_lea.vmem %s1748_s0, %s1096_s17  ;;  %s202_s17 = scalar_lea.vmem %s1751_s3, %s1038_s9 }
  0x11   : > { %v208_v0 = vld [vmem:[%s198_s20] sm:$0xff]  ;;  %v1432_v1 = vld [vmem:[%s198_s20 + $0x8] sm:$0xf]  ;;  %v210_v2 = vld [vmem:[%s198_s20 + $0xc] sm:$0xff] }
  0x12   : > { %v217_v3 = vunpack.c.h.bf16 %v208_v0  ;;  %v218_v4 = vunpack.c.l.bf16 %v1432_v1  ;;  %v216_v5 = vunpack.c.l.bf16 %v208_v0  ;;  %v219_v6 = vunpack.c.l.bf16 %v210_v2  ;;  %v1435_v7 = vld [vmem:[%s198_s20 + $0x14] sm:$0xf]  ;;  %v212_v8 = vld [vmem:[%s198_s20 + $0x18] sm:$0xff]  ;;  %v1437_v9 = vld [vmem:[%s198_s20 + $0x20] sm:$0xf] }
  0x13   : > { %v220_v10 = vunpack.c.h.bf16 %v210_v2  ;;  %v221_v11 = vunpack.c.l.bf16 %v1435_v7  ;;  %v223_v12 = vunpack.c.h.bf16 %v212_v8  ;;  %v224_v13 = vunpack.c.l.bf16 %v1437_v9  ;;  %v214_v14 = vld [vmem:[%s198_s20 + $0x24] sm:$0xff]  ;;  %v1441_v15 = vld [vmem:[%s198_s20 + $0x2c] sm:$0xf] }
  0x14   : > { %v1116_v16 = vpack.i.bf16 %v218_v4, %v217_v3  ;;  %v1443_v17 = vpack.i.bf16 %v219_v6, %v216_v5  ;;  %v226_v18 = vunpack.c.h.bf16 %v214_v14  ;;  %v227_v19 = vunpack.c.l.bf16 %v1441_v15 }
  0x15   : > { %v1121_v20 = vpack.i.bf16 %v221_v11, %v220_v10  ;;  %v1131_v21 = vpack.i.bf16 %v224_v13, %v223_v12  ;;  %v222_v22 = vunpack.c.l.bf16 %v212_v8  ;;  %v225_v23 = vunpack.c.l.bf16 %v214_v14 }
  0x16   : > { %1117 = vrot.lane.b32.xlu0 %v1116_v16, %s1382_s21  ;;  %1127 = vrot.lane.b32.xlu1 %v1443_v17, %s1382_s21  ;;  %v1136_v24 = vpack.i.bf16 %v227_v19, %v226_v18  ;;  %v1296_v26 = vpack.i.bf16 %v221_v11, %v218_v4  ;;  %v1301_v27 = vpack.i.bf16 %v220_v10, %v217_v3 }
  0x17   : > { %v1447_v25 = vpack.i.bf16 %v225_v23, %v222_v22  ;;  %v1450_v28 = vpack.i.bf16 %v227_v19, %v224_v13  ;;  %v1452_v29 = vpack.i.bf16 %v226_v18, %v223_v12  ;;  %v1041_v30 = vcombine.high %v208_v0, %v210_v2 }
  0x18   : > { %v1040_v31 = vcombine.low %v208_v0, %v210_v2  ;;  %v1044_v32 = vcombine.high %v212_v8, %v214_v14  ;;  %v1043_v33 = vcombine.low %v212_v8, %v214_v14  ;;  %v1042_v34 = vcombine.low %v1432_v1, %v1435_v7 }
  0x19   : > { %676 = vmatprep.subr.bf16.mxu0 %v1041_v30  ;;  %v1045_v36 = vcombine.low %v1437_v9, %v1441_v15 }
  0x1a   : > { %1122 = vrot.lane.b32.xlu0 %v1121_v20, %s1382_s21  ;;  %1132 = vrot.lane.b32.xlu1 %v1131_v21, %s1382_s21 }
  0x1b   : > { %677 = vmatpush1.bf16.msra.mxu0 %v1040_v31 }
  0x1c   : > { %678 = vmatprep.subr.bf16.mxu0 %v1044_v32 }
  0x1e   : > { %1137 = vrot.lane.b32.xlu0 %v1136_v24, %s1382_s21  ;;  %1142 = vrot.lane.b32.xlu1 %v1447_v25, %s1382_s21 }
  0x1f   : > { %679 = vmatpush1.bf16.msra.mxu0 %v1043_v33 }
  0x22   : > { %1147 = vrot.lane.b32.xlu0 %v1116_v16, %s1383_s22  ;;  %1152 = vrot.lane.b32.xlu1 %v1121_v20, %s1383_s22 }
  0x26   : > { %1157 = vrot.lane.b32.xlu0 %v1443_v17, %s1383_s22  ;;  %1162 = vrot.lane.b32.xlu1 %v1131_v21, %s1383_s22 }
  0x2a   : > { %1167 = vrot.lane.b32.xlu0 %v1136_v24, %s1383_s22  ;;  %1172 = vrot.lane.b32.xlu1 %v1447_v25, %s1383_s22 }
  0x2e   : > { %1177 = vrot.lane.b32.xlu0 %v1116_v16, %s1384_s23  ;;  %1182 = vrot.lane.b32.xlu1 %v1121_v20, %s1384_s23 }
  0x32   : > { %1187 = vrot.lane.b32.xlu0 %v1443_v17, %s1384_s23  ;;  %1192 = vrot.lane.b32.xlu1 %v1116_v16, %s1385_s24 }
  0x36   : > { %1197 = vrot.lane.b32.xlu0 %v1121_v20, %s1385_s24  ;;  %1202 = vrot.lane.b32.xlu1 %v1443_v17, %s1385_s24 }
  0x3a   : > { %1207 = vrot.lane.b32.xlu0 %v1131_v21, %s1384_s23  ;;  %1212 = vrot.lane.b32.xlu1 %v1136_v24, %s1384_s23 }
  0x3e   : > { %1217 = vrot.lane.b32.xlu0 %v1447_v25, %s1384_s23  ;;  %1222 = vrot.lane.b32.xlu1 %v1131_v21, %s1385_s24 }
  0x42   : > { %1227 = vrot.lane.b32.xlu0 %v1136_v24, %s1385_s24  ;;  %1232 = vrot.lane.b32.xlu1 %v1447_v25, %s1385_s24 }
  0x46   : > { %1237 = vrot.lane.b32.xlu0 %v1296_v26, %s1387_s25  ;;  %1242 = vrot.lane.b32.xlu1 %v1301_v27, %s1387_s25 }
  0x4a   : > { %1247 = vrot.lane.b32.xlu0 %v1443_v17, %s1387_s25  ;;  %1252 = vrot.lane.b32.xlu1 %v1450_v28, %s1387_s25 }
  0x4e   : > { %1257 = vrot.lane.b32.xlu0 %v1452_v29, %s1387_s25  ;;  %1262 = vrot.lane.b32.xlu1 %v1447_v25, %s1387_s25 }
  0x52   : > { %1267 = vrot.lane.b32.xlu0 %v1296_v26, %s1388_s26  ;;  %1272 = vrot.lane.b32.xlu1 %v1301_v27, %s1388_s26 }
  0x56   : > { %1277 = vrot.lane.b32.xlu0 %v1443_v17, %s1388_s26  ;;  %1282 = vrot.lane.b32.xlu1 %v1450_v28, %s1388_s26 }
  0x5a   : > { %1287 = vrot.lane.b32.xlu0 %v1452_v29, %s1388_s26  ;;  %1292 = vrot.lane.b32.xlu1 %v1447_v25, %s1388_s26 }
  0x5e   : > { %1297 = vrot.lane.b32.xlu0 %v1296_v26, %s1389_s27  ;;  %1302 = vrot.lane.b32.xlu1 %v1301_v27, %s1389_s27 }
  0x62   : > { %1307 = vrot.lane.b32.xlu0 %v1443_v17, %s1389_s27  ;;  %1312 = vrot.lane.b32.xlu1 %v1450_v28, %s1389_s27 }
  0x66   : > { %1317 = vrot.lane.b32.xlu0 %v1452_v29, %s1389_s27  ;;  %1322 = vrot.lane.b32.xlu1 %v1447_v25, %s1389_s27 }
  0x6a   : > { %1327 = vrot.lane.b32.xlu0 %v1296_v26, %s1390_s30  ;;  %1332 = vrot.lane.b32.xlu1 %v1301_v27, %s1390_s30 }
  0x6e   : > { %1337 = vrot.lane.b32.xlu0 %v1443_v17, %s1390_s30  ;;  %1342 = vrot.lane.b32.xlu1 %v1450_v28, %s1390_s30 }
  0x72   : > { %1347 = vrot.lane.b32.xlu0 %v1452_v29, %s1390_s30  ;;  %1352 = vrot.lane.b32.xlu1 %v1447_v25, %s1390_s30 }
  0x76   : > { %659 = vperm.xlu0 %1356, %v656_v39  }
  0x88   : > { %v1493_v40 = vpop.permute.xlu0 %1117  ;;  %v1128_v41 = vpop.permute.xlu1 %1127 }
  0x89   : > { %v1120_v42 = vunpack.i.h.bf16 %v1493_v40  ;;  %v1119_v43 = vunpack.i.l.bf16 %v1493_v40  ;;  %v1129_v44 = vunpack.i.l.bf16 %v1128_v41  ;;  %v1130_v47 = vunpack.i.h.bf16 %v1128_v41 }
  0x8b   : > { %v266_v50 = vsel %vm264_vm0, %v1119_v43, %v1120_v42  ;;  %v265_v51 = vsel %vm264_vm0, %v1129_v44, %v1119_v43 }
  0x8c   : > { %v1497_v45 = vpop.permute.xlu0 %1122  ;;  %v1499_v46 = vpop.permute.xlu1 %1132 }
  0x8d   : > { %v1125_v48 = vunpack.i.h.bf16 %v1497_v45  ;;  %v1124_v49 = vunpack.i.l.bf16 %v1497_v45  ;;  %v1135_v52 = vunpack.i.h.bf16 %v1499_v46  ;;  %v1134_v53 = vunpack.i.l.bf16 %v1499_v46 }
  0x8f   : > { %v268_v54 = vsel %vm264_vm0, %v1124_v49, %v1125_v48  ;;  %v267_v55 = vsel %vm264_vm0, %v1130_v47, %v1124_v49  ;;  %v270_v0 = vsel %vm264_vm0, %v1134_v53, %v1135_v52 }
  0x90   : > { %v1513_v56 = vpop.permute.xlu0 %1137  ;;  %v1143_v57 = vpop.permute.xlu1 %1142  ;;  %v607_v58 = vpack.c.bf16 %v268_v54, %v266_v50  ;;  %v606_v59 = vpack.c.bf16 %v267_v55, %v265_v51 }
  0x91   : > { %v1140_v60 = vunpack.i.h.bf16 %v1513_v56  ;;  %v1139_v61 = vunpack.i.l.bf16 %v1513_v56  ;;  %v1145_v62 = vunpack.i.h.bf16 %v1143_v57  ;;  %v1144_v63 = vunpack.i.l.bf16 %v1143_v57 }
  0x92   : > { %680 = vmatprep.subr.bf16.mxu0 %v607_v58 }
  0x93   : > { %681 = vmatpush1.bf16.msra.mxu0 %v606_v59  ;;  %v272_v2 = vsel %vm264_vm0, %v1139_v61, %v1140_v60  ;;  %v269_v3 = vsel %vm264_vm0, %v1144_v63, %v1134_v53  ;;  %v271_v4 = vsel %vm264_vm0, %v1145_v62, %v1139_v61  ;;  %v611_v40 = vpack.c.bf16 %v1140_v60, %v1135_v52 }
  0x94   : > { %v1525_v5 = vpop.permute.xlu0 %1147  ;;  %v1527_v6 = vpop.permute.xlu1 %1152  ;;  %v610_v8 = vpack.c.bf16 %v272_v2, %v270_v0  ;;  %v609_v10 = vpack.c.bf16 %v271_v4, %v269_v3 }
  0x95   : > { %v1150_v11 = vunpack.i.h.bf16 %v1525_v5  ;;  %v1149_v12 = vunpack.i.l.bf16 %v1525_v5  ;;  %v1155_v13 = vunpack.i.h.bf16 %v1527_v6  ;;  %v1154_v14 = vunpack.i.l.bf16 %v1527_v6 }
  0x96   : > { %682 = vmatprep.subr.bf16.mxu0 %v610_v8 }
  0x97   : > { %683 = vmatpush1.bf16.msra.mxu0 %v609_v10  ;;  %v311_v16 = vsel %vm309_vm1, %v1149_v12, %v1150_v11  ;;  %v313_v17 = vsel %vm309_vm1, %v1154_v14, %v1155_v13 }
  0x98   : > { %v1158_v18 = vpop.permute.xlu0 %1157  ;;  %v1539_v19 = vpop.permute.xlu1 %1162  ;;  %v613_v20 = vpack.c.bf16 %v313_v17, %v311_v16 }
  0x99   : > { %v1160_v21 = vunpack.i.h.bf16 %v1158_v18  ;;  %v1159_v22 = vunpack.i.l.bf16 %v1158_v18  ;;  %v1165_v23 = vunpack.i.h.bf16 %v1539_v19  ;;  %v1164_v24 = vunpack.i.l.bf16 %v1539_v19 }
  0x9a   : > { %684 = vmatprep.subr.bf16.mxu0 %v613_v20 }
  0x9b   : > { %v310_v25 = vsel %vm309_vm1, %v1159_v22, %v1149_v12  ;;  %v312_v26 = vsel %vm309_vm1, %v1160_v21, %v1154_v14  ;;  %v315_v35 = vsel %vm309_vm1, %v1164_v24, %v1165_v23 }
  0x9c   : > { %v1545_v27 = vpop.permute.xlu0 %1167  ;;  %v1173_v28 = vpop.permute.xlu1 %1172  ;;  %v612_v29 = vpack.c.bf16 %v312_v26, %v310_v25 }
  0x9d   : > { %v1170_v30 = vunpack.i.h.bf16 %v1545_v27  ;;  %v1169_v31 = vunpack.i.l.bf16 %v1545_v27  ;;  %v1175_v32 = vunpack.i.h.bf16 %v1173_v28  ;;  %v1174_v33 = vunpack.i.l.bf16 %v1173_v28 }
  0x9e   : > { %685 = vmatpush1.bf16.msra.mxu0 %v612_v29 }
  0x9f   : > { %v317_v39 = vsel %vm309_vm1, %v1169_v31, %v1170_v30  ;;  %v314_v41 = vsel %vm309_vm1, %v1174_v33, %v1164_v24  ;;  %v316_v43 = vsel %vm309_vm1, %v1175_v32, %v1169_v31  ;;  %v617_v5 = vpack.c.bf16 %v1170_v30, %v1165_v23 }
  0xa0   : > { %v1178_v44 = vpop.permute.xlu0 %1177  ;;  %v1183_v47 = vpop.permute.xlu1 %1182  ;;  %v616_v49 = vpack.c.bf16 %v317_v39, %v315_v35  ;;  %v615_v50 = vpack.c.bf16 %v316_v43, %v314_v41 }
  0xa1   : > { %v1180_v51 = vunpack.i.h.bf16 %v1178_v44  ;;  %v1179_v53 = vunpack.i.l.bf16 %v1178_v44  ;;  %v1185_v54 = vunpack.i.h.bf16 %v1183_v47  ;;  %v1184_v55 = vunpack.i.l.bf16 %v1183_v47 }
  0xa2   : > { %686 = vmatprep.subr.bf16.mxu0 %v616_v49 }
  0xa3   : > { %v1557_v57 = vpack.c.bf16 %v1185_v54, %v1180_v51  ;;  %687 = vmatpush1.bf16.msra.mxu0 %v615_v50  ;;  %v581_v58 = vsel %vm579_vm2, %v1179_v53, %v1180_v51  ;;  %v583_v59 = vsel %vm579_vm2, %v1184_v55, %v1185_v54 }
  0xa4   : > { %v1188_v61 = vpop.permute.xlu0 %1187  ;;  %v1561_v62 = vpop.permute.xlu1 %1192  ;;  %v649_v63 = vpack.c.bf16 %v583_v59, %v581_v58 }
  0xa5   : > { %v1190_v0 = vunpack.i.h.bf16 %v1188_v61  ;;  %v1189_v2 = vunpack.i.l.bf16 %v1188_v61  ;;  %v1195_v3 = vunpack.i.h.bf16 %v1561_v62  ;;  %v1194_v4 = vunpack.i.l.bf16 %v1561_v62 }
  0xa6   : > { %717 = vmatprep.subr.bf16.mxu1 %v649_v63 }
  0xa7   : > { %v580_v8 = vsel %vm579_vm2, %v1189_v2, %v1179_v53  ;;  %v582_v10 = vsel %vm579_vm2, %v1190_v0, %v1184_v55  ;;  %v356_v22 = vsel %vm354_vm3, %v1194_v4, %v1195_v3 }
  0xa8   : > { %v1567_v12 = vpop.permute.xlu0 %1197  ;;  %v1203_v14 = vpop.permute.xlu1 %1202  ;;  %v648_v16 = vpack.c.bf16 %v582_v10, %v580_v8 }
  0xa9   : > { %v1200_v17 = vunpack.i.h.bf16 %v1567_v12  ;;  %v1199_v18 = vunpack.i.l.bf16 %v1567_v12  ;;  %v1205_v20 = vunpack.i.h.bf16 %v1203_v14  ;;  %v1204_v21 = vunpack.i.l.bf16 %v1203_v14  ;;  %v1606_v14 = vld [vmem:[%s1749_s1 + $0x8] ss:$0 sps:$4 sm:$0x77]  }
  0xaa   : > { %718 = vmatpush1.bf16.msra.mxu1 %v648_v16 }
  0xab   : > { %v358_v24 = vsel %vm354_vm3, %v1199_v18, %v1200_v17  ;;  %v355_v25 = vsel %vm354_vm3, %v1204_v21, %v1194_v4  ;;  %v357_v26 = vsel %vm354_vm3, %v1205_v20, %v1199_v18 }
  0xac   : > { %v1579_v28 = vpop.permute.xlu0 %1207  ;;  %v1581_v29 = vpop.permute.xlu1 %1212  ;;  %v619_v31 = vpack.c.bf16 %v358_v24, %v356_v22  ;;  %v618_v32 = vpack.c.bf16 %v357_v26, %v355_v25 }
  0xad   : > { %v1210_v33 = vunpack.i.h.bf16 %v1579_v28  ;;  %v1209_v35 = vunpack.i.l.bf16 %v1579_v28  ;;  %v1215_v39 = vunpack.i.h.bf16 %v1581_v29  ;;  %v1214_v41 = vunpack.i.l.bf16 %v1581_v29 }
  0xae   : > { %688 = vmatprep.subr.bf16.mxu0 %v619_v31 }
  0xaf   : > { %689 = vmatpush1.bf16.msra.mxu0 %v618_v32  ;;  %v585_v43 = vsel %vm579_vm2, %v1209_v35, %v1210_v33  ;;  %v587_v44 = vsel %vm579_vm2, %v1214_v41, %v1215_v39 }
  0xb0   : > { %v1218_v47 = vpop.permute.xlu0 %1217  ;;  %v1593_v49 = vpop.permute.xlu1 %1222  ;;  %v652_v50 = vpack.c.bf16 %v587_v44, %v585_v43 }
  0xb1   : > { %v1220_v51 = vunpack.i.h.bf16 %v1218_v47  ;;  %v1219_v53 = vunpack.i.l.bf16 %v1218_v47  ;;  %v1225_v54 = vunpack.i.h.bf16 %v1593_v49  ;;  %v1224_v55 = vunpack.i.l.bf16 %v1593_v49 }
  0xb2   : > { %719 = vmatprep.subr.bf16.mxu1 %v652_v50 }
  0xb3   : > { %v584_v58 = vsel %vm579_vm2, %v1219_v53, %v1209_v35  ;;  %v586_v59 = vsel %vm579_vm2, %v1220_v51, %v1214_v41  ;;  %v360_v16 = vsel %vm354_vm3, %v1224_v55, %v1225_v54 }
  0xb4   : > { %v1599_v61 = vpop.permute.xlu0 %1227  ;;  %v1233_v63 = vpop.permute.xlu1 %1232  ;;  %v651_v0 = vpack.c.bf16 %v586_v59, %v584_v58 }
  0xb5   : > { %v1230_v2 = vunpack.i.h.bf16 %v1599_v61  ;;  %v1229_v4 = vunpack.i.l.bf16 %v1599_v61  ;;  %v1235_v8 = vunpack.i.h.bf16 %v1233_v63  ;;  %v1234_v10 = vunpack.i.l.bf16 %v1233_v63 }
  0xb6   : > { %720 = vmatpush1.bf16.msra.mxu1 %v651_v0 }
  0xb7   : > { %v362_v18 = vsel %vm354_vm3, %v1229_v4, %v1230_v2  ;;  %v359_v20 = vsel %vm354_vm3, %v1234_v10, %v1224_v55  ;;  %v361_v21 = vsel %vm354_vm3, %v1235_v8, %v1229_v4  ;;  %v623_v62 = vpack.c.bf16 %v1230_v2, %v1225_v54 }
  0xb8   : > { %v1238_v22 = vpop.permute.xlu0 %1237  ;;  %v1243_v24 = vpop.permute.xlu1 %1242  ;;  %v622_v25 = vpack.c.bf16 %v362_v18, %v360_v16  ;;  %v621_v26 = vpack.c.bf16 %v361_v21, %v359_v20 }
  0xb9   : > { %v1240_v31 = vunpack.i.h.bf16 %v1238_v22  ;;  %v1239_v32 = vunpack.i.l.bf16 %v1238_v22  ;;  %v1245_v35 = vunpack.i.h.bf16 %v1243_v24  ;;  %v1244_v41 = vunpack.i.l.bf16 %v1243_v24  ;;  %1049 = vmatmul.mubr.msk.bf16.vlgmr.msra.gmra.mrb[0].mxu1 %vm672_vm4, %v1606_v14 }
  0xba   : > { %690 = vmatprep.subr.bf16.mxu0 %v622_v25  ;;  %790 = vmatprep.mubr.bf16.mxu1 %v1483_v38 }
  0xbb   : > { %v626_v43 = vpack.c.bf16 %v1240_v31, %v1239_v32  ;;  %691 = vmatpush1.bf16.msra.mxu0 %v621_v26  ;;  %v401_v44 = vsel %vm399_vm5, %v1244_v41, %v1239_v32  ;;  %v403_v47 = vsel %vm399_vm5, %v1245_v35, %v1240_v31 }
  0xbc   : > { %v1248_v50 = vpop.permute.xlu0 %1247  ;;  %v1253_v51 = vpop.permute.xlu1 %1252  ;;  %v625_v53 = vpack.c.bf16 %v403_v47, %v401_v44  ;;  %v608_v47 = vpack.c.bf16 %v1125_v48, %v1120_v42 }
  0xbd   : > { %v1250_v55 = vunpack.i.h.bf16 %v1248_v50  ;;  %v1249_v58 = vunpack.i.l.bf16 %v1248_v50  ;;  %v1255_v59 = vunpack.i.h.bf16 %v1253_v51  ;;  %v1254_v63 = vunpack.i.l.bf16 %v1253_v51  ;;  %1059 = vmatprep.subr.bf16.mxu1 %v626_v43 }
  0xbe   : > { %692 = vmatprep.subr.bf16.mxu0 %v625_v53  ;;  %1060 = vmatpush3.bf16.msra.mxu1 %v1042_v34 }
  0xbf   : > { %v629_v38 = vpack.c.bf16 %v1255_v59, %v1254_v63  ;;  %v400_v0 = vsel %vm399_vm5, %v1249_v58, %v1244_v41  ;;  %v402_v4 = vsel %vm399_vm5, %v1250_v55, %v1245_v35 }
  0xc0   : > { %v1258_v8 = vpop.permute.xlu0 %1257  ;;  %v1263_v10 = vpop.permute.xlu1 %1262  ;;  %v624_v16 = vpack.c.bf16 %v402_v4, %v400_v0 }
  0xc1   : > { %v1260_v18 = vunpack.i.h.bf16 %v1258_v8  ;;  %v1259_v20 = vunpack.i.l.bf16 %v1258_v8  ;;  %v1265_v21 = vunpack.i.h.bf16 %v1263_v10  ;;  %v1264_v22 = vunpack.i.l.bf16 %v1263_v10  ;;  %1061 = vmatprep.subr.bf16.mxu1 %v629_v38 }
  0xc2   : > { %693 = vmatpush1.bf16.msra.mxu0 %v624_v16  ;;  %1062 = vmatpush3.bf16.msra.mxu1 %v1045_v36 }
  0xc3   : > { %v405_v1 = vsel %vm399_vm5, %v1259_v20, %v1254_v63  ;;  %v407_v7 = vsel %vm399_vm5, %v1260_v18, %v1255_v59  ;;  %v404_v34 = vsel %vm399_vm5, %v1264_v22, %v1259_v20  ;;  %v406_v24 = vsel %vm399_vm5, %v1265_v21, %v1260_v18 }
  0xc4   : > { %v1268_v25 = vpop.permute.xlu0 %1267  ;;  %v1273_v26 = vpop.permute.xlu1 %1272  ;;  %v628_v31 = vpack.c.bf16 %v407_v7, %v405_v1  ;;  %v627_v32 = vpack.c.bf16 %v406_v24, %v404_v34 }
  0xc5   : > { %v1270_v35 = vunpack.i.h.bf16 %v1268_v25  ;;  %v1269_v41 = vunpack.i.l.bf16 %v1268_v25  ;;  %v1275_v43 = vunpack.i.h.bf16 %v1273_v26  ;;  %v1274_v44 = vunpack.i.l.bf16 %v1273_v26 }
  0xc6   : > { %694 = vmatprep.subr.bf16.mxu0 %v628_v31 }
  0xc7   : > { %v632_v9 = vpack.c.bf16 %v1270_v35, %v1269_v41  ;;  %695 = vmatpush1.bf16.msra.mxu0 %v627_v32  ;;  %v446_v15 = vsel %vm444_vm6, %v1274_v44, %v1269_v41  ;;  %v448_v36 = vsel %vm444_vm6, %v1275_v43, %v1270_v35  ;;  %v614_v35 = vpack.c.bf16 %v1155_v13, %v1150_v11 }
  0xc8   : > { %v1278_v50 = vpop.permute.xlu0 %1277  ;;  %v1283_v51 = vpop.permute.xlu1 %1282  ;;  %v631_v53 = vpack.c.bf16 %v448_v36, %v446_v15 }
  0xc9   : > { %v1280_v55 = vunpack.i.h.bf16 %v1278_v50  ;;  %v1279_v58 = vunpack.i.l.bf16 %v1278_v50  ;;  %v1285_v59 = vunpack.i.h.bf16 %v1283_v51  ;;  %v1284_v63 = vunpack.i.l.bf16 %v1283_v51  ;;  %1063 = vmatprep.subr.bf16.mxu1 %v632_v9 }
  0xca   : > { %696 = vmatprep.subr.bf16.mxu0 %v631_v53  ;;  %1064 = vmatpush3.bf16.msra.mxu1 %v608_v47 }
  0xcb   : > { %v635_v38 = vpack.c.bf16 %v1285_v59, %v1284_v63  ;;  %v445_v0 = vsel %vm444_vm6, %v1279_v58, %v1274_v44  ;;  %v447_v4 = vsel %vm444_vm6, %v1280_v55, %v1275_v43 }
  0xcc   : > { %v1288_v42 = vpop.permute.xlu0 %1287  ;;  %v1293_v45 = vpop.permute.xlu1 %1292  ;;  %v630_v48 = vpack.c.bf16 %v447_v4, %v445_v0 }
  0xcd   : > { %v1290_v8 = vunpack.i.h.bf16 %v1288_v42  ;;  %v1289_v10 = vunpack.i.l.bf16 %v1288_v42  ;;  %v1295_v16 = vunpack.i.h.bf16 %v1293_v45  ;;  %v1294_v18 = vunpack.i.l.bf16 %v1293_v45  ;;  %1065 = vmatprep.subr.bf16.mxu1 %v635_v38 }
  0xce   : > { %697 = vmatpush1.bf16.msra.mxu0 %v630_v48  ;;  %1066 = vmatpush3.bf16.msra.mxu1 %v611_v40 }
  0xcf   : > { %v450_v20 = vsel %vm444_vm6, %v1289_v10, %v1284_v63  ;;  %v452_v21 = vsel %vm444_vm6, %v1290_v8, %v1285_v59  ;;  %v449_v22 = vsel %vm444_vm6, %v1294_v18, %v1289_v10  ;;  %v451_v46 = vsel %vm444_vm6, %v1295_v16, %v1290_v8 }
  0xd0   : > { %v1298_v56 = vpop.permute.xlu0 %1297  ;;  %v1303_v52 = vpop.permute.xlu1 %1302  ;;  %v634_v60 = vpack.c.bf16 %v452_v21, %v450_v20  ;;  %v633_v1 = vpack.c.bf16 %v451_v46, %v449_v22  ;;  %v620_v20 = vpack.c.bf16 %v1200_v17, %v1195_v3  ;;  %vm884_vm6 = vcmask 1044480  }
  0xd1   : > { %v1300_v7 = vunpack.i.h.bf16 %v1298_v56  ;;  %v1299_v34 = vunpack.i.l.bf16 %v1298_v56  ;;  %v1305_v24 = vunpack.i.h.bf16 %v1303_v52  ;;  %v1304_v25 = vunpack.i.l.bf16 %v1303_v52 }
  0xd2   : > { %698 = vmatprep.subr.bf16.mxu0 %v634_v60 }
  0xd3   : > { %v638_v26 = vpack.c.bf16 %v1300_v7, %v1299_v34  ;;  %699 = vmatpush1.bf16.msra.mxu0 %v633_v1  ;;  %v491_v31 = vsel %vm489_vm7, %v1304_v25, %v1299_v34  ;;  %v493_v32 = vsel %vm489_vm7, %v1305_v24, %v1300_v7 }
  0xd4   : > { %v1308_v41 = vpop.permute.xlu0 %1307  ;;  %v1313_v43 = vpop.permute.xlu1 %1312  ;;  %v637_v44 = vpack.c.bf16 %v493_v32, %v491_v31 }
  0xd5   : > { %v1310_v9 = vunpack.i.h.bf16 %v1308_v41  ;;  %v1309_v15 = vunpack.i.l.bf16 %v1308_v41  ;;  %v1315_v36 = vunpack.i.h.bf16 %v1313_v43  ;;  %v1314_v47 = vunpack.i.l.bf16 %v1313_v43  ;;  %1067 = vmatprep.subr.bf16.mxu1 %v638_v26 }
  0xd6   : > { %700 = vmatprep.subr.bf16.mxu0 %v637_v44  ;;  %1068 = vmatpush3.bf16.msra.mxu1 %v614_v35  ;;  %v1391_v41 = vmov 0.0  }
  0xd7   : > { %v641_v50 = vpack.c.bf16 %v1315_v36, %v1314_v47  ;;  %v490_v51 = vsel %vm489_vm7, %v1309_v15, %v1304_v25  ;;  %v492_v53 = vsel %vm489_vm7, %v1310_v9, %v1305_v24  ;;  %v1046_v25 = vcombine.low %v1477_v37, %v1477_v37 }
  0xd8   : > { %v1318_v6 = vpop.permute.xlu0 %1317  ;;  %v1323_v11 = vpop.permute.xlu1 %1322  ;;  %v636_v13 = vpack.c.bf16 %v492_v53, %v490_v51  ;;  %v653_v37 = vpack.c.bf16 %v1215_v39, %v1210_v33 }
  0xd9   : > { %v1320_v55 = vunpack.i.h.bf16 %v1318_v6  ;;  %v1319_v58 = vunpack.i.l.bf16 %v1318_v6  ;;  %v1325_v59 = vunpack.i.h.bf16 %v1323_v11  ;;  %v1324_v63 = vunpack.i.l.bf16 %v1323_v11  ;;  %1069 = vmatprep.subr.bf16.mxu1 %v641_v50 }
  0xda   : > { %701 = vmatpush1.bf16.msra.mxu0 %v636_v13  ;;  %1070 = vmatpush3.bf16.msra.mxu1 %v617_v5  ;;  %v847_v50 = vlaneseq }
  0xdb   : > { %v495_v38 = vsel %vm489_vm7, %v1319_v58, %v1314_v47  ;;  %v497_v0 = vsel %vm489_vm7, %v1320_v55, %v1315_v36  ;;  %v494_v4 = vsel %vm489_vm7, %v1324_v63, %v1319_v58  ;;  %v496_v19 = vsel %vm489_vm7, %v1325_v59, %v1320_v55 }
  0xdc   : > { %v1328_v27 = vpop.permute.xlu0 %1327  ;;  %v1333_v23 = vpop.permute.xlu1 %1332  ;;  %v640_v30 = vpack.c.bf16 %v497_v0, %v495_v38  ;;  %v639_v40 = vpack.c.bf16 %v496_v19, %v494_v4  ;;  %vm887_vm7 = vcmask 208896  }
  0xdd   : > { %v1330_v42 = vunpack.i.h.bf16 %v1328_v27  ;;  %v1329_v45 = vunpack.i.l.bf16 %v1328_v27  ;;  %v1335_v48 = vunpack.i.h.bf16 %v1333_v23  ;;  %v1334_v8 = vunpack.i.l.bf16 %v1333_v23 }
  0xde   : > { %702 = vmatprep.subr.bf16.mxu0 %v640_v30 }
  0xdf   : > { %v644_v10 = vpack.c.bf16 %v1330_v42, %v1329_v45  ;;  %703 = vmatpush1.bf16.msra.mxu0 %v639_v40  ;;  %v536_v16 = vsel %vm534_vm8, %v1334_v8, %v1329_v45  ;;  %v538_v18 = vsel %vm534_vm8, %v1335_v48, %v1330_v42 }
  0xe0   : > { %v1338_v21 = vpop.permute.xlu0 %1337  ;;  %v1343_v22 = vpop.permute.xlu1 %1342  ;;  %v643_v46 = vpack.c.bf16 %v538_v18, %v536_v16 }
  0xe1   : > { %v1340_v56 = vunpack.i.h.bf16 %v1338_v21  ;;  %v1339_v52 = vunpack.i.l.bf16 %v1338_v21  ;;  %v1345_v60 = vunpack.i.h.bf16 %v1343_v22  ;;  %v1344_v1 = vunpack.i.l.bf16 %v1343_v22  ;;  %1071 = vmatprep.subr.bf16.mxu1 %v644_v10 }
  0xe2   : > { %704 = vmatprep.subr.bf16.mxu0 %v643_v46  ;;  %1072 = vmatpush3.bf16.msra.mxu1 %v620_v20 }
  0xe3   : > { %v647_v7 = vpack.c.bf16 %v1345_v60, %v1344_v1  ;;  %v535_v34 = vsel %vm534_vm8, %v1339_v52, %v1334_v8  ;;  %v537_v24 = vsel %vm534_vm8, %v1340_v56, %v1335_v48 }
  0xe4   : > { %v1348_v3 = vpop.permute.xlu0 %1347  ;;  %v1353_v12 = vpop.permute.xlu1 %1352  ;;  %v642_v17 = vpack.c.bf16 %v537_v24, %v535_v34 }
  0xe5   : > { %v1350_v26 = vunpack.i.h.bf16 %v1348_v3  ;;  %v1349_v31 = vunpack.i.l.bf16 %v1348_v3  ;;  %v1355_v32 = vunpack.i.h.bf16 %v1353_v12  ;;  %v1354_v35 = vunpack.i.l.bf16 %v1353_v12  ;;  %1073 = vmatprep.subr.bf16.mxu1 %v647_v7 }
  0xe6   : > { %705 = vmatpush1.bf16.msra.mxu0 %v642_v17  ;;  %1074 = vmatpush3.bf16.msra.mxu1 %v623_v62 }
  0xe7   : > { %1084 = vmatprep.subr.bf16.mxu1 %v1391_v41  ;;  %v540_v49 = vsel %vm534_vm8, %v1349_v31, %v1344_v1  ;;  %v542_v61 = vsel %vm534_vm8, %v1350_v26, %v1345_v60  ;;  %v539_v54 = vsel %vm534_vm8, %v1354_v35, %v1349_v31  ;;  %v541_v2 = vsel %vm534_vm8, %v1355_v32, %v1350_v26 }
  0xe8   : > { %v646_v43 = vpack.c.bf16 %v542_v61, %v540_v49  ;;  %v645_v44 = vpack.c.bf16 %v541_v2, %v539_v54  ;;  %vm935_vm8 = vcmask 4096  }
  0xe9   : > { %791 = vmatmul.mubr.bf16.vlgmr.msra.gmra.mrb[4].mxu1 %v1046_v25 }
  0xea   : > { %706 = vmatprep.subr.bf16.mxu0 %v646_v43  ;;  %1085 = vmatpush3.bf16.msra.mxu1 %v1557_v57  ;;  %v848_v57 = vand.u32 127, %v847_v50 }
  0xeb   : > { %707 = vmatpush1.bf16.msra.mxu0 %v645_v44  ;;  %1086 = vmatprep.subr.bf16.mxu1 %v1391_v41 }
  0xec   : > { %1088 = vmatprep.mubr.msk.bf16.mxu1 %vm1392_vm9, %v1391_v41  ;;  %v849_v51 = vadd.s32 128, %v848_v57  ;;  %v850_v53 = vadd.s32 256, %v848_v57  ;;  %v851_v5 = vcvt.s32.f32 %v848_v57 }
  0xee   : > { %709 = vmatmul.mubr.bf16.vlgmr.msra.gmra.mrb[0].mxu0 %v1046_v25  ;;  %1087 = vmatpush3.bf16.msra.mxu1 %v653_v37  ;;  %v852_v28 = vcvt.s32.f32 %v849_v51  ;;  %v853_v6 = vcvt.s32.f32 %v850_v53  ;;  %v854_v29 = vadd.f32 0.5, %v851_v5  ;;  %vm872_vm11 = vcmp.lt.f32.partialorder %v851_v5, 160.0 }
  0xf0   : > { %v855_v33 = vadd.f32 0.5, %v852_v28  ;;  %v856_v39 = vadd.f32 0.5, %v853_v6  ;;  %v1690_v11 = vmul.f32 0.0625, %v854_v29  ;;  %vm873_vm13 = vcmp.lt.f32.partialorder %v852_v28, 160.0 }
  0xf1   : > { %1089 = vmatmul.mubr.msk.bf16.vlgmr.msra.gmra.mrb[8].mxu1 %vm672_vm4, %v1606_v14  ;;  %vm874_vm0 = vcmp.lt.f32.partialorder %v853_v6, 160.0 }
  0xf2   : > { %v1692_v13 = vmul.f32 0.0625, %v855_v33  ;;  %v1694_v55 = vmul.f32 0.0625, %v856_v39  ;;  %v860_v14 = vfloor.f32 %v1690_v11 }
  0xf4   : > { %v861_v58 = vfloor.f32 %v1692_v13  ;;  %v862_v59 = vfloor.f32 %v1694_v55  ;;  %v863_v38 = vmul.f32 16.0, %v860_v14 }
  0xf5   : > { %v660_v40 = vpop.permute.xlu0 %659 }
  0xf6   : > { %v864_v4 = vmul.f32 16.0, %v861_v58  ;;  %v865_v23 = vmul.f32 16.0, %v862_v59  ;;  %v1705_v42 = vsub.f32 %v851_v5, %v863_v38  ;;  %v919_v38 = vmul.f32 0.22222222, %v860_v14 }
  0xf8   : > { %v1707_v48 = vsub.f32 %v852_v28, %v864_v4  ;;  %v1709_v16 = vsub.f32 %v853_v6, %v865_v23  ;;  %vm869_vm10 = vcmp.lt.f32.partialorder %v1705_v42, 10.0  ;;  %v921_v4 = vmul.f32 0.22222222, %v862_v59 }
  0xf9   : > { %vm875_vm3 = vmand %vm869_vm10, %vm872_vm11 }
  0xfa   : > { %vm870_vm12 = vcmp.lt.f32.partialorder %v1707_v48, 10.0  ;;  %vm871_vm15 = vcmp.lt.f32.partialorder %v1709_v16, 10.0  ;;  %v915_v23 = vmul.f32 0.22222222, %v1709_v16 }
  0xfb   : > { %vm876_vm4 = vmand %vm870_vm12, %vm873_vm13 }
  0xfc   : > { %vm877_vm5 = vmand %vm871_vm15, %vm874_vm0  ;;  %v1053_v11 = vadd.f32 -1.0, %v915_v23 }
 0x18c   : > { %v751_v9 = vpop.f32.mrb[0].mxu1 }
 0x18d   : > { %v753_v15 = vpop.f32.mrb[1].mxu1 }
 0x18e   : > { %v755_v36 = vpop.f32.mrb[2].mxu1 }
 0x18f   : > { %v756_v47 = vpop.f32.mrb[3].mxu1 }
 0x1bc   : > { %v1075_v63 = vpop.f32.mrb[4].mxu1 }
 0x1bd   : > { %v1076_v0 = vpop.f32.mrb[5].mxu1 }
 0x1be   : > { %v1077_v19 = vadd.f32 %v1076_v0, %v1075_v63  ;;  %v1078_v27 = vpop.f32.mrb[6].mxu1  ;;  %v920_v0 = vmul.f32 0.22222222, %v861_v58 }
 0x1bf   : > { %v1079_v30 = vpop.f32.mrb[7].mxu1  ;;  %v914_v27 = vmul.f32 0.22222222, %v1707_v48 }
 0x1c0   : > { %v793_v21 = vadd.f32 %v1077_v19, %v660_v40  ;;  %v913_v19 = vmul.f32 0.22222222, %v1705_v42  ;;  %v1054_v30 = vadd.f32 -1.0, %v919_v38 }
 0x1c1   : > { %v710_v45 = vpop.f32.mrb[0].mxu0 }
 0x1c2   : > { %v711_v8 = vadd.f32 %v710_v45, %v660_v40  ;;  %v712_v10 = vpop.f32.mrb[1].mxu0  ;;  %v1056_v45 = vadd.f32 -1.0, %v921_v4 }
 0x1c3   : > { %v713_v18 = vadd.f32 %v712_v10, %v660_v40  ;;  %v714_v20 = vpop.f32.mrb[2].mxu0  ;;  %v1055_v40 = vadd.f32 -1.0, %v920_v0 }
 0x1c4   : > { %v752_v22 = vadd.f32 %v751_v9, %v711_v8  ;;  %v715_v46 = vpop.f32.mrb[3].mxu0  ;;  %v832_v56 = vpop.f32.mrb[8].mxu1  ;;  %v1051_v8 = vadd.f32 -1.0, %v913_v19 }
 0x1c5   : > { %v754_v52 = vadd.f32 %v753_v15, %v713_v18  ;;  %v833_v60 = vadd.f32 %v832_v56, %v793_v21  ;;  %v1090_v1 = vpop.f32.mrb[9].mxu1  ;;  %v1052_v18 = vadd.f32 -1.0, %v914_v27 }
 0x1c6   : > { %vm838_vm14 = vcmp.ge.f32.partialorder %v752_v22, 0.0  ;;  %v841_v7 = vmul.f32 0.3, %v752_v22  ;;  %v835_v34 = vpop.f32.mrb[10].mxu1 }
 0x1c7   : > { %vm839_vm1 = vcmp.ge.f32.partialorder %v754_v52, 0.0  ;;  %v842_v24 = vmul.f32 0.3, %v754_v52  ;;  %vm840_vm2 = vcmp.ge.f32.partialorder %v833_v60, 0.0  ;;  %v843_v62 = vmul.f32 0.3, %v833_v60 }
 0x1c8   : > { %v844_v3 = vsel %vm838_vm14, %v752_v22, %v841_v7  ;;  %v1091_v12 = vpop.f32.mrb[11].mxu1 }
 0x1c9   : > { %v878_v17 = vmul.f32 10000.0, %v844_v3  ;;  %v845_v25 = vsel %vm839_vm1, %v754_v52, %v842_v24  ;;  %v846_v26 = vsel %vm840_vm2, %v833_v60, %v843_v62 }
 0x1ca   : > { %v879_v31 = vmul.f32 10000.0, %v845_v25  ;;  %v880_v32 = vmul.f32 10000.0, %v846_v26 }
 0x1cb   : > { %v881_v35 = vsel %vm875_vm3, %v878_v17, -1e+30 }
 0x1cc   : > { %v882_v41 = vsel %vm876_vm4, %v879_v31, -1e+30  ;;  %v883_v49 = vsel %vm877_vm5, %v880_v32, -1e+30  ;;  %v885_v61 = vsel %vm884_vm6, %v881_v35, -inf }
 0x1cd   : > { %v886_v54 = vsel %vm884_vm6, %v882_v41, -inf  ;;  %v888_v43 = vsel %vm887_vm7, %v883_v49, -inf }
 0x1ce   : > { %v889_v2 = vmax.f32 %v885_v61, %v886_v54 }
 0x1d0   : > { %v890_v44 = vmax.f32 %v889_v2, %v888_v43 }
 0x1d2   : > { %891 = vmax.xlane.f32.xlu1 %v890_v44 }
 0x25f   : > { %v892_v37 = vpop.xlane.xlu1 %891 }
 0x260   : > { %v893_v9 = vsub.f32 %v881_v35, %v892_v37  ;;  %v894_v15 = vsub.f32 %v882_v41, %v892_v37  ;;  %v895_v36 = vsub.f32 %v883_v49, %v892_v37 }
 0x262   : > { %v896_v47 = vmul.f32 1.442695, %v893_v9  ;;  %v898_v50 = vmul.f32 1.442695, %v894_v15  ;;  %v900_v57 = vmul.f32 1.442695, %v895_v36 }
 0x264   : > { %1366 = vpow2.f32 %v896_v47 }
 0x265   : > { %1368 = vpow2.f32 %v898_v50 }
 0x266   : > { %1370 = vpow2.f32 %v900_v57 }
 0x26e   : > { %v1367_v51 = vpop.eup %1366 }
 0x26f   : > { %v1369_v53 = vpop.eup %1368  ;;  %v902_v5 = vsel %vm884_vm6, %v1367_v51, 0.0 }
 0x270   : > { %v1371_v28 = vpop.eup %1370  ;;  %v903_v6 = vsel %vm884_vm6, %v1369_v53, 0.0 }
 0x271   : > { %v904_v29 = vadd.f32 %v903_v6, %v902_v5  ;;  %v905_v33 = vsel %vm887_vm7, %v1371_v28, 0.0 }
 0x273   : > { %v906_v39 = vadd.f32 %v905_v33, %v904_v29 }
 0x275   : > { %907 = vadd.xlane.f32.xlu0 %v906_v39 }
 0x302   : > { %v908_v63 = vpop.xlane.xlu0 %907 }
 0x303   : > { %1372 = vrcp.f32 %v908_v63 }
 0x30d   : > { %v1373_v10 = vpop.eup %1372 }
 0x30e   : > { %v910_v14 = vmul.f32 %v1373_v10, %v1367_v51  ;;  %v911_v20 = vmul.f32 %v1373_v10, %v1369_v53  ;;  %v912_v13 = vmul.f32 %v1373_v10, %v1371_v28 }
 0x310   : > { %v937_v58 = vmul.f32 %v1054_v30, %v910_v14  ;;  %v938_v21 = vmul.f32 %v1055_v40, %v911_v20  ;;  %v939_v55 = vmul.f32 %v1056_v45, %v912_v13  ;;  %v925_v59 = vmul.f32 %v1051_v8, %v910_v14 }
 0x311   : > { %v926_v42 = vmul.f32 %v1052_v18, %v911_v20  ;;  %v927_v22 = vmul.f32 %v1053_v11, %v912_v13 }
 0x312   : > { %v940_v48 = vsel %vm884_vm6, %v937_v58, 0.0  ;;  %v941_v16 = vsel %vm884_vm6, %v938_v21, 0.0  ;;  %v928_v46 = vsel %vm884_vm6, %v925_v59, 0.0  ;;  %v943_v60 = vsel %vm887_vm7, %v939_v55, 0.0 }
 0x313   : > { %v942_v56 = vadd.f32 %v941_v16, %v940_v48  ;;  %v929_v52 = vsel %vm884_vm6, %v926_v42, 0.0  ;;  %v931_v34 = vsel %vm887_vm7, %v927_v22, 0.0 }
 0x314   : > { %v930_v1 = vadd.f32 %v929_v52, %v928_v46 }
 0x315   : > { %v944_v7 = vadd.f32 %v943_v60, %v942_v56 }
 0x316   : > { %v932_v24 = vadd.f32 %v931_v34, %v930_v1 }
 0x317   : > { %945 = vadd.xlane.f32.xlu0 %v944_v7 }
 0x318   : > { %933 = vadd.xlane.f32.xlu1 %v932_v24 }
 0x3a4   : > { %v946_v62 = vpop.xlane.xlu0 %945 }
 0x3a5   : > { %947 = vst.msk [vmem:[%s206_s12] sm:$0x1f] %vm935_vm8, %v946_v62  ;;  %v934_v3 = vpop.xlane.xlu1 %933 }
 0x3a6   : > { %936 = vst.msk [vmem:[%s202_s17] sm:$0x1f] %vm935_vm8, %v934_v3 }
 0x3a7 PF: > { %s15_s15 = sadd.s32 1, %s1380_s15  }
 0x3a8   : > { %p12_p4 = scmp.ge.s32.totalorder %s15_s15, 4  }
 0x3aa   :  { %14 = sbr.rel (!%p12_p4) target bundleno = 1 (0x1), region = 74 }

// kernel: hsarnn_forward.15
= control target key start
LH: loop header
LB: loop body
LE: loop exit
PB: predicated region body
PF: predicated region fallthrough
CT: control target
= control target key end

     0   :  { %s1709_s6 = smov 1   ;;  %s1710_s10 = smov 2   ;;  %s2100_s0 = inlined_call_operand.smem [shape: u32[32], index: -1, kind: input, shape index: {}] }
   0x1   :  { %s1765_s5 = sld [smem:[%s2100_s0]]   ;;  %s1711_s14 = smov 3  }
   0x2   :  { %s1770_s9 = sld [smem:[%s2100_s0 + %s1709_s6]]   ;;  %s1712_s18 = smov 4  }
   0x3   :  { %s1775_s13 = sld [smem:[%s2100_s0 + %s1710_s10]]   ;;  %s1713_s22 = smov 5  }
   0x4   :  { %s1780_s17 = sld [smem:[%s2100_s0 + %s1711_s14]]   ;;  %s1714_s26 = smov 6  }
   0x5   :  { %s1785_s21 = sld [smem:[%s2100_s0 + %s1712_s18]]   ;;  %s1715_s30 = smov 7  }
   0x6   :  { %s1790_s25 = sld [smem:[%s2100_s0 + %s1713_s22]]   ;;  %s1716_s4 = smov 8  }
   0x7   :  { %s1795_s29 = sld [smem:[%s2100_s0 + %s1714_s26]]   ;;  %s1717_s10 = smov 9  }
   0x8   :  { %s1800_s3 = sld [smem:[%s2100_s0 + %s1715_s30]]   ;;  %s1718_s15 = smov 10  }
   0x9   :  { %s1805_s8 = sld [smem:[%s2100_s0 + %s1716_s4]]   ;;  %s1719_s20 = smov 11  }
   0xa   :  { %s1810_s14 = sld [smem:[%s2100_s0 + %s1717_s10]]   ;;  %s1720_s26 = smov 12  }
   0xb   :  { %s1815_s19 = sld [smem:[%s2100_s0 + %s1718_s15]]   ;;  %s1721_s1 = smov 13  }
   0xc   :  { %s1820_s24 = sld [smem:[%s2100_s0 + %s1719_s20]]   ;;  %s1722_s7 = smov 14  }
   0xd   :  { %s1825_s30 = sld [smem:[%s2100_s0 + %s1720_s26]]   ;;  %s1723_s15 = smov 15  }
   0xe   :  { %2110 = sst [smem:[#allocation17_spill]] %s1800_s3  ;;  %s1724_s22 = smov 16  }
   0xf   :  { %s1830_s6 = sld [smem:[%s2100_s0 + %s1721_s1]]   ;;  %s1725_s28 = smov 17  }
  0x10   :  { %s1835_s12 = sld [smem:[%s2100_s0 + %s1722_s7]]   ;;  %s1726_s7 = smov 18  }
  0x11   :  { %s1840_s20 = sld [smem:[%s2100_s0 + %s1723_s15]]   ;;  %s1727_s15 = smov 19  }
  0x12   :  { %2111 = sst [smem:[#allocation18_spill]] %s1820_s24 }
  0x13   :  { %s1845_s27 = sld [smem:[%s2100_s0 + %s1724_s22]]   ;;  %s1728_s22 = smov 20  }
  0x14   :  { %s1850_s4 = sld [smem:[%s2100_s0 + %s1725_s28]]   ;;  %s1729_s28 = smov 21  }
  0x15   :  { %s1855_s3 = sld [smem:[%s2100_s0 + %s1726_s7]]   ;;  %s1730_s7 = smov 22  }
  0x16   :  { %s1860_s24 = sld [smem:[%s2100_s0 + %s1727_s15]]   ;;  %s1731_s15 = smov 23  }
  0x19   :  { %2112 = sst [smem:[#allocation19_spill]] %s1845_s27 }
  0x1a   :  { %2113 = sst [smem:[#allocation20_spill]] %s1850_s4 }
  0x1b   :  { %2114 = sst [smem:[#allocation21_spill]] %s1855_s3 }
  0x1c   :  { %2115 = sst [smem:[#allocation22_spill]] %s1860_s24 }
  0x1d   :  { %s1865_s27 = sld [smem:[%s2100_s0 + %s1728_s22]]   ;;  %s1732_s22 = smov 24  }
  0x1e   :  { %s1870_s4 = sld [smem:[%s2100_s0 + %s1729_s28]]   ;;  %s1733_s28 = smov 25  }
  0x1f   :  { %s1875_s3 = sld [smem:[%s2100_s0 + %s1730_s7]]   ;;  %s1734_s7 = smov 26  }
  0x20   :  { %s1880_s24 = sld [smem:[%s2100_s0 + %s1731_s15]]   ;;  %s1735_s15 = smov 27  }
  0x23   :  { %2116 = sst [smem:[#allocation23_spill]] %s1865_s27 }
  0x24   :  { %2117 = sst [smem:[#allocation24_spill]] %s1870_s4 }
  0x25   :  { %2118 = sst [smem:[#allocation25_spill]] %s1875_s3 }
  0x26   :  { %2119 = sst [smem:[#allocation26_spill]] %s1880_s24 }
  0x27   :  { %s1885_s27 = sld [smem:[%s2100_s0 + %s1732_s22]]   ;;  %s1736_s22 = smov 28  }
  0x28   :  { %s1890_s4 = sld [smem:[%s2100_s0 + %s1733_s28]]   ;;  %s1737_s28 = smov 29  }
  0x29   :  { %s1895_s3 = sld [smem:[%s2100_s0 + %s1734_s7]]   ;;  %s1738_s7 = smov 30  }
  0x2a   :  { %s1900_s24 = sld [smem:[%s2100_s0 + %s1735_s15]]   ;;  %s1739_s15 = smov 31  }
  0x2d   :  { %2120 = sst [smem:[#allocation27_spill]] %s1885_s27 }
  0x2e   :  { %2121 = sst [smem:[#allocation28_spill]] %s1890_s4 }
  0x2f   :  { %2122 = sst [smem:[#allocation29_spill]] %s1895_s3 }
  0x30   :  { %2123 = sst [smem:[#allocation30_spill]] %s1900_s24 }
  0x31   :  { %s1905_s27 = sld [smem:[%s2100_s0 + %s1736_s22]]  }
  0x32   :  { %s1910_s4 = sld [smem:[%s2100_s0 + %s1737_s28]]  }
  0x33   :  { %s1915_s3 = sld [smem:[%s2100_s0 + %s1738_s7]]  }
  0x34   :  { %s1920_s24 = sld [smem:[%s2100_s0 + %s1739_s15]]  }
  0x35   :  { %69 = vsyncpa [#allocation3], 0 }
  0x36   :  { %70 = vsyncpa [#allocation5], 0 }
  0x37   :  { %71 = vsyncpa [#allocation8], 0  ;;  %v125_v0 = vld [vmem:[%s1810_s14] sm:$0xff]  ;;  %v126_v1 = vld [vmem:[%s1810_s14 + $0x8] sm:$0xff]  ;;  %vm205_vm0 = vcmask 1041408   ;;  %v1740_v3 = vmov 0.0|0.0  }
  0x38   :  { %v123_v2 = vld [vmem:[%s1805_s8] sm:$0xff]  ;;  %1422 = vmatprep.subr.bf16.mxu0 %v1740_v3  ;;  %v1423_v4 = vpack.c.bf16 %v126_v1, %v125_v0  ;;  %1425 = vmatprep.subr.bf16.mxu1 %v1740_v3  ;;  %v124_v5 = vld [vmem:[%s1805_s8 + $0x8] sm:$0x3]  ;;  %vm1741_vm1 = vmmov 1   ;;  %vm1742_vm3 = vmmov 0   ;;  %v1743_v8 = vmov 0.0  }
  0x39   :  { %vm1928_vm2 = vmpackc.low %vm205_vm0, %vm1741_vm1  ;;  %v1426_v7 = vpack.c.bf16 %v124_v5, %v123_v2  ;;  %1325 = vmatprep.mubr.msk.f32.mxu0 %vm1742_vm3, %v1743_v8  ;;  %1332 = vmatprep.mubr.msk.f32.mxu1 %vm1742_vm3, %v1743_v8  ;;  %v280_v9 = vld [vmem:[%s1815_s19] sm:$0xff]  ;;  %v281_v10 = vld [vmem:[%s1815_s19 + $0x8] sm:$0xff]  ;;  %vm127_vm4 = vcmask 130048   ;;  %vm201_vm5 = vcmask 80896  }
  0x3a   :  { %1424 = vmatpush3.bf16.msra.mxu0 %v1423_v4  ;;  %v1939_v11 = vld [vmem:[%s1795_s29] sm:$0x3]  ;;  %v1430_v12 = vpack.c.bf16 %v281_v10, %v280_v9  ;;  %v400_v14 = vld [vmem:[%s1830_s6 + $0x8] sm:$0xff]  ;;  %v282_v17 = vld [vmem:[%s1815_s19 + $0x10] sm:$0xff] }
  0x3b   :  { %v399_v13 = vld [vmem:[%s1830_s6] sm:$0xff]  ;;  %1428 = vmatpush3.bf16.msk.msra.mxu1 %vm1928_vm2, %v1426_v7  ;;  %1429 = vmatprep.subr.bf16.mxu0 %v1740_v3  ;;  %v283_v18 = vld [vmem:[%s1815_s19 + $0x18] sm:$0xff]  ;;  %v398_v20 = vld [vmem:[%s1825_s30 + $0x8] sm:$0x3] }
  0x3c   :  { %v122_v15 = vld [vmem:[%s1765_s5] sm:$0x3]  ;;  %v1436_v16 = vpack.c.bf16 %v400_v14, %v399_v13  ;;  %1435 = vmatprep.subr.bf16.mxu1 %v1740_v3  ;;  %v1433_v21 = vpack.c.bf16 %v283_v18, %v282_v17  ;;  %v549_v25 = vld [vmem:[%s1835_s12 + $0x8] sm:$0xff] }
  0x3d   :  { %v397_v19 = vld [vmem:[%s1825_s30] sm:$0xff]  ;;  %1326 = vmatmul.mubr.msk.f32.vlgmr.msra.gmra.mrb[0].mxu0 %vm127_vm4, %v1939_v11 }
  0x3e   :  { %1333 = vmatmul.mubr.msk.f32.vlgmr.msra.gmra.mrb[0].mxu1 %vm201_vm5, %v122_v15  ;;  %1431 = vmatpush3.bf16.msra.mxu0 %v1430_v12  ;;  %v634_v22 = vld [vmem:[%s1790_s25] sm:$0x3]  ;;  %v1439_v23 = vpack.c.bf16 %v398_v20, %v397_v19 }
  0x3f   :  { %1437 = vmatpush3.bf16.msra.mxu1 %v1436_v16  ;;  %1432 = vmatprep.subr.bf16.mxu0 %v1740_v3  ;;  %v548_v24 = vld [vmem:[%s1835_s12] sm:$0xff] }
  0x40   :  { %72 = vsyncpa [#allocation11], 0  ;;  %1350 = vmatprep.mubr.msk.f32.mxu1 %vm1742_vm3, %v1743_v8  ;;  %1438 = vmatprep.subr.bf16.mxu1 %v1740_v3  ;;  %s1744_s0 = smov 32   ;;  %v279_v26 = vld [vmem:[%s1775_s13] sm:$0x3]  ;;  %vm284_vm6 = vcmask 261120   ;;  %v1443_v27 = vpack.c.bf16 %v549_v25, %v548_v24 }
  0x41   :  { %1343 = vmatprep.mubr.msk.f32.mxu0 %vm1742_vm3, %v1743_v8  ;;  %643 = vrot.lane.b32.xlu1 %v634_v22, %s1744_s0  ;;  %v367_v28 = vld [vmem:[%s1780_s17] sm:$0x3]  ;;  %v550_v30 = vld [vmem:[%s1835_s12 + $0x10] sm:$0xff]  ;;  %v551_v31 = vld [vmem:[%s1835_s12 + $0x18] sm:$0xff]  ;;  %s2126_s5 = sld [smem:[#allocation18_spill]]  ;;  %s2127_s13 = sld [smem:[#allocation20_spill]] }
  0x42   :  { %1434 = vmatpush3.bf16.msra.mxu0 %v1433_v21  ;;  %1351 = vmatmul.mubr.msk.f32.vlgmr.msra.gmra.mrb[2].mxu1 %vm127_vm4, %v1939_v11  ;;  %v396_v29 = vld [vmem:[%s1770_s9] sm:$0x3]  ;;  %v1446_v32 = vpack.c.bf16 %v551_v31, %v550_v30  ;;  %s1745_s9 = smov 64   ;;  %s2128_s17 = sld [smem:[#allocation19_spill]]  ;;  %vm932_vm7 = vcmask 254976   ;;  %vm1038_vm8 = vcmask 74752  }
  0x43   :  { %1441 = vmatpush3.bf16.msk.msra.mxu1 %vm1928_vm2, %v1439_v23  ;;  %1442 = vmatprep.subr.bf16.mxu0 %v1740_v3  ;;  %v547_v33 = vld [vmem:[%s1785_s21] sm:$0x3]  ;;  %s2129_s21 = sld [smem:[#allocation17_spill]]  ;;  %s2130_s25 = sld [smem:[#allocation21_spill]]  ;;  %vm950_vm10 = vcmask 123904  }
  0x44   :  { %1357 = vmatprep.mubr.msk.f32.mxu1 %vm1742_vm3, %v1743_v8  ;;  %1448 = vmatprep.subr.bf16.mxu1 %v1740_v3  ;;  %v1265_v48 = vld [vmem:[%s1840_s20] ss:$0 sm:$0xff]  ;;  %s2131_s29 = sld [smem:[#allocation23_spill]]  ;;  %s2132_s8 = sld [smem:[#allocation25_spill]] }
  0x45   :  { %1344 = vmatmul.mubr.msk.f32.vlgmr.msra.gmra.mrb[2].mxu0 %vm284_vm6, %v279_v26  ;;  %376 = vrot.lane.b32.xlu1 %v367_v28, %s1744_s0  ;;  %s1746_s14 = smov 16   ;;  %s2133_s19 = sld [smem:[#allocation22_spill]] }
  0x46   :  { %1444 = vmatpush3.bf16.msra.mxu0 %v1443_v27  ;;  %1358 = vmatmul.mubr.msk.f32.vlgmr.msra.gmra.mrb[4].mxu1 %vm201_vm5, %v396_v29  ;;  %s2134_s30 = sld [smem:[#allocation24_spill]]  ;;  %s2135_s6 = sld [smem:[#allocation26_spill]] }
  0x47   :  { %1445 = vmatprep.subr.bf16.mxu0 %v1740_v3  ;;  %1368 = vmatprep.mubr.msk.f32.mxu0 %vm1742_vm3, %v1743_v8  ;;  %v1259_v51 = vld [vmem:[%s2126_s5] ss:$0 sm:$0xff]  ;;  %v668_v16 = vld [vmem:[%s2127_s13 + $0x8] sm:$0xff]  ;;  %v669_v17 = vld [vmem:[%s2127_s13 + $0x10] sm:$0xff]  ;;  %s1747_s12 = smov 96   ;;  %s1749_s20 = smov [#allocation4]  }
  0x48   :  { %1379 = vmatprep.mubr.msk.f32.mxu1 %vm1742_vm3, %v1743_v8  ;;  %v667_v15 = vld [vmem:[%s2127_s13] sm:$0xff]  ;;  %v670_v19 = vld [vmem:[%s2127_s13 + $0x18] sm:$0xff]  ;;  %v664_v21 = vld [vmem:[%s2128_s17 + $0x8] sm:$0xff]  ;;  %s1141_s22 = sshll.u32 %s1749_s20, 4  ;;  %s1142_s22 = int_to_ptr.vmem [resolvable:$true] %s1141_s22 }
  0x49   :  { %v1449_v18 = vpack.c.bf16 %v668_v16, %v667_v15  ;;  %v663_v20 = vld [vmem:[%s2128_s17] sm:$0xff]  ;;  %v1452_v23 = vpack.c.bf16 %v670_v19, %v669_v17  ;;  %v665_v26 = vld [vmem:[%s2128_s17 + $0x10] sm:$0xff]  ;;  %v666_v27 = vld [vmem:[%s2128_s17 + $0x18] sm:$0xff]  ;;  %s1547_s23 = scalar_lea.vmem %s1142_s22, 32  ;;  %p1552_p1 = scmp.lt.s32.totalorder %s1142_s22, %s1142_s22 }
  0x4a   :  { %1447 = vmatpush3.bf16.msra.mxu0 %v1446_v32  ;;  %v1455_v22 = vpack.c.bf16 %v664_v21, %v663_v20  ;;  %v1458_v28 = vpack.c.bf16 %v666_v27, %v665_v26  ;;  %p1548_p0 = scmp.ne.s32.totalorder %s1142_s22, %s1547_s23  ;;  %p1553_p2 = scmp.lt.s32.totalorder %s1547_s23, %s1547_s23 }
  0x4b   :  { %1454 = vmatprep.subr.bf16.mxu0 %v1740_v3  ;;  %1450 = vmatpush3.bf16.msra.mxu1 %v1449_v18 }
  0x4c   :  { %1451 = vmatprep.subr.bf16.mxu1 %v1740_v3  ;;  %p1554_p3 = por %p1553_p2, %p1552_p1 }
  0x4d   :  { %1369 = vmatmul.mubr.msk.f32.vlgmr.msra.gmra.mrb[4].mxu0 %vm284_vm6, %v547_v33  ;;  %v902_v33 = vld [vmem:[%s2129_s21] sm:$0x3] }
  0x4e   :  { %1390 = vmatprep.mubr.msk.f32.mxu0 %vm1742_vm3, %v1743_v8  ;;  %1456 = vmatpush3.bf16.msra.mxu0 %v1455_v22  ;;  %p1555_p4 = pnand %p1554_p3, %p1548_p0 }
  0x4f   :  { %1457 = vmatprep.subr.bf16.mxu0 %v1740_v3  ;;  %1453 = vmatpush3.bf16.msra.mxu1 %v1452_v23 }
  0x50   :  { %1460 = vmatprep.subr.bf16.mxu1 %v1740_v3 }
  0x52   :  { %1459 = vmatpush3.bf16.msra.mxu0 %v1458_v28 }
  0x53   :  { %1469 = vmatprep.subr.bf16.mxu0 %v1740_v3 }
  0xb3   :  { %v644_v5 = vpop.permute.xlu1 %643 }
  0xb7   :  { %v377_v7 = vpop.permute.xlu1 %376 }
 0x110   :  { %v197_v34 = vpop.f32.mrb[0].mxu0 }
 0x111   :  { %v1327_v35 = vpop.f32.mrb[1].mxu0  ;;  %v275_v36 = vpop.f32.mrb[0].mxu1 }
 0x112   :  { %v276_v37 = vadd.f32 %v275_v36, %v197_v34  ;;  %v1334_v38 = vpop.f32.mrb[1].mxu1  ;;  %v821_v34 = vld [vmem:[%s2130_s25] sm:$0xff]  ;;  %v822_v35 = vld [vmem:[%s2130_s25 + $0x8] sm:$0xff] }
 0x113   :  { %v1461_v36 = vpack.c.bf16 %v822_v35, %v821_v34  ;;  %v958_v38 = vld [vmem:[%s2131_s29 + $0x8] sm:$0xff] }
 0x115   :  { %v467_v39 = vpop.f32.mrb[2].mxu1 }
 0x116   :  { %v1352_v40 = vpop.f32.mrb[3].mxu1 }
 0x117   :  { %v1041_v40 = vld [vmem:[%s2132_s8 + $0x8] sm:$0xff] }
 0x118   :  { %v354_v41 = vpop.f32.mrb[2].mxu0 }
 0x119   :  { %v358_v42 = vadd.f32 %v354_v41, %v276_v37  ;;  %v1345_v43 = vpop.f32.mrb[3].mxu0  ;;  %v543_v44 = vpop.f32.mrb[4].mxu1  ;;  %v957_v37 = vld [vmem:[%s2131_s29] sm:$0xff] }
 0x11a   :  { %v544_v45 = vadd.f32 %v543_v44, %v467_v39  ;;  %v1359_v46 = vpop.f32.mrb[5].mxu1  ;;  %v1040_v39 = vld [vmem:[%s2132_s8] sm:$0xff]  ;;  %v959_v44 = vld [vmem:[%s2131_s29 + $0x10] sm:$0xff] }
 0x11b   :  { %v366_v53 = vadd.f32 %v1259_v51, %v358_v42  ;;  %v1464_v42 = vpack.c.bf16 %v958_v38, %v957_v37  ;;  %v1470_v43 = vpack.c.bf16 %v1041_v40, %v1040_v39  ;;  %v1042_v46 = vld [vmem:[%s2132_s8 + $0x10] sm:$0xff] }
 0x11d   :  { %v1260_v57 = vmul.f32 -1.442695, %v366_v53 }
 0x120   :  { %v621_v47 = vpop.f32.mrb[4].mxu0 }
 0x121   :  { %v625_v49 = vadd.f32 %v621_v47, %v544_v45  ;;  %v1370_v50 = vpop.f32.mrb[5].mxu0  ;;  %v960_v45 = vld [vmem:[%s2131_s29 + $0x18] sm:$0xff] }
 0x122   :  { %v1043_v47 = vld [vmem:[%s2132_s8 + $0x18] sm:$0xff] }
 0x123   :  { %v633_v52 = vadd.f32 %v1265_v48, %v625_v49  ;;  %v1467_v49 = vpack.c.bf16 %v960_v45, %v959_v44  ;;  %v1473_v50 = vpack.c.bf16 %v1043_v47, %v1042_v46 }
 0x125   :  { %1523 = vtanh.f32 %v633_v52  ;;  %v1266_v56 = vmul.f32 -1.442695, %v633_v52 }
 0x126   :  { %1525 = vtanh.f32 %v366_v53 }
 0x127   :  { %1527 = vpow2.f32 %v1266_v56  ;;  %v1270_v56 = vld [vmem:[%s2133_s19] ss:$0 sm:$0xff] }
 0x128   :  { %1529 = vpow2.f32 %v1260_v57 }
 0x12f   :  { %v1524_v54 = vpop.eup %1523 }
 0x130   :  { %648 = vrot.lane.b32.xlu0 %v1524_v54, %s1745_s9  ;;  %v1526_v55 = vpop.eup %1525 }
 0x131   :  { %v1528_v58 = vpop.eup %1527 }
 0x132   :  { %v638_v59 = vadd.f32 1.0, %v1528_v58  ;;  %v1530_v60 = vpop.eup %1529 }
 0x133   :  { %v371_v61 = vadd.f32 1.0, %v1530_v60 }
 0x134   :  { %381 = vrot.lane.b32.xlu0 %v1526_v55, %s1745_s9  ;;  %1531 = vrcp.f32 %v638_v59  ;;  %v1272_v59 = vld [vmem:[%s2134_s30] ss:$0 sm:$0xff] }
 0x135   :  { %1533 = vrcp.f32 %v371_v61 }
 0x13e   :  { %v1532_v62 = vpop.eup %1531 }
 0x13f   :  { %v1534_v1 = vpop.eup %1533  ;;  %v646_v6 = vmul.f32 %v1532_v62, %v644_v5 }
 0x140   :  { %v379_v12 = vmul.f32 %v1534_v1, %v377_v7 }
 0x1a2   :  { %v649_v63 = vpop.permute.xlu0 %648 }
 0x1a3   :  { %v651_v0 = vmul.f32 %v1532_v62, %v649_v63 }
 0x1a5   :  { %653 = vrot.lane.b32.xlu0 %v651_v0, %s1744_s0 }
 0x1a6   :  { %v382_v2 = vpop.permute.xlu0 %381 }
 0x1a7   :  { %v384_v4 = vmul.f32 %v1534_v1, %v382_v2 }
 0x1a9   :  { %386 = vrot.lane.b32.xlu1 %v384_v4, %s1744_s0 }
 0x217   :  { %v654_v9 = vpop.permute.xlu0 %653 }
 0x218   :  { %v1997_v10 = vadd.f32 %v654_v9, %v646_v6 }
 0x21a   :  { %1535 = vtanh.f32 %v1997_v10 }
 0x21b   :  { %v387_v13 = vpop.permute.xlu1 %386 }
 0x21c   :  { %v2000_v14 = vadd.f32 %v387_v13, %v379_v12 }
 0x21e   :  { %1537 = vtanh.f32 %v2000_v14 }
 0x224   :  { %v1536_v24 = vpop.eup %1535 }
 0x225   :  { %659 = vrot.lane.b32.xlu0 %v1536_v24, %s1745_s9 }
 0x228   :  { %v1538_v25 = vpop.eup %1537 }
 0x229   :  { %392 = vrot.lane.b32.xlu1 %v1538_v25, %s1745_s9 }
 0x297   :  { %v660_v29 = vpop.permute.xlu0 %659 }
 0x298   :  { %v662_v30 = vmul.f32 %v1532_v62, %v660_v29 }
 0x29a   :  { %672 = vrot.lane.b32.xlu0 %v662_v30, %s1744_s0 }
 0x29b   :  { %v393_v31 = vpop.permute.xlu1 %392 }
 0x29c   :  { %v395_v32 = vmul.f32 %v1534_v1, %v393_v31 }
 0x29e   :  { %747 = vrot.lane.b32.xlu1 %v395_v32, %s1744_s0 }
 0x2a2   :  { %911 = vrot.lane.b32.xlu1 %v902_v33, %s1746_s14 }
 0x30c   :  { %v673_v41 = vpop.permute.xlu0 %672 }
 0x30d   :  { %1380 = vmatmul.mubr.msk.f32.vlgmr.msra.gmra.mrb[6].mxu1 %vm284_vm6, %v673_v41  ;;  %940 = vst.msk [vmem:[#allocation6] sm:$0x3] %vm932_vm7, %v673_v41 }
 0x30e   :  { %1462 = vmatpush3.bf16.msra.mxu1 %v1461_v36  ;;  %1397 = vmatprep.mubr.msk.f32.mxu1 %vm1742_vm3, %v1743_v8 }
 0x30f   :  { %1463 = vmatprep.subr.bf16.mxu1 %v1740_v3 }
 0x310   :  { %v748_v48 = vpop.permute.xlu1 %747 }
 0x311   :  { %1391 = vmatmul.mubr.msk.f32.vlgmr.msra.gmra.mrb[6].mxu0 %vm284_vm6, %v748_v48  ;;  %1398 = vmatmul.mubr.msk.f32.vlgmr.msra.gmra.mrb[8].mxu1 %vm127_vm4, %v1939_v11  ;;  %933 = vst.msk [vmem:[#allocation2] sm:$0x3] %vm932_vm7, %v748_v48 }
 0x312   :  { %1465 = vmatpush3.bf16.msra.mxu1 %v1464_v42  ;;  %1471 = vmatpush3.bf16.msra.mxu0 %v1470_v43 }
 0x313   :  { %1466 = vmatprep.subr.bf16.mxu1 %v1740_v3  ;;  %1472 = vmatprep.subr.bf16.mxu0 %v1740_v3 }
 0x314   :  { %1408 = vmatprep.mubr.msk.f32.mxu1 %vm1742_vm3, %v1743_v8  ;;  %1419 = vmatprep.mubr.msk.f32.mxu0 %vm1742_vm3, %v1743_v8  ;;  %v1274_v8 = vld [vmem:[%s2135_s6] ss:$0 sm:$0xff]  ;;  %v912_v16 = vpop.permute.xlu1 %911 }
 0x316   :  { %1468 = vmatpush3.bf16.msra.mxu1 %v1467_v49  ;;  %1474 = vmatpush3.bf16.msra.mxu0 %v1473_v50 }
 0x319   :  { %1409 = vmatmul.mubr.msk.f32.vlgmr.msra.gmra.mrb[10].mxu1 %vm284_vm6, %v748_v48  ;;  %1420 = vmatmul.mubr.msk.f32.vlgmr.msra.gmra.mrb[8].mxu0 %vm284_vm6, %v673_v41 }
 0x3e0   :  { %v742_v11 = vpop.f32.mrb[6].mxu1 }
 0x3e1   :  { %v1381_v51 = vpop.f32.mrb[7].mxu1 }
 0x3e4   :  { %v817_v52 = vpop.f32.mrb[6].mxu0  ;;  %v889_v53 = vpop.f32.mrb[8].mxu1 }
 0x3e5   :  { %v818_v54 = vadd.f32 %v817_v52, %v742_v11  ;;  %v1392_v3 = vpop.f32.mrb[7].mxu0  ;;  %v1399_v55 = vpop.f32.mrb[9].mxu1 }
 0x3e7   :  { %v893_v57 = vadd.f32 %v889_v53, %v818_v54 }
 0x3e9   :  { %v901_v58 = vadd.f32 %v1270_v56, %v893_v57 }
 0x3eb   :  { %1539 = vtanh.f32 %v901_v58  ;;  %v1271_v6 = vmul.f32 -1.442695, %v901_v58 }
 0x3ec   :  { %v1034_v60 = vpop.f32.mrb[10].mxu1  ;;  %v1117_v61 = vpop.f32.mrb[8].mxu0 }
 0x3ed   :  { %v1035_v62 = vadd.f32 %v1272_v59, %v1034_v60  ;;  %v1118_v63 = vadd.f32 %v1274_v8, %v1117_v61  ;;  %v1410_v0 = vpop.f32.mrb[11].mxu1  ;;  %v1421_v1 = vpop.f32.mrb[9].mxu0  ;;  %1541 = vpow2.f32 %v1271_v6 }
 0x3ef   :  { %1039 = vst.msk [vmem:[%s1915_s3] sm:$0x3] %vm1038_vm8, %v1035_v62  ;;  %v1122_v2 = vmul.f32 0.3, %v1118_v63  ;;  %vm1121_vm9 = vcmp.ge.f32.partialorder %v1118_v63, 0.0  ;;  %s1748_s3 = smov 112  }
 0x3f1   :  { %v1123_v4 = vsel %vm1121_vm9, %v1118_v63, %v1122_v2 }
 0x3f2   :  { %1124 = vst.msk [vmem:[#allocation12] sm:$0x3] %vm1038_vm8, %v1123_v4 }
 0x3f5   :  { %v1540_v5 = vpop.eup %1539 }
 0x3f6   :  { %916 = vrot.lane.b32.xlu0 %v1540_v5, %s1747_s12 }
 0x3f7   :  { %v1542_v7 = vpop.eup %1541 }
 0x3f8   :  { %v906_v9 = vadd.f32 1.0, %v1542_v7 }
 0x3fa   :  { %1543 = vrcp.f32 %v906_v9 }
 0x404   :  { %v2052_v12 = vpop.eup %1543 }
 0x405   :  { %v914_v17 = vmul.f32 %v2052_v12, %v912_v16 }
 0x468   :  { %v917_v13 = vpop.permute.xlu0 %916 }
 0x469   :  { %v919_v15 = vmul.f32 %v2052_v12, %v917_v13 }
 0x46b   :  { %921 = vrot.lane.b32.xlu0 %v919_v15, %s1746_s14 }
 0x46f   :  { %935 = vrot.lane.b32.xlu0 %v2000_v14, %s1747_s12 }
 0x4dd   :  { %v922_v18 = vpop.permute.xlu0 %921 }
 0x4de   :  { %v924_v19 = vadd.f32 %v922_v18, %v914_v17 }
 0x4e0   :  { %1545 = vtanh.f32 %v924_v19  ;;  %953 = vrot.lane.b32.xlu0 %v924_v19, %s1748_s3 }
 0x4e1   :  { %v936_v20 = vpop.permute.xlu0 %935 }
 0x4e2   :  { %938 = vst.msk [vmem:[#allocation4] sm:$0x3] %vm932_vm7, %v936_v20 }
 0x4ea   :  { %v1546_v21 = vpop.eup %1545 }
 0x4eb   :  { %927 = vrot.lane.b32.xlu1 %v1546_v21, %s1744_s0 }
 0x4ef   :  { %942 = vrot.lane.b32.xlu1 %v1997_v10, %s1747_s12 }
 0x552   :  { %v954_v22 = vpop.permute.xlu0 %953 }
 0x553   :  { %956 = vst.msk [vmem:[#allocation10] sm:$0x3] %vm950_vm10, %v954_v22 }
 0x554   :  { %1558 = shalt.err (!%p1555_p4)
}
 0x555   :  { %s2136_s26 = sld [smem:[#allocation28_spill]] }
 0x55b   :  { %s1559_s28 = scalar_lea.hbm %s2136_s26, 32 }
 0x55c   :  { %p1560_p5 = scmp.ne.s32.totalorder %s2136_s26, %s1559_s28  ;;  %p1563_p6 = scmp.lt.u32.totalorder %s1559_s28, %s2136_s26 }
 0x55e   :  { %p1565_p7 = pnand %p1563_p6, %p1560_p5 }
 0x560   :  { %1568 = shalt.err (!%p1565_p7)
}
 0x561   :  { %1144 = dma.vmem_to_hbm [thread:$0]  %s1142_s22, 32, %s2136_s26, [#allocation5]  }
 0x562   :  { %s1750_s1 = smov [#allocation10]   ;;  %s1751_s7 = smov [#allocation2]  }
 0x563   :  { %s1181_s2 = sshll.u32 %s1750_s1, 4  ;;  %s1131_s10 = sshll.u32 %s1751_s7, 4  ;;  %s1182_s2 = int_to_ptr.vmem [resolvable:$true] %s1181_s2  ;;  %s1132_s10 = int_to_ptr.vmem [resolvable:$true] %s1131_s10 }
 0x564   :  { %s1569_s11 = scalar_lea.vmem %s1182_s2, 32  ;;  %p1574_p9 = scmp.lt.s32.totalorder %s1182_s2, %s1182_s2 }
 0x565   :  { %p1570_p8 = scmp.ne.s32.totalorder %s1182_s2, %s1569_s11  ;;  %p1575_p10 = scmp.lt.s32.totalorder %s1569_s11, %s1569_s11 }
 0x567   :  { %p1576_p11 = por %p1575_p10, %p1574_p9 }
 0x569   :  { %p1577_p12 = pnand %p1576_p11, %p1570_p8 }
 0x56b   :  { %1580 = shalt.err (!%p1577_p12)
}
 0x56c   :  { %s1581_s15 = scalar_lea.hbm %s1910_s4, 32 }
 0x56d   :  { %p1582_p13 = scmp.ne.s32.totalorder %s1910_s4, %s1581_s15  ;;  %p1585_p0 = scmp.lt.u32.totalorder %s1581_s15, %s1910_s4 }
 0x56f   :  { %p1587_p1 = pnand %p1585_p0, %p1582_p13 }
 0x571   :  { %1590 = shalt.err (!%p1587_p1)
}
 0x572   :  { %1184 = dma.vmem_to_hbm [thread:$0]  %s1182_s2, 32, %s1910_s4, [#allocation11]  }
 0x573   :  { %s1591_s16 = scalar_lea.vmem %s1132_s10, 32  ;;  %p1596_p3 = scmp.lt.s32.totalorder %s1132_s10, %s1132_s10 }
 0x574   :  { %p1592_p2 = scmp.ne.s32.totalorder %s1132_s10, %s1591_s16  ;;  %p1597_p4 = scmp.lt.s32.totalorder %s1591_s16, %s1591_s16 }
 0x576   :  { %p1598_p5 = por %p1597_p4, %p1596_p3 }
 0x578   :  { %p1599_p6 = pnand %p1598_p5, %p1592_p2 }
 0x57a   :  { %1602 = shalt.err (!%p1599_p6)
}
 0x57b   :  { %s2137_s18 = sld [smem:[#allocation27_spill]] }
 0x581   :  { %s1603_s0 = scalar_lea.hbm %s2137_s18, 32 }
 0x582   :  { %p1604_p7 = scmp.ne.s32.totalorder %s2137_s18, %s1603_s0  ;;  %p1607_p8 = scmp.lt.u32.totalorder %s1603_s0, %s2137_s18 }
 0x584   :  { %p1609_p9 = pnand %p1607_p8, %p1604_p7 }
 0x586   :  { %1612 = shalt.err (!%p1609_p9)
}
 0x587   :  { %1134 = dma.vmem_to_hbm [thread:$0]  %s1132_s10, 32, %s2137_s18, [#allocation3]   ;;  %v928_v10 = vpop.permute.xlu1 %927 }
 0x588   :  { %s1752_s5 = smov [#allocation6]   ;;  %s1753_s4 = smov [#allocation7]  }
 0x589   :  { %s1151_s9 = sshll.u32 %s1752_s5, 4  ;;  %s1161_s13 = sshll.u32 %s1753_s4, 4  ;;  %s1152_s9 = int_to_ptr.vmem [resolvable:$true] %s1151_s9  ;;  %s2079_s13 = int_to_ptr.vmem [resolvable:$true] %s1161_s13 }
 0x58a   :  { %s1613_s17 = scalar_lea.vmem %s1152_s9, 32  ;;  %p1618_p11 = scmp.lt.s32.totalorder %s1152_s9, %s1152_s9 }
 0x58b   :  { %p1614_p10 = scmp.ne.s32.totalorder %s1152_s9, %s1613_s17  ;;  %p1619_p12 = scmp.lt.s32.totalorder %s1613_s17, %s1613_s17 }
 0x58d   :  { %p1620_p13 = por %p1619_p12, %p1618_p11 }
 0x58f   :  { %p1621_p0 = pnand %p1620_p13, %p1614_p10 }
 0x591   :  { %1624 = shalt.err (!%p1621_p0)
}
 0x592   :  { %s2138_s21 = sld [smem:[#allocation29_spill]] }
 0x598   :  { %s1625_s25 = scalar_lea.hbm %s2138_s21, 32 }
 0x599   :  { %p1626_p1 = scmp.ne.s32.totalorder %s2138_s21, %s1625_s25  ;;  %p1629_p2 = scmp.lt.u32.totalorder %s1625_s25, %s2138_s21 }
 0x59b   :  { %p1631_p3 = pnand %p1629_p2, %p1626_p1 }
 0x59d   :  { %1634 = shalt.err (!%p1631_p3)
}
 0x59e   :  { %1154 = dma.vmem_to_hbm [thread:$0]  %s1152_s9, 32, %s2138_s21, [#allocation5]   ;;  %v930_v14 = vmul.f32 %v2052_v12, %v928_v10  ;;  %v943_v23 = vpop.permute.xlu1 %942 }
 0x59f   :  { %s1754_s29 = smov [#allocation12]   ;;  %s1755_s14 = smov 80  }
 0x5a0   :  { %s1193_s8 = sshll.u32 %s1754_s29, 4  ;;  %947 = vrot.lane.b32.xlu1 %v930_v14, %s1755_s14  ;;  %s1194_s8 = int_to_ptr.vmem [resolvable:$true] %s1193_s8 }
 0x5a1   :  { %s1635_s19 = scalar_lea.vmem %s1194_s8, 32  ;;  %p1640_p5 = scmp.lt.s32.totalorder %s1194_s8, %s1194_s8 }
 0x5a2   :  { %p1636_p4 = scmp.ne.s32.totalorder %s1194_s8, %s1635_s19  ;;  %p1641_p6 = scmp.lt.s32.totalorder %s1635_s19, %s1635_s19 }
 0x5a4   :  { %p1642_p7 = por %p1641_p6, %p1640_p5 }
 0x5a6   :  { %p1643_p8 = pnand %p1642_p7, %p1636_p4 }
 0x5a8   :  { %1646 = shalt.err (!%p1643_p8)
}
 0x5a9   :  { %s1647_s30 = scalar_lea.hbm %s1920_s24, 32 }
 0x5aa   :  { %p1648_p9 = scmp.ne.s32.totalorder %s1920_s24, %s1647_s30  ;;  %p1651_p10 = scmp.lt.u32.totalorder %s1647_s30, %s1920_s24 }
 0x5ac   :  { %p1653_p11 = pnand %p1651_p10, %p1648_p9 }
 0x5ae   :  { %1656 = shalt.err (!%p1653_p11)
}
 0x5af   :  { %1196 = dma.vmem_to_hbm [thread:$0]  %s1194_s8, 32, %s1920_s24, [#allocation11]   ;;  %945 = vst.msk [vmem:[#allocation7] sm:$0x3] %vm932_vm7, %v943_v23 }
 0x5b0   :  { %s1657_s6 = scalar_lea.vmem %s2079_s13, 32  ;;  %p1662_p13 = scmp.lt.s32.totalorder %s2079_s13, %s2079_s13 }
 0x5b1   :  { %p1658_p12 = scmp.ne.s32.totalorder %s2079_s13, %s1657_s6  ;;  %p1663_p0 = scmp.lt.s32.totalorder %s1657_s6, %s1657_s6 }
 0x5b3   :  { %p1664_p1 = por %p1663_p0, %p1662_p13 }
 0x5b5   :  { %p1665_p2 = pnand %p1664_p1, %p1658_p12 }
 0x5b7   :  { %1668 = shalt.err (!%p1665_p2)
}
 0x5b8   :  { %s2139_s12 = sld [smem:[#allocation30_spill]] }
 0x5be   :  { %s1669_s3 = scalar_lea.hbm %s2139_s12, 32 }
 0x5bf   :  { %p1670_p3 = scmp.ne.s32.totalorder %s2139_s12, %s1669_s3  ;;  %p1673_p4 = scmp.lt.u32.totalorder %s1669_s3, %s2139_s12 }
 0x5c1   :  { %p1675_p5 = pnand %p1673_p4, %p1670_p3 }
 0x5c3   :  { %1678 = shalt.err (!%p1675_p5)
}
 0x5c4   :  { %1164 = dma.vmem_to_hbm [thread:$0]  %s2079_s13, 32, %s2139_s12, [#allocation8]  }
 0x5c5   :  { %s1756_s24 = smov [#allocation9]  }
 0x5c6   :  { %s1171_s20 = sshll.u32 %s1756_s24, 4  ;;  %s1172_s20 = int_to_ptr.vmem [resolvable:$true] %s1171_s20 }
 0x5c7   :  { %s1679_s22 = scalar_lea.vmem %s1172_s20, 32  ;;  %p1684_p7 = scmp.lt.s32.totalorder %s1172_s20, %s1172_s20 }
 0x5c8   :  { %p1680_p6 = scmp.ne.s32.totalorder %s1172_s20, %s1679_s22  ;;  %p1685_p8 = scmp.lt.s32.totalorder %s1679_s22, %s1679_s22 }
 0x5ca   :  { %p1686_p9 = por %p1685_p8, %p1684_p7 }
 0x5cc   :  { %p1687_p10 = pnand %p1686_p9, %p1680_p6 }
 0x612   :  { %v948_v24 = vpop.permute.xlu1 %947 }
 0x613   :  { %951 = vst.msk [vmem:[#allocation9] sm:$0x3] %vm950_vm10, %v948_v24 }
 0x614   :  { %1690 = shalt.err (!%p1687_p10)
}
 0x615   :  { %s1691_s23 = scalar_lea.hbm %s1905_s27, 32 }
 0x616   :  { %p1692_p11 = scmp.ne.s32.totalorder %s1905_s27, %s1691_s23  ;;  %p1695_p12 = scmp.lt.u32.totalorder %s1691_s23, %s1905_s27 }
 0x618   :  { %p1697_p13 = pnand %p1695_p12, %p1692_p11 }
 0x61a   :  { %1700 = shalt.err (!%p1697_p13)
}
 0x61b   :  { %1174 = dma.vmem_to_hbm [thread:$0]  %s1172_s20, 32, %s1905_s27, [#allocation8]  }
 0x61c   :  { %1701 = dma.done.wait [#allocation3], 32  }
 0x61d   :  { %1702 = vsyncadd [#allocation3], 4294967264 }
 0x61e   :  { %1703 = dma.done.wait [#allocation5], 64  }
 0x61f   :  { %1704 = vsyncadd [#allocation5], 4294967232 }
 0x620   :  { %1705 = dma.done.wait [#allocation8], 64  }
 0x621   :  { %1706 = vsyncadd [#allocation8], 4294967232 }
 0x622   :  { %1707 = dma.done.wait [#allocation11], 64  }
 0x623   :  { %1708 = vsyncadd [#allocation11], 4294967232 }
 0x624   :  { %1220 = vsyncpa [#allocation3], 1 }
 0x625   :  { %1221 = vsyncpa [#allocation5], 1 }
 0x626   :  { %1222 = vsyncpa [#allocation8], 1 }
 0x627   :  { %1223 = vsyncpa [#allocation11], 1 }

// kernel: hsarnn_forward.16
= control target key start
LH: loop header
LB: loop body
LE: loop exit
PB: predicated region body
PF: predicated region fallthrough
CT: control target
= control target key end

     0   :  { %s430_s12 = smov 0   ;;  %s457_s0 = inlined_call_operand.vmem [shape: f32[2,5,282], index: 0, kind: input, shape index: {}]   ;;  %s458_s1 = inlined_call_operand.vmem [shape: f32[2,5,1], index: 1, kind: input, shape index: {}]   ;;  %s459_s2 = inlined_call_operand.vmem [shape: f32[2,5,1], index: 2, kind: input, shape index: {}]   ;;  %s460_s3 = inlined_call_operand.vmem [shape: f32[2,5,282], index: 3, kind: output, shape index: {}]  }
   0x1 LB: > { %s367_s13 = sadd.s32 4294967295, %s407_s12   ;;  %p371_p0 = scmp.ge.s32.totalorder %s407_s12, 1  ;;  %s407_s12 = sphi %s430_s12, %s13_s12  }
   0x2   : > { %p155_p1 = scmp.lt.s32.totalorder %s407_s12, 3 }
   0x4   : > { %p156_p2 = pnand %p371_p0, %p155_p1 }
   0x5   : > { %p187_p3 = scmp.lt.s32.totalorder (!%p156_p2), %s367_s13, 1  ;;  %v409_v0 = vmov (!%p156_p2), 0   ;;  %v208_v3 = vlaneseq (!%p156_p2)  ;;  %vm286_vm0 = vcmask (!%p156_p2), 208896  }
   0x6   : > { %159 = sbr.rel (%p156_p2) target bundleno = 177 (0xb1), region = 32  ;;  %394 = vset.pattern.permute.xlu0 (!%p156_p2), %v409_v0 }
   0x7   : > { %v209_v4 = vand.u32 (!%p156_p2), 127, %v208_v3 }
   0x9   : > { %v210_v5 = vadd.s32 (!%p156_p2), 128, %v209_v4  ;;  %v211_v6 = vadd.s32 (!%p156_p2), 256, %v209_v4  ;;  %v212_v7 = vcvt.s32.f32 (!%p156_p2), %v209_v4 }
   0xb   : > { %v213_v8 = vcvt.s32.f32 (!%p156_p2), %v210_v5  ;;  %v214_v9 = vcvt.s32.f32 (!%p156_p2), %v211_v6  ;;  %v215_v10 = vadd.f32 (!%p156_p2), 0.5, %v212_v7 }
   0xd   : > { %s462_s13 = smov (!%p187_p3, %s367_s13), 1  ;;  %v216_v11 = vadd.f32 0.5, %v213_v8  ;;  %v217_v12 = vadd.f32 0.5, %v214_v9  ;;  %v218_v13 = vmul.f32 0.0625, %v215_v10 }
   0xe   : > { %s373_s14 = sshll.u32 %s462_s13, 3  ;;  %s384_s21 = smul.u32 24, %s462_s13 }
   0xf   : > { %s195_s17 = scalar_lea.vmem %s458_s1, %s373_s14  ;;  %s199_s20 = scalar_lea.vmem %s459_s2, %s373_s14  ;;  %v219_v14 = vmul.f32 0.0625, %v216_v11  ;;  %v220_v15 = vmul.f32 0.0625, %v217_v12  ;;  %v221_v16 = vfloor.f32 %v218_v13 }
  0x10   : > { %v242_v1 = vld [vmem:[%s195_s17] sm:$0x1f]  ;;  %s191_s24 = scalar_lea.vmem %s457_s0, %s384_s21  ;;  %s204_s27 = scalar_lea.vmem %s460_s3, %s384_s21 }
  0x11   : > { %245 = vperm.xlu0 %394, %v242_v1   ;;  %v254_v2 = vld [vmem:[%s199_s20] sm:$0x1f]  ;;  %v222_v17 = vfloor.f32 %v219_v14  ;;  %v223_v18 = vfloor.f32 %v220_v15  ;;  %v224_v19 = vmul.f32 16.0, %v221_v16  ;;  %v236_v28 = vmul.f32 0.22222222, %v221_v16 }
  0x12   : > { %v205_v63 = vld [vmem:[%s191_s24] sm:$0x1f]  ;;  %v206_v0 = vld [vmem:[%s191_s24 + $0x8] sm:$0x1f] }
  0x13   : > { %v225_v20 = vmul.f32 16.0, %v222_v17  ;;  %v226_v21 = vmul.f32 16.0, %v223_v18  ;;  %v227_v22 = vsub.f32 %v212_v7, %v224_v19  ;;  %v237_v29 = vmul.f32 0.22222222, %v222_v17 }
  0x14   : > { %v238_v30 = vmul.f32 0.22222222, %v223_v18  ;;  %v379_v35 = vadd.f32 -1.0, %v236_v28 }
  0x15   : > { %257 = vperm.xlu0 %394, %v254_v2   ;;  %v228_v23 = vsub.f32 %v213_v8, %v225_v20  ;;  %v229_v24 = vsub.f32 %v214_v9, %v226_v21  ;;  %v230_v25 = vmul.f32 0.22222222, %v227_v22  ;;  %v380_v36 = vadd.f32 -1.0, %v237_v29  ;;  %v207_v2 = vld [vmem:[%s191_s24 + $0x10] sm:$0x1f] }
  0x16   : > { %v381_v37 = vadd.f32 -1.0, %v238_v30 }
  0x17   : > { %v231_v26 = vmul.f32 0.22222222, %v228_v23  ;;  %v232_v27 = vmul.f32 0.22222222, %v229_v24  ;;  %v376_v31 = vadd.f32 -1.0, %v230_v25 }
  0x19   : > { %v377_v32 = vadd.f32 -1.0, %v231_v26  ;;  %v378_v33 = vadd.f32 -1.0, %v232_v27 }
  0x90   : > { %v246_v34 = vpop.permute.xlu0 %245 }
  0x91   : > { %v248_v38 = vsub.f32 %v376_v31, %v246_v34  ;;  %v249_v39 = vsub.f32 %v377_v32, %v246_v34  ;;  %v250_v40 = vsub.f32 %v378_v33, %v246_v34 }
  0x93   : > { %v251_v45 = vmul.f32 %v248_v38, %v248_v38  ;;  %v252_v46 = vmul.f32 %v249_v39, %v249_v39  ;;  %v253_v47 = vmul.f32 %v250_v40, %v250_v40 }
  0x94   : > { %v258_v41 = vpop.permute.xlu0 %257 }
  0x95   : > { %v260_v42 = vsub.f32 %v379_v35, %v258_v41  ;;  %v261_v43 = vsub.f32 %v380_v36, %v258_v41  ;;  %v262_v44 = vsub.f32 %v381_v37, %v258_v41 }
  0x97   : > { %v263_v48 = vmul.f32 %v260_v42, %v260_v42  ;;  %v264_v49 = vmul.f32 %v261_v43, %v261_v43  ;;  %v265_v50 = vmul.f32 %v262_v44, %v262_v44 }
  0x99   : > { %v266_v51 = vadd.f32 %v263_v48, %v251_v45  ;;  %v267_v52 = vadd.f32 %v264_v49, %v252_v46  ;;  %v268_v53 = vadd.f32 %v265_v50, %v253_v47 }
  0x9b   : > { %v269_v54 = vsub.f32 0.0, %v266_v51  ;;  %v270_v55 = vsub.f32 0.0, %v267_v52  ;;  %v271_v56 = vsub.f32 0.0, %v268_v53 }
  0x9d   : > { %v272_v57 = vmul.f32 10.0, %v269_v54  ;;  %v273_v58 = vmul.f32 10.0, %v270_v55  ;;  %v274_v59 = vmul.f32 10.0, %v271_v56 }
  0x9f   : > { %v275_v60 = vmul.f32 1.442695, %v272_v57  ;;  %v277_v61 = vmul.f32 1.442695, %v273_v58  ;;  %v279_v62 = vmul.f32 1.442695, %v274_v59 }
  0xa1   : > { %395 = vpow2.f32 %v275_v60 }
  0xa2   : > { %397 = vpow2.f32 %v277_v61 }
  0xa3   : > { %399 = vpow2.f32 %v279_v62 }
  0xab   : > { %v396_v1 = vpop.eup %395 }
  0xac   : > { %v398_v3 = vpop.eup %397  ;;  %v281_v4 = vmul.f32 %v396_v1, %v205_v63 }
  0xad   : > { %v400_v5 = vpop.eup %399  ;;  %v282_v6 = vmul.f32 %v398_v3, %v206_v0 }
  0xae   : > { %v283_v7 = vmul.f32 %v400_v5, %v207_v2  ;;  %284 = vst [vmem:[%s204_s27] sm:$0x1f] %v281_v4 }
  0xaf   : > { %285 = vst [vmem:[%s204_s27 + $0x8] sm:$0x1f] %v282_v6 }
  0xb0   : > { %287 = vst.msk [vmem:[%s204_s27 + $0x10] sm:$0x1f] %vm286_vm0, %v283_v7 }
  0xb1 PF: > { %s13_s12 = sadd.s32 1, %s407_s12  }
  0xb2   : > { %p10_p4 = scmp.ge.s32.totalorder %s13_s12, 4  }
  0xb4   :  { %12 = sbr.rel (!%p10_p4) target bundleno = 1 (0x1), region = 68 }

// kernel: hsarnn_forward.13
= control target key start
LH: loop header
LB: loop body
LE: loop exit
PB: predicated region body
PF: predicated region fallthrough
CT: control target
= control target key end

     0   :  { %s1237_s12 = smov 0   ;;  %s1497_s0 = inlined_call_operand.vmem [shape: bf16[2,32,316], index: 0, kind: input, shape index: {}]   ;;  %s1498_s1 = inlined_call_operand.vmem [shape: bf16[5,288], index: 1, kind: input, shape index: {}]   ;;  %s1499_s2 = inlined_call_operand.vmem [shape: f32[5,1], index: 2, kind: input, shape index: {}]   ;;  %s1500_s3 = inlined_call_operand.vmem [shape: f32[2,5,282], index: 3, kind: output, shape index: {}]  }
   0x1 LB: > { %s870_s13 = sadd.s32 4294967295, %s1204_s12   ;;  %p874_p0 = scmp.ge.s32.totalorder %s1204_s12, 1  ;;  %s1204_s12 = sphi %s1237_s12, %s13_s12  }
   0x2   : > { %p137_p1 = scmp.lt.s32.totalorder %s1204_s12, 3 }
   0x4   : > { %p138_p2 = pnand %p874_p0, %p137_p1 }
   0x5   : > { %p161_p3 = scmp.lt.s32.totalorder (!%p138_p2), %s870_s13, 1  ;;  %s1206_s18 = smov (!%p138_p2), 127   ;;  %v1210_v35 = vmov (!%p138_p2), 0   ;;  %v1291_v37 = vld [vmem:[%s1498_s1] sm:$0x77] (!%p138_p2)  ;;  %vm228_vm0 = vcmask (!%p138_p2), 1039360  }
   0x6   : > { %141 = sbr.rel (%p138_p2) target bundleno = 459 (0x1cb), region = 32  ;;  %s1207_s19 = smov (!%p138_p2), 126   ;;  %713 = vmatprep.mubr.bf16.mxu1 (!%p138_p2), %v1210_v35  ;;  %1188 = vset.pattern.permute.xlu0 (!%p138_p2), %v1210_v35  ;;  %v1296_v38 = vcombine.high (!%p138_p2), %v1291_v37, %v1291_v37  ;;  %v620_v39 = vld [vmem:[%s1499_s2] sm:$0x1f] (!%p138_p2)  ;;  %vm273_vm1 = vcmask (!%p138_p2), 1031168   ;;  %vm543_vm2 = vcmask (!%p138_p2), 769024  }
   0x7   : > { %s1208_s20 = smov (!%p138_p2), 94   ;;  %s1209_s21 = smov (!%p138_p2), 112   ;;  %vm318_vm3 = vcmask (!%p138_p2), 916480   ;;  %vm636_vm4 = vcmask (!%p138_p2), 261120   ;;  %vm363_vm5 = vcmask (!%p138_p2), 908288   ;;  %vm408_vm6 = vcmask (!%p138_p2), 900096  }
   0x8   : > { %s1211_s22 = smov (!%p138_p2), 111   ;;  %s1212_s23 = smov (!%p138_p2), 110   ;;  %672 = vmatprep.mubr.bf16.mxu0 (!%p138_p2), %v1296_v38  ;;  %vm453_vm7 = vcmask (!%p138_p2), 785408   ;;  %vm498_vm8 = vcmask (!%p138_p2), 777216   ;;  %vm1216_vm9 = vmmov (!%p138_p2), 0   ;;  %vm813_vm11 = vcmask (!%p138_p2), 208896  }
   0x9   : > { %s1213_s24 = smov (!%p138_p2), 96   ;;  %s1214_s27 = smov (!%p138_p2), 95  }
   0xd   : > { %s1502_s13 = smov (!%p161_p3, %s870_s13), 1 }
   0xe   : > { %s927_s14 = smul.u32 48, %s1502_s13 }
   0xf   : > { %s928_s5 = smul.u32 24, %s1502_s13 }
  0x10   : > { %s165_s17 = scalar_lea.vmem %s1497_s0, %s927_s14 }
  0x11   : > { %v172_v0 = vld [vmem:[%s165_s17] sm:$0xff]  ;;  %v1251_v1 = vld [vmem:[%s165_s17 + $0x8] sm:$0xf]  ;;  %v174_v2 = vld [vmem:[%s165_s17 + $0xc] sm:$0xff]  ;;  %s170_s8 = scalar_lea.vmem %s1500_s3, %s928_s5 }
  0x12   : > { %v181_v3 = vunpack.c.h.bf16 %v172_v0  ;;  %v182_v4 = vunpack.c.l.bf16 %v1251_v1  ;;  %v180_v5 = vunpack.c.l.bf16 %v172_v0  ;;  %v183_v6 = vunpack.c.l.bf16 %v174_v2  ;;  %v1254_v7 = vld [vmem:[%s165_s17 + $0x14] sm:$0xf]  ;;  %v176_v8 = vld [vmem:[%s165_s17 + $0x18] sm:$0xff]  ;;  %v1256_v9 = vld [vmem:[%s165_s17 + $0x20] sm:$0xf] }
  0x13   : > { %v184_v10 = vunpack.c.h.bf16 %v174_v2  ;;  %v185_v11 = vunpack.c.l.bf16 %v1254_v7  ;;  %v187_v12 = vunpack.c.h.bf16 %v176_v8  ;;  %v188_v13 = vunpack.c.l.bf16 %v1256_v9  ;;  %v178_v14 = vld [vmem:[%s165_s17 + $0x24] sm:$0xff]  ;;  %v1260_v15 = vld [vmem:[%s165_s17 + $0x2c] sm:$0xf] }
  0x14   : > { %v948_v16 = vpack.i.bf16 %v182_v4, %v181_v3  ;;  %v1262_v17 = vpack.i.bf16 %v183_v6, %v180_v5  ;;  %v190_v18 = vunpack.c.h.bf16 %v178_v14  ;;  %v191_v19 = vunpack.c.l.bf16 %v1260_v15 }
  0x15   : > { %v953_v20 = vpack.i.bf16 %v185_v11, %v184_v10  ;;  %v963_v21 = vpack.i.bf16 %v188_v13, %v187_v12  ;;  %v186_v22 = vunpack.c.l.bf16 %v176_v8  ;;  %v189_v23 = vunpack.c.l.bf16 %v178_v14 }
  0x16   : > { %949 = vrot.lane.b32.xlu0 %v948_v16, %s1206_s18  ;;  %959 = vrot.lane.b32.xlu1 %v1262_v17, %s1206_s18  ;;  %v968_v24 = vpack.i.bf16 %v191_v19, %v190_v18  ;;  %v1123_v26 = vpack.i.bf16 %v185_v11, %v182_v4  ;;  %v1133_v27 = vpack.i.bf16 %v184_v10, %v181_v3 }
  0x17   : > { %v1266_v25 = vpack.i.bf16 %v189_v23, %v186_v22  ;;  %v1138_v28 = vpack.i.bf16 %v191_v19, %v188_v13  ;;  %v1269_v29 = vpack.i.bf16 %v190_v18, %v187_v12  ;;  %v878_v30 = vcombine.high %v172_v0, %v174_v2 }
  0x18   : > { %v877_v31 = vcombine.low %v172_v0, %v174_v2  ;;  %v881_v32 = vcombine.high %v176_v8, %v178_v14  ;;  %v880_v33 = vcombine.low %v176_v8, %v178_v14  ;;  %v879_v34 = vcombine.low %v1251_v1, %v1254_v7 }
  0x19   : > { %640 = vmatprep.subr.bf16.mxu0 %v878_v30  ;;  %v882_v36 = vcombine.low %v1256_v9, %v1260_v15 }
  0x1a   : > { %954 = vrot.lane.b32.xlu0 %v953_v20, %s1206_s18  ;;  %964 = vrot.lane.b32.xlu1 %v963_v21, %s1206_s18 }
  0x1b   : > { %641 = vmatpush1.bf16.msra.mxu0 %v877_v31 }
  0x1c   : > { %642 = vmatprep.subr.bf16.mxu0 %v881_v32 }
  0x1e   : > { %969 = vrot.lane.b32.xlu0 %v968_v24, %s1206_s18  ;;  %974 = vrot.lane.b32.xlu1 %v1266_v25, %s1206_s18 }
  0x1f   : > { %643 = vmatpush1.bf16.msra.mxu0 %v880_v33 }
  0x22   : > { %979 = vrot.lane.b32.xlu0 %v948_v16, %s1207_s19  ;;  %984 = vrot.lane.b32.xlu1 %v953_v20, %s1207_s19 }
  0x26   : > { %989 = vrot.lane.b32.xlu0 %v1262_v17, %s1207_s19  ;;  %994 = vrot.lane.b32.xlu1 %v948_v16, %s1208_s20 }
  0x2a   : > { %999 = vrot.lane.b32.xlu0 %v953_v20, %s1208_s20  ;;  %1004 = vrot.lane.b32.xlu1 %v963_v21, %s1207_s19 }
  0x2e   : > { %1009 = vrot.lane.b32.xlu0 %v968_v24, %s1207_s19  ;;  %1014 = vrot.lane.b32.xlu1 %v1262_v17, %s1208_s20 }
  0x32   : > { %1019 = vrot.lane.b32.xlu0 %v1266_v25, %s1207_s19  ;;  %1024 = vrot.lane.b32.xlu1 %v963_v21, %s1208_s20 }
  0x36   : > { %1029 = vrot.lane.b32.xlu0 %v968_v24, %s1208_s20  ;;  %1034 = vrot.lane.b32.xlu1 %v948_v16, %s1209_s21 }
  0x3a   : > { %1039 = vrot.lane.b32.xlu0 %v953_v20, %s1209_s21  ;;  %1044 = vrot.lane.b32.xlu1 %v1266_v25, %s1208_s20 }
  0x3e   : > { %1049 = vrot.lane.b32.xlu0 %v1262_v17, %s1209_s21  ;;  %1054 = vrot.lane.b32.xlu1 %v963_v21, %s1209_s21 }
  0x42   : > { %1059 = vrot.lane.b32.xlu0 %v968_v24, %s1209_s21  ;;  %1064 = vrot.lane.b32.xlu1 %v1123_v26, %s1211_s22 }
  0x46   : > { %1069 = vrot.lane.b32.xlu0 %v1266_v25, %s1209_s21  ;;  %1074 = vrot.lane.b32.xlu1 %v1133_v27, %s1211_s22 }
  0x4a   : > { %1079 = vrot.lane.b32.xlu0 %v1138_v28, %s1211_s22  ;;  %1084 = vrot.lane.b32.xlu1 %v1262_v17, %s1211_s22 }
  0x4e   : > { %1089 = vrot.lane.b32.xlu0 %v1269_v29, %s1211_s22  ;;  %1094 = vrot.lane.b32.xlu1 %v1123_v26, %s1212_s23 }
  0x52   : > { %1099 = vrot.lane.b32.xlu0 %v1266_v25, %s1211_s22  ;;  %1104 = vrot.lane.b32.xlu1 %v1133_v27, %s1212_s23 }
  0x56   : > { %1109 = vrot.lane.b32.xlu0 %v1138_v28, %s1212_s23  ;;  %1114 = vrot.lane.b32.xlu1 %v1262_v17, %s1212_s23 }
  0x5a   : > { %1119 = vrot.lane.b32.xlu0 %v1269_v29, %s1212_s23  ;;  %1124 = vrot.lane.b32.xlu1 %v1123_v26, %s1213_s24 }
  0x5e   : > { %1129 = vrot.lane.b32.xlu0 %v1266_v25, %s1212_s23  ;;  %1134 = vrot.lane.b32.xlu1 %v1133_v27, %s1213_s24 }
  0x62   : > { %1139 = vrot.lane.b32.xlu0 %v1138_v28, %s1213_s24  ;;  %1144 = vrot.lane.b32.xlu1 %v1262_v17, %s1213_s24 }
  0x66   : > { %1149 = vrot.lane.b32.xlu0 %v1269_v29, %s1213_s24  ;;  %1154 = vrot.lane.b32.xlu1 %v1123_v26, %s1214_s27 }
  0x6a   : > { %1159 = vrot.lane.b32.xlu0 %v1266_v25, %s1213_s24  ;;  %1164 = vrot.lane.b32.xlu1 %v1133_v27, %s1214_s27 }
  0x6e   : > { %1169 = vrot.lane.b32.xlu0 %v1138_v28, %s1214_s27  ;;  %1174 = vrot.lane.b32.xlu1 %v1262_v17, %s1214_s27 }
  0x72   : > { %1179 = vrot.lane.b32.xlu0 %v1269_v29, %s1214_s27  ;;  %1184 = vrot.lane.b32.xlu1 %v1266_v25, %s1214_s27 }
  0x76   : > { %623 = vperm.xlu0 %1188, %v620_v39  }
  0x88   : > { %v1306_v40 = vpop.permute.xlu0 %949  ;;  %v960_v41 = vpop.permute.xlu1 %959 }
  0x89   : > { %v952_v42 = vunpack.i.h.bf16 %v1306_v40  ;;  %v951_v43 = vunpack.i.l.bf16 %v1306_v40  ;;  %v961_v44 = vunpack.i.l.bf16 %v960_v41  ;;  %v962_v47 = vunpack.i.h.bf16 %v960_v41 }
  0x8b   : > { %v230_v50 = vsel %vm228_vm0, %v951_v43, %v952_v42  ;;  %v229_v51 = vsel %vm228_vm0, %v961_v44, %v951_v43 }
  0x8c   : > { %v1310_v45 = vpop.permute.xlu0 %954  ;;  %v1312_v46 = vpop.permute.xlu1 %964 }
  0x8d   : > { %v957_v48 = vunpack.i.h.bf16 %v1310_v45  ;;  %v956_v49 = vunpack.i.l.bf16 %v1310_v45  ;;  %v967_v52 = vunpack.i.h.bf16 %v1312_v46  ;;  %v966_v53 = vunpack.i.l.bf16 %v1312_v46 }
  0x8f   : > { %v232_v54 = vsel %vm228_vm0, %v956_v49, %v957_v48  ;;  %v231_v55 = vsel %vm228_vm0, %v962_v47, %v956_v49  ;;  %v234_v0 = vsel %vm228_vm0, %v966_v53, %v967_v52 }
  0x90   : > { %v1326_v56 = vpop.permute.xlu0 %969  ;;  %v975_v57 = vpop.permute.xlu1 %974  ;;  %v571_v58 = vpack.c.bf16 %v232_v54, %v230_v50  ;;  %v570_v59 = vpack.c.bf16 %v231_v55, %v229_v51 }
  0x91   : > { %v972_v60 = vunpack.i.h.bf16 %v1326_v56  ;;  %v971_v61 = vunpack.i.l.bf16 %v1326_v56  ;;  %v977_v62 = vunpack.i.h.bf16 %v975_v57  ;;  %v976_v63 = vunpack.i.l.bf16 %v975_v57 }
  0x92   : > { %644 = vmatprep.subr.bf16.mxu0 %v571_v58 }
  0x93   : > { %645 = vmatpush1.bf16.msra.mxu0 %v570_v59  ;;  %v236_v2 = vsel %vm228_vm0, %v971_v61, %v972_v60  ;;  %v233_v3 = vsel %vm228_vm0, %v976_v63, %v966_v53  ;;  %v235_v4 = vsel %vm228_vm0, %v977_v62, %v971_v61 }
  0x94   : > { %v1338_v5 = vpop.permute.xlu0 %979  ;;  %v1340_v6 = vpop.permute.xlu1 %984  ;;  %v574_v8 = vpack.c.bf16 %v236_v2, %v234_v0  ;;  %v573_v10 = vpack.c.bf16 %v235_v4, %v233_v3 }
  0x95   : > { %v982_v11 = vunpack.i.h.bf16 %v1338_v5  ;;  %v981_v12 = vunpack.i.l.bf16 %v1338_v5  ;;  %v987_v13 = vunpack.i.h.bf16 %v1340_v6  ;;  %v986_v14 = vunpack.i.l.bf16 %v1340_v6 }
  0x96   : > { %646 = vmatprep.subr.bf16.mxu0 %v574_v8 }
  0x97   : > { %647 = vmatpush1.bf16.msra.mxu0 %v573_v10  ;;  %v275_v16 = vsel %vm273_vm1, %v981_v12, %v982_v11  ;;  %v277_v17 = vsel %vm273_vm1, %v986_v14, %v987_v13  ;;  %v578_v46 = vpack.c.bf16 %v987_v13, %v982_v11 }
  0x98   : > { %v990_v18 = vpop.permute.xlu0 %989  ;;  %v995_v19 = vpop.permute.xlu1 %994  ;;  %v577_v20 = vpack.c.bf16 %v277_v17, %v275_v16 }
  0x99   : > { %v992_v21 = vunpack.i.h.bf16 %v990_v18  ;;  %v991_v22 = vunpack.i.l.bf16 %v990_v18  ;;  %v997_v23 = vunpack.i.h.bf16 %v995_v19  ;;  %v996_v24 = vunpack.i.l.bf16 %v995_v19 }
  0x9a   : > { %648 = vmatprep.subr.bf16.mxu0 %v577_v20 }
  0x9b   : > { %v274_v25 = vsel %vm273_vm1, %v991_v22, %v981_v12  ;;  %v276_v26 = vsel %vm273_vm1, %v992_v21, %v986_v14  ;;  %v545_v32 = vsel %vm543_vm2, %v996_v24, %v997_v23 }
  0x9c   : > { %v1000_v27 = vpop.permute.xlu0 %999  ;;  %v1354_v28 = vpop.permute.xlu1 %1004  ;;  %v576_v29 = vpack.c.bf16 %v276_v26, %v274_v25 }
  0x9d   : > { %v1002_v30 = vunpack.i.h.bf16 %v1000_v27  ;;  %v1001_v31 = vunpack.i.l.bf16 %v1000_v27  ;;  %v1007_v35 = vunpack.i.h.bf16 %v1354_v28  ;;  %v1006_v39 = vunpack.i.l.bf16 %v1354_v28 }
  0x9e   : > { %649 = vmatpush1.bf16.msra.mxu0 %v576_v29 }
  0x9f   : > { %v1357_v33 = vpack.c.bf16 %v1002_v30, %v997_v23  ;;  %v547_v41 = vsel %vm543_vm2, %v1001_v31, %v1002_v30  ;;  %v279_v54 = vsel %vm273_vm1, %v1006_v39, %v1007_v35 }
  0xa0   : > { %v1362_v43 = vpop.permute.xlu0 %1009  ;;  %v1015_v44 = vpop.permute.xlu1 %1014  ;;  %v613_v47 = vpack.c.bf16 %v547_v41, %v545_v32 }
  0xa1   : > { %v1012_v49 = vunpack.i.h.bf16 %v1362_v43  ;;  %v1011_v50 = vunpack.i.l.bf16 %v1362_v43  ;;  %v1017_v51 = vunpack.i.h.bf16 %v1015_v44  ;;  %v1016_v53 = vunpack.i.l.bf16 %v1015_v44 }
  0xa2   : > { %681 = vmatprep.subr.bf16.mxu1 %v613_v47 }
  0xa3   : > { %v281_v55 = vsel %vm273_vm1, %v1011_v50, %v1012_v49  ;;  %v544_v57 = vsel %vm543_vm2, %v1016_v53, %v996_v24  ;;  %v546_v58 = vsel %vm543_vm2, %v1017_v51, %v1001_v31 }
  0xa4   : > { %v1020_v59 = vpop.permute.xlu0 %1019  ;;  %v1025_v61 = vpop.permute.xlu1 %1024  ;;  %v580_v62 = vpack.c.bf16 %v281_v55, %v279_v54  ;;  %v612_v63 = vpack.c.bf16 %v546_v58, %v544_v57  ;;  %v1401_v57 = vld [vmem:[%s1498_s1 + $0x8] ss:$0 sps:$4 sm:$0x77]  }
  0xa5   : > { %v1022_v0 = vunpack.i.h.bf16 %v1020_v59  ;;  %v1021_v2 = vunpack.i.l.bf16 %v1020_v59  ;;  %v1027_v3 = vunpack.i.h.bf16 %v1025_v61  ;;  %v1026_v4 = vunpack.i.l.bf16 %v1025_v61 }
  0xa6   : > { %650 = vmatprep.subr.bf16.mxu0 %v580_v62  ;;  %682 = vmatpush1.bf16.msra.mxu1 %v612_v63 }
  0xa7   : > { %v278_v8 = vsel %vm273_vm1, %v1021_v2, %v1006_v39  ;;  %v280_v10 = vsel %vm273_vm1, %v1022_v0, %v1011_v50  ;;  %v549_v19 = vsel %vm543_vm2, %v1026_v4, %v1027_v3 }
  0xa8   : > { %v1030_v12 = vpop.permute.xlu0 %1029  ;;  %v1376_v14 = vpop.permute.xlu1 %1034  ;;  %v579_v16 = vpack.c.bf16 %v280_v10, %v278_v8 }
  0xa9   : > { %v1032_v17 = vunpack.i.h.bf16 %v1030_v12  ;;  %v1031_v18 = vunpack.i.l.bf16 %v1030_v12  ;;  %v1037_v21 = vunpack.i.h.bf16 %v1376_v14  ;;  %v1036_v22 = vunpack.i.l.bf16 %v1376_v14 }
  0xaa   : > { %651 = vmatpush1.bf16.msra.mxu0 %v579_v16 }
  0xab   : > { %v1379_v20 = vpack.c.bf16 %v1032_v17, %v1027_v3  ;;  %v551_v23 = vsel %vm543_vm2, %v1031_v18, %v1032_v17  ;;  %v320_v32 = vsel %vm318_vm3, %v1036_v22, %v1037_v21 }
  0xac   : > { %v1384_v24 = vpop.permute.xlu0 %1039  ;;  %v1045_v25 = vpop.permute.xlu1 %1044  ;;  %v616_v26 = vpack.c.bf16 %v551_v23, %v549_v19 }
  0xad   : > { %v1042_v27 = vunpack.i.h.bf16 %v1384_v24  ;;  %v1041_v29 = vunpack.i.l.bf16 %v1384_v24  ;;  %v1047_v30 = vunpack.i.h.bf16 %v1045_v25  ;;  %v1046_v31 = vunpack.i.l.bf16 %v1045_v25 }
  0xae   : > { %683 = vmatprep.subr.bf16.mxu1 %v616_v26 }
  0xaf   : > { %v322_v39 = vsel %vm318_vm3, %v1041_v29, %v1042_v27  ;;  %v548_v41 = vsel %vm543_vm2, %v1046_v31, %v1026_v4  ;;  %v550_v44 = vsel %vm543_vm2, %v1047_v30, %v1031_v18  ;;  %v584_v28 = vpack.c.bf16 %v1042_v27, %v1037_v21 }
  0xb0   : > { %v1050_v47 = vpop.permute.xlu0 %1049  ;;  %v1396_v50 = vpop.permute.xlu1 %1054  ;;  %v583_v51 = vpack.c.bf16 %v322_v39, %v320_v32  ;;  %v615_v53 = vpack.c.bf16 %v550_v44, %v548_v41 }
  0xb1   : > { %v1052_v54 = vunpack.i.h.bf16 %v1050_v47  ;;  %v1051_v55 = vunpack.i.l.bf16 %v1050_v47  ;;  %v1057_v58 = vunpack.i.h.bf16 %v1396_v50  ;;  %v1056_v59 = vunpack.i.l.bf16 %v1396_v50 }
  0xb2   : > { %652 = vmatprep.subr.bf16.mxu0 %v583_v51  ;;  %684 = vmatpush1.bf16.msra.mxu1 %v615_v53 }
  0xb3   : > { %v319_v61 = vsel %vm318_vm3, %v1051_v55, %v1036_v22  ;;  %v321_v62 = vsel %vm318_vm3, %v1052_v54, %v1041_v29  ;;  %v324_v16 = vsel %vm318_vm3, %v1056_v59, %v1057_v58 }
  0xb4   : > { %v1407_v63 = vpop.permute.xlu0 %1059  ;;  %v1065_v0 = vpop.permute.xlu1 %1064  ;;  %v582_v2 = vpack.c.bf16 %v321_v62, %v319_v61 }
  0xb5   : > { %v1062_v3 = vunpack.i.h.bf16 %v1407_v63  ;;  %v1061_v4 = vunpack.i.l.bf16 %v1407_v63  ;;  %v1067_v8 = vunpack.i.h.bf16 %v1065_v0  ;;  %v1066_v10 = vunpack.i.l.bf16 %v1065_v0  ;;  %886 = vmatmul.mubr.msk.bf16.vlgmr.msra.gmra.mrb[0].mxu1 %vm636_vm4, %v1401_v57 }
  0xb6   : > { %653 = vmatpush1.bf16.msra.mxu0 %v582_v2  ;;  %754 = vmatprep.mubr.bf16.mxu1 %v1296_v38 }
  0xb7   : > { %v590_v12 = vpack.c.bf16 %v1067_v8, %v1066_v10  ;;  %v326_v17 = vsel %vm318_vm3, %v1061_v4, %v1062_v3 }
  0xb8   : > { %v1070_v18 = vpop.permute.xlu0 %1069  ;;  %v1075_v19 = vpop.permute.xlu1 %1074  ;;  %v586_v22 = vpack.c.bf16 %v326_v17, %v324_v16  ;;  %v572_v17 = vpack.c.bf16 %v957_v48, %v952_v42 }
  0xb9   : > { %v1072_v23 = vunpack.i.h.bf16 %v1070_v18  ;;  %v1071_v25 = vunpack.i.l.bf16 %v1070_v18  ;;  %v1077_v26 = vunpack.i.h.bf16 %v1075_v19  ;;  %v1076_v29 = vunpack.i.l.bf16 %v1075_v19  ;;  %890 = vmatprep.subr.bf16.mxu1 %v590_v12 }
  0xba   : > { %654 = vmatprep.subr.bf16.mxu0 %v586_v22  ;;  %891 = vmatpush3.bf16.msra.mxu1 %v879_v34 }
  0xbb   : > { %v323_v38 = vsel %vm318_vm3, %v1071_v25, %v1056_v59  ;;  %v325_v30 = vsel %vm318_vm3, %v1072_v23, %v1061_v4  ;;  %v365_v31 = vsel %vm363_vm5, %v1076_v29, %v1066_v10  ;;  %v367_v32 = vsel %vm363_vm5, %v1077_v26, %v1067_v8 }
  0xbc   : > { %v1080_v39 = vpop.permute.xlu0 %1079  ;;  %v1085_v41 = vpop.permute.xlu1 %1084  ;;  %v585_v44 = vpack.c.bf16 %v325_v30, %v323_v38  ;;  %v589_v47 = vpack.c.bf16 %v367_v32, %v365_v31 }
  0xbd   : > { %v1082_v51 = vunpack.i.h.bf16 %v1080_v39  ;;  %v1081_v53 = vunpack.i.l.bf16 %v1080_v39  ;;  %v1087_v54 = vunpack.i.h.bf16 %v1085_v41  ;;  %v1086_v55 = vunpack.i.l.bf16 %v1085_v41 }
  0xbe   : > { %655 = vmatpush1.bf16.msra.mxu0 %v585_v44 }
  0xbf   : > { %v593_v61 = vpack.c.bf16 %v1082_v51, %v1081_v53  ;;  %656 = vmatprep.subr.bf16.mxu0 %v589_v47  ;;  %v364_v1 = vsel %vm363_vm5, %v1086_v55, %v1076_v29  ;;  %v366_v7 = vsel %vm363_vm5, %v1087_v54, %v1077_v26 }
  0xc0   : > { %v1090_v34 = vpop.permute.xlu0 %1089  ;;  %v1095_v59 = vpop.permute.xlu1 %1094  ;;  %v588_v62 = vpack.c.bf16 %v366_v7, %v364_v1 }
  0xc1   : > { %v1092_v0 = vunpack.i.h.bf16 %v1090_v34  ;;  %v1091_v2 = vunpack.i.l.bf16 %v1090_v34  ;;  %v1097_v4 = vunpack.i.h.bf16 %v1095_v59  ;;  %v1096_v8 = vunpack.i.l.bf16 %v1095_v59  ;;  %892 = vmatprep.subr.bf16.mxu1 %v593_v61 }
  0xc2   : > { %657 = vmatpush1.bf16.msra.mxu0 %v588_v62  ;;  %893 = vmatpush3.bf16.msra.mxu1 %v882_v36 }
  0xc3   : > { %v596_v10 = vpack.c.bf16 %v1097_v4, %v1096_v8  ;;  %v369_v12 = vsel %vm363_vm5, %v1091_v2, %v1081_v53  ;;  %v371_v16 = vsel %vm363_vm5, %v1092_v0, %v1082_v51  ;;  %v575_v51 = vpack.c.bf16 %v972_v60, %v967_v52 }
  0xc4   : > { %v1100_v18 = vpop.permute.xlu0 %1099  ;;  %v1105_v19 = vpop.permute.xlu1 %1104  ;;  %v592_v22 = vpack.c.bf16 %v371_v16, %v369_v12 }
  0xc5   : > { %v1102_v23 = vunpack.i.h.bf16 %v1100_v18  ;;  %v1101_v25 = vunpack.i.l.bf16 %v1100_v18  ;;  %v1107_v26 = vunpack.i.h.bf16 %v1105_v19  ;;  %v1106_v29 = vunpack.i.l.bf16 %v1105_v19  ;;  %894 = vmatprep.subr.bf16.mxu1 %v596_v10 }
  0xc6   : > { %658 = vmatprep.subr.bf16.mxu0 %v592_v22  ;;  %895 = vmatpush3.bf16.msra.mxu1 %v572_v17 }
  0xc7   : > { %v368_v9 = vsel %vm363_vm5, %v1101_v25, %v1091_v2  ;;  %v370_v15 = vsel %vm363_vm5, %v1102_v23, %v1092_v0  ;;  %v410_v36 = vsel %vm408_vm6, %v1106_v29, %v1096_v8  ;;  %v412_v40 = vsel %vm408_vm6, %v1107_v26, %v1097_v4 }
  0xc8   : > { %v1110_v42 = vpop.permute.xlu0 %1109  ;;  %v1115_v45 = vpop.permute.xlu1 %1114  ;;  %v591_v48 = vpack.c.bf16 %v370_v15, %v368_v9  ;;  %v595_v38 = vpack.c.bf16 %v412_v40, %v410_v36  ;;  %v581_v15 = vpack.c.bf16 %v1012_v49, %v1007_v35 }
  0xc9   : > { %v1112_v30 = vunpack.i.h.bf16 %v1110_v42  ;;  %v1111_v31 = vunpack.i.l.bf16 %v1110_v42  ;;  %v1117_v32 = vunpack.i.h.bf16 %v1115_v45  ;;  %v1116_v39 = vunpack.i.l.bf16 %v1115_v45 }
  0xca   : > { %659 = vmatpush1.bf16.msra.mxu0 %v591_v48 }
  0xcb   : > { %v599_v41 = vpack.c.bf16 %v1112_v30, %v1111_v31  ;;  %660 = vmatprep.subr.bf16.mxu0 %v595_v38  ;;  %v409_v44 = vsel %vm408_vm6, %v1116_v39, %v1106_v29  ;;  %v411_v47 = vsel %vm408_vm6, %v1117_v32, %v1107_v26 }
  0xcc   : > { %v1120_v53 = vpop.permute.xlu0 %1119  ;;  %v1125_v54 = vpop.permute.xlu1 %1124  ;;  %v594_v55 = vpack.c.bf16 %v411_v47, %v409_v44 }
  0xcd   : > { %v1122_v61 = vunpack.i.h.bf16 %v1120_v53  ;;  %v1121_v1 = vunpack.i.l.bf16 %v1120_v53  ;;  %v1127_v7 = vunpack.i.h.bf16 %v1125_v54  ;;  %v1126_v34 = vunpack.i.l.bf16 %v1125_v54  ;;  %896 = vmatprep.subr.bf16.mxu1 %v599_v41 }
  0xce   : > { %661 = vmatpush1.bf16.msra.mxu0 %v594_v55  ;;  %897 = vmatpush3.bf16.msra.mxu1 %v575_v51 }
  0xcf   : > { %v602_v59 = vpack.c.bf16 %v1127_v7, %v1126_v34  ;;  %v414_v62 = vsel %vm408_vm6, %v1121_v1, %v1111_v31  ;;  %v416_v0 = vsel %vm408_vm6, %v1122_v61, %v1112_v30 }
  0xd0   : > { %v1130_v52 = vpop.permute.xlu0 %1129  ;;  %v1135_v56 = vpop.permute.xlu1 %1134  ;;  %v598_v60 = vpack.c.bf16 %v416_v0, %v414_v62 }
  0xd1   : > { %v1132_v2 = vunpack.i.h.bf16 %v1130_v52  ;;  %v1131_v4 = vunpack.i.l.bf16 %v1130_v52  ;;  %v1137_v8 = vunpack.i.h.bf16 %v1135_v56  ;;  %v1136_v10 = vunpack.i.l.bf16 %v1135_v56  ;;  %898 = vmatprep.subr.bf16.mxu1 %v602_v59 }
  0xd2   : > { %662 = vmatprep.subr.bf16.mxu0 %v598_v60  ;;  %899 = vmatpush3.bf16.msra.mxu1 %v578_v46  ;;  %v587_v52 = vpack.c.bf16 %v1062_v3, %v1057_v58 }
  0xd3   : > { %v413_v12 = vsel %vm408_vm6, %v1131_v4, %v1121_v1  ;;  %v415_v16 = vsel %vm408_vm6, %v1132_v2, %v1122_v61  ;;  %v455_v5 = vsel %vm453_vm7, %v1136_v10, %v1126_v34  ;;  %v457_v6 = vsel %vm453_vm7, %v1137_v8, %v1127_v7 }
  0xd4   : > { %v1140_v11 = vpop.permute.xlu0 %1139  ;;  %v1145_v13 = vpop.permute.xlu1 %1144  ;;  %v597_v17 = vpack.c.bf16 %v415_v16, %v413_v12  ;;  %v601_v18 = vpack.c.bf16 %v457_v6, %v455_v5  ;;  %v883_v4 = vcombine.low %v1291_v37, %v1291_v37  ;;  %v1215_v5 = vmov 0.0  }
  0xd5   : > { %v1142_v19 = vunpack.i.h.bf16 %v1140_v11  ;;  %v1141_v22 = vunpack.i.l.bf16 %v1140_v11  ;;  %v1147_v23 = vunpack.i.h.bf16 %v1145_v13  ;;  %v1146_v25 = vunpack.i.l.bf16 %v1145_v13 }
  0xd6   : > { %663 = vmatpush1.bf16.msra.mxu0 %v597_v17 }
  0xd7   : > { %v605_v26 = vpack.c.bf16 %v1142_v19, %v1141_v22  ;;  %664 = vmatprep.subr.bf16.mxu0 %v601_v18  ;;  %v454_v29 = vsel %vm453_vm7, %v1146_v25, %v1136_v10  ;;  %v456_v9 = vsel %vm453_vm7, %v1147_v23, %v1137_v8 }
  0xd8   : > { %v1150_v36 = vpop.permute.xlu0 %1149  ;;  %v1155_v40 = vpop.permute.xlu1 %1154  ;;  %v600_v42 = vpack.c.bf16 %v456_v9, %v454_v29 }
  0xd9   : > { %v1152_v45 = vunpack.i.h.bf16 %v1150_v36  ;;  %v1151_v48 = vunpack.i.l.bf16 %v1150_v36  ;;  %v1157_v38 = vunpack.i.h.bf16 %v1155_v40  ;;  %v1156_v30 = vunpack.i.l.bf16 %v1155_v40  ;;  %900 = vmatprep.subr.bf16.mxu1 %v605_v26 }
  0xda   : > { %665 = vmatpush1.bf16.msra.mxu0 %v600_v42  ;;  %901 = vmatpush3.bf16.msra.mxu1 %v581_v15 }
  0xdb   : > { %v608_v31 = vpack.c.bf16 %v1157_v38, %v1156_v30  ;;  %v459_v32 = vsel %vm453_vm7, %v1151_v48, %v1141_v22  ;;  %v461_v39 = vsel %vm453_vm7, %v1152_v45, %v1142_v19 }
  0xdc   : > { %v1160_v35 = vpop.permute.xlu0 %1159  ;;  %v1165_v43 = vpop.permute.xlu1 %1164  ;;  %v604_v49 = vpack.c.bf16 %v461_v39, %v459_v32 }
  0xdd   : > { %v1162_v41 = vunpack.i.h.bf16 %v1160_v35  ;;  %v1161_v44 = vunpack.i.l.bf16 %v1160_v35  ;;  %v1167_v47 = vunpack.i.h.bf16 %v1165_v43  ;;  %v1166_v51 = vunpack.i.l.bf16 %v1165_v43  ;;  %902 = vmatprep.subr.bf16.mxu1 %v608_v31 }
  0xde   : > { %666 = vmatprep.subr.bf16.mxu0 %v604_v49  ;;  %903 = vmatpush3.bf16.msra.mxu1 %v584_v28 }
  0xdf   : > { %v458_v53 = vsel %vm453_vm7, %v1161_v44, %v1151_v48  ;;  %v460_v54 = vsel %vm453_vm7, %v1162_v41, %v1152_v45  ;;  %v500_v14 = vsel %vm498_vm8, %v1166_v51, %v1156_v30  ;;  %v502_v24 = vsel %vm498_vm8, %v1167_v47, %v1157_v38 }
  0xe0   : > { %v1170_v21 = vpop.permute.xlu0 %1169  ;;  %v1175_v27 = vpop.permute.xlu1 %1174  ;;  %v603_v55 = vpack.c.bf16 %v460_v54, %v458_v53  ;;  %v607_v61 = vpack.c.bf16 %v502_v24, %v500_v14 }
  0xe1   : > { %v1172_v1 = vunpack.i.h.bf16 %v1170_v21  ;;  %v1171_v7 = vunpack.i.l.bf16 %v1170_v21  ;;  %v1177_v34 = vunpack.i.h.bf16 %v1175_v27  ;;  %v1176_v59 = vunpack.i.l.bf16 %v1175_v27 }
  0xe2   : > { %667 = vmatpush1.bf16.msra.mxu0 %v603_v55 }
  0xe3   : > { %v611_v62 = vpack.c.bf16 %v1172_v1, %v1171_v7  ;;  %668 = vmatprep.subr.bf16.mxu0 %v607_v61  ;;  %v499_v0 = vsel %vm498_vm8, %v1176_v59, %v1166_v51  ;;  %v501_v46 = vsel %vm498_vm8, %v1177_v34, %v1167_v47 }
  0xe4   : > { %v1180_v56 = vpop.permute.xlu0 %1179  ;;  %v1185_v60 = vpop.permute.xlu1 %1184  ;;  %v606_v2 = vpack.c.bf16 %v501_v46, %v499_v0 }
  0xe5   : > { %v1182_v8 = vunpack.i.h.bf16 %v1180_v56  ;;  %v1181_v10 = vunpack.i.l.bf16 %v1180_v56  ;;  %v1187_v12 = vunpack.i.h.bf16 %v1185_v60  ;;  %v1186_v16 = vunpack.i.l.bf16 %v1185_v60  ;;  %904 = vmatprep.subr.bf16.mxu1 %v611_v62 }
  0xe6   : > { %669 = vmatpush1.bf16.msra.mxu0 %v606_v2  ;;  %905 = vmatpush3.bf16.msra.mxu1 %v587_v52 }
  0xe7   : > { %915 = vmatprep.subr.bf16.mxu1 %v1215_v5  ;;  %v504_v50 = vsel %vm498_vm8, %v1181_v10, %v1171_v7  ;;  %v506_v63 = vsel %vm498_vm8, %v1182_v8, %v1172_v1  ;;  %v503_v58 = vsel %vm498_vm8, %v1186_v16, %v1181_v10  ;;  %v505_v3 = vsel %vm498_vm8, %v1187_v12, %v1182_v8 }
  0xe8   : > { %v610_v6 = vpack.c.bf16 %v506_v63, %v504_v50  ;;  %v609_v11 = vpack.c.bf16 %v505_v3, %v503_v58 }
  0xe9   : > { %755 = vmatmul.mubr.bf16.vlgmr.msra.gmra.mrb[4].mxu1 %v883_v4 }
  0xea   : > { %670 = vmatprep.subr.bf16.mxu0 %v610_v6  ;;  %916 = vmatpush3.bf16.msra.mxu1 %v1357_v33 }
  0xeb   : > { %671 = vmatpush1.bf16.msra.mxu0 %v609_v11  ;;  %917 = vmatprep.subr.bf16.mxu1 %v1215_v5 }
  0xec   : > { %919 = vmatprep.mubr.msk.bf16.mxu1 %vm1216_vm9, %v1215_v5 }
  0xee   : > { %673 = vmatmul.mubr.bf16.vlgmr.msra.gmra.mrb[0].mxu0 %v883_v4  ;;  %918 = vmatpush3.bf16.msra.mxu1 %v1379_v20 }
  0xf1   : > { %920 = vmatmul.mubr.msk.bf16.vlgmr.msra.gmra.mrb[8].mxu1 %vm636_vm4, %v1401_v57 }
  0xf5   : > { %v624_v26 = vpop.permute.xlu0 %623 }
 0x188   : > { %v715_v37 = vpop.f32.mrb[0].mxu1 }
 0x189   : > { %v717_v13 = vpop.f32.mrb[1].mxu1 }
 0x18a   : > { %v719_v17 = vpop.f32.mrb[2].mxu1 }
 0x18b   : > { %v720_v18 = vpop.f32.mrb[3].mxu1 }
 0x1bc   : > { %v906_v19 = vpop.f32.mrb[4].mxu1 }
 0x1bd   : > { %v907_v22 = vpop.f32.mrb[5].mxu1 }
 0x1be   : > { %v908_v23 = vadd.f32 %v907_v22, %v906_v19  ;;  %v909_v25 = vpop.f32.mrb[6].mxu1 }
 0x1bf   : > { %v910_v33 = vpop.f32.mrb[7].mxu1 }
 0x1c0   : > { %v757_v36 = vadd.f32 %v908_v23, %v624_v26 }
 0x1c1   : > { %v674_v29 = vpop.f32.mrb[0].mxu0 }
 0x1c2   : > { %v675_v9 = vadd.f32 %v674_v29, %v624_v26  ;;  %v676_v15 = vpop.f32.mrb[1].mxu0 }
 0x1c3   : > { %v677_v40 = vadd.f32 %v676_v15, %v624_v26  ;;  %v678_v20 = vpop.f32.mrb[2].mxu0 }
 0x1c4   : > { %v716_v42 = vadd.f32 %v715_v37, %v675_v9  ;;  %v679_v45 = vpop.f32.mrb[3].mxu0  ;;  %v796_v57 = vpop.f32.mrb[8].mxu1 }
 0x1c5   : > { %v718_v48 = vadd.f32 %v717_v13, %v677_v40  ;;  %v797_v38 = vadd.f32 %v796_v57, %v757_v36  ;;  %v921_v30 = vpop.f32.mrb[9].mxu1 }
 0x1c6   : > { %vm802_vm10 = vcmp.ge.f32.partialorder %v716_v42, 0.0  ;;  %v805_v31 = vmul.f32 0.3, %v716_v42  ;;  %v799_v32 = vpop.f32.mrb[10].mxu1 }
 0x1c7   : > { %vm803_vm12 = vcmp.ge.f32.partialorder %v718_v48, 0.0  ;;  %v806_v39 = vmul.f32 0.3, %v718_v48  ;;  %vm804_vm13 = vcmp.ge.f32.partialorder %v797_v38, 0.0  ;;  %v807_v28 = vmul.f32 0.3, %v797_v38 }
 0x1c8   : > { %v808_v35 = vsel %vm802_vm10, %v716_v42, %v805_v31  ;;  %v922_v43 = vpop.f32.mrb[11].mxu1 }
 0x1c9   : > { %811 = vst [vmem:[%s170_s8] sm:$0x1f] %v808_v35  ;;  %v809_v49 = vsel %vm803_vm12, %v718_v48, %v806_v39  ;;  %v810_v41 = vsel %vm804_vm13, %v797_v38, %v807_v28 }
 0x1ca   : > { %812 = vst [vmem:[%s170_s8 + $0x8] sm:$0x1f] %v809_v49  ;;  %814 = vst.msk [vmem:[%s170_s8 + $0x10] sm:$0x1f] %vm813_vm11, %v810_v41 }
 0x1cb PF: > { %s13_s12 = sadd.s32 1, %s1204_s12  }
 0x1cc   : > { %p10_p4 = scmp.ge.s32.totalorder %s13_s12, 4  }
 0x1ce   :  { %12 = sbr.rel (!%p10_p4) target bundleno = 1 (0x1), region = 62 }

// kernel: hsarnn_forward.11
= control target key start
LH: loop header
LB: loop body
LE: loop exit
PB: predicated region body
PF: predicated region fallthrough
CT: control target
= control target key end

     0   :  { %s916_s12 = smov 0   ;;  %s1009_s0 = inlined_call_operand.vmem [shape: bf16[2,32,350], index: 0, kind: input, shape index: {}]   ;;  %s1010_s1 = inlined_call_operand.vmem [shape: bf16[32,144], index: 1, kind: input, shape index: {}]   ;;  %s1011_s2 = inlined_call_operand.vmem [shape: f32[32,1], index: 2, kind: input, shape index: {}]   ;;  %s1012_s3 = inlined_call_operand.vmem [shape: bf16[2,32,316], index: 3, kind: output, shape index: {}]  }
   0x1 LB: > { %s694_s13 = sadd.s32 4294967295, %s885_s12   ;;  %p698_p0 = scmp.ge.s32.totalorder %s885_s12, 1  ;;  %s885_s12 = sphi %s916_s12, %s13_s12  }
   0x2   : > { %p137_p1 = scmp.lt.s32.totalorder %s885_s12, 3 }
   0x4   : > { %p138_p2 = pnand %p698_p0, %p137_p1 }
   0x5   : > { %p161_p3 = scmp.lt.s32.totalorder (!%p138_p2), %s694_s13, 1  ;;  %v887_v0 = vmov (!%p138_p2), 0   ;;  %s888_s18 = smov (!%p138_p2), 127   ;;  %v875_v17 = vld [vmem:[%s1010_s1 + $0x4] ss:$8 sps:$4 sm:$0xff] (!%p138_p2)   ;;  %vm445_vm0 = vcmask (!%p138_p2), 130048  }
   0x6   : > { %141 = sbr.rel (%p138_p2) target bundleno = 423 (0x1a7), region = 32  ;;  %505 = vmatprep.subr.bf16.mxu1 (!%p138_p2), %v887_v0  ;;  %868 = vset.pattern.permute.xlu0 (!%p138_p2), %v887_v0  ;;  %s889_s19 = smov (!%p138_p2), 126   ;;  %v403_v18 = vld [vmem:[%s1011_s2] sm:$0xff] (!%p138_p2)  ;;  %v404_v19 = vld [vmem:[%s1011_s2 + $0x8] sm:$0xff] (!%p138_p2)  ;;  %v405_v20 = vld [vmem:[%s1011_s2 + $0x10] sm:$0xff] (!%p138_p2)  ;;  %vm200_vm1 = vcmask (!%p138_p2), 1039360  }
   0x7   : > { %869 = vset.pattern.permute.xlu1 (!%p138_p2), %v887_v0  ;;  %s890_s20 = smov (!%p138_p2), 112   ;;  %s891_s21 = smov (!%p138_p2), 111   ;;  %710 = vmatprep.mubr.msk.bf16.mxu1 (!%p138_p2), %vm445_vm0, %v875_v17  ;;  %v406_v21 = vld [vmem:[%s1011_s2 + $0x18] sm:$0xff] (!%p138_p2)  ;;  %vm223_vm2 = vcmask (!%p138_p2), 1031168   ;;  %vm246_vm3 = vcmask (!%p138_p2), 916480   ;;  %vm269_vm4 = vcmask (!%p138_p2), 908288  }
   0x8   : > { %s892_s22 = smov (!%p138_p2), 110   ;;  %s893_s23 = smov (!%p138_p2), 96   ;;  %708 = vmatprep.mubr.msk.bf16.mxu0 (!%p138_p2), %vm445_vm0, %v875_v17  ;;  %vm292_vm5 = vcmask (!%p138_p2), 900096   ;;  %vm315_vm6 = vcmask (!%p138_p2), 785408   ;;  %vm338_vm7 = vcmask (!%p138_p2), 777216   ;;  %vm361_vm8 = vcmask (!%p138_p2), 769024  }
   0x9   : > { %s894_s26 = smov (!%p138_p2), 95   ;;  %s895_s27 = smov (!%p138_p2), 94   ;;  %vm631_vm10 = vcmask (!%p138_p2), 486400  }
   0xd   : > { %s1014_s13 = smov (!%p161_p3, %s694_s13), 1 }
   0xe   : > { %s730_s14 = smul.u32 48, %s1014_s13 }
  0x10   : > { %s165_s17 = scalar_lea.vmem %s1009_s0, %s730_s14 }
  0x11   : > { %v172_v1 = vld [vmem:[%s165_s17] sm:$0xff]  ;;  %v173_v2 = vld [vmem:[%s165_s17 + $0x8] sm:$0xf]  ;;  %v174_v3 = vld [vmem:[%s165_s17 + $0xc] sm:$0xff] }
  0x12   : > { %v177_v4 = vunpack.c.h.bf16 %v172_v1  ;;  %v178_v5 = vunpack.c.l.bf16 %v173_v2  ;;  %v176_v6 = vunpack.c.l.bf16 %v172_v1  ;;  %v179_v7 = vunpack.c.l.bf16 %v174_v3  ;;  %v175_v8 = vld [vmem:[%s165_s17 + $0x14] sm:$0xf] }
  0x13   : > { %v180_v9 = vunpack.c.h.bf16 %v174_v3  ;;  %v181_v10 = vunpack.c.l.bf16 %v175_v8  ;;  %v703_v11 = vcombine.low %v173_v2, %v175_v8  ;;  %v702_v12 = vcombine.high %v172_v1, %v174_v3 }
  0x14   : > { %v748_v13 = vpack.i.bf16 %v178_v5, %v177_v4  ;;  %v758_v14 = vpack.i.bf16 %v179_v7, %v176_v6  ;;  %v701_v16 = vcombine.low %v172_v1, %v174_v3 }
  0x15   : > { %506 = vmatpush1.bf16.msra.mxu1 %v703_v11  ;;  %v753_v15 = vpack.i.bf16 %v181_v10, %v180_v9  ;;  %452 = vmatprep.subr.bf16.mxu0 %v702_v12 }
  0x16   : > { %749 = vrot.lane.b32.xlu0 %v748_v13, %s888_s18  ;;  %759 = vrot.lane.b32.xlu1 %v758_v14, %s888_s18 }
  0x17   : > { %507 = vmatprep.subr.bf16.mxu1 %v887_v0  ;;  %453 = vmatpush1.bf16.msra.mxu0 %v701_v16 }
  0x1a   : > { %754 = vrot.lane.b32.xlu0 %v753_v15, %s888_s18  ;;  %764 = vrot.lane.b32.xlu1 %v748_v13, %s889_s19 }
  0x1e   : > { %769 = vrot.lane.b32.xlu0 %v753_v15, %s889_s19  ;;  %774 = vrot.lane.b32.xlu1 %v758_v14, %s889_s19 }
  0x22   : > { %779 = vrot.lane.b32.xlu0 %v748_v13, %s890_s20  ;;  %784 = vrot.lane.b32.xlu1 %v753_v15, %s890_s20 }
  0x26   : > { %789 = vrot.lane.b32.xlu0 %v758_v14, %s890_s20  ;;  %794 = vrot.lane.b32.xlu1 %v748_v13, %s891_s21  ;;  %s992_s20 = scalar_lea.vmem %s1012_s3, %s730_s14 }
  0x2a   : > { %799 = vrot.lane.b32.xlu0 %v753_v15, %s891_s21  ;;  %804 = vrot.lane.b32.xlu1 %v758_v14, %s891_s21 }
  0x2e   : > { %809 = vrot.lane.b32.xlu0 %v748_v13, %s892_s22  ;;  %814 = vrot.lane.b32.xlu1 %v753_v15, %s892_s22 }
  0x32   : > { %819 = vrot.lane.b32.xlu0 %v758_v14, %s892_s22  ;;  %824 = vrot.lane.b32.xlu1 %v748_v13, %s893_s23 }
  0x36   : > { %829 = vrot.lane.b32.xlu0 %v753_v15, %s893_s23  ;;  %834 = vrot.lane.b32.xlu1 %v758_v14, %s893_s23 }
  0x3a   : > { %839 = vrot.lane.b32.xlu0 %v748_v13, %s894_s26  ;;  %844 = vrot.lane.b32.xlu1 %v753_v15, %s894_s26 }
  0x3e   : > { %849 = vrot.lane.b32.xlu0 %v758_v14, %s894_s26  ;;  %854 = vrot.lane.b32.xlu1 %v748_v13, %s895_s27 }
  0x42   : > { %859 = vrot.lane.b32.xlu0 %v753_v15, %s895_s27  ;;  %864 = vrot.lane.b32.xlu1 %v758_v14, %s895_s27 }
  0x46   : > { %409 = vperm.xlu0 %868, %v403_v18   ;;  %414 = vperm.xlu1 %869, %v404_v19  }
  0x4a   : > { %419 = vperm.xlu1 %869, %v405_v20   ;;  %424 = vperm.xlu0 %868, %v406_v21  }
  0x88   : > { %v750_v22 = vpop.permute.xlu0 %749  ;;  %v760_v23 = vpop.permute.xlu1 %759 }
  0x89   : > { %v752_v24 = vunpack.i.h.bf16 %v750_v22  ;;  %v751_v25 = vunpack.i.l.bf16 %v750_v22  ;;  %v761_v26 = vunpack.i.l.bf16 %v760_v23  ;;  %v762_v29 = vunpack.i.h.bf16 %v760_v23 }
  0x8b   : > { %v202_v34 = vsel %vm200_vm1, %v751_v25, %v752_v24  ;;  %v201_v37 = vsel %vm200_vm1, %v761_v26, %v751_v25 }
  0x8c   : > { %v755_v27 = vpop.permute.xlu0 %754  ;;  %v765_v28 = vpop.permute.xlu1 %764 }
  0x8d   : > { %v757_v30 = vunpack.i.h.bf16 %v755_v27  ;;  %v756_v31 = vunpack.i.l.bf16 %v755_v27  ;;  %v767_v32 = vunpack.i.h.bf16 %v765_v28  ;;  %v766_v33 = vunpack.i.l.bf16 %v765_v28 }
  0x8f   : > { %v377_v35 = vpack.c.bf16 %v757_v30, %v752_v24  ;;  %v204_v36 = vsel %vm200_vm1, %v756_v31, %v757_v30  ;;  %v203_v38 = vsel %vm200_vm1, %v762_v29, %v756_v31  ;;  %v225_v47 = vsel %vm223_vm2, %v766_v33, %v767_v32 }
  0x90   : > { %v770_v39 = vpop.permute.xlu0 %769  ;;  %v775_v40 = vpop.permute.xlu1 %774  ;;  %v376_v41 = vpack.c.bf16 %v204_v36, %v202_v34  ;;  %v375_v42 = vpack.c.bf16 %v203_v38, %v201_v37 }
  0x91   : > { %v772_v43 = vunpack.i.h.bf16 %v770_v39  ;;  %v771_v44 = vunpack.i.l.bf16 %v770_v39  ;;  %v777_v45 = vunpack.i.h.bf16 %v775_v40  ;;  %v776_v46 = vunpack.i.l.bf16 %v775_v40  ;;  %508 = vmatpush1.bf16.msra.mxu1 %v377_v35 }
  0x92   : > { %454 = vmatprep.subr.bf16.mxu0 %v376_v41  ;;  %509 = vmatprep.subr.bf16.mxu1 %v887_v0 }
  0x93   : > { %v380_v48 = vpack.c.bf16 %v772_v43, %v767_v32  ;;  %455 = vmatpush1.bf16.msra.mxu0 %v375_v42  ;;  %v227_v49 = vsel %vm223_vm2, %v771_v44, %v772_v43  ;;  %v224_v50 = vsel %vm223_vm2, %v776_v46, %v766_v33  ;;  %v226_v51 = vsel %vm223_vm2, %v777_v45, %v771_v44 }
  0x94   : > { %v780_v52 = vpop.permute.xlu0 %779  ;;  %v785_v53 = vpop.permute.xlu1 %784  ;;  %v379_v54 = vpack.c.bf16 %v227_v49, %v225_v47  ;;  %v378_v55 = vpack.c.bf16 %v226_v51, %v224_v50 }
  0x95   : > { %v782_v56 = vunpack.i.h.bf16 %v780_v52  ;;  %v781_v57 = vunpack.i.l.bf16 %v780_v52  ;;  %v787_v58 = vunpack.i.h.bf16 %v785_v53  ;;  %v786_v59 = vunpack.i.l.bf16 %v785_v53  ;;  %510 = vmatpush1.bf16.msra.mxu1 %v380_v48 }
  0x96   : > { %456 = vmatprep.subr.bf16.mxu0 %v379_v54  ;;  %511 = vmatprep.subr.bf16.mxu1 %v887_v0 }
  0x97   : > { %v383_v60 = vpack.c.bf16 %v787_v58, %v782_v56  ;;  %457 = vmatpush1.bf16.msra.mxu0 %v378_v55  ;;  %v248_v61 = vsel %vm246_vm3, %v781_v57, %v782_v56  ;;  %v250_v62 = vsel %vm246_vm3, %v786_v59, %v787_v58 }
  0x98   : > { %v790_v63 = vpop.permute.xlu0 %789  ;;  %v795_v1 = vpop.permute.xlu1 %794  ;;  %v382_v2 = vpack.c.bf16 %v250_v62, %v248_v61 }
  0x99   : > { %v792_v3 = vunpack.i.h.bf16 %v790_v63  ;;  %v791_v4 = vunpack.i.l.bf16 %v790_v63  ;;  %512 = vmatpush1.bf16.msra.mxu1 %v383_v60  ;;  %v797_v5 = vunpack.i.h.bf16 %v795_v1  ;;  %v796_v6 = vunpack.i.l.bf16 %v795_v1 }
  0x9a   : > { %458 = vmatprep.subr.bf16.mxu0 %v382_v2  ;;  %513 = vmatprep.subr.bf16.mxu1 %v887_v0 }
  0x9b   : > { %v247_v7 = vsel %vm246_vm3, %v791_v4, %v781_v57  ;;  %v249_v8 = vsel %vm246_vm3, %v792_v3, %v786_v59  ;;  %v271_v16 = vsel %vm269_vm4, %v796_v6, %v797_v5 }
  0x9c   : > { %v800_v9 = vpop.permute.xlu0 %799  ;;  %v805_v10 = vpop.permute.xlu1 %804  ;;  %v381_v11 = vpack.c.bf16 %v249_v8, %v247_v7 }
  0x9d   : > { %v802_v12 = vunpack.i.h.bf16 %v800_v9  ;;  %v801_v13 = vunpack.i.l.bf16 %v800_v9  ;;  %v807_v14 = vunpack.i.h.bf16 %v805_v10  ;;  %v806_v15 = vunpack.i.l.bf16 %v805_v10 }
  0x9e   : > { %459 = vmatpush1.bf16.msra.mxu0 %v381_v11 }
  0x9f   : > { %v386_v17 = vpack.c.bf16 %v802_v12, %v797_v5  ;;  %v273_v18 = vsel %vm269_vm4, %v801_v13, %v802_v12  ;;  %v270_v19 = vsel %vm269_vm4, %v806_v15, %v796_v6  ;;  %v272_v20 = vsel %vm269_vm4, %v807_v14, %v801_v13 }
  0xa0   : > { %v810_v21 = vpop.permute.xlu0 %809  ;;  %v815_v22 = vpop.permute.xlu1 %814  ;;  %v385_v23 = vpack.c.bf16 %v273_v18, %v271_v16  ;;  %v384_v24 = vpack.c.bf16 %v272_v20, %v270_v19 }
  0xa1   : > { %v812_v25 = vunpack.i.h.bf16 %v810_v21  ;;  %v811_v26 = vunpack.i.l.bf16 %v810_v21  ;;  %v817_v27 = vunpack.i.h.bf16 %v815_v22  ;;  %v816_v28 = vunpack.i.l.bf16 %v815_v22  ;;  %514 = vmatpush1.bf16.msra.mxu1 %v386_v17 }
  0xa2   : > { %460 = vmatprep.subr.bf16.mxu0 %v385_v23  ;;  %515 = vmatprep.subr.bf16.mxu1 %v887_v0  ;;  %v873_v23 = vld [vmem:[%s1010_s1] ss:$8 sps:$4 sm:$0xff]  }
  0xa3   : > { %v389_v29 = vpack.c.bf16 %v817_v27, %v812_v25  ;;  %461 = vmatpush1.bf16.msra.mxu0 %v384_v24  ;;  %v294_v30 = vsel %vm292_vm5, %v811_v26, %v812_v25  ;;  %v296_v31 = vsel %vm292_vm5, %v816_v28, %v817_v27  ;;  %v876_v24 = vld [vmem:[%s1010_s1 + $0x14] ss:$8 sps:$4 sm:$0xff]   ;;  %v878_v25 = vld [vmem:[%s1010_s1 + $0x10] ss:$8 sps:$4 sm:$0xff]  }
  0xa4   : > { %v820_v32 = vpop.permute.xlu0 %819  ;;  %v825_v33 = vpop.permute.xlu1 %824  ;;  %v388_v34 = vpack.c.bf16 %v296_v31, %v294_v30 }
  0xa5   : > { %v822_v35 = vunpack.i.h.bf16 %v820_v32  ;;  %v821_v36 = vunpack.i.l.bf16 %v820_v32  ;;  %516 = vmatpush1.bf16.msra.mxu1 %v389_v29  ;;  %v827_v37 = vunpack.i.h.bf16 %v825_v33  ;;  %v826_v38 = vunpack.i.l.bf16 %v825_v33 }
  0xa6   : > { %462 = vmatprep.subr.bf16.mxu0 %v388_v34  ;;  %517 = vmatprep.subr.bf16.mxu1 %v887_v0 }
  0xa7   : > { %v293_v39 = vsel %vm292_vm5, %v821_v36, %v811_v26  ;;  %v295_v40 = vsel %vm292_vm5, %v822_v35, %v816_v28  ;;  %v317_v48 = vsel %vm315_vm6, %v826_v38, %v827_v37 }
  0xa8   : > { %v830_v41 = vpop.permute.xlu0 %829  ;;  %v835_v42 = vpop.permute.xlu1 %834  ;;  %v387_v43 = vpack.c.bf16 %v295_v40, %v293_v39 }
  0xa9   : > { %v832_v44 = vunpack.i.h.bf16 %v830_v41  ;;  %v831_v45 = vunpack.i.l.bf16 %v830_v41  ;;  %v837_v46 = vunpack.i.h.bf16 %v835_v42  ;;  %v836_v47 = vunpack.i.l.bf16 %v835_v42 }
  0xaa   : > { %463 = vmatpush1.bf16.msra.mxu0 %v387_v43 }
  0xab   : > { %v392_v49 = vpack.c.bf16 %v832_v44, %v827_v37  ;;  %v319_v50 = vsel %vm315_vm6, %v831_v45, %v832_v44  ;;  %v316_v51 = vsel %vm315_vm6, %v836_v47, %v826_v38  ;;  %v318_v52 = vsel %vm315_vm6, %v837_v46, %v831_v45 }
  0xac   : > { %v840_v53 = vpop.permute.xlu0 %839  ;;  %v845_v54 = vpop.permute.xlu1 %844  ;;  %v391_v55 = vpack.c.bf16 %v319_v50, %v317_v48  ;;  %v390_v56 = vpack.c.bf16 %v318_v52, %v316_v51 }
  0xad   : > { %v842_v57 = vunpack.i.h.bf16 %v840_v53  ;;  %v841_v58 = vunpack.i.l.bf16 %v840_v53  ;;  %v847_v59 = vunpack.i.h.bf16 %v845_v54  ;;  %v846_v60 = vunpack.i.l.bf16 %v845_v54  ;;  %518 = vmatpush1.bf16.msra.mxu1 %v392_v49 }
  0xae   : > { %464 = vmatprep.subr.bf16.mxu0 %v391_v55  ;;  %519 = vmatprep.subr.bf16.mxu1 %v887_v0 }
  0xaf   : > { %v395_v61 = vpack.c.bf16 %v847_v59, %v842_v57  ;;  %465 = vmatpush1.bf16.msra.mxu0 %v390_v56  ;;  %v340_v62 = vsel %vm338_vm7, %v841_v58, %v842_v57  ;;  %v342_v63 = vsel %vm338_vm7, %v846_v60, %v847_v59 }
  0xb0   : > { %v850_v1 = vpop.permute.xlu0 %849  ;;  %v855_v2 = vpop.permute.xlu1 %854  ;;  %v394_v3 = vpack.c.bf16 %v342_v63, %v340_v62 }
  0xb1   : > { %v852_v4 = vunpack.i.h.bf16 %v850_v1  ;;  %v851_v5 = vunpack.i.l.bf16 %v850_v1  ;;  %520 = vmatpush1.bf16.msra.mxu1 %v395_v61  ;;  %v857_v6 = vunpack.i.h.bf16 %v855_v2  ;;  %v856_v7 = vunpack.i.l.bf16 %v855_v2 }
  0xb2   : > { %466 = vmatprep.subr.bf16.mxu0 %v394_v3  ;;  %521 = vmatprep.subr.bf16.mxu1 %v887_v0 }
  0xb3   : > { %v339_v8 = vsel %vm338_vm7, %v851_v5, %v841_v58  ;;  %v341_v9 = vsel %vm338_vm7, %v852_v4, %v846_v60  ;;  %v363_v17 = vsel %vm361_vm8, %v856_v7, %v857_v6 }
  0xb4   : > { %v860_v10 = vpop.permute.xlu0 %859  ;;  %v865_v11 = vpop.permute.xlu1 %864  ;;  %v393_v12 = vpack.c.bf16 %v341_v9, %v339_v8 }
  0xb5   : > { %v862_v13 = vunpack.i.h.bf16 %v860_v10  ;;  %v861_v14 = vunpack.i.l.bf16 %v860_v10  ;;  %v867_v15 = vunpack.i.h.bf16 %v865_v11  ;;  %v866_v16 = vunpack.i.l.bf16 %v865_v11 }
  0xb6   : > { %467 = vmatpush1.bf16.msra.mxu0 %v393_v12 }
  0xb7   : > { %v398_v18 = vpack.c.bf16 %v862_v13, %v857_v6  ;;  %v365_v19 = vsel %vm361_vm8, %v861_v14, %v862_v13  ;;  %v362_v20 = vsel %vm361_vm8, %v866_v16, %v856_v7  ;;  %v364_v21 = vsel %vm361_vm8, %v867_v15, %v861_v14 }
  0xb8   : > { %v397_v22 = vpack.c.bf16 %v365_v19, %v363_v17  ;;  %v396_v0 = vpack.c.bf16 %v364_v21, %v362_v20 }
  0xb9   : > { %522 = vmatpush1.bf16.msra.mxu1 %v398_v18 }
  0xba   : > { %468 = vmatprep.subr.bf16.mxu0 %v397_v22 }
  0xbb   : > { %469 = vmatpush1.bf16.msra.mxu0 %v396_v0 }
  0xbc   : > { %538 = vmatmul.mubr.bf16.vlgmr.msra.gmra.mrb[0].mxu1 %v873_v23 }
  0xbd   : > { %711 = vmatprep.mubr.msk.bf16.mxu1 %vm445_vm0, %v876_v24 }
  0xbe   : > { %485 = vmatmul.mubr.bf16.vlgmr.msra.gmra.mrb[0].mxu0 %v873_v23 }
  0xbf   : > { %709 = vmatprep.mubr.msk.bf16.mxu0 %vm445_vm0, %v876_v24 }
  0xc4   : > { %546 = vmatmul.mubr.bf16.gmra.mrb[4].mxu1 %v878_v25 }
  0xc5   : > { %v410_v26 = vpop.permute.xlu0 %409  ;;  %v415_v28 = vpop.permute.xlu1 %414 }
  0xc6   : > { %495 = vmatmul.mubr.bf16.gmra.mrb[4].mxu0 %v878_v25 }
  0xc9   : > { %v420_v49 = vpop.permute.xlu1 %419  ;;  %v425_v53 = vpop.permute.xlu0 %424 }
 0x18f   : > { %v539_v27 = vpop.f32.mrb[0].mxu1 }
 0x190   : > { %v540_v29 = vadd.f32 %v539_v27, %v410_v26  ;;  %v541_v30 = vpop.f32.mrb[1].mxu1 }
 0x191   : > { %v486_v31 = vpop.f32.mrb[0].mxu0  ;;  %v542_v32 = vpop.f32.mrb[2].mxu1 }
 0x192   : > { %vm556_vm9 = vcmp.ge.f32.partialorder %v540_v29, 0.0  ;;  %v568_v33 = vmul.f32 0.3, %v540_v29  ;;  %v487_v34 = vadd.f32 %v486_v31, %v410_v26  ;;  %v543_v35 = vadd.f32 %v542_v32, %v415_v28  ;;  %v488_v36 = vpop.f32.mrb[1].mxu0  ;;  %v544_v37 = vpop.f32.mrb[3].mxu1 }
 0x193   : > { %v489_v38 = vadd.f32 %v488_v36, %v410_v26  ;;  %v490_v39 = vpop.f32.mrb[2].mxu0 }
 0x194   : > { %v580_v40 = vsel %vm556_vm9, %v540_v29, %v568_v33  ;;  %vm554_vm11 = vcmp.ge.f32.partialorder %v487_v34, 0.0  ;;  %v566_v41 = vmul.f32 0.3, %v487_v34  ;;  %vm559_vm12 = vcmp.ge.f32.partialorder %v543_v35, 0.0  ;;  %v492_v42 = vpop.f32.mrb[3].mxu0 }
 0x195   : > { %v723_v43 = vpack.c.bf16 %v580_v40, %v580_v40  ;;  %v571_v44 = vmul.f32 0.3, %v543_v35  ;;  %vm555_vm13 = vcmp.ge.f32.partialorder %v489_v38, 0.0  ;;  %v567_v45 = vmul.f32 0.3, %v489_v38 }
 0x196   : > { %v578_v46 = vsel %vm554_vm11, %v487_v34, %v566_v41  ;;  %v491_v47 = vadd.f32 %v490_v39, %v415_v28  ;;  %v493_v48 = vadd.f32 %v492_v42, %v415_v28 }
 0x197   : > { %632 = vst.msk [vmem:[%s992_s20 + $0x8] sm:$0xf] %vm631_vm10, %v723_v43  ;;  %v583_v50 = vsel %vm559_vm12, %v543_v35, %v571_v44  ;;  %v579_v51 = vsel %vm555_vm13, %v489_v38, %v567_v45  ;;  %v547_v52 = vpop.f32.mrb[4].mxu1 }
 0x198   : > { %v725_v54 = vpack.c.bf16 %v583_v50, %v583_v50  ;;  %v722_v55 = vpack.c.bf16 %v579_v51, %v578_v46  ;;  %vm557_vm14 = vcmp.ge.f32.partialorder %v491_v47, 0.0  ;;  %v569_v56 = vmul.f32 0.3, %v491_v47  ;;  %v549_v57 = vpop.f32.mrb[5].mxu1 }
 0x199   : > { %vm558_vm15 = vcmp.ge.f32.partialorder %v493_v48, 0.0  ;;  %v570_v58 = vmul.f32 0.3, %v493_v48  ;;  %v548_v59 = vadd.f32 %v547_v52, %v420_v49  ;;  %v496_v60 = vpop.f32.mrb[4].mxu0  ;;  %v550_v61 = vpop.f32.mrb[6].mxu1 }
 0x19a   : > { %634 = vst.msk [vmem:[%s992_s20 + $0x14] sm:$0xf] %vm631_vm10, %v725_v54  ;;  %630 = vst [vmem:[%s992_s20] sm:$0xff] %v722_v55  ;;  %v581_v62 = vsel %vm557_vm14, %v491_v47, %v569_v56  ;;  %v497_v63 = vadd.f32 %v496_v60, %v420_v49  ;;  %v551_v1 = vadd.f32 %v550_v61, %v425_v53  ;;  %v498_v2 = vpop.f32.mrb[5].mxu0  ;;  %v552_v3 = vpop.f32.mrb[7].mxu1 }
 0x19b   : > { %v582_v4 = vsel %vm558_vm15, %v493_v48, %v570_v58  ;;  %vm562_vm0 = vcmp.ge.f32.partialorder %v548_v59, 0.0  ;;  %v574_v5 = vmul.f32 0.3, %v548_v59  ;;  %v499_v6 = vadd.f32 %v498_v2, %v420_v49  ;;  %v500_v7 = vpop.f32.mrb[6].mxu0 }
 0x19c   : > { %v724_v8 = vpack.c.bf16 %v582_v4, %v581_v62  ;;  %vm560_vm1 = vcmp.ge.f32.partialorder %v497_v63, 0.0  ;;  %v572_v9 = vmul.f32 0.3, %v497_v63  ;;  %vm565_vm2 = vcmp.ge.f32.partialorder %v551_v1, 0.0  ;;  %v502_v10 = vpop.f32.mrb[7].mxu0 }
 0x19d   : > { %v586_v11 = vsel %vm562_vm0, %v548_v59, %v574_v5  ;;  %v577_v12 = vmul.f32 0.3, %v551_v1  ;;  %vm561_vm3 = vcmp.ge.f32.partialorder %v499_v6, 0.0  ;;  %v573_v13 = vmul.f32 0.3, %v499_v6 }
 0x19e   : > { %633 = vst [vmem:[%s992_s20 + $0xc] sm:$0xff] %v724_v8  ;;  %v727_v14 = vpack.c.bf16 %v586_v11, %v586_v11  ;;  %v584_v15 = vsel %vm560_vm1, %v497_v63, %v572_v9  ;;  %v501_v16 = vadd.f32 %v500_v7, %v425_v53  ;;  %v503_v17 = vadd.f32 %v502_v10, %v425_v53 }
 0x19f   : > { %v589_v18 = vsel %vm565_vm2, %v551_v1, %v577_v12  ;;  %v585_v19 = vsel %vm561_vm3, %v499_v6, %v573_v13 }
 0x1a0   : > { %636 = vst.msk [vmem:[%s992_s20 + $0x20] sm:$0xf] %vm631_vm10, %v727_v14  ;;  %v729_v20 = vpack.c.bf16 %v589_v18, %v589_v18  ;;  %v726_v21 = vpack.c.bf16 %v585_v19, %v584_v15  ;;  %vm563_vm4 = vcmp.ge.f32.partialorder %v501_v16, 0.0  ;;  %v575_v22 = vmul.f32 0.3, %v501_v16 }
 0x1a1   : > { %vm564_vm5 = vcmp.ge.f32.partialorder %v503_v17, 0.0  ;;  %v576_v0 = vmul.f32 0.3, %v503_v17 }
 0x1a2   : > { %638 = vst.msk [vmem:[%s992_s20 + $0x2c] sm:$0xf] %vm631_vm10, %v729_v20  ;;  %635 = vst [vmem:[%s992_s20 + $0x18] sm:$0xff] %v726_v21  ;;  %v587_v23 = vsel %vm563_vm4, %v501_v16, %v575_v22 }
 0x1a3   : > { %v588_v24 = vsel %vm564_vm5, %v503_v17, %v576_v0 }
 0x1a4   : > { %v728_v25 = vpack.c.bf16 %v588_v24, %v587_v23 }
 0x1a6   : > { %637 = vst [vmem:[%s992_s20 + $0x24] sm:$0xff] %v728_v25 }
 0x1a7 PF: > { %s13_s12 = sadd.s32 1, %s885_s12  }
 0x1a8   : > { %p10_p4 = scmp.ge.s32.totalorder %s13_s12, 4  }
 0x1aa   :  { %12 = sbr.rel (!%p10_p4) target bundleno = 1 (0x1), region = 62 }

// kernel: hsarnn_forward.17
= control target key start
LH: loop header
LB: loop body
LE: loop exit
PB: predicated region body
PF: predicated region fallthrough
CT: control target
= control target key end

     0   :  { %s742_s12 = smov 0   ;;  %s817_s0 = inlined_call_operand.vmem [shape: bf16[2,8,324], index: 0, kind: input, shape index: {}]   ;;  %s818_s1 = inlined_call_operand.vmem [shape: bf16[32,72], index: 1, kind: input, shape index: {}]   ;;  %s819_s2 = inlined_call_operand.vmem [shape: f32[32,1], index: 2, kind: input, shape index: {}]   ;;  %s820_s3 = inlined_call_operand.vmem [shape: bf16[2,32,294], index: 3, kind: output, shape index: {}]  }
   0x1 LB: > { %s588_s13 = sadd.s32 4294967295, %s711_s12   ;;  %p592_p0 = scmp.ge.s32.totalorder %s711_s12, 1  ;;  %s711_s12 = sphi %s742_s12, %s13_s12  }
   0x2   : > { %p137_p1 = scmp.lt.s32.totalorder %s711_s12, 3 }
   0x4   : > { %p138_p2 = pnand %p592_p0, %p137_p1 }
   0x5   : > { %p161_p3 = scmp.lt.s32.totalorder (!%p138_p2), %s588_s13, 1  ;;  %s713_s18 = smov (!%p138_p2), 126   ;;  %v759_v6 = vld [vmem:[%s818_s1] sm:$0xff] (!%p138_p2)   ;;  %vm329_vm0 = vcmask (!%p138_p2), 588800   ;;  %v720_v7 = vmov (!%p138_p2), 0   ;;  %v296_v10 = vld [vmem:[%s819_s2 + $0x8] sm:$0xff] (!%p138_p2) }
   0x6   : > { %141 = sbr.rel (%p138_p2) target bundleno = 405 (0x195), region = 32  ;;  %s714_s19 = smov (!%p138_p2), 127   ;;  %378 = vmatprep.mubr.bf16.mxu0 (!%p138_p2), %v720_v7  ;;  %701 = vset.pattern.permute.xlu0 (!%p138_p2), %v720_v7  ;;  %v295_v9 = vld [vmem:[%s819_s2] sm:$0xff] (!%p138_p2)  ;;  %v297_v11 = vld [vmem:[%s819_s2 + $0x10] sm:$0xff] (!%p138_p2)  ;;  %v298_v12 = vld [vmem:[%s819_s2 + $0x18] sm:$0xff] (!%p138_p2)  ;;  %vm186_vm1 = vcmask (!%p138_p2), 1039360  }
   0x7   : > { %s715_s20 = smov (!%p138_p2), 114   ;;  %s716_s21 = smov (!%p138_p2), 112   ;;  %637 = vmatprep.mubr.msk.bf16.mxu1 (!%p138_p2), %vm329_vm0, %v759_v6  ;;  %702 = vset.pattern.permute.xlu1 (!%p138_p2), %v720_v7  ;;  %vm210_vm2 = vcmask (!%p138_p2), 932864   ;;  %vm198_vm3 = vcmask (!%p138_p2), 1031168   ;;  %vm234_vm4 = vcmask (!%p138_p2), 916480   ;;  %vm222_vm5 = vcmask (!%p138_p2), 924672  }
   0x8   : > { %s717_s22 = smov (!%p138_p2), 113   ;;  %s718_s23 = smov (!%p138_p2), 99   ;;  %vm258_vm6 = vcmask (!%p138_p2), 809984   ;;  %vm246_vm7 = vcmask (!%p138_p2), 818176   ;;  %vm270_vm8 = vcmask (!%p138_p2), 801792   ;;  %vm336_vm9 = vcmask (!%p138_p2), 1043456  }
   0x9   : > { %s719_s24 = smov (!%p138_p2), 100   ;;  %s721_s27 = smov (!%p138_p2), 98   ;;  %vm525_vm10 = vcmask (!%p138_p2), 306176  }
   0xd   : > { %s822_s13 = smov (!%p161_p3, %s588_s13), 1 }
   0xe   : > { %s642_s14 = smul.u32 12, %s822_s13 }
   0xf   : > { %s643_s11 = smul.u32 48, %s822_s13 }
  0x10   : > { %s165_s17 = scalar_lea.vmem %s817_s0, %s642_s14 }
  0x11   : > { %v172_v0 = vld [vmem:[%s165_s17] sm:$0xff]  ;;  %v173_v1 = vld [vmem:[%s165_s17 + $0x8] sm:$0xf]  ;;  %s797_s15 = scalar_lea.vmem %s820_s3, %s643_s11 }
  0x12   : > { %v175_v2 = vunpack.c.h.bf16 %v172_v0  ;;  %v176_v3 = vunpack.c.l.bf16 %v173_v1  ;;  %v174_v5 = vunpack.c.l.bf16 %v172_v0 }
  0x14   : > { %v666_v4 = vpack.i.bf16 %v176_v3, %v175_v2  ;;  %v696_v8 = vpack.i.bf16 %v175_v2, %v174_v5 }
  0x16   : > { %667 = vrot.lane.b32.xlu1 %v666_v4, %s713_s18  ;;  %662 = vrot.lane.b32.xlu0 %v666_v4, %s714_s19 }
  0x1a   : > { %672 = vrot.lane.b32.xlu1 %v666_v4, %s715_s20  ;;  %180 = vrot.lane.b32.xlu0 %v174_v5, %s714_s19 }
  0x1e   : > { %204 = vrot.lane.b32.xlu1 %v174_v5, %s715_s20  ;;  %192 = vrot.lane.b32.xlu0 %v174_v5, %s713_s18 }
  0x22   : > { %682 = vrot.lane.b32.xlu1 %v666_v4, %s716_s21  ;;  %677 = vrot.lane.b32.xlu0 %v666_v4, %s717_s22 }
  0x26   : > { %228 = vrot.lane.b32.xlu1 %v174_v5, %s716_s21  ;;  %216 = vrot.lane.b32.xlu0 %v174_v5, %s717_s22 }
  0x2a   : > { %692 = vrot.lane.b32.xlu1 %v666_v4, %s718_s23  ;;  %687 = vrot.lane.b32.xlu0 %v666_v4, %s719_s24 }
  0x2e   : > { %252 = vrot.lane.b32.xlu1 %v174_v5, %s718_s23  ;;  %240 = vrot.lane.b32.xlu0 %v174_v5, %s719_s24 }
  0x32   : > { %697 = vrot.lane.b32.xlu0 %v696_v8, %s721_s27  ;;  %268 = vrot.lane.b32.xlu1 %v176_v3, %s721_s27 }
  0x36   : > { %301 = vperm.xlu0 %701, %v295_v9   ;;  %306 = vperm.xlu1 %702, %v296_v10  }
  0x3a   : > { %311 = vperm.xlu1 %702, %v297_v11   ;;  %316 = vperm.xlu0 %701, %v298_v12  }
  0x88   : > { %v668_v13 = vpop.permute.xlu1 %667  ;;  %v663_v14 = vpop.permute.xlu0 %662 }
  0x89   : > { %v665_v15 = vunpack.i.h.bf16 %v663_v14  ;;  %v664_v16 = vunpack.i.l.bf16 %v663_v14  ;;  %v670_v17 = vunpack.i.h.bf16 %v668_v13  ;;  %v669_v18 = vunpack.i.l.bf16 %v668_v13  ;;  %v704_v13 = vld [vmem:[%s818_s1 + $0x8] sm:$0xff]  }
  0x8b   : > { %v278_v19 = vpack.c.bf16 %v665_v15, %v176_v3  ;;  %v188_v20 = vsel %vm186_vm1, %v664_v16, %v665_v15  ;;  %v200_v29 = vsel %vm198_vm3, %v669_v18, %v670_v17 }
  0x8c   : > { %v673_v21 = vpop.permute.xlu1 %672  ;;  %v181_v22 = vpop.permute.xlu0 %180  ;;  %v277_v23 = vpack.c.bf16 %v188_v20, %v175_v2 }
  0x8d   : > { %v675_v24 = vunpack.i.h.bf16 %v673_v21  ;;  %v674_v25 = vunpack.i.l.bf16 %v673_v21  ;;  %v187_v26 = vsel %vm186_vm1, %v181_v22, %v664_v16  ;;  %627 = vmatprep.subr.bf16.mxu1 %v278_v19 }
  0x8e   : > { %346 = vmatprep.subr.bf16.mxu0 %v277_v23  ;;  %628 = vmatpush3.bf16.msra.mxu1 %v278_v19  ;;  %v276_v27 = vpack.c.bf16 %v187_v26, %v174_v5 }
  0x8f   : > { %v281_v28 = vpack.c.bf16 %v675_v24, %v670_v17  ;;  %v212_v30 = vsel %vm210_vm2, %v674_v25, %v675_v24 }
  0x90   : > { %v205_v31 = vpop.permute.xlu1 %204  ;;  %347 = vmatpush1.bf16.msra.mxu0 %v276_v27  ;;  %v193_v32 = vpop.permute.xlu0 %192  ;;  %v280_v33 = vpack.c.bf16 %v212_v30, %v200_v29 }
  0x91   : > { %v211_v34 = vsel %vm210_vm2, %v205_v31, %v674_v25  ;;  %v199_v35 = vsel %vm198_vm3, %v193_v32, %v669_v18  ;;  %629 = vmatprep.subr.bf16.mxu1 %v281_v28 }
  0x92   : > { %v279_v36 = vpack.c.bf16 %v211_v34, %v199_v35  ;;  %348 = vmatprep.subr.bf16.mxu0 %v280_v33  ;;  %630 = vmatpush3.bf16.msra.mxu1 %v281_v28 }
  0x94   : > { %v683_v37 = vpop.permute.xlu1 %682  ;;  %349 = vmatpush1.bf16.msra.mxu0 %v279_v36  ;;  %v678_v38 = vpop.permute.xlu0 %677 }
  0x95   : > { %v685_v39 = vunpack.i.h.bf16 %v683_v37  ;;  %v684_v40 = vunpack.i.l.bf16 %v683_v37  ;;  %v680_v41 = vunpack.i.h.bf16 %v678_v38  ;;  %v679_v42 = vunpack.i.l.bf16 %v678_v38 }
  0x97   : > { %v284_v43 = vpack.c.bf16 %v685_v39, %v680_v41  ;;  %v224_v44 = vsel %vm222_vm5, %v679_v42, %v680_v41  ;;  %v236_v45 = vsel %vm234_vm4, %v684_v40, %v685_v39 }
  0x98   : > { %v229_v46 = vpop.permute.xlu1 %228  ;;  %v217_v47 = vpop.permute.xlu0 %216  ;;  %v283_v48 = vpack.c.bf16 %v236_v45, %v224_v44 }
  0x99   : > { %v235_v49 = vsel %vm234_vm4, %v229_v46, %v684_v40  ;;  %v223_v50 = vsel %vm222_vm5, %v217_v47, %v679_v42  ;;  %631 = vmatprep.subr.bf16.mxu1 %v284_v43 }
  0x9a   : > { %v282_v51 = vpack.c.bf16 %v235_v49, %v223_v50  ;;  %350 = vmatprep.subr.bf16.mxu0 %v283_v48  ;;  %632 = vmatpush3.bf16.msra.mxu1 %v284_v43 }
  0x9c   : > { %v693_v52 = vpop.permute.xlu1 %692  ;;  %v688_v53 = vpop.permute.xlu0 %687  ;;  %351 = vmatpush1.bf16.msra.mxu0 %v282_v51 }
  0x9d   : > { %v695_v54 = vunpack.i.h.bf16 %v693_v52  ;;  %v694_v55 = vunpack.i.l.bf16 %v693_v52  ;;  %v690_v56 = vunpack.i.h.bf16 %v688_v53  ;;  %v689_v57 = vunpack.i.l.bf16 %v688_v53 }
  0x9f   : > { %v287_v58 = vpack.c.bf16 %v695_v54, %v690_v56  ;;  %v248_v59 = vsel %vm246_vm7, %v689_v57, %v690_v56  ;;  %v260_v60 = vsel %vm258_vm6, %v694_v55, %v695_v54 }
  0xa0   : > { %v253_v61 = vpop.permute.xlu1 %252  ;;  %v241_v62 = vpop.permute.xlu0 %240  ;;  %v286_v63 = vpack.c.bf16 %v260_v60, %v248_v59 }
  0xa1   : > { %v259_v0 = vsel %vm258_vm6, %v253_v61, %v694_v55  ;;  %v247_v1 = vsel %vm246_vm7, %v241_v62, %v689_v57  ;;  %633 = vmatprep.subr.bf16.mxu1 %v287_v58 }
  0xa2   : > { %v285_v2 = vpack.c.bf16 %v259_v0, %v247_v1  ;;  %352 = vmatprep.subr.bf16.mxu0 %v286_v63  ;;  %634 = vmatpush3.bf16.msra.mxu1 %v287_v58 }
  0xa4   : > { %v698_v3 = vpop.permute.xlu0 %697  ;;  %353 = vmatpush1.bf16.msra.mxu0 %v285_v2  ;;  %v269_v4 = vpop.permute.xlu1 %268 }
  0xa5   : > { %v700_v5 = vunpack.i.h.bf16 %v698_v3  ;;  %v699_v8 = vunpack.i.l.bf16 %v698_v3  ;;  %v290_v9 = vpack.c.bf16 %v269_v4, %v269_v4 }
  0xa7   : > { %v272_v10 = vsel %vm270_vm8, %v700_v5, %v269_v4  ;;  %641 = vmatprep.subr.msk.bf16.mxu1 %vm336_vm9, %v290_v9  ;;  %v344_v11 = vsel %vm336_vm9, %v290_v9, 0  ;;  %v271_v12 = vsel %vm270_vm8, %v699_v8, %v700_v5 }
  0xa8   : > { %v289_v14 = vpack.c.bf16 %v272_v10, %v272_v10  ;;  %636 = vmatpush3.bf16.msra.mxu1 %v344_v11  ;;  %v288_v15 = vpack.c.bf16 %v271_v12, %v271_v12 }
  0xaa   : > { %597 = vmatprep.subr.msk.bf16.mxu0 %vm336_vm9, %v289_v14  ;;  %v338_v16 = vsel %vm336_vm9, %v288_v15, 0 }
  0xab   : > { %355 = vmatpush1.bf16.msra.mxu0 %v338_v16  ;;  %638 = vmatmul.mubr.msk.bf16.vlgmr.msra.gmra.mrb[0].mxu1 %vm329_vm0, %v704_v13 }
  0xae   : > { %598 = vmatmul.mubr.msk.bf16.vlgmr.msra.gmra.mrb[0].mxu0 %vm329_vm0, %v759_v6 }
  0xaf   : > { %388 = vmatprep.mubr.bf16.mxu0 %v720_v7 }
  0xb5   : > { %v307_v17 = vpop.permute.xlu1 %306  ;;  %v302_v18 = vpop.permute.xlu0 %301 }
  0xb6   : > { %599 = vmatmul.mubr.msk.bf16.gmra.mrb[4].mxu0 %vm329_vm0, %v704_v13 }
  0xb9   : > { %v312_v19 = vpop.permute.xlu1 %311  ;;  %v790_v21 = vpop.permute.xlu0 %316 }
 0x17e   : > { %v639_v20 = vpop.f32.mrb[0].mxu1 }
 0x17f   : > { %v433_v22 = vpop.f32.mrb[1].mxu1  ;;  %v442_v23 = vadd.f32 %v639_v20, %v312_v19 }
 0x180   : > { %v434_v24 = vadd.f32 %v433_v22, %v302_v18  ;;  %v640_v25 = vpop.f32.mrb[2].mxu1 }
 0x181   : > { %v380_v26 = vpop.f32.mrb[0].mxu0  ;;  %vm456_vm11 = vcmp.ge.f32.partialorder %v442_v23, 0.0  ;;  %v468_v27 = vmul.f32 0.3, %v442_v23  ;;  %v445_v6 = vadd.f32 %v640_v25, %v790_v21  ;;  %v436_v7 = vpop.f32.mrb[3].mxu1 }
 0x182   : > { %v381_v28 = vadd.f32 %v380_v26, %v302_v18  ;;  %v382_v29 = vpop.f32.mrb[1].mxu0  ;;  %vm450_vm12 = vcmp.ge.f32.partialorder %v434_v24, 0.0  ;;  %v462_v30 = vmul.f32 0.3, %v434_v24  ;;  %v437_v31 = vadd.f32 %v436_v7, %v307_v17 }
 0x183   : > { %v383_v32 = vadd.f32 %v382_v29, %v302_v18  ;;  %v384_v33 = vpop.f32.mrb[2].mxu0  ;;  %v480_v34 = vsel %vm456_vm11, %v442_v23, %v468_v27  ;;  %vm459_vm13 = vcmp.ge.f32.partialorder %v445_v6, 0.0  ;;  %v471_v35 = vmul.f32 0.3, %v445_v6 }
 0x184   : > { %vm448_vm14 = vcmp.ge.f32.partialorder %v381_v28, 0.0  ;;  %v460_v36 = vmul.f32 0.3, %v381_v28  ;;  %v385_v37 = vadd.f32 %v384_v33, %v307_v17  ;;  %v386_v38 = vpop.f32.mrb[3].mxu0  ;;  %v474_v39 = vsel %vm450_vm12, %v434_v24, %v462_v30 }
 0x185   : > { %vm449_vm15 = vcmp.ge.f32.partialorder %v383_v32, 0.0  ;;  %v461_v40 = vmul.f32 0.3, %v383_v32  ;;  %v387_v41 = vadd.f32 %v386_v38, %v307_v17  ;;  %v613_v42 = vpack.c.bf16 %v474_v39, %v474_v39 }
 0x186   : > { %v472_v43 = vsel %vm448_vm14, %v381_v28, %v460_v36  ;;  %vm451_vm0 = vcmp.ge.f32.partialorder %v385_v37, 0.0  ;;  %v463_v44 = vmul.f32 0.3, %v385_v37  ;;  %v617_v45 = vpack.c.bf16 %v480_v34, %v480_v34 }
 0x187   : > { %v473_v46 = vsel %vm449_vm15, %v383_v32, %v461_v40  ;;  %vm452_vm1 = vcmp.ge.f32.partialorder %v387_v41, 0.0  ;;  %v464_v47 = vmul.f32 0.3, %v387_v41  ;;  %526 = vst.msk [vmem:[%s797_s15 + $0x8] sm:$0xf] %vm525_vm10, %v613_v42  ;;  %v483_v48 = vsel %vm459_vm13, %v445_v6, %v471_v35 }
 0x188   : > { %v612_v49 = vpack.c.bf16 %v473_v46, %v472_v43  ;;  %v475_v50 = vsel %vm451_vm0, %v385_v37, %v463_v44  ;;  %530 = vst.msk [vmem:[%s797_s15 + $0x20] sm:$0xf] %vm525_vm10, %v617_v45  ;;  %v619_v51 = vpack.c.bf16 %v483_v48, %v483_v48  ;;  %vm453_vm2 = vcmp.ge.f32.partialorder %v437_v31, 0.0 }
 0x189   : > { %v476_v52 = vsel %vm452_vm1, %v387_v41, %v464_v47  ;;  %v465_v53 = vmul.f32 0.3, %v437_v31  ;;  %v390_v54 = vpop.f32.mrb[4].mxu0 }
 0x18a   : > { %524 = vst [vmem:[%s797_s15] sm:$0xff] %v612_v49  ;;  %v614_v55 = vpack.c.bf16 %v476_v52, %v475_v50  ;;  %532 = vst.msk [vmem:[%s797_s15 + $0x2c] sm:$0xf] %vm525_vm10, %v619_v51  ;;  %v391_v56 = vadd.f32 %v390_v54, %v312_v19  ;;  %v392_v57 = vpop.f32.mrb[5].mxu0 }
 0x18b   : > { %v477_v58 = vsel %vm453_vm2, %v437_v31, %v465_v53  ;;  %v393_v59 = vadd.f32 %v392_v57, %v312_v19  ;;  %v394_v60 = vpop.f32.mrb[6].mxu0 }
 0x18c   : > { %527 = vst [vmem:[%s797_s15 + $0xc] sm:$0xff] %v614_v55  ;;  %v615_v61 = vpack.c.bf16 %v477_v58, %v477_v58  ;;  %vm454_vm3 = vcmp.ge.f32.partialorder %v391_v56, 0.0  ;;  %v466_v62 = vmul.f32 0.3, %v391_v56  ;;  %v395_v63 = vadd.f32 %v394_v60, %v790_v21  ;;  %v396_v0 = vpop.f32.mrb[7].mxu0 }
 0x18d   : > { %vm455_vm4 = vcmp.ge.f32.partialorder %v393_v59, 0.0  ;;  %v467_v1 = vmul.f32 0.3, %v393_v59  ;;  %v397_v2 = vadd.f32 %v396_v0, %v790_v21 }
 0x18e   : > { %528 = vst.msk [vmem:[%s797_s15 + $0x14] sm:$0xf] %vm525_vm10, %v615_v61  ;;  %v478_v3 = vsel %vm454_vm3, %v391_v56, %v466_v62  ;;  %vm457_vm5 = vcmp.ge.f32.partialorder %v395_v63, 0.0  ;;  %v469_v4 = vmul.f32 0.3, %v395_v63 }
 0x18f   : > { %v479_v5 = vsel %vm455_vm4, %v393_v59, %v467_v1  ;;  %vm458_vm6 = vcmp.ge.f32.partialorder %v397_v2, 0.0  ;;  %v470_v8 = vmul.f32 0.3, %v397_v2 }
 0x190   : > { %v616_v9 = vpack.c.bf16 %v479_v5, %v478_v3  ;;  %v481_v10 = vsel %vm457_vm5, %v395_v63, %v469_v4 }
 0x191   : > { %v482_v11 = vsel %vm458_vm6, %v397_v2, %v470_v8 }
 0x192   : > { %529 = vst [vmem:[%s797_s15 + $0x18] sm:$0xff] %v616_v9  ;;  %v618_v12 = vpack.c.bf16 %v482_v11, %v481_v10 }
 0x194   : > { %531 = vst [vmem:[%s797_s15 + $0x24] sm:$0xff] %v618_v12 }
 0x195 PF: > { %s13_s12 = sadd.s32 1, %s711_s12  }
 0x196   : > { %p10_p4 = scmp.ge.s32.totalorder %s13_s12, 4  }
 0x198   :  { %12 = sbr.rel (!%p10_p4) target bundleno = 1 (0x1), region = 62 }

// kernel: hsarnn_forward.18
= control target key start
LH: loop header
LB: loop body
LE: loop exit
PB: predicated region body
PF: predicated region fallthrough
CT: control target
= control target key end

     0   :  { %s1300_s12 = smov 0   ;;  %s1560_s0 = inlined_call_operand.vmem [shape: bf16[2,32,384], index: 0, kind: input, shape index: {}]   ;;  %s1561_s1 = inlined_call_operand.vmem [shape: bf16[16,288], index: 1, kind: input, shape index: {}]   ;;  %s1562_s2 = inlined_call_operand.vmem [shape: f32[16,1], index: 2, kind: input, shape index: {}]   ;;  %s1563_s3 = inlined_call_operand.vmem [shape: bf16[2,16,350], index: 3, kind: output, shape index: {}]  }
   0x1 LB: > { %s919_s13 = sadd.s32 4294967295, %s1267_s12   ;;  %p923_p0 = scmp.ge.s32.totalorder %s1267_s12, 1  ;;  %s1267_s12 = sphi %s1300_s12, %s13_s12  }
   0x2   : > { %p137_p1 = scmp.lt.s32.totalorder %s1267_s12, 3 }
   0x4   : > { %p138_p2 = pnand %p923_p0, %p137_p1 }
   0x5   : > { %p161_p3 = scmp.lt.s32.totalorder (!%p138_p2), %s919_s13, 1  ;;  %s1269_s18 = smov (!%p138_p2), 127   ;;  %v1273_v35 = vmov (!%p138_p2), 0   ;;  %v1355_v37 = vld [vmem:[%s1561_s1 + $0x4] ss:$12 sps:$4 sm:$0xff] (!%p138_p2)   ;;  %v623_v39 = vld [vmem:[%s1562_s2 + $0x8] sm:$0xff] (!%p138_p2) }
   0x6   : > { %141 = sbr.rel (%p138_p2) target bundleno = 465 (0x1d1), region = 32  ;;  %s1270_s19 = smov (!%p138_p2), 126   ;;  %728 = vmatprep.mubr.bf16.mxu1 (!%p138_p2), %v1273_v35  ;;  %1249 = vset.pattern.permute.xlu0 (!%p138_p2), %v1273_v35  ;;  %v622_v38 = vld [vmem:[%s1562_s2] sm:$0xff] (!%p138_p2)  ;;  %vm228_vm0 = vcmask (!%p138_p2), 1039360   ;;  %vm273_vm1 = vcmask (!%p138_p2), 1031168   ;;  %vm543_vm2 = vcmask (!%p138_p2), 769024  }
   0x7   : > { %s1271_s20 = smov (!%p138_p2), 94   ;;  %s1272_s21 = smov (!%p138_p2), 112   ;;  %1250 = vset.pattern.permute.xlu1 (!%p138_p2), %v1273_v35  ;;  %685 = vmatprep.mubr.bf16.mxu0 (!%p138_p2), %v1355_v37  ;;  %vm318_vm3 = vcmask (!%p138_p2), 916480   ;;  %vm649_vm4 = vcmask (!%p138_p2), 261120   ;;  %vm363_vm5 = vcmask (!%p138_p2), 908288   ;;  %vm408_vm6 = vcmask (!%p138_p2), 900096  }
   0x8   : > { %s1274_s22 = smov (!%p138_p2), 111   ;;  %s1275_s23 = smov (!%p138_p2), 110   ;;  %vm453_vm7 = vcmask (!%p138_p2), 785408   ;;  %vm498_vm8 = vcmask (!%p138_p2), 777216   ;;  %vm1279_vm9 = vmmov (!%p138_p2), 0   ;;  %vm860_vm15 = vcmask (!%p138_p2), 764928  }
   0x9   : > { %s1276_s24 = smov (!%p138_p2), 96   ;;  %s1277_s25 = smov (!%p138_p2), 95  }
   0xd   : > { %s1565_s13 = smov (!%p161_p3, %s919_s13), 1 }
   0xe   : > { %s988_s14 = smul.u32 48, %s1565_s13 }
   0xf   : > { %s989_s9 = smul.u32 24, %s1565_s13 }
  0x10   : > { %s165_s17 = scalar_lea.vmem %s1560_s0, %s988_s14 }
  0x11   : > { %v172_v0 = vld [vmem:[%s165_s17] sm:$0xff]  ;;  %v1314_v1 = vld [vmem:[%s165_s17 + $0x8] sm:$0xf]  ;;  %v174_v2 = vld [vmem:[%s165_s17 + $0xc] sm:$0xff]  ;;  %s170_s13 = scalar_lea.vmem %s1563_s3, %s989_s9 }
  0x12   : > { %v181_v3 = vunpack.c.h.bf16 %v172_v0  ;;  %v182_v4 = vunpack.c.l.bf16 %v1314_v1  ;;  %v180_v5 = vunpack.c.l.bf16 %v172_v0  ;;  %v183_v6 = vunpack.c.l.bf16 %v174_v2  ;;  %v1317_v7 = vld [vmem:[%s165_s17 + $0x14] sm:$0xf]  ;;  %v176_v8 = vld [vmem:[%s165_s17 + $0x18] sm:$0xff]  ;;  %v1319_v9 = vld [vmem:[%s165_s17 + $0x20] sm:$0xf] }
  0x13   : > { %v184_v10 = vunpack.c.h.bf16 %v174_v2  ;;  %v185_v11 = vunpack.c.l.bf16 %v1317_v7  ;;  %v187_v12 = vunpack.c.h.bf16 %v176_v8  ;;  %v188_v13 = vunpack.c.l.bf16 %v1319_v9  ;;  %v178_v14 = vld [vmem:[%s165_s17 + $0x24] sm:$0xff]  ;;  %v1323_v15 = vld [vmem:[%s165_s17 + $0x2c] sm:$0xf] }
  0x14   : > { %v1009_v16 = vpack.i.bf16 %v182_v4, %v181_v3  ;;  %v1325_v17 = vpack.i.bf16 %v183_v6, %v180_v5  ;;  %v190_v18 = vunpack.c.h.bf16 %v178_v14  ;;  %v191_v19 = vunpack.c.l.bf16 %v1323_v15 }
  0x15   : > { %v1014_v20 = vpack.i.bf16 %v185_v11, %v184_v10  ;;  %v1024_v21 = vpack.i.bf16 %v188_v13, %v187_v12  ;;  %v186_v22 = vunpack.c.l.bf16 %v176_v8  ;;  %v189_v23 = vunpack.c.l.bf16 %v178_v14 }
  0x16   : > { %1010 = vrot.lane.b32.xlu0 %v1009_v16, %s1269_s18  ;;  %1020 = vrot.lane.b32.xlu1 %v1325_v17, %s1269_s18  ;;  %v1029_v24 = vpack.i.bf16 %v191_v19, %v190_v18  ;;  %v1184_v26 = vpack.i.bf16 %v185_v11, %v182_v4  ;;  %v1194_v27 = vpack.i.bf16 %v184_v10, %v181_v3 }
  0x17   : > { %v1329_v25 = vpack.i.bf16 %v189_v23, %v186_v22  ;;  %v1199_v28 = vpack.i.bf16 %v191_v19, %v188_v13  ;;  %v1332_v29 = vpack.i.bf16 %v190_v18, %v187_v12  ;;  %v927_v30 = vcombine.high %v172_v0, %v174_v2 }
  0x18   : > { %v926_v31 = vcombine.low %v172_v0, %v174_v2  ;;  %v930_v32 = vcombine.high %v176_v8, %v178_v14  ;;  %v929_v33 = vcombine.low %v176_v8, %v178_v14  ;;  %v928_v34 = vcombine.low %v1314_v1, %v1317_v7 }
  0x19   : > { %653 = vmatprep.subr.bf16.mxu0 %v927_v30  ;;  %v931_v36 = vcombine.low %v1319_v9, %v1323_v15 }
  0x1a   : > { %1015 = vrot.lane.b32.xlu0 %v1014_v20, %s1269_s18  ;;  %1025 = vrot.lane.b32.xlu1 %v1024_v21, %s1269_s18 }
  0x1b   : > { %654 = vmatpush1.bf16.msra.mxu0 %v926_v31 }
  0x1c   : > { %655 = vmatprep.subr.bf16.mxu0 %v930_v32 }
  0x1e   : > { %1030 = vrot.lane.b32.xlu0 %v1029_v24, %s1269_s18  ;;  %1035 = vrot.lane.b32.xlu1 %v1329_v25, %s1269_s18 }
  0x1f   : > { %656 = vmatpush1.bf16.msra.mxu0 %v929_v33 }
  0x22   : > { %1040 = vrot.lane.b32.xlu0 %v1009_v16, %s1270_s19  ;;  %1045 = vrot.lane.b32.xlu1 %v1014_v20, %s1270_s19 }
  0x26   : > { %1050 = vrot.lane.b32.xlu0 %v1325_v17, %s1270_s19  ;;  %1055 = vrot.lane.b32.xlu1 %v1009_v16, %s1271_s20 }
  0x2a   : > { %1060 = vrot.lane.b32.xlu0 %v1014_v20, %s1271_s20  ;;  %1065 = vrot.lane.b32.xlu1 %v1024_v21, %s1270_s19 }
  0x2e   : > { %1070 = vrot.lane.b32.xlu0 %v1029_v24, %s1270_s19  ;;  %1075 = vrot.lane.b32.xlu1 %v1325_v17, %s1271_s20 }
  0x32   : > { %1080 = vrot.lane.b32.xlu0 %v1329_v25, %s1270_s19  ;;  %1085 = vrot.lane.b32.xlu1 %v1024_v21, %s1271_s20 }
  0x36   : > { %1090 = vrot.lane.b32.xlu0 %v1029_v24, %s1271_s20  ;;  %1095 = vrot.lane.b32.xlu1 %v1009_v16, %s1272_s21 }
  0x3a   : > { %1100 = vrot.lane.b32.xlu0 %v1014_v20, %s1272_s21  ;;  %1105 = vrot.lane.b32.xlu1 %v1329_v25, %s1271_s20 }
  0x3e   : > { %1110 = vrot.lane.b32.xlu0 %v1325_v17, %s1272_s21  ;;  %1115 = vrot.lane.b32.xlu1 %v1024_v21, %s1272_s21 }
  0x42   : > { %1120 = vrot.lane.b32.xlu0 %v1029_v24, %s1272_s21  ;;  %1125 = vrot.lane.b32.xlu1 %v1184_v26, %s1274_s22 }
  0x46   : > { %1130 = vrot.lane.b32.xlu0 %v1329_v25, %s1272_s21  ;;  %1135 = vrot.lane.b32.xlu1 %v1194_v27, %s1274_s22 }
  0x4a   : > { %1140 = vrot.lane.b32.xlu0 %v1199_v28, %s1274_s22  ;;  %1145 = vrot.lane.b32.xlu1 %v1325_v17, %s1274_s22 }
  0x4e   : > { %1150 = vrot.lane.b32.xlu0 %v1332_v29, %s1274_s22  ;;  %1155 = vrot.lane.b32.xlu1 %v1184_v26, %s1275_s23 }
  0x52   : > { %1160 = vrot.lane.b32.xlu0 %v1329_v25, %s1274_s22  ;;  %1165 = vrot.lane.b32.xlu1 %v1194_v27, %s1275_s23 }
  0x56   : > { %1170 = vrot.lane.b32.xlu0 %v1199_v28, %s1275_s23  ;;  %1175 = vrot.lane.b32.xlu1 %v1325_v17, %s1275_s23 }
  0x5a   : > { %1180 = vrot.lane.b32.xlu0 %v1332_v29, %s1275_s23  ;;  %1185 = vrot.lane.b32.xlu1 %v1184_v26, %s1276_s24 }
  0x5e   : > { %1190 = vrot.lane.b32.xlu0 %v1329_v25, %s1275_s23  ;;  %1195 = vrot.lane.b32.xlu1 %v1194_v27, %s1276_s24 }
  0x62   : > { %1200 = vrot.lane.b32.xlu0 %v1199_v28, %s1276_s24  ;;  %1205 = vrot.lane.b32.xlu1 %v1325_v17, %s1276_s24 }
  0x66   : > { %1210 = vrot.lane.b32.xlu0 %v1332_v29, %s1276_s24  ;;  %1215 = vrot.lane.b32.xlu1 %v1184_v26, %s1277_s25 }
  0x6a   : > { %1220 = vrot.lane.b32.xlu0 %v1329_v25, %s1276_s24  ;;  %1225 = vrot.lane.b32.xlu1 %v1194_v27, %s1277_s25 }
  0x6e   : > { %1230 = vrot.lane.b32.xlu0 %v1199_v28, %s1277_s25  ;;  %1235 = vrot.lane.b32.xlu1 %v1325_v17, %s1277_s25 }
  0x72   : > { %1240 = vrot.lane.b32.xlu0 %v1332_v29, %s1277_s25  ;;  %1245 = vrot.lane.b32.xlu1 %v1329_v25, %s1277_s25 }
  0x76   : > { %626 = vperm.xlu0 %1249, %v622_v38   ;;  %631 = vperm.xlu1 %1250, %v623_v39  }
  0x88   : > { %v1368_v40 = vpop.permute.xlu0 %1010  ;;  %v1021_v41 = vpop.permute.xlu1 %1020 }
  0x89   : > { %v1013_v42 = vunpack.i.h.bf16 %v1368_v40  ;;  %v1012_v43 = vunpack.i.l.bf16 %v1368_v40  ;;  %v1022_v44 = vunpack.i.l.bf16 %v1021_v41  ;;  %v1023_v47 = vunpack.i.h.bf16 %v1021_v41 }
  0x8b   : > { %v230_v50 = vsel %vm228_vm0, %v1012_v43, %v1013_v42  ;;  %v229_v51 = vsel %vm228_vm0, %v1022_v44, %v1012_v43 }
  0x8c   : > { %v1372_v45 = vpop.permute.xlu0 %1015  ;;  %v1374_v46 = vpop.permute.xlu1 %1025 }
  0x8d   : > { %v1018_v48 = vunpack.i.h.bf16 %v1372_v45  ;;  %v1017_v49 = vunpack.i.l.bf16 %v1372_v45  ;;  %v1028_v52 = vunpack.i.h.bf16 %v1374_v46  ;;  %v1027_v53 = vunpack.i.l.bf16 %v1374_v46 }
  0x8f   : > { %v232_v54 = vsel %vm228_vm0, %v1017_v49, %v1018_v48  ;;  %v231_v55 = vsel %vm228_vm0, %v1023_v47, %v1017_v49  ;;  %v234_v0 = vsel %vm228_vm0, %v1027_v53, %v1028_v52 }
  0x90   : > { %v1388_v56 = vpop.permute.xlu0 %1030  ;;  %v1036_v57 = vpop.permute.xlu1 %1035  ;;  %v571_v58 = vpack.c.bf16 %v232_v54, %v230_v50  ;;  %v570_v59 = vpack.c.bf16 %v231_v55, %v229_v51 }
  0x91   : > { %v1033_v60 = vunpack.i.h.bf16 %v1388_v56  ;;  %v1032_v61 = vunpack.i.l.bf16 %v1388_v56  ;;  %v1038_v62 = vunpack.i.h.bf16 %v1036_v57  ;;  %v1037_v63 = vunpack.i.l.bf16 %v1036_v57 }
  0x92   : > { %657 = vmatprep.subr.bf16.mxu0 %v571_v58 }
  0x93   : > { %658 = vmatpush1.bf16.msra.mxu0 %v570_v59  ;;  %v236_v2 = vsel %vm228_vm0, %v1032_v61, %v1033_v60  ;;  %v233_v3 = vsel %vm228_vm0, %v1037_v63, %v1027_v53  ;;  %v235_v4 = vsel %vm228_vm0, %v1038_v62, %v1032_v61 }
  0x94   : > { %v1400_v5 = vpop.permute.xlu0 %1040  ;;  %v1402_v6 = vpop.permute.xlu1 %1045  ;;  %v574_v8 = vpack.c.bf16 %v236_v2, %v234_v0  ;;  %v573_v10 = vpack.c.bf16 %v235_v4, %v233_v3 }
  0x95   : > { %v1043_v11 = vunpack.i.h.bf16 %v1400_v5  ;;  %v1042_v12 = vunpack.i.l.bf16 %v1400_v5  ;;  %v1048_v13 = vunpack.i.h.bf16 %v1402_v6  ;;  %v1047_v14 = vunpack.i.l.bf16 %v1402_v6 }
  0x96   : > { %659 = vmatprep.subr.bf16.mxu0 %v574_v8 }
  0x97   : > { %660 = vmatpush1.bf16.msra.mxu0 %v573_v10  ;;  %v275_v16 = vsel %vm273_vm1, %v1042_v12, %v1043_v11  ;;  %v277_v17 = vsel %vm273_vm1, %v1047_v14, %v1048_v13  ;;  %v578_v46 = vpack.c.bf16 %v1048_v13, %v1043_v11 }
  0x98   : > { %v1051_v18 = vpop.permute.xlu0 %1050  ;;  %v1056_v19 = vpop.permute.xlu1 %1055  ;;  %v577_v20 = vpack.c.bf16 %v277_v17, %v275_v16 }
  0x99   : > { %v1053_v21 = vunpack.i.h.bf16 %v1051_v18  ;;  %v1052_v22 = vunpack.i.l.bf16 %v1051_v18  ;;  %v1058_v23 = vunpack.i.h.bf16 %v1056_v19  ;;  %v1057_v24 = vunpack.i.l.bf16 %v1056_v19 }
  0x9a   : > { %661 = vmatprep.subr.bf16.mxu0 %v577_v20 }
  0x9b   : > { %v274_v25 = vsel %vm273_vm1, %v1052_v22, %v1042_v12  ;;  %v276_v26 = vsel %vm273_vm1, %v1053_v21, %v1047_v14  ;;  %v545_v32 = vsel %vm543_vm2, %v1057_v24, %v1058_v23 }
  0x9c   : > { %v1061_v27 = vpop.permute.xlu0 %1060  ;;  %v1416_v28 = vpop.permute.xlu1 %1065  ;;  %v576_v29 = vpack.c.bf16 %v276_v26, %v274_v25 }
  0x9d   : > { %v1063_v30 = vunpack.i.h.bf16 %v1061_v27  ;;  %v1062_v31 = vunpack.i.l.bf16 %v1061_v27  ;;  %v1068_v35 = vunpack.i.h.bf16 %v1416_v28  ;;  %v1067_v38 = vunpack.i.l.bf16 %v1416_v28 }
  0x9e   : > { %662 = vmatpush1.bf16.msra.mxu0 %v576_v29 }
  0x9f   : > { %v1419_v33 = vpack.c.bf16 %v1063_v30, %v1058_v23  ;;  %v547_v39 = vsel %vm543_vm2, %v1062_v31, %v1063_v30  ;;  %v279_v53 = vsel %vm273_vm1, %v1067_v38, %v1068_v35 }
  0xa0   : > { %v1424_v41 = vpop.permute.xlu0 %1070  ;;  %v1076_v43 = vpop.permute.xlu1 %1075  ;;  %v613_v44 = vpack.c.bf16 %v547_v39, %v545_v32 }
  0xa1   : > { %v1073_v47 = vunpack.i.h.bf16 %v1424_v41  ;;  %v1072_v49 = vunpack.i.l.bf16 %v1424_v41  ;;  %v1078_v50 = vunpack.i.h.bf16 %v1076_v43  ;;  %v1077_v51 = vunpack.i.l.bf16 %v1076_v43 }
  0xa2   : > { %696 = vmatprep.subr.bf16.mxu1 %v613_v44 }
  0xa3   : > { %v281_v54 = vsel %vm273_vm1, %v1072_v49, %v1073_v47  ;;  %v544_v55 = vsel %vm543_vm2, %v1077_v51, %v1057_v24  ;;  %v546_v57 = vsel %vm543_vm2, %v1078_v50, %v1062_v31 }
  0xa4   : > { %v1081_v58 = vpop.permute.xlu0 %1080  ;;  %v1086_v59 = vpop.permute.xlu1 %1085  ;;  %v580_v61 = vpack.c.bf16 %v281_v54, %v279_v53  ;;  %v612_v62 = vpack.c.bf16 %v546_v57, %v544_v55  ;;  %v1463_v54 = vld [vmem:[%s1561_s1 + $0x8] ss:$12 sps:$4 sm:$0xff]  }
  0xa5   : > { %v1083_v63 = vunpack.i.h.bf16 %v1081_v58  ;;  %v1082_v0 = vunpack.i.l.bf16 %v1081_v58  ;;  %v1088_v2 = vunpack.i.h.bf16 %v1086_v59  ;;  %v1087_v3 = vunpack.i.l.bf16 %v1086_v59 }
  0xa6   : > { %663 = vmatprep.subr.bf16.mxu0 %v580_v61  ;;  %697 = vmatpush1.bf16.msra.mxu1 %v612_v62 }
  0xa7   : > { %v278_v4 = vsel %vm273_vm1, %v1082_v0, %v1067_v38  ;;  %v280_v8 = vsel %vm273_vm1, %v1083_v63, %v1072_v49  ;;  %v549_v18 = vsel %vm543_vm2, %v1087_v3, %v1088_v2 }
  0xa8   : > { %v1091_v10 = vpop.permute.xlu0 %1090  ;;  %v1438_v12 = vpop.permute.xlu1 %1095  ;;  %v579_v14 = vpack.c.bf16 %v280_v8, %v278_v4 }
  0xa9   : > { %v1093_v16 = vunpack.i.h.bf16 %v1091_v10  ;;  %v1092_v17 = vunpack.i.l.bf16 %v1091_v10  ;;  %v1098_v20 = vunpack.i.h.bf16 %v1438_v12  ;;  %v1097_v21 = vunpack.i.l.bf16 %v1438_v12 }
  0xaa   : > { %664 = vmatpush1.bf16.msra.mxu0 %v579_v14 }
  0xab   : > { %v1441_v19 = vpack.c.bf16 %v1093_v16, %v1088_v2  ;;  %v551_v22 = vsel %vm543_vm2, %v1092_v17, %v1093_v16  ;;  %v320_v31 = vsel %vm318_vm3, %v1097_v21, %v1098_v20 }
  0xac   : > { %v1446_v23 = vpop.permute.xlu0 %1100  ;;  %v1106_v24 = vpop.permute.xlu1 %1105  ;;  %v616_v25 = vpack.c.bf16 %v551_v22, %v549_v18 }
  0xad   : > { %v1103_v26 = vunpack.i.h.bf16 %v1446_v23  ;;  %v1102_v27 = vunpack.i.l.bf16 %v1446_v23  ;;  %v1108_v29 = vunpack.i.h.bf16 %v1106_v24  ;;  %v1107_v30 = vunpack.i.l.bf16 %v1106_v24 }
  0xae   : > { %698 = vmatprep.subr.bf16.mxu1 %v616_v25 }
  0xaf   : > { %v322_v32 = vsel %vm318_vm3, %v1102_v27, %v1103_v26  ;;  %v548_v38 = vsel %vm543_vm2, %v1107_v30, %v1087_v3  ;;  %v550_v39 = vsel %vm543_vm2, %v1108_v29, %v1092_v17  ;;  %v584_v28 = vpack.c.bf16 %v1103_v26, %v1098_v20 }
  0xb0   : > { %v1111_v43 = vpop.permute.xlu0 %1110  ;;  %v1458_v44 = vpop.permute.xlu1 %1115  ;;  %v583_v49 = vpack.c.bf16 %v322_v32, %v320_v31  ;;  %v615_v50 = vpack.c.bf16 %v550_v39, %v548_v38 }
  0xb1   : > { %v1113_v51 = vunpack.i.h.bf16 %v1111_v43  ;;  %v1112_v53 = vunpack.i.l.bf16 %v1111_v43  ;;  %v1118_v55 = vunpack.i.h.bf16 %v1458_v44  ;;  %v1117_v57 = vunpack.i.l.bf16 %v1458_v44 }
  0xb2   : > { %665 = vmatprep.subr.bf16.mxu0 %v583_v49  ;;  %699 = vmatpush1.bf16.msra.mxu1 %v615_v50 }
  0xb3   : > { %v319_v58 = vsel %vm318_vm3, %v1112_v53, %v1097_v21  ;;  %v321_v59 = vsel %vm318_vm3, %v1113_v51, %v1102_v27  ;;  %v324_v10 = vsel %vm318_vm3, %v1117_v57, %v1118_v55 }
  0xb4   : > { %v1469_v61 = vpop.permute.xlu0 %1120  ;;  %v1126_v62 = vpop.permute.xlu1 %1125  ;;  %v582_v63 = vpack.c.bf16 %v321_v59, %v319_v58 }
  0xb5   : > { %v1123_v0 = vunpack.i.h.bf16 %v1469_v61  ;;  %v1122_v2 = vunpack.i.l.bf16 %v1469_v61  ;;  %v1128_v3 = vunpack.i.h.bf16 %v1126_v62  ;;  %v1127_v4 = vunpack.i.l.bf16 %v1126_v62  ;;  %935 = vmatmul.mubr.msk.bf16.vlgmr.msra.gmra.mrb[0].mxu1 %vm649_vm4, %v1463_v54 }
  0xb6   : > { %666 = vmatpush1.bf16.msra.mxu0 %v582_v63  ;;  %771 = vmatprep.mubr.bf16.mxu1 %v1355_v37 }
  0xb7   : > { %v590_v8 = vpack.c.bf16 %v1128_v3, %v1127_v4  ;;  %v326_v14 = vsel %vm318_vm3, %v1122_v2, %v1123_v0 }
  0xb8   : > { %v1131_v16 = vpop.permute.xlu0 %1130  ;;  %v1136_v17 = vpop.permute.xlu1 %1135  ;;  %v586_v18 = vpack.c.bf16 %v326_v14, %v324_v10  ;;  %v572_v10 = vpack.c.bf16 %v1018_v48, %v1013_v42 }
  0xb9   : > { %v1133_v21 = vunpack.i.h.bf16 %v1131_v16  ;;  %v1132_v22 = vunpack.i.l.bf16 %v1131_v16  ;;  %v1138_v24 = vunpack.i.h.bf16 %v1136_v17  ;;  %v1137_v25 = vunpack.i.l.bf16 %v1136_v17  ;;  %947 = vmatprep.subr.bf16.mxu1 %v590_v8 }
  0xba   : > { %667 = vmatprep.subr.bf16.mxu0 %v586_v18  ;;  %948 = vmatpush3.bf16.msra.mxu1 %v928_v34 }
  0xbb   : > { %v323_v37 = vsel %vm318_vm3, %v1132_v22, %v1117_v57  ;;  %v325_v27 = vsel %vm318_vm3, %v1133_v21, %v1122_v2  ;;  %v365_v29 = vsel %vm363_vm5, %v1137_v25, %v1127_v4  ;;  %v367_v30 = vsel %vm363_vm5, %v1138_v24, %v1128_v3 }
  0xbc   : > { %v1141_v31 = vpop.permute.xlu0 %1140  ;;  %v1146_v32 = vpop.permute.xlu1 %1145  ;;  %v585_v38 = vpack.c.bf16 %v325_v27, %v323_v37  ;;  %v589_v39 = vpack.c.bf16 %v367_v30, %v365_v29 }
  0xbd   : > { %v1143_v43 = vunpack.i.h.bf16 %v1141_v31  ;;  %v1142_v49 = vunpack.i.l.bf16 %v1141_v31  ;;  %v1148_v50 = vunpack.i.h.bf16 %v1146_v32  ;;  %v1147_v51 = vunpack.i.l.bf16 %v1146_v32 }
  0xbe   : > { %668 = vmatpush1.bf16.msra.mxu0 %v585_v38 }
  0xbf   : > { %v593_v53 = vpack.c.bf16 %v1143_v43, %v1142_v49  ;;  %669 = vmatprep.subr.bf16.mxu0 %v589_v39  ;;  %v364_v1 = vsel %vm363_vm5, %v1147_v51, %v1137_v25  ;;  %v366_v7 = vsel %vm363_vm5, %v1148_v50, %v1138_v24  ;;  %v575_v39 = vpack.c.bf16 %v1033_v60, %v1028_v52 }
  0xc0   : > { %v1151_v34 = vpop.permute.xlu0 %1150  ;;  %v1156_v57 = vpop.permute.xlu1 %1155  ;;  %v588_v58 = vpack.c.bf16 %v366_v7, %v364_v1 }
  0xc1   : > { %v1153_v59 = vunpack.i.h.bf16 %v1151_v34  ;;  %v1152_v62 = vunpack.i.l.bf16 %v1151_v34  ;;  %v1158_v63 = vunpack.i.h.bf16 %v1156_v57  ;;  %v1157_v2 = vunpack.i.l.bf16 %v1156_v57  ;;  %949 = vmatprep.subr.bf16.mxu1 %v593_v53 }
  0xc2   : > { %670 = vmatpush1.bf16.msra.mxu0 %v588_v58  ;;  %950 = vmatpush3.bf16.msra.mxu1 %v931_v36 }
  0xc3   : > { %v596_v3 = vpack.c.bf16 %v1158_v63, %v1157_v2  ;;  %v369_v4 = vsel %vm363_vm5, %v1152_v62, %v1142_v49  ;;  %v371_v8 = vsel %vm363_vm5, %v1153_v59, %v1143_v43 }
  0xc4   : > { %v1161_v14 = vpop.permute.xlu0 %1160  ;;  %v1166_v16 = vpop.permute.xlu1 %1165  ;;  %v592_v17 = vpack.c.bf16 %v371_v8, %v369_v4 }
  0xc5   : > { %v1163_v18 = vunpack.i.h.bf16 %v1161_v14  ;;  %v1162_v21 = vunpack.i.l.bf16 %v1161_v14  ;;  %v1168_v22 = vunpack.i.h.bf16 %v1166_v16  ;;  %v1167_v24 = vunpack.i.l.bf16 %v1166_v16  ;;  %951 = vmatprep.subr.bf16.mxu1 %v596_v3 }
  0xc6   : > { %671 = vmatprep.subr.bf16.mxu0 %v592_v17  ;;  %952 = vmatpush3.bf16.msra.mxu1 %v572_v10 }
  0xc7   : > { %v368_v9 = vsel %vm363_vm5, %v1162_v21, %v1152_v62  ;;  %v370_v15 = vsel %vm363_vm5, %v1163_v18, %v1153_v59  ;;  %v410_v36 = vsel %vm408_vm6, %v1167_v24, %v1157_v2  ;;  %v412_v40 = vsel %vm408_vm6, %v1168_v22, %v1158_v63 }
  0xc8   : > { %v1171_v42 = vpop.permute.xlu0 %1170  ;;  %v1176_v45 = vpop.permute.xlu1 %1175  ;;  %v591_v48 = vpack.c.bf16 %v370_v15, %v368_v9  ;;  %v595_v25 = vpack.c.bf16 %v412_v40, %v410_v36  ;;  %v581_v9 = vpack.c.bf16 %v1073_v47, %v1068_v35 }
  0xc9   : > { %v1173_v37 = vunpack.i.h.bf16 %v1171_v42  ;;  %v1172_v27 = vunpack.i.l.bf16 %v1171_v42  ;;  %v1178_v29 = vunpack.i.h.bf16 %v1176_v45  ;;  %v1177_v30 = vunpack.i.l.bf16 %v1176_v45 }
  0xca   : > { %672 = vmatpush1.bf16.msra.mxu0 %v591_v48 }
  0xcb   : > { %v599_v31 = vpack.c.bf16 %v1173_v37, %v1172_v27  ;;  %673 = vmatprep.subr.bf16.mxu0 %v595_v25  ;;  %v409_v32 = vsel %vm408_vm6, %v1177_v30, %v1167_v24  ;;  %v411_v38 = vsel %vm408_vm6, %v1178_v29, %v1168_v22 }
  0xcc   : > { %v1181_v43 = vpop.permute.xlu0 %1180  ;;  %v1186_v49 = vpop.permute.xlu1 %1185  ;;  %v594_v50 = vpack.c.bf16 %v411_v38, %v409_v32 }
  0xcd   : > { %v1183_v51 = vunpack.i.h.bf16 %v1181_v43  ;;  %v1182_v53 = vunpack.i.l.bf16 %v1181_v43  ;;  %v1188_v1 = vunpack.i.h.bf16 %v1186_v49  ;;  %v1187_v7 = vunpack.i.l.bf16 %v1186_v49  ;;  %953 = vmatprep.subr.bf16.mxu1 %v599_v31 }
  0xce   : > { %674 = vmatpush1.bf16.msra.mxu0 %v594_v50  ;;  %954 = vmatpush3.bf16.msra.mxu1 %v575_v39 }
  0xcf   : > { %v602_v34 = vpack.c.bf16 %v1188_v1, %v1187_v7  ;;  %v414_v57 = vsel %vm408_vm6, %v1182_v53, %v1172_v27  ;;  %v416_v58 = vsel %vm408_vm6, %v1183_v51, %v1173_v37 }
  0xd0   : > { %v1191_v52 = vpop.permute.xlu0 %1190  ;;  %v1196_v56 = vpop.permute.xlu1 %1195  ;;  %v598_v60 = vpack.c.bf16 %v416_v58, %v414_v57 }
  0xd1   : > { %v1193_v59 = vunpack.i.h.bf16 %v1191_v52  ;;  %v1192_v62 = vunpack.i.l.bf16 %v1191_v52  ;;  %v1198_v63 = vunpack.i.h.bf16 %v1196_v56  ;;  %v1197_v2 = vunpack.i.l.bf16 %v1196_v56  ;;  %955 = vmatprep.subr.bf16.mxu1 %v602_v34 }
  0xd2   : > { %675 = vmatprep.subr.bf16.mxu0 %v598_v60  ;;  %956 = vmatpush3.bf16.msra.mxu1 %v578_v46  ;;  %v587_v46 = vpack.c.bf16 %v1123_v0, %v1118_v55 }
  0xd3   : > { %v413_v3 = vsel %vm408_vm6, %v1192_v62, %v1182_v53  ;;  %v415_v4 = vsel %vm408_vm6, %v1193_v59, %v1183_v51  ;;  %v455_v5 = vsel %vm453_vm7, %v1197_v2, %v1187_v7  ;;  %v457_v6 = vsel %vm453_vm7, %v1198_v63, %v1188_v1 }
  0xd4   : > { %v1201_v11 = vpop.permute.xlu0 %1200  ;;  %v1206_v13 = vpop.permute.xlu1 %1205  ;;  %v597_v8 = vpack.c.bf16 %v415_v4, %v413_v3  ;;  %v601_v10 = vpack.c.bf16 %v457_v6, %v455_v5  ;;  %v1258_v3 = vld [vmem:[%s1561_s1] ss:$12 sps:$4 sm:$0xff]   ;;  %v1278_v4 = vmov 0.0  }
  0xd5   : > { %v1203_v14 = vunpack.i.h.bf16 %v1201_v11  ;;  %v1202_v16 = vunpack.i.l.bf16 %v1201_v11  ;;  %v1208_v17 = vunpack.i.h.bf16 %v1206_v13  ;;  %v1207_v18 = vunpack.i.l.bf16 %v1206_v13 }
  0xd6   : > { %676 = vmatpush1.bf16.msra.mxu0 %v597_v8 }
  0xd7   : > { %v605_v21 = vpack.c.bf16 %v1203_v14, %v1202_v16  ;;  %677 = vmatprep.subr.bf16.mxu0 %v601_v10  ;;  %v454_v22 = vsel %vm453_vm7, %v1207_v18, %v1197_v2  ;;  %v456_v24 = vsel %vm453_vm7, %v1208_v17, %v1198_v63 }
  0xd8   : > { %v1211_v15 = vpop.permute.xlu0 %1210  ;;  %v1216_v36 = vpop.permute.xlu1 %1215  ;;  %v600_v40 = vpack.c.bf16 %v456_v24, %v454_v22 }
  0xd9   : > { %v1213_v42 = vunpack.i.h.bf16 %v1211_v15  ;;  %v1212_v45 = vunpack.i.l.bf16 %v1211_v15  ;;  %v1218_v48 = vunpack.i.h.bf16 %v1216_v36  ;;  %v1217_v25 = vunpack.i.l.bf16 %v1216_v36  ;;  %957 = vmatprep.subr.bf16.mxu1 %v605_v21 }
  0xda   : > { %678 = vmatpush1.bf16.msra.mxu0 %v600_v40  ;;  %958 = vmatpush3.bf16.msra.mxu1 %v581_v9 }
  0xdb   : > { %v608_v37 = vpack.c.bf16 %v1218_v48, %v1217_v25  ;;  %v459_v27 = vsel %vm453_vm7, %v1212_v45, %v1202_v16  ;;  %v461_v29 = vsel %vm453_vm7, %v1213_v42, %v1203_v14 }
  0xdc   : > { %v1221_v35 = vpop.permute.xlu0 %1220  ;;  %v1226_v41 = vpop.permute.xlu1 %1225  ;;  %v604_v47 = vpack.c.bf16 %v461_v29, %v459_v27 }
  0xdd   : > { %v1223_v30 = vunpack.i.h.bf16 %v1221_v35  ;;  %v1222_v31 = vunpack.i.l.bf16 %v1221_v35  ;;  %v1228_v32 = vunpack.i.h.bf16 %v1226_v41  ;;  %v1227_v38 = vunpack.i.l.bf16 %v1226_v41  ;;  %959 = vmatprep.subr.bf16.mxu1 %v608_v37 }
  0xde   : > { %679 = vmatprep.subr.bf16.mxu0 %v604_v47  ;;  %960 = vmatpush3.bf16.msra.mxu1 %v584_v28 }
  0xdf   : > { %v458_v39 = vsel %vm453_vm7, %v1222_v31, %v1212_v45  ;;  %v460_v43 = vsel %vm453_vm7, %v1223_v30, %v1213_v42  ;;  %v500_v12 = vsel %vm498_vm8, %v1227_v38, %v1217_v25  ;;  %v502_v23 = vsel %vm498_vm8, %v1228_v32, %v1218_v48 }
  0xe0   : > { %v1231_v20 = vpop.permute.xlu0 %1230  ;;  %v1236_v26 = vpop.permute.xlu1 %1235  ;;  %v603_v49 = vpack.c.bf16 %v460_v43, %v458_v39  ;;  %v607_v50 = vpack.c.bf16 %v502_v23, %v500_v12 }
  0xe1   : > { %v1233_v51 = vunpack.i.h.bf16 %v1231_v20  ;;  %v1232_v53 = vunpack.i.l.bf16 %v1231_v20  ;;  %v1238_v1 = vunpack.i.h.bf16 %v1236_v26  ;;  %v1237_v7 = vunpack.i.l.bf16 %v1236_v26 }
  0xe2   : > { %680 = vmatpush1.bf16.msra.mxu0 %v603_v49 }
  0xe3   : > { %v611_v34 = vpack.c.bf16 %v1233_v51, %v1232_v53  ;;  %681 = vmatprep.subr.bf16.mxu0 %v607_v50  ;;  %v499_v57 = vsel %vm498_vm8, %v1237_v7, %v1227_v38  ;;  %v501_v58 = vsel %vm498_vm8, %v1238_v1, %v1228_v32 }
  0xe4   : > { %v1241_v52 = vpop.permute.xlu0 %1240  ;;  %v1246_v56 = vpop.permute.xlu1 %1245  ;;  %v606_v60 = vpack.c.bf16 %v501_v58, %v499_v57 }
  0xe5   : > { %v1243_v59 = vunpack.i.h.bf16 %v1241_v52  ;;  %v1242_v62 = vunpack.i.l.bf16 %v1241_v52  ;;  %v1248_v63 = vunpack.i.h.bf16 %v1246_v56  ;;  %v1247_v2 = vunpack.i.l.bf16 %v1246_v56  ;;  %961 = vmatprep.subr.bf16.mxu1 %v611_v34 }
  0xe6   : > { %682 = vmatpush1.bf16.msra.mxu0 %v606_v60  ;;  %962 = vmatpush3.bf16.msra.mxu1 %v587_v46 }
  0xe7   : > { %972 = vmatprep.subr.bf16.mxu1 %v1278_v4  ;;  %v504_v44 = vsel %vm498_vm8, %v1242_v62, %v1232_v53  ;;  %v506_v55 = vsel %vm498_vm8, %v1243_v59, %v1233_v51  ;;  %v503_v61 = vsel %vm498_vm8, %v1247_v2, %v1242_v62  ;;  %v505_v0 = vsel %vm498_vm8, %v1248_v63, %v1243_v59 }
  0xe8   : > { %v610_v5 = vpack.c.bf16 %v506_v55, %v504_v44  ;;  %v609_v6 = vpack.c.bf16 %v505_v0, %v503_v61 }
  0xe9   : > { %772 = vmatmul.mubr.bf16.vlgmr.msra.gmra.mrb[4].mxu1 %v1258_v3 }
  0xea   : > { %683 = vmatprep.subr.bf16.mxu0 %v610_v5  ;;  %973 = vmatpush3.bf16.msra.mxu1 %v1419_v33 }
  0xeb   : > { %684 = vmatpush1.bf16.msra.mxu0 %v609_v6  ;;  %974 = vmatprep.subr.bf16.mxu1 %v1278_v4 }
  0xec   : > { %976 = vmatprep.mubr.msk.bf16.mxu1 %vm1279_vm9, %v1278_v4 }
  0xee   : > { %686 = vmatmul.mubr.bf16.vlgmr.msra.gmra.mrb[0].mxu0 %v1258_v3  ;;  %975 = vmatpush3.bf16.msra.mxu1 %v1441_v19 }
  0xf1   : > { %977 = vmatmul.mubr.msk.bf16.vlgmr.msra.gmra.mrb[8].mxu1 %vm649_vm4, %v1463_v54 }
  0xf5   : > { %v627_v21 = vpop.permute.xlu0 %626  ;;  %v632_v19 = vpop.permute.xlu1 %631 }
 0x188   : > { %v730_v11 = vpop.f32.mrb[0].mxu1 }
 0x189   : > { %v732_v13 = vpop.f32.mrb[1].mxu1 }
 0x18a   : > { %v734_v8 = vpop.f32.mrb[2].mxu1 }
 0x18b   : > { %v736_v10 = vpop.f32.mrb[3].mxu1 }
 0x1bc   : > { %v963_v14 = vpop.f32.mrb[4].mxu1 }
 0x1bd   : > { %v964_v16 = vpop.f32.mrb[5].mxu1 }
 0x1be   : > { %v965_v17 = vadd.f32 %v964_v16, %v963_v14  ;;  %v966_v18 = vpop.f32.mrb[6].mxu1 }
 0x1bf   : > { %v967_v33 = vpop.f32.mrb[7].mxu1 }
 0x1c0   : > { %v968_v22 = vadd.f32 %v967_v33, %v966_v18  ;;  %v774_v36 = vadd.f32 %v965_v17, %v627_v21 }
 0x1c1   : > { %v687_v24 = vpop.f32.mrb[0].mxu0 }
 0x1c2   : > { %v688_v9 = vadd.f32 %v687_v24, %v627_v21  ;;  %v689_v15 = vpop.f32.mrb[1].mxu0  ;;  %v777_v35 = vadd.f32 %v968_v22, %v632_v19 }
 0x1c3   : > { %v690_v40 = vadd.f32 %v689_v15, %v627_v21  ;;  %v691_v42 = vpop.f32.mrb[2].mxu0 }
 0x1c4   : > { %v731_v54 = vadd.f32 %v730_v11, %v688_v9  ;;  %v692_v45 = vadd.f32 %v691_v42, %v632_v19  ;;  %v693_v48 = vpop.f32.mrb[3].mxu0  ;;  %v814_v25 = vpop.f32.mrb[8].mxu1 }
 0x1c5   : > { %v733_v37 = vadd.f32 %v732_v13, %v690_v40  ;;  %v694_v27 = vadd.f32 %v693_v48, %v632_v19  ;;  %v815_v29 = vadd.f32 %v814_v25, %v774_v36  ;;  %v978_v28 = vpop.f32.mrb[9].mxu1 }
 0x1c6   : > { %vm821_vm10 = vcmp.ge.f32.partialorder %v731_v54, 0.0  ;;  %v827_v41 = vmul.f32 0.3, %v731_v54  ;;  %v735_v47 = vadd.f32 %v734_v8, %v692_v45  ;;  %v817_v30 = vpop.f32.mrb[10].mxu1 }
 0x1c7   : > { %vm822_vm11 = vcmp.ge.f32.partialorder %v733_v37, 0.0  ;;  %v828_v31 = vmul.f32 0.3, %v733_v37  ;;  %v737_v32 = vadd.f32 %v736_v10, %v694_v27  ;;  %vm823_vm12 = vcmp.ge.f32.partialorder %v815_v29, 0.0  ;;  %v979_v38 = vpop.f32.mrb[11].mxu1 }
 0x1c8   : > { %v833_v39 = vsel %vm821_vm10, %v731_v54, %v827_v41  ;;  %vm824_vm13 = vcmp.ge.f32.partialorder %v735_v47, 0.0  ;;  %v830_v43 = vmul.f32 0.3, %v735_v47  ;;  %v829_v12 = vmul.f32 0.3, %v815_v29 }
 0x1c9   : > { %v834_v23 = vsel %vm822_vm11, %v733_v37, %v828_v31  ;;  %vm825_vm14 = vcmp.ge.f32.partialorder %v737_v32, 0.0  ;;  %v831_v20 = vmul.f32 0.3, %v737_v32  ;;  %v818_v26 = vadd.f32 %v817_v30, %v777_v35 }
 0x1ca   : > { %v943_v49 = vpack.c.bf16 %v834_v23, %v833_v39  ;;  %v836_v50 = vsel %vm824_vm13, %v735_v47, %v830_v43  ;;  %v835_v51 = vsel %vm823_vm12, %v815_v29, %v829_v12 }
 0x1cb   : > { %v837_v53 = vsel %vm825_vm14, %v737_v32, %v831_v20  ;;  %v944_v1 = vpack.c.bf16 %v835_v51, %v835_v51  ;;  %vm826_vm0 = vcmp.ge.f32.partialorder %v818_v26, 0.0  ;;  %v832_v7 = vmul.f32 0.3, %v818_v26 }
 0x1cc   : > { %859 = vst [vmem:[%s170_s13] sm:$0xff] %v943_v49  ;;  %v945_v34 = vpack.c.bf16 %v837_v53, %v836_v50 }
 0x1cd   : > { %861 = vst.msk [vmem:[%s170_s13 + $0x8] sm:$0xf] %vm860_vm15, %v944_v1  ;;  %v838_v57 = vsel %vm826_vm0, %v818_v26, %v832_v7 }
 0x1ce   : > { %862 = vst [vmem:[%s170_s13 + $0xc] sm:$0xff] %v945_v34  ;;  %v946_v58 = vpack.c.bf16 %v838_v57, %v838_v57 }
 0x1d0   : > { %863 = vst.msk [vmem:[%s170_s13 + $0x14] sm:$0xf] %vm860_vm15, %v946_v58 }
 0x1d1 PF: > { %s13_s12 = sadd.s32 1, %s1267_s12  }
 0x1d2   : > { %p10_p4 = scmp.ge.s32.totalorder %s13_s12, 4  }
 0x1d4   :  { %12 = sbr.rel (!%p10_p4) target bundleno = 1 (0x1), region = 62 }

// kernel: hsarnn_forward.19
= control target key start
LH: loop header
LB: loop body
LE: loop exit
PB: predicated region body
PF: predicated region fallthrough
CT: control target
= control target key end

     0   :  { %s898_s12 = smov 0   ;;  %s975_s0 = inlined_call_operand.vmem [shape: bf16[2,16,452], index: 0, kind: input, shape index: {}]   ;;  %s976_s1 = inlined_call_operand.vmem [shape: bf16[3,144], index: 1, kind: input, shape index: {}]   ;;  %s977_s2 = inlined_call_operand.vmem [shape: f32[3,1], index: 2, kind: input, shape index: {}]   ;;  %s978_s3 = inlined_call_operand.vmem [shape: f32[2,3,414], index: 3, kind: output, shape index: {}]  }
   0x1 LB: > { %s659_s13 = sadd.s32 4294967295, %s867_s12   ;;  %p663_p0 = scmp.ge.s32.totalorder %s867_s12, 1  ;;  %s867_s12 = sphi %s898_s12, %s13_s12  }
   0x2   : > { %p137_p1 = scmp.lt.s32.totalorder %s867_s12, 3 }
   0x4   : > { %p138_p2 = pnand %p663_p0, %p137_p1 }
   0x5   : > { %p161_p3 = scmp.lt.s32.totalorder (!%p138_p2), %s659_s13, 1  ;;  %s869_s18 = smov (!%p138_p2), 127   ;;  %v915_v20 = vld.sshfl [vmem:[%s976_s1] sm:$0x33 pattern:$0x76325410] (!%p138_p2) }
   0x6   : > { %141 = sbr.rel (%p138_p2) target bundleno = 426 (0x1aa), region = 32  ;;  %s870_s19 = smov (!%p138_p2), 126   ;;  %v491_v21 = vcombine.high (!%p138_p2), %v915_v20, %v915_v20  ;;  %vm493_vm0 = vcmask (!%p138_p2), 130048   ;;  %v877_v22 = vmov (!%p138_p2), 0   ;;  %v477_v23 = vld [vmem:[%s977_s2] sm:$0x7] (!%p138_p2) }
   0x7   : > { %s871_s20 = smov (!%p138_p2), 110   ;;  %s872_s21 = smov (!%p138_p2), 109   ;;  %856 = vset.pattern.permute.xlu0 (!%p138_p2), %v877_v22  ;;  %vm208_vm1 = vcmask (!%p138_p2), 1039360   ;;  %vm239_vm2 = vcmask (!%p138_p2), 1031168   ;;  %vm270_vm3 = vcmask (!%p138_p2), 900096   ;;  %vm301_vm4 = vcmask (!%p138_p2), 891904  }
   0x8   : > { %s873_s22 = smov (!%p138_p2), 108   ;;  %s874_s23 = smov (!%p138_p2), 92   ;;  %673 = vmatprep.mubr.msk.bf16.mxu0 (!%p138_p2), %vm493_vm0, %v491_v21  ;;  %674 = vmatprep.mubr.msk.bf16.mxu1 (!%p138_p2), %vm493_vm0, %v491_v21  ;;  %vm332_vm5 = vcmask (!%p138_p2), 883712   ;;  %vm363_vm6 = vcmask (!%p138_p2), 752640   ;;  %vm394_vm7 = vcmask (!%p138_p2), 744448   ;;  %vm425_vm8 = vcmask (!%p138_p2), 736256  }
   0x9   : > { %s875_s24 = smov (!%p138_p2), 91   ;;  %s876_s27 = smov (!%p138_p2), 90   ;;  %vm600_vm9 = vcmask (!%p138_p2), 1042432   ;;  %vm601_vm11 = vcmask (!%p138_p2), 243716  }
   0xa   : > { %vm602_vm15 = vmor (!%p138_p2), %vm601_vm11, %vm600_vm9 }
   0xd   : > { %s980_s13 = smov (!%p161_p3, %s659_s13), 1 }
   0xe   : > { %s677_s14 = sshll.u32 %s980_s13, 5  ;;  %s678_s30 = sshll.u32 %s980_s13, 4 }
   0xf   : > { %s165_s17 = scalar_lea.vmem %s975_s0, %s677_s14  ;;  %s170_s6 = scalar_lea.vmem %s978_s3, %s678_s30 }
  0x10   : > { %v172_v0 = vld [vmem:[%s165_s17] sm:$0xff]  ;;  %v173_v1 = vld [vmem:[%s165_s17 + $0x8] sm:$0xff]  ;;  %v174_v2 = vld [vmem:[%s165_s17 + $0x10] sm:$0xff] }
  0x11   : > { %v177_v3 = vunpack.c.h.bf16 %v172_v0  ;;  %v178_v4 = vunpack.c.l.bf16 %v173_v1  ;;  %v176_v5 = vunpack.c.l.bf16 %v172_v0  ;;  %v179_v6 = vunpack.c.h.bf16 %v173_v1  ;;  %v175_v7 = vld [vmem:[%s165_s17 + $0x18] sm:$0xff] }
  0x12   : > { %v181_v8 = vunpack.c.h.bf16 %v174_v2  ;;  %v182_v9 = vunpack.c.l.bf16 %v175_v7  ;;  %v180_v10 = vunpack.c.l.bf16 %v174_v2  ;;  %v183_v11 = vunpack.c.h.bf16 %v175_v7 }
  0x13   : > { %v696_v12 = vpack.i.bf16 %v178_v4, %v177_v3  ;;  %v706_v13 = vpack.i.bf16 %v179_v6, %v176_v5  ;;  %v671_v16 = vcombine.high %v173_v1, %v175_v7  ;;  %v669_v17 = vcombine.high %v172_v0, %v174_v2 }
  0x14   : > { %v701_v14 = vpack.i.bf16 %v182_v9, %v181_v8  ;;  %v711_v15 = vpack.i.bf16 %v183_v11, %v180_v10  ;;  %v670_v18 = vcombine.low %v173_v1, %v175_v7  ;;  %v668_v19 = vcombine.low %v172_v0, %v174_v2 }
  0x15   : > { %697 = vrot.lane.b32.xlu0 %v696_v12, %s869_s18  ;;  %707 = vrot.lane.b32.xlu1 %v706_v13, %s869_s18 }
  0x16   : > { %538 = vmatprep.subr.bf16.mxu1 %v671_v16  ;;  %497 = vmatprep.subr.bf16.mxu0 %v669_v17 }
  0x17   : > { %539 = vmatpush1.bf16.msra.mxu1 %v670_v18  ;;  %498 = vmatpush1.bf16.msra.mxu0 %v668_v19 }
  0x19   : > { %702 = vrot.lane.b32.xlu0 %v701_v14, %s869_s18  ;;  %712 = vrot.lane.b32.xlu1 %v711_v15, %s869_s18 }
  0x1d   : > { %717 = vrot.lane.b32.xlu0 %v696_v12, %s870_s19  ;;  %722 = vrot.lane.b32.xlu1 %v701_v14, %s870_s19 }
  0x21   : > { %727 = vrot.lane.b32.xlu0 %v706_v13, %s870_s19  ;;  %732 = vrot.lane.b32.xlu1 %v711_v15, %s870_s19 }
  0x25   : > { %737 = vrot.lane.b32.xlu0 %v696_v12, %s871_s20  ;;  %742 = vrot.lane.b32.xlu1 %v701_v14, %s871_s20 }
  0x29   : > { %747 = vrot.lane.b32.xlu0 %v706_v13, %s871_s20  ;;  %752 = vrot.lane.b32.xlu1 %v711_v15, %s871_s20 }
  0x2d   : > { %757 = vrot.lane.b32.xlu0 %v696_v12, %s872_s21  ;;  %762 = vrot.lane.b32.xlu1 %v701_v14, %s872_s21 }
  0x31   : > { %767 = vrot.lane.b32.xlu0 %v706_v13, %s872_s21  ;;  %772 = vrot.lane.b32.xlu1 %v711_v15, %s872_s21 }
  0x35   : > { %777 = vrot.lane.b32.xlu0 %v696_v12, %s873_s22  ;;  %782 = vrot.lane.b32.xlu1 %v701_v14, %s873_s22 }
  0x39   : > { %787 = vrot.lane.b32.xlu0 %v706_v13, %s873_s22  ;;  %792 = vrot.lane.b32.xlu1 %v711_v15, %s873_s22 }
  0x3d   : > { %797 = vrot.lane.b32.xlu0 %v696_v12, %s874_s23  ;;  %802 = vrot.lane.b32.xlu1 %v701_v14, %s874_s23 }
  0x41   : > { %807 = vrot.lane.b32.xlu0 %v706_v13, %s874_s23  ;;  %812 = vrot.lane.b32.xlu1 %v711_v15, %s874_s23 }
  0x45   : > { %817 = vrot.lane.b32.xlu0 %v696_v12, %s875_s24  ;;  %822 = vrot.lane.b32.xlu1 %v701_v14, %s875_s24 }
  0x49   : > { %827 = vrot.lane.b32.xlu0 %v706_v13, %s875_s24  ;;  %832 = vrot.lane.b32.xlu1 %v711_v15, %s875_s24 }
  0x4d   : > { %837 = vrot.lane.b32.xlu0 %v696_v12, %s876_s27  ;;  %842 = vrot.lane.b32.xlu1 %v701_v14, %s876_s27 }
  0x51   : > { %847 = vrot.lane.b32.xlu0 %v706_v13, %s876_s27  ;;  %852 = vrot.lane.b32.xlu1 %v711_v15, %s876_s27 }
  0x55   : > { %480 = vperm.xlu0 %856, %v477_v23  }
  0x87   : > { %v698_v24 = vpop.permute.xlu0 %697  ;;  %v708_v25 = vpop.permute.xlu1 %707 }
  0x88   : > { %v700_v26 = vunpack.i.h.bf16 %v698_v24  ;;  %v699_v27 = vunpack.i.l.bf16 %v698_v24  ;;  %v710_v28 = vunpack.i.h.bf16 %v708_v25  ;;  %v709_v29 = vunpack.i.l.bf16 %v708_v25 }
  0x8a   : > { %v210_v36 = vsel %vm208_vm1, %v699_v27, %v700_v26  ;;  %v211_v37 = vsel %vm208_vm1, %v700_v26, %v710_v28  ;;  %v209_v38 = vsel %vm208_vm1, %v709_v29, %v699_v27 }
  0x8b   : > { %v703_v30 = vpop.permute.xlu0 %702  ;;  %v713_v31 = vpop.permute.xlu1 %712 }
  0x8c   : > { %v705_v32 = vunpack.i.h.bf16 %v703_v30  ;;  %v704_v33 = vunpack.i.l.bf16 %v703_v30  ;;  %v715_v34 = vunpack.i.h.bf16 %v713_v31  ;;  %v714_v35 = vunpack.i.l.bf16 %v713_v31 }
  0x8e   : > { %v447_v39 = vpack.c.bf16 %v715_v34, %v710_v28  ;;  %v213_v40 = vsel %vm208_vm1, %v704_v33, %v705_v32  ;;  %v214_v41 = vsel %vm208_vm1, %v705_v32, %v715_v34  ;;  %v212_v42 = vsel %vm208_vm1, %v714_v35, %v704_v33 }
  0x8f   : > { %v718_v43 = vpop.permute.xlu0 %717  ;;  %v723_v44 = vpop.permute.xlu1 %722  ;;  %v445_v45 = vpack.c.bf16 %v213_v40, %v210_v36  ;;  %v446_v46 = vpack.c.bf16 %v214_v41, %v211_v37  ;;  %v444_v47 = vpack.c.bf16 %v212_v42, %v209_v38 }
  0x90   : > { %v720_v48 = vunpack.i.h.bf16 %v718_v43  ;;  %v719_v49 = vunpack.i.l.bf16 %v718_v43  ;;  %v725_v50 = vunpack.i.h.bf16 %v723_v44  ;;  %v724_v51 = vunpack.i.l.bf16 %v723_v44  ;;  %540 = vmatprep.subr.bf16.mxu1 %v447_v39 }
  0x91   : > { %499 = vmatprep.subr.bf16.mxu0 %v445_v45  ;;  %541 = vmatpush1.bf16.msra.mxu1 %v446_v46 }
  0x92   : > { %500 = vmatpush1.bf16.msra.mxu0 %v444_v47  ;;  %v241_v52 = vsel %vm239_vm2, %v719_v49, %v720_v48  ;;  %v244_v53 = vsel %vm239_vm2, %v724_v51, %v725_v50 }
  0x93   : > { %v728_v54 = vpop.permute.xlu0 %727  ;;  %v733_v55 = vpop.permute.xlu1 %732  ;;  %v449_v56 = vpack.c.bf16 %v244_v53, %v241_v52 }
  0x94   : > { %v730_v57 = vunpack.i.h.bf16 %v728_v54  ;;  %v729_v58 = vunpack.i.l.bf16 %v728_v54  ;;  %v735_v59 = vunpack.i.h.bf16 %v733_v55  ;;  %v734_v60 = vunpack.i.l.bf16 %v733_v55 }
  0x95   : > { %501 = vmatprep.subr.bf16.mxu0 %v449_v56 }
  0x96   : > { %v451_v61 = vpack.c.bf16 %v735_v59, %v730_v57  ;;  %v240_v62 = vsel %vm239_vm2, %v729_v58, %v719_v49  ;;  %v243_v63 = vsel %vm239_vm2, %v734_v60, %v724_v51  ;;  %v242_v0 = vsel %vm239_vm2, %v720_v48, %v730_v57 }
  0x97   : > { %v738_v1 = vpop.permute.xlu0 %737  ;;  %v743_v2 = vpop.permute.xlu1 %742  ;;  %v448_v3 = vpack.c.bf16 %v243_v63, %v240_v62  ;;  %v245_v4 = vsel %vm239_vm2, %v725_v50, %v735_v59 }
  0x98   : > { %v740_v5 = vunpack.i.h.bf16 %v738_v1  ;;  %v739_v6 = vunpack.i.l.bf16 %v738_v1  ;;  %v745_v7 = vunpack.i.h.bf16 %v743_v2  ;;  %v744_v8 = vunpack.i.l.bf16 %v743_v2  ;;  %542 = vmatprep.subr.bf16.mxu1 %v451_v61 }
  0x99   : > { %502 = vmatpush1.bf16.msra.mxu0 %v448_v3  ;;  %v450_v9 = vpack.c.bf16 %v245_v4, %v242_v0 }
  0x9a   : > { %v272_v10 = vsel %vm270_vm3, %v739_v6, %v740_v5  ;;  %v275_v11 = vsel %vm270_vm3, %v744_v8, %v745_v7 }
  0x9b   : > { %543 = vmatpush1.bf16.msra.mxu1 %v450_v9  ;;  %v748_v12 = vpop.permute.xlu0 %747  ;;  %v753_v13 = vpop.permute.xlu1 %752  ;;  %v453_v14 = vpack.c.bf16 %v275_v11, %v272_v10 }
  0x9c   : > { %v750_v15 = vunpack.i.h.bf16 %v748_v12  ;;  %v749_v16 = vunpack.i.l.bf16 %v748_v12  ;;  %v755_v17 = vunpack.i.h.bf16 %v753_v13  ;;  %v754_v18 = vunpack.i.l.bf16 %v753_v13 }
  0x9d   : > { %503 = vmatprep.subr.bf16.mxu0 %v453_v14 }
  0x9e   : > { %v455_v19 = vpack.c.bf16 %v755_v17, %v750_v15  ;;  %v271_v21 = vsel %vm270_vm3, %v749_v16, %v739_v6  ;;  %v274_v22 = vsel %vm270_vm3, %v754_v18, %v744_v8  ;;  %v273_v23 = vsel %vm270_vm3, %v740_v5, %v750_v15 }
  0x9f   : > { %v758_v24 = vpop.permute.xlu0 %757  ;;  %v763_v25 = vpop.permute.xlu1 %762  ;;  %v452_v26 = vpack.c.bf16 %v274_v22, %v271_v21  ;;  %v276_v27 = vsel %vm270_vm3, %v745_v7, %v755_v17 }
  0xa0   : > { %v760_v28 = vunpack.i.h.bf16 %v758_v24  ;;  %v759_v29 = vunpack.i.l.bf16 %v758_v24  ;;  %v765_v30 = vunpack.i.h.bf16 %v763_v25  ;;  %v764_v31 = vunpack.i.l.bf16 %v763_v25  ;;  %544 = vmatprep.subr.bf16.mxu1 %v455_v19 }
  0xa1   : > { %504 = vmatpush1.bf16.msra.mxu0 %v452_v26  ;;  %v454_v32 = vpack.c.bf16 %v276_v27, %v273_v23 }
  0xa2   : > { %v303_v33 = vsel %vm301_vm4, %v759_v29, %v760_v28  ;;  %v306_v34 = vsel %vm301_vm4, %v764_v31, %v765_v30 }
  0xa3   : > { %545 = vmatpush1.bf16.msra.mxu1 %v454_v32  ;;  %v768_v35 = vpop.permute.xlu0 %767  ;;  %v773_v36 = vpop.permute.xlu1 %772  ;;  %v457_v37 = vpack.c.bf16 %v306_v34, %v303_v33 }
  0xa4   : > { %v770_v38 = vunpack.i.h.bf16 %v768_v35  ;;  %v769_v39 = vunpack.i.l.bf16 %v768_v35  ;;  %v775_v40 = vunpack.i.h.bf16 %v773_v36  ;;  %v774_v41 = vunpack.i.l.bf16 %v773_v36 }
  0xa5   : > { %505 = vmatprep.subr.bf16.mxu0 %v457_v37 }
  0xa6   : > { %v459_v42 = vpack.c.bf16 %v775_v40, %v770_v38  ;;  %v302_v43 = vsel %vm301_vm4, %v769_v39, %v759_v29  ;;  %v305_v44 = vsel %vm301_vm4, %v774_v41, %v764_v31  ;;  %v304_v45 = vsel %vm301_vm4, %v760_v28, %v770_v38 }
  0xa7   : > { %v778_v46 = vpop.permute.xlu0 %777  ;;  %v783_v47 = vpop.permute.xlu1 %782  ;;  %v456_v48 = vpack.c.bf16 %v305_v44, %v302_v43  ;;  %v307_v49 = vsel %vm301_vm4, %v765_v30, %v775_v40 }
  0xa8   : > { %v780_v50 = vunpack.i.h.bf16 %v778_v46  ;;  %v779_v51 = vunpack.i.l.bf16 %v778_v46  ;;  %v785_v52 = vunpack.i.h.bf16 %v783_v47  ;;  %v784_v53 = vunpack.i.l.bf16 %v783_v47  ;;  %546 = vmatprep.subr.bf16.mxu1 %v459_v42 }
  0xa9   : > { %506 = vmatpush1.bf16.msra.mxu0 %v456_v48  ;;  %v458_v54 = vpack.c.bf16 %v307_v49, %v304_v45 }
  0xaa   : > { %v334_v55 = vsel %vm332_vm5, %v779_v51, %v780_v50  ;;  %v337_v56 = vsel %vm332_vm5, %v784_v53, %v785_v52 }
  0xab   : > { %547 = vmatpush1.bf16.msra.mxu1 %v458_v54  ;;  %v788_v57 = vpop.permute.xlu0 %787  ;;  %v793_v58 = vpop.permute.xlu1 %792  ;;  %v461_v59 = vpack.c.bf16 %v337_v56, %v334_v55 }
  0xac   : > { %v790_v60 = vunpack.i.h.bf16 %v788_v57  ;;  %v789_v61 = vunpack.i.l.bf16 %v788_v57  ;;  %v795_v62 = vunpack.i.h.bf16 %v793_v58  ;;  %v794_v63 = vunpack.i.l.bf16 %v793_v58 }
  0xad   : > { %507 = vmatprep.subr.bf16.mxu0 %v461_v59 }
  0xae   : > { %v463_v0 = vpack.c.bf16 %v795_v62, %v790_v60  ;;  %v333_v1 = vsel %vm332_vm5, %v789_v61, %v779_v51  ;;  %v336_v2 = vsel %vm332_vm5, %v794_v63, %v784_v53  ;;  %v335_v3 = vsel %vm332_vm5, %v780_v50, %v790_v60 }
  0xaf   : > { %v798_v4 = vpop.permute.xlu0 %797  ;;  %v803_v5 = vpop.permute.xlu1 %802  ;;  %v460_v6 = vpack.c.bf16 %v336_v2, %v333_v1  ;;  %v338_v7 = vsel %vm332_vm5, %v785_v52, %v795_v62 }
  0xb0   : > { %v800_v8 = vunpack.i.h.bf16 %v798_v4  ;;  %v799_v9 = vunpack.i.l.bf16 %v798_v4  ;;  %v805_v10 = vunpack.i.h.bf16 %v803_v5  ;;  %v804_v11 = vunpack.i.l.bf16 %v803_v5  ;;  %548 = vmatprep.subr.bf16.mxu1 %v463_v0 }
  0xb1   : > { %508 = vmatpush1.bf16.msra.mxu0 %v460_v6  ;;  %v462_v12 = vpack.c.bf16 %v338_v7, %v335_v3 }
  0xb2   : > { %v365_v13 = vsel %vm363_vm6, %v799_v9, %v800_v8  ;;  %v368_v14 = vsel %vm363_vm6, %v804_v11, %v805_v10 }
  0xb3   : > { %549 = vmatpush1.bf16.msra.mxu1 %v462_v12  ;;  %v808_v15 = vpop.permute.xlu0 %807  ;;  %v813_v16 = vpop.permute.xlu1 %812  ;;  %v465_v17 = vpack.c.bf16 %v368_v14, %v365_v13 }
  0xb4   : > { %v810_v18 = vunpack.i.h.bf16 %v808_v15  ;;  %v809_v19 = vunpack.i.l.bf16 %v808_v15  ;;  %v815_v21 = vunpack.i.h.bf16 %v813_v16  ;;  %v814_v22 = vunpack.i.l.bf16 %v813_v16 }
  0xb5   : > { %509 = vmatprep.subr.bf16.mxu0 %v465_v17 }
  0xb6   : > { %v467_v23 = vpack.c.bf16 %v815_v21, %v810_v18  ;;  %v364_v24 = vsel %vm363_vm6, %v809_v19, %v799_v9  ;;  %v367_v25 = vsel %vm363_vm6, %v814_v22, %v804_v11  ;;  %v366_v26 = vsel %vm363_vm6, %v800_v8, %v810_v18 }
  0xb7   : > { %v818_v27 = vpop.permute.xlu0 %817  ;;  %v823_v28 = vpop.permute.xlu1 %822  ;;  %v464_v29 = vpack.c.bf16 %v367_v25, %v364_v24  ;;  %v369_v30 = vsel %vm363_vm6, %v805_v10, %v815_v21 }
  0xb8   : > { %v820_v31 = vunpack.i.h.bf16 %v818_v27  ;;  %v819_v32 = vunpack.i.l.bf16 %v818_v27  ;;  %v825_v33 = vunpack.i.h.bf16 %v823_v28  ;;  %v824_v34 = vunpack.i.l.bf16 %v823_v28  ;;  %550 = vmatprep.subr.bf16.mxu1 %v467_v23 }
  0xb9   : > { %510 = vmatpush1.bf16.msra.mxu0 %v464_v29  ;;  %v466_v35 = vpack.c.bf16 %v369_v30, %v366_v26 }
  0xba   : > { %v396_v36 = vsel %vm394_vm7, %v819_v32, %v820_v31  ;;  %v399_v37 = vsel %vm394_vm7, %v824_v34, %v825_v33 }
  0xbb   : > { %551 = vmatpush1.bf16.msra.mxu1 %v466_v35  ;;  %v828_v38 = vpop.permute.xlu0 %827  ;;  %v833_v39 = vpop.permute.xlu1 %832  ;;  %v469_v40 = vpack.c.bf16 %v399_v37, %v396_v36 }
  0xbc   : > { %v830_v41 = vunpack.i.h.bf16 %v828_v38  ;;  %v829_v42 = vunpack.i.l.bf16 %v828_v38  ;;  %v835_v43 = vunpack.i.h.bf16 %v833_v39  ;;  %v834_v44 = vunpack.i.l.bf16 %v833_v39 }
  0xbd   : > { %511 = vmatprep.subr.bf16.mxu0 %v469_v40 }
  0xbe   : > { %v471_v45 = vpack.c.bf16 %v835_v43, %v830_v41  ;;  %v395_v46 = vsel %vm394_vm7, %v829_v42, %v819_v32  ;;  %v398_v47 = vsel %vm394_vm7, %v834_v44, %v824_v34  ;;  %v397_v48 = vsel %vm394_vm7, %v820_v31, %v830_v41 }
  0xbf   : > { %v838_v49 = vpop.permute.xlu0 %837  ;;  %v843_v50 = vpop.permute.xlu1 %842  ;;  %v468_v51 = vpack.c.bf16 %v398_v47, %v395_v46  ;;  %v400_v52 = vsel %vm394_vm7, %v825_v33, %v835_v43 }
  0xc0   : > { %v840_v53 = vunpack.i.h.bf16 %v838_v49  ;;  %v839_v54 = vunpack.i.l.bf16 %v838_v49  ;;  %v845_v55 = vunpack.i.h.bf16 %v843_v50  ;;  %v844_v56 = vunpack.i.l.bf16 %v843_v50  ;;  %552 = vmatprep.subr.bf16.mxu1 %v471_v45 }
  0xc1   : > { %512 = vmatpush1.bf16.msra.mxu0 %v468_v51  ;;  %v470_v57 = vpack.c.bf16 %v400_v52, %v397_v48 }
  0xc2   : > { %v427_v58 = vsel %vm425_vm8, %v839_v54, %v840_v53  ;;  %v430_v59 = vsel %vm425_vm8, %v844_v56, %v845_v55 }
  0xc3   : > { %553 = vmatpush1.bf16.msra.mxu1 %v470_v57  ;;  %v848_v60 = vpop.permute.xlu0 %847  ;;  %v853_v61 = vpop.permute.xlu1 %852  ;;  %v473_v62 = vpack.c.bf16 %v430_v59, %v427_v58 }
  0xc4   : > { %v850_v63 = vunpack.i.h.bf16 %v848_v60  ;;  %v849_v0 = vunpack.i.l.bf16 %v848_v60  ;;  %v855_v1 = vunpack.i.h.bf16 %v853_v61  ;;  %v854_v2 = vunpack.i.l.bf16 %v853_v61 }
  0xc5   : > { %513 = vmatprep.subr.bf16.mxu0 %v473_v62 }
  0xc6   : > { %v475_v3 = vpack.c.bf16 %v855_v1, %v850_v63  ;;  %v426_v4 = vsel %vm425_vm8, %v849_v0, %v839_v54  ;;  %v429_v5 = vsel %vm425_vm8, %v854_v2, %v844_v56  ;;  %v428_v6 = vsel %vm425_vm8, %v840_v53, %v850_v63 }
  0xc7   : > { %v472_v7 = vpack.c.bf16 %v429_v5, %v426_v4  ;;  %v431_v8 = vsel %vm425_vm8, %v845_v55, %v855_v1 }
  0xc8   : > { %554 = vmatprep.subr.bf16.mxu1 %v475_v3  ;;  %v474_v9 = vpack.c.bf16 %v431_v8, %v428_v6 }
  0xc9   : > { %514 = vmatpush1.bf16.msra.mxu0 %v472_v7 }
  0xca   : > { %555 = vmatpush1.bf16.msra.mxu1 %v474_v9 }
  0xcc   : > { %530 = vmatmul.mubr.bf16.vlgmr.msra.gmra.mrb[0].mxu0 %v915_v20 }
  0xcd   : > { %571 = vmatmul.mubr.bf16.vlgmr.msra.gmra.mrb[0].mxu1 %v915_v20 }
  0xd4   : > { %v481_v10 = vpop.permute.xlu0 %480 }
 0x19f   : > { %v531_v11 = vpop.f32.mrb[0].mxu0 }
 0x1a0   : > { %v532_v12 = vadd.f32 %v531_v11, %v481_v10  ;;  %v572_v13 = vpop.f32.mrb[0].mxu1  ;;  %v533_v14 = vpop.f32.mrb[1].mxu0 }
 0x1a1   : > { %v573_v15 = vadd.f32 %v572_v13, %v481_v10  ;;  %v534_v16 = vadd.f32 %v533_v14, %v481_v10  ;;  %v574_v17 = vpop.f32.mrb[1].mxu1  ;;  %v535_v18 = vpop.f32.mrb[2].mxu0 }
 0x1a2   : > { %vm579_vm10 = vcmp.ge.f32.partialorder %v532_v12, 0.0  ;;  %v583_v19 = vmul.f32 0.3, %v532_v12  ;;  %v575_v21 = vadd.f32 %v574_v17, %v481_v10  ;;  %v576_v22 = vpop.f32.mrb[2].mxu1  ;;  %v536_v23 = vpop.f32.mrb[3].mxu0 }
 0x1a3   : > { %vm581_vm12 = vcmp.ge.f32.partialorder %v573_v15, 0.0  ;;  %v585_v24 = vmul.f32 0.3, %v573_v15  ;;  %vm580_vm13 = vcmp.ge.f32.partialorder %v534_v16, 0.0  ;;  %v584_v20 = vmul.f32 0.3, %v534_v16 }
 0x1a4   : > { %v587_v25 = vsel %vm579_vm10, %v532_v12, %v583_v19  ;;  %vm582_vm14 = vcmp.ge.f32.partialorder %v575_v21, 0.0  ;;  %v586_v26 = vmul.f32 0.3, %v575_v21  ;;  %v577_v27 = vpop.f32.mrb[3].mxu1 }
 0x1a5   : > { %v589_v28 = vsel %vm581_vm12, %v573_v15, %v585_v24  ;;  %v588_v29 = vsel %vm580_vm13, %v534_v16, %v584_v20 }
 0x1a6   : > { %v595_v30 = vcombine.low %v587_v25, %v588_v29  ;;  %v590_v31 = vsel %vm582_vm14, %v575_v21, %v586_v26 }
 0x1a7   : > { %v596_v32 = vcombine.low %v589_v28, %v590_v31 }
 0x1a8   : > { %599 = vst [vmem:[%s170_s6] sm:$0x77] %v595_v30 }
 0x1a9   : > { %603 = vst.msk [vmem:[%s170_s6 + $0x8] sm:$0x77] %vm602_vm15, %v596_v32 }
 0x1aa PF: > { %s13_s12 = sadd.s32 1, %s867_s12  }
 0x1ab   : > { %p10_p4 = scmp.ge.s32.totalorder %s13_s12, 4  }
 0x1ad   :  { %12 = sbr.rel (!%p10_p4) target bundleno = 1 (0x1), region = 62 }

</bundles_post_ra>
